<compile_context>
chip_gen: v5e
topology: v5e:2x2
jax: 0.10.0
libtpu: 0.0.40
codegen_flags: <defaults>
</compile_context>

<pallas_src>
import functools
import math

import jax
import jax.numpy as jnp
import numpy as np
from jax import lax
from jax.experimental import pallas as pl
from jax.experimental.pallas import tpu as pltpu


def _round_up(a, b):
    return (a + b - 1) // b * b


def _pick_tile(dim, candidates):
    for t in candidates:
        if dim >= t and dim % t == 0:
            return t
    return dim  # full dimension is always a legal block size


# ---------------------------------------------------------------------------
# Pallas kernel 1: "shear" build of the pseudo-diagonal weight sum.
#   For the current column tile (base column c0):
#       O[r, cl] = (A * s)[(r - (c0 + cl)) mod P, cl]
#   realized as one unconditional pltpu.roll by c0 (sublane rotate, dynamic
#   shift) plus ceil(log2(tile_cols)) masked power-of-two sublane rolls.
#   transpose_out=True stores the tile transposed, so the out > in branch can
#   emit W.T row bands directly (no extra HBM pass, MXU-native RHS layout).
# ---------------------------------------------------------------------------
def _shear_kernel(a_ref, s_ref, o_ref, *, nbits, pre_roll, transpose_out):
    p, tc = a_ref.shape
    w = a_ref[...] * s_ref[...]                    # fold the alpha mask in-kernel

    if pre_roll:
        # Unconditional rotate by the tile's base column offset (always < P).
        c0 = pl.program_id(0) * tc
        w = pltpu.roll(w, shift=c0, axis=0)        # w'[r] = w[(r - c0) mod p]

    # Residual per-column roll by the *local* column index (log-depth, masked).
    col = lax.broadcasted_iota(jnp.int32, (p, tc), 1)
    for b in range(nbits):
        amt = 1 << b
        rolled = pltpu.roll(w, shift=amt, axis=0)  # rolled[r] = w[(r - amt) mod p]
        w = jnp.where(((col >> b) & 1) == 1, rolled, w)

    if transpose_out:
        o_ref[...] = w.T.astype(o_ref.dtype)
    else:
        o_ref[...] = w.astype(o_ref.dtype)


def shear_build_pallas(a, scale_col, out_dtype, *, transpose_out=False):
    p, c = a.shape
    tc = _pick_tile(c, (256, 128))
    n_tiles = c // tc
    nbits = (tc - 1).bit_length() if tc > 1 else 0
    kernel = functools.partial(_shear_kernel, nbits=nbits,
                               pre_roll=(n_tiles > 1),
                               transpose_out=transpose_out)
    if transpose_out:
        out_shape = jax.ShapeDtypeStruct((c, p), out_dtype)   # W.T row bands
        out_spec = pl.BlockSpec((tc, p), lambda j: (j, 0))
    else:
        out_shape = jax.ShapeDtypeStruct((p, c), out_dtype)
        out_spec = pl.BlockSpec((p, tc), lambda j: (0, j))
    return pl.pallas_call(
        kernel,
        out_shape=out_shape,
        grid=(n_tiles,),
        in_specs=[
            pl.BlockSpec((p, tc), lambda j: (0, j)),
            pl.BlockSpec((p, 1), lambda j: (0, 0)),
        ],
        out_specs=out_spec,
        compiler_params=pltpu.CompilerParams(dimension_semantics=("parallel",)),
    )(a, scale_col)


# ---------------------------------------------------------------------------
# Pallas kernel 2: MXU matmul with the (K, N) weight fully VMEM-resident.
#   No K grid axis, no accumulator scratch: each (tm, tn) output tile is one
#   dot_general with f32 accumulation.  x streams from HBM exactly once.
# ---------------------------------------------------------------------------
def _matmul_kernel(x_ref, w_ref, o_ref):
    o_ref[...] = jnp.dot(x_ref[...], w_ref[...],
                         preferred_element_type=jnp.float32).astype(o_ref.dtype)


def pallas_matmul(x, wt, *, out_dtype=jnp.bfloat16):
    """out = x @ wt, where wt is the (K, N)-layout weight (W.T)."""
    m, k = x.shape
    k2, n = wt.shape
    assert k == k2

    # M tile: 512 amortizes per-step overhead and stays inside the v7x VMEM
    # budget with the resident weight; small M pads to a multiple of 16 (bf16
    # sublane packing).  (v5e/v6e have headroom for tm=1024 if desired.)
    if m >= 512:
        tm = 512
    elif m >= 256:
        tm = 256
    else:
        tm = _round_up(m, 16)
    m_pad = _round_up(m, tm)
    if m_pad != m:
        x = jnp.pad(x, ((0, m_pad - m), (0, 0)))
    grid_m = m_pad // tm

    # Keep N un-tiled so W is fetched once; only split N (into 2) when M gives
    # a single tile so both v7x TensorCores get work.
    if grid_m >= 2 or n % 256 != 0:
        tn = n
    else:
        tn = n // 2
    grid_n = n // tn

    out_itemsize = jnp.dtype(out_dtype).itemsize
    vmem_need = 2 * (tm * k * x.dtype.itemsize
                     + k * tn * wt.dtype.itemsize
                     + tm * tn * out_itemsize)
    vmem_limit = int(min(max(vmem_need + (8 << 20), 32 << 20), 56 << 20))

    w_reads = 1 if grid_n == 1 else grid_n
    cost = pl.CostEstimate(
        flops=2 * m_pad * k * n,
        transcendentals=0,
        bytes_accessed=(m_pad * k * x.dtype.itemsize
                        + w_reads * k * n * wt.dtype.itemsize
                        + m_pad * n * out_itemsize))

    out = pl.pallas_call(
        _matmul_kernel,
        out_shape=jax.ShapeDtypeStruct((m_pad, n), out_dtype),
        grid=(grid_m, grid_n),
        in_specs=[pl.BlockSpec((tm, k), lambda i, j: (i, 0)),
                  pl.BlockSpec((k, tn), lambda i, j: (0, j))],
        out_specs=pl.BlockSpec((tm, tn), lambda i, j: (i, j)),
        compiler_params=pltpu.CompilerParams(
            dimension_semantics=("parallel", "parallel"),
            vmem_limit_bytes=vmem_limit),
        cost_estimate=cost,
    )(x, wt)
    return out[:m] if m_pad != m else out


# ---------------------------------------------------------------------------
# Module equivalent (parameter setup + glue in plain JAX).
# ---------------------------------------------------------------------------
class CustomFullyConnectedLayerPallas:
    def __init__(self, in_features, out_features, sparsity=0.1, alphaLR=0.01,
                 compute_dtype=jnp.bfloat16, out_dtype=None, key=None):
        self.in_features = in_features
        self.out_features = out_features
        self.total_permutations = max(in_features, out_features)
        self.diag_length = min(in_features, out_features)
        num_params = in_features * out_features
        req_params = int((1 - sparsity) * num_params)
        self.K = math.ceil(req_params / min(in_features, out_features))
        self.topkLR = alphaLR
        self.compute_dtype = compute_dtype
        # bf16 output by default (halves HBM writeback).  For exact PyTorch
        # f32 parity construct with compute_dtype=jnp.float32.
        self.out_dtype = compute_dtype if out_dtype is None else out_dtype

        key = jax.random.PRNGKey(0) if key is None else key
        # kaiming_uniform_(a=sqrt(5)) on 2D -> U(-1/sqrt(fan_in), 1/sqrt(fan_in))
        bound = 1.0 / math.sqrt(self.diag_length)
        self.V = jax.random.uniform(
            key, (self.total_permutations, self.diag_length),
            minval=-bound, maxval=bound, dtype=jnp.float32)
        self.alpha = jnp.full(
            (self.total_permutations,), 1.0 / self.in_features, dtype=jnp.float32)

        # out == in branch shears the wrap-reversed V: hoist the (static) V
        # transform out of the per-forward path (perf feedback).
        if in_features == out_features:
            self._V_wrapflip = jnp.roll(jnp.flip(self.V, axis=0), 1, axis=0)

    def _alpha_topk(self):
        # TODO(synk): sparse_soft_topk_mask_dykstra is external/undefined in the
        # reference; approximated here with a hard top-K {0,1} mask over alpha.
        _, idx = lax.top_k(self.alpha, self.K)
        return jnp.zeros_like(self.alpha).at[idx].set(1.0)

    def _build_wt(self, dtype):
        """Build W.T with shape (in_features, out_features) — the (K, N) RHS."""
        mask = self._alpha_topk()
        if self.out_features > self.in_features:
            # W[r, c] = (V*mask)[(r - c) mod out, c]; shear of V gives column
            # tiles of W, transposed in-kernel into row bands of W.T.
            return shear_build_pallas(self.V, mask[:, None], dtype,
                                      transpose_out=True)
        elif self.out_features < self.in_features:
            # W[r, c] = (V*mask)[(c - r) mod in, r]; shear of V is W.T directly.
            return shear_build_pallas(self.V, mask[:, None], dtype)
        else:
            # W[r, c] = (V*mask)[(r - c) mod n, r]; shear of the wrap-reversed
            # V (precomputed at init) is W.T directly.
            s = jnp.roll(jnp.flip(mask), 1)
            return shear_build_pallas(self._V_wrapflip, s[:, None], dtype)

    def compute_weights(self, dtype=jnp.float32):
        """Effective weight W, shape (out_features, in_features), as in PyTorch."""
        return self._build_wt(dtype).T

    def forward(self, x):
        wt = self._build_wt(self.compute_dtype)          # (in, out) = (K, N)
        lead = x.shape[:-1]
        x2d = x.reshape(-1, self.in_features).astype(self.compute_dtype)
        out2d = pallas_matmul(x2d, wt, out_dtype=self.out_dtype)
        return out2d.reshape(*lead, self.out_features)


# ---------------------------------------------------------------------------
# Pure-JAX reference (mirrors the PyTorch mask/bmm construction analytically).
# ---------------------------------------------------------------------------
def _ref_weights(v_scaled, out_features, in_features):
    r = jnp.arange(out_features)[:, None]
    c = jnp.arange(in_features)[None, :]
    if out_features > in_features:
        d = (r - c) % out_features
        cc = jnp.broadcast_to(c, d.shape)
        return v_scaled[d, cc]
    elif out_features < in_features:
        d = (c - r) % in_features
        rr = jnp.broadcast_to(r, d.shape)
        return v_scaled[d, rr]
    else:
        d = (r - c) % out_features
        rr = jnp.broadcast_to(r, d.shape)
        return v_scaled[d, rr]


if __name__ == "__main__":
    # Small, TPU-aligned analogue of the production 768 -> 2304 layer (out > in,
    # same branch), with enough columns to exercise the multi-tile shear path
    # (dynamic pre-roll) and the in-kernel transpose.
    in_features, out_features = 384, 768
    layer = CustomFullyConnectedLayerPallas(in_features, out_features, sparsity=0.1)

    key = jax.random.PRNGKey(0)
    x = jax.random.normal(key, (2, 8, in_features), dtype=jnp.float32)

    out = jax.block_until_ready(layer.forward(x))        # bf16 MXU path, bf16 out

    # reference weights / output
    mask = layer._alpha_topk()
    v_scaled = layer.V * mask[:, None]
    w_ref = _ref_weights(v_scaled, out_features, in_features)
    out_ref = jnp.einsum("bsi,oi->bso", x, w_ref,
                         precision=lax.Precision.HIGHEST)

    # exact W-build check (f32): validates pltpu.roll sign convention, the
    # dynamic pre-roll, and the transposed W.T emission for out > in.
    w_kernel = layer.compute_weights(jnp.float32)
    np.testing.assert_allclose(np.asarray(w_kernel), np.asarray(w_ref),
                               rtol=1e-6, atol=1e-6)

    # bf16 forward path: loose tolerance against the f32 reference
    np.testing.assert_allclose(np.asarray(out.astype(jnp.float32)),
                               np.asarray(out_ref), rtol=5e-2, atol=5e-2)

    # f32 forward path: tight tolerance (same params, compute_dtype=f32)
    layer_f32 = CustomFullyConnectedLayerPallas(in_features, out_features,
                                                sparsity=0.1,
                                                compute_dtype=jnp.float32)
    out_f32 = jax.block_until_ready(layer_f32.forward(x))
    np.testing.assert_allclose(np.asarray(out_f32), np.asarray(out_ref),
                               rtol=1e-3, atol=1e-3)

    # exercise the out < in and out == in branches (W build + forward)
    for fi, fo in [(768, 384), (256, 256)]:
        lyr = CustomFullyConnectedLayerPallas(fi, fo, sparsity=0.1)
        m2 = lyr._alpha_topk()
        vr = lyr.V * m2[:, None]
        wr = _ref_weights(vr, fo, fi)
        np.testing.assert_allclose(
            np.asarray(lyr.compute_weights(jnp.float32)), np.asarray(wr),
            rtol=1e-6, atol=1e-6)

        x2 = jax.random.normal(jax.random.PRNGKey(1), (4, fi), dtype=jnp.float32)
        o2 = jax.block_until_ready(lyr.forward(x2))
        o2_ref = jnp.einsum("mi,oi->mo", x2, wr, precision=lax.Precision.HIGHEST)
        np.testing.assert_allclose(np.asarray(o2.astype(jnp.float32)),
                                   np.asarray(o2_ref), rtol=5e-2, atol=5e-2)

    print("KERNEL_OK")
</pallas_src>

<mosaic_0001>
module attributes {stable_mosaic.version = 11 : i64} {
  func.func @_shear_kernel(%arg0: i32, %arg1: memref<768x128xf32, #tpu.memory_space<vmem>>, %arg2: memref<768x1xf32, #tpu.memory_space<vmem>>, %arg3: memref<128x768xbf16, #tpu.memory_space<vmem>>) attributes {dimension_semantics = [#tpu.dimension_semantics<parallel>], iteration_bounds = array<i64: 3>, scalar_prefetch = 0 : i64, scratch_operands = 0 : i64, tpu.core_type = #tpu.core_type<tc>, window_params = [{transform_indices = @transform_0, window_bounds = array<i64: 768, 128>}, {pipeline_mode = #tpu.pipeline_mode<synchronous>, transform_indices = @transform_1, window_bounds = array<i64: 768, 1>}, {transform_indices = @transform_2, window_bounds = array<i64: 128, 768>}]} {
    %c0 = arith.constant 0 : index
    %c0_0 = arith.constant 0 : index
    %0 = vector.load %arg1[%c0, %c0_0] : memref<768x128xf32, #tpu.memory_space<vmem>>, vector<768x128xf32>
    %c0_1 = arith.constant 0 : index
    %c0_2 = arith.constant 0 : index
    %1 = vector.load %arg2[%c0_1, %c0_2] : memref<768x1xf32, #tpu.memory_space<vmem>>, vector<768x1xf32>
    %2 = vector.broadcast %1 : vector<768x1xf32> to vector<768x128xf32>
    %3 = arith.mulf %0, %2 : vector<768x128xf32>
    %c128_i32 = arith.constant 128 : i32
    %4 = arith.muli %arg0, %c128_i32 : i32
    %5 = tpu.dynamic_rotate %3 by %4 dim 0 : vector<768x128xf32>, i32 -> vector<768x128xf32>
    %6 = tpu.iota {dimensions = array<i32: 1>} : vector<768x128xi32>
    %c1_i32 = arith.constant 1 : i32
    %7 = tpu.dynamic_rotate %5 by %c1_i32 dim 0 : vector<768x128xf32>, i32 -> vector<768x128xf32>
    %c0_i32 = arith.constant 0 : i32
    %8 = vector.broadcast %c0_i32 : i32 to vector<768x128xi32>
    %9 = arith.shrsi %6, %8 : vector<768x128xi32>
    %c1_i32_3 = arith.constant 1 : i32
    %10 = vector.broadcast %c1_i32_3 : i32 to vector<768x128xi32>
    %11 = arith.andi %9, %10 : vector<768x128xi32>
    %c1_i32_4 = arith.constant 1 : i32
    %12 = vector.broadcast %c1_i32_4 : i32 to vector<768x128xi32>
    %13 = arith.cmpi eq, %11, %12 : vector<768x128xi32>
    %14 = arith.select %13, %7, %5 : vector<768x128xi1>, vector<768x128xf32>
    %c2_i32 = arith.constant 2 : i32
    %15 = tpu.dynamic_rotate %14 by %c2_i32 dim 0 : vector<768x128xf32>, i32 -> vector<768x128xf32>
    %c1_i32_5 = arith.constant 1 : i32
    %16 = vector.broadcast %c1_i32_5 : i32 to vector<768x128xi32>
    %17 = arith.shrsi %6, %16 : vector<768x128xi32>
    %c1_i32_6 = arith.constant 1 : i32
    %18 = vector.broadcast %c1_i32_6 : i32 to vector<768x128xi32>
    %19 = arith.andi %17, %18 : vector<768x128xi32>
    %c1_i32_7 = arith.constant 1 : i32
    %20 = vector.broadcast %c1_i32_7 : i32 to vector<768x128xi32>
    %21 = arith.cmpi eq, %19, %20 : vector<768x128xi32>
    %22 = arith.select %21, %15, %14 : vector<768x128xi1>, vector<768x128xf32>
    %c4_i32 = arith.constant 4 : i32
    %23 = tpu.dynamic_rotate %22 by %c4_i32 dim 0 : vector<768x128xf32>, i32 -> vector<768x128xf32>
    %c2_i32_8 = arith.constant 2 : i32
    %24 = vector.broadcast %c2_i32_8 : i32 to vector<768x128xi32>
    %25 = arith.shrsi %6, %24 : vector<768x128xi32>
    %c1_i32_9 = arith.constant 1 : i32
    %26 = vector.broadcast %c1_i32_9 : i32 to vector<768x128xi32>
    %27 = arith.andi %25, %26 : vector<768x128xi32>
    %c1_i32_10 = arith.constant 1 : i32
    %28 = vector.broadcast %c1_i32_10 : i32 to vector<768x128xi32>
    %29 = arith.cmpi eq, %27, %28 : vector<768x128xi32>
    %30 = arith.select %29, %23, %22 : vector<768x128xi1>, vector<768x128xf32>
    %c8_i32 = arith.constant 8 : i32
    %31 = tpu.dynamic_rotate %30 by %c8_i32 dim 0 : vector<768x128xf32>, i32 -> vector<768x128xf32>
    %c3_i32 = arith.constant 3 : i32
    %32 = vector.broadcast %c3_i32 : i32 to vector<768x128xi32>
    %33 = arith.shrsi %6, %32 : vector<768x128xi32>
    %c1_i32_11 = arith.constant 1 : i32
    %34 = vector.broadcast %c1_i32_11 : i32 to vector<768x128xi32>
    %35 = arith.andi %33, %34 : vector<768x128xi32>
    %c1_i32_12 = arith.constant 1 : i32
    %36 = vector.broadcast %c1_i32_12 : i32 to vector<768x128xi32>
    %37 = arith.cmpi eq, %35, %36 : vector<768x128xi32>
    %38 = arith.select %37, %31, %30 : vector<768x128xi1>, vector<768x128xf32>
    %c16_i32 = arith.constant 16 : i32
    %39 = tpu.dynamic_rotate %38 by %c16_i32 dim 0 : vector<768x128xf32>, i32 -> vector<768x128xf32>
    %c4_i32_13 = arith.constant 4 : i32
    %40 = vector.broadcast %c4_i32_13 : i32 to vector<768x128xi32>
    %41 = arith.shrsi %6, %40 : vector<768x128xi32>
    %c1_i32_14 = arith.constant 1 : i32
    %42 = vector.broadcast %c1_i32_14 : i32 to vector<768x128xi32>
    %43 = arith.andi %41, %42 : vector<768x128xi32>
    %c1_i32_15 = arith.constant 1 : i32
    %44 = vector.broadcast %c1_i32_15 : i32 to vector<768x128xi32>
    %45 = arith.cmpi eq, %43, %44 : vector<768x128xi32>
    %46 = arith.select %45, %39, %38 : vector<768x128xi1>, vector<768x128xf32>
    %c32_i32 = arith.constant 32 : i32
    %47 = tpu.dynamic_rotate %46 by %c32_i32 dim 0 : vector<768x128xf32>, i32 -> vector<768x128xf32>
    %c5_i32 = arith.constant 5 : i32
    %48 = vector.broadcast %c5_i32 : i32 to vector<768x128xi32>
    %49 = arith.shrsi %6, %48 : vector<768x128xi32>
    %c1_i32_16 = arith.constant 1 : i32
    %50 = vector.broadcast %c1_i32_16 : i32 to vector<768x128xi32>
    %51 = arith.andi %49, %50 : vector<768x128xi32>
    %c1_i32_17 = arith.constant 1 : i32
    %52 = vector.broadcast %c1_i32_17 : i32 to vector<768x128xi32>
    %53 = arith.cmpi eq, %51, %52 : vector<768x128xi32>
    %54 = arith.select %53, %47, %46 : vector<768x128xi1>, vector<768x128xf32>
    %c64_i32 = arith.constant 64 : i32
    %55 = tpu.dynamic_rotate %54 by %c64_i32 dim 0 : vector<768x128xf32>, i32 -> vector<768x128xf32>
    %c6_i32 = arith.constant 6 : i32
    %56 = vector.broadcast %c6_i32 : i32 to vector<768x128xi32>
    %57 = arith.shrsi %6, %56 : vector<768x128xi32>
    %c1_i32_18 = arith.constant 1 : i32
    %58 = vector.broadcast %c1_i32_18 : i32 to vector<768x128xi32>
    %59 = arith.andi %57, %58 : vector<768x128xi32>
    %c1_i32_19 = arith.constant 1 : i32
    %60 = vector.broadcast %c1_i32_19 : i32 to vector<768x128xi32>
    %61 = arith.cmpi eq, %59, %60 : vector<768x128xi32>
    %62 = arith.select %61, %55, %54 : vector<768x128xi1>, vector<768x128xf32>
    %63 = tpu.transpose %62, [1, 0] : vector<768x128xf32> -> vector<128x768xf32>
    %64 = arith.truncf %63 : vector<128x768xf32> to vector<128x768xbf16>
    %c0_20 = arith.constant 0 : index
    %c0_21 = arith.constant 0 : index
    %65 = vector.load %arg3[%c0_20, %c0_21] : memref<128x768xbf16, #tpu.memory_space<vmem>>, vector<128x768xbf16>
    tpu.vector_store %arg3[%c0_20, %c0_21], %64 {strides = array<i32>} : memref<128x768xbf16, #tpu.memory_space<vmem>>, vector<128x768xbf16>,
    return
  }
  func.func @transform_0(%arg0: i32) -> (i32, i32) {
    %c0_i32 = arith.constant 0 : i32
    %c0_i32_0 = arith.constant 0 : i32
    return %c0_i32, %arg0 : i32, i32
  }
  func.func @transform_1(%arg0: i32) -> (i32, i32) {
    %c0_i32 = arith.constant 0 : i32
    %c0_i32_0 = arith.constant 0 : i32
    %c0_i32_1 = arith.constant 0 : i32
    return %c0_i32, %c0_i32_0 : i32, i32
  }
  func.func @transform_2(%arg0: i32) -> (i32, i32) {
    %c0_i32 = arith.constant 0 : i32
    %c0_i32_0 = arith.constant 0 : i32
    return %arg0, %c0_i32 : i32, i32
  }
}

</mosaic_0001>

<bundles_post_ra>
// kernel: tpu_custom_call.1
= control target key start
LH: loop header
LB: loop body
LE: loop exit
PB: predicated region body
PF: predicated region fallthrough
CT: control target
= control target key end

     0   :  { %7 = vsyncpa [#allocation3], 0  ;;  %s12824_s0 = inlined_call_operand.hbm [shape: f32[768,384], index: 0, kind: input, shape index: {}]   ;;  %s12825_s1 = inlined_call_operand.vmem [shape: f32[768,1], index: 1, kind: input, shape index: {}]   ;;  %s12826_s2 = inlined_call_operand.hbm [shape: bf16[384,768], index: 2, kind: output, shape index: {}]  }
   0x1   :  { %9 = vsyncpa [#allocation3 + $0x1], 0 }
   0x2   :  { %10 = vsyncpa [#allocation4], 0 }
   0x3   :  { %12 = vsyncpa [#allocation4 + $0x1], 0  ;;  %s4103_s9 = smov 0   ;;  %s4105_s10 = smov 0  }
   0x4   :  { %s4107_s11 = smov 0   ;;  %s4109_s12 = smov 0  }
   0x5 LB: > { %s4124_s13 = sadd.s32 4294967295, %s4080_s12   ;;  %s3574_s14 = sadd.s32 4294967294, %s4080_s12   ;;  %s4080_s12 = sphi %s4109_s12, %s14648_s12   ;;  %s4076_s11 = sphi %s4107_s11, %s14647_s11   ;;  %s4072_s10 = sphi %s4105_s10, %s14646_s10   ;;  %s4068_s9 = sphi %s4103_s9, %s14645_s9  }
   0x6   : > { %s4128_s15 = sadd.s32 1, %s4080_s12   ;;  %s25_s16 = sadd.s32 1, %s4076_s11 }
   0x7   : > { %s22_s17 = ssub.s32 %s4080_s12, %s4128_s15  ;;  %p32_p0 = scmp.ne.s32.totalorder %s4076_s11, %s4072_s10 }
   0x8   : > { %p23_p1 = scmp.eq.s32.totalorder %s22_s17, 0  ;;  %p33_p2 = scmp.eq.s32.totalorder %s4080_s12, 0 }
   0x9   : > { %p38_p3 = scmp.ne.s32.totalorder %s4072_s10, %s4068_s9  ;;  %p39_p4 = scmp.eq.s32.totalorder %s4124_s13, 0 }
   0xa   : > { %s4140_s18 = scalar_select %p23_p1, %s4076_s11, %s25_s16  }
   0xb   : > { %p34_p5 = por %p33_p2, %p32_p0  ;;  %p4142_p6 = por %p39_p4, %p38_p3 }
   0xc   : > { %p83_p7 = scmp.eq.s32.totalorder %s4124_s13, 2  ;;  %p89_p8 = scmp.eq.s32.totalorder %s3574_s14, 2 }
   0xd   : > { %p3601_p9 = scmp.lt.s32.totalorder %s4080_s12, 3  ;;  %s112_s22 = sand.u32 1, %s4076_s11  }
   0xe   : > { %p4148_p10 = por %p83_p7, %p32_p0  ;;  %p4152_p11 = por %p89_p8, %p38_p3 }
   0xf   : > { %s3577_s23 = sshll.u32 %s4080_s12, 3  ;;  %s3585_s24 = smul.u32 768, %s112_s22 }
  0x10   : > { %s120_s27 = scalar_lea.hbm %s12824_s0, %s3577_s23  ;;  %p4161_p12 = pnand %p3601_p9, %p34_p5 }
  0x11   : > { %s121_s29 = sshll.u32 %s120_s27, 4  ;;  %s116_s30 = scalar_lea.vmem [#allocation2], %s3585_s24  ;;  %s122_s29 = int_to_ptr.hbm [resolvable:$true] %s121_s29 }
  0x12   : > { %s123_s3 = sshll.u32 %s116_s30, 4  ;;  %p3578_p13 = scmp.ge.s32.totalorder %s4080_s12, 1  ;;  %s124_s3 = int_to_ptr.vmem [resolvable:$true] %s123_s3 }
  0x13   : > { %s113_s4 = scalar_lea.sflag [#allocation3], %s112_s22  ;;  %s3984_s5 = sshra.s32 %s122_s29, 4  ;;  %s3985_s5 = int_to_ptr.hbm [resolvable:$true] %s3984_s5 }
  0x14   : > { %s3986_s6 = scalar_lea.hbm %s3985_s5, 768  ;;  %p3988_p1 = pneg %p4161_p12 }
  0x15   : > { %p3987_p0 = scmp.ne.s32.totalorder %s3985_s5, %s3986_s6  ;;  %s3991_s14 = scalar_lea.hbm %s12824_s0, 2304 }
  0x16   : > { %p3992_p4 = scmp.lt.s32.totalorder %s3985_s5, %s12824_s0  ;;  %p3993_p5 = scmp.lt.s32.totalorder %s3991_s14, %s3986_s6 }
  0x17   : > { %p3989_p2 = pnand %p3988_p1, %p3987_p0 }
  0x18   : > { %p3994_p7 = por %p3993_p5, %p3992_p4 }
  0x19   : > { %p3990_p3 = pneg %p3989_p2 }
  0x1b   : > { %p3995_p8 = pnand %p3994_p7, %p3990_p3 }
  0x1d   : > { %3998 = shalt.err (!%p3995_p8)
}
  0x1e   : > { %s4082_s22 = smov 384   ;;  %s4083_s23 = smov 128  }
  0x1f   : > { %s4084_s24 = smov 8   ;;  %p131_p9 = scmp.lt.s32.totalorder %s4080_s12, 4 }
  0x20   : > { %3596 = dma.hbm_to_vmem [thread:$0]  (!%p4161_p12), %s122_s29, 12288, %s124_s3, %s113_s4, %s4082_s22, %s4083_s23, %s4084_s24  }
  0x21   : > { %p132_p0 = pnand %p3578_p13, %p131_p9 }
  0x23   : > { %135 = sbr.rel (%p132_p0) target bundleno = 1240 (0x4d8), region = 28 }
  0x28   : > { %s4180_s25 = sand.u32 1, %s4072_s10  }
  0x29   : > { %s3586_s26 = smul.u32 768, %s4180_s25  ;;  %s138_s27 = scalar_lea.sflag [#allocation3], %s4180_s25 }
  0x2b   : > { %s4184_s30 = scalar_lea.vmem [#allocation2], %s3586_s26 }
  0x2c   : > { %4059 = dma.done.wait (%p4142_p6), %s138_s27, 12288  }
  0x2d   : > { %4061 = vsyncadd (%p4142_p6), %s138_s27, 4294955008  ;;  %s3579_s28 = sshll.u32 %s4124_s13, 7  ;;  %v4085_v0 = vmov 0   ;;  %v264_v1 = vld [vmem:[%s12825_s1 + $0x20] sm:$0xff]  ;;  %v262_v2 = vld [vmem:[%s12825_s1 + $0x10] sm:$0xff]  ;;  %v12827_v39 = vlaneseq }
  0x2e   : > { %3644 = vset.pattern.permute.xlu2 %v4085_v0  ;;  %3643 = vset.pattern.permute.xlu1 %v4085_v0  ;;  %3981 = sdivrem.u32 %s3579_s28, 768  ;;  %v260_v3 = vld [vmem:[%s12825_s1] sm:$0xff]  ;;  %v265_v4 = vld [vmem:[%s12825_s1 + $0x28] sm:$0xff]  ;;  %v263_v5 = vld [vmem:[%s12825_s1 + $0x18] sm:$0xff] }
  0x2f   : > { %3642 = vset.pattern.permute.xlu0 %v4085_v0  ;;  %378 = vperm.xlu2 %3644, %v264_v1   ;;  %v261_v6 = vld [vmem:[%s12825_s1 + $0x8] sm:$0xff]  ;;  %v268_v7 = vld [vmem:[%s12825_s1 + $0x40] sm:$0xff]  ;;  %v267_v8 = vld [vmem:[%s12825_s1 + $0x38] sm:$0xff]  ;;  %v4315_v45 = vshrl.u32 %v12827_v39, 7 }
  0x30   : > { %368 = vperm.xlu1 %3643, %v262_v2   ;;  %358 = vperm.xlu0 %3642, %v260_v3   ;;  %v266_v9 = vld [vmem:[%s12825_s1 + $0x30] sm:$0xff]  ;;  %v271_v10 = vld [vmem:[%s12825_s1 + $0x58] sm:$0xff]  ;;  %v269_v12 = vld [vmem:[%s12825_s1 + $0x48] sm:$0xff] }
  0x31   : > { %v270_v11 = vld [vmem:[%s12825_s1 + $0x50] sm:$0xff]  ;;  %v273_v14 = vld [vmem:[%s12825_s1 + $0x68] sm:$0xff]  ;;  %v272_v15 = vld [vmem:[%s12825_s1 + $0x60] sm:$0xff]  ;;  %13410 = vst [vmem:[#allocation8_spill] sm:$0xff] %v4315_v45 }
  0x32   : > { %v274_v13 = vld [vmem:[%s12825_s1 + $0x70] sm:$0xff]  ;;  %v277_v16 = vld [vmem:[%s12825_s1 + $0x88] sm:$0xff]  ;;  %v276_v17 = vld [vmem:[%s12825_s1 + $0x80] sm:$0xff] }
  0x33   : > { %v275_v18 = vld [vmem:[%s12825_s1 + $0x78] sm:$0xff]  ;;  %v280_v19 = vld [vmem:[%s12825_s1 + $0xa0] sm:$0xff]  ;;  %v278_v21 = vld [vmem:[%s12825_s1 + $0x90] sm:$0xff] }
  0x34   : > { %v279_v20 = vld [vmem:[%s12825_s1 + $0x98] sm:$0xff]  ;;  %v282_v23 = vld [vmem:[%s12825_s1 + $0xb0] sm:$0xff]  ;;  %v281_v24 = vld [vmem:[%s12825_s1 + $0xa8] sm:$0xff] }
  0x35   : > { %v283_v22 = vld [vmem:[%s12825_s1 + $0xb8] sm:$0xff]  ;;  %v286_v25 = vld [vmem:[%s12825_s1 + $0xd0] sm:$0xff]  ;;  %v285_v26 = vld [vmem:[%s12825_s1 + $0xc8] sm:$0xff] }
  0x36   : > { %v284_v27 = vld [vmem:[%s12825_s1 + $0xc0] sm:$0xff]  ;;  %v289_v28 = vld [vmem:[%s12825_s1 + $0xe8] sm:$0xff]  ;;  %v287_v30 = vld [vmem:[%s12825_s1 + $0xd8] sm:$0xff] }
  0x37   : > { %s3982_s19 = spop.drf %3981  ;;  %383 = vperm.xlu2 %3644, %v265_v4   ;;  %v288_v29 = vld [vmem:[%s12825_s1 + $0xe0] sm:$0xff]  ;;  %v291_v32 = vld [vmem:[%s12825_s1 + $0xf8] sm:$0xff]  ;;  %v290_v33 = vld [vmem:[%s12825_s1 + $0xf0] sm:$0xff] }
  0x38   : > { %373 = vperm.xlu1 %3643, %v263_v5   ;;  %363 = vperm.xlu0 %3642, %v261_v6   ;;  %v292_v31 = vld [vmem:[%s12825_s1 + $0x100] sm:$0xff]  ;;  %v295_v34 = vld [vmem:[%s12825_s1 + $0x118] sm:$0xff]  ;;  %v294_v35 = vld [vmem:[%s12825_s1 + $0x110] sm:$0xff]  ;;  %s4299_s7 = spop.drf %3981 }
  0x39   : > { %v293_v36 = vld [vmem:[%s12825_s1 + $0x108] sm:$0xff]  ;;  %s935_s19 = sand.u32 7, %s4299_s7   ;;  %v168_v38 = vld [vmem:[%s4184_s30 + $0x20] sm:$0xff]  ;;  %v298_v40 = vld [vmem:[%s12825_s1 + $0x130] sm:$0xff]  ;;  %s4353_s17 = sshrl.u32 %s4299_s7, 3 }
  0x3a   : > { %s937_s8 = ssub.s32 8, %s935_s19  ;;  %v297_v41 = vld [vmem:[%s12825_s1 + $0x128] sm:$0xff]  ;;  %v296_v42 = vld [vmem:[%s12825_s1 + $0x120] sm:$0xff]  ;;  %v1130_v47 = vstv %s935_s19  ;;  %v299_v55 = vld [vmem:[%s12825_s1 + $0x138] sm:$0xff]  ;;  %s1230_s29 = sand.u32 1, %s4353_s17 }
  0x3b   : > { %v4312_v44 = vstv %s937_s8  ;;  %v169_v46 = vld [vmem:[%s4184_s30 + $0x28] sm:$0xff]  ;;  %vm4320_vm0 = vcmp.lt.s32.totalorder %v4315_v45, %v1130_v47  ;;  %v300_v54 = vld [vmem:[%s12825_s1 + $0x140] sm:$0xff]  ;;  %v303_v59 = vld [vmem:[%s12825_s1 + $0x158] sm:$0xff]  ;;  %s1329_s7 = sand.u32 2, %s4353_s17  ;;  %s1428_s14 = sand.u32 4, %s4353_s17 }
  0x3c   : > { %v301_v53 = vld [vmem:[%s12825_s1 + $0x148] sm:$0xff]  ;;  %v304_v58 = vld [vmem:[%s12825_s1 + $0x160] sm:$0xff]  ;;  %v302_v60 = vld [vmem:[%s12825_s1 + $0x150] sm:$0xff]  ;;  %s1527_s23 = sand.u32 8, %s4353_s17  ;;  %s1626_s22 = sand.u32 16, %s4353_s17 }
  0x3d   : > { %v307_v0 = vld [vmem:[%s12825_s1 + $0x178] sm:$0xff]  ;;  %v306_v1 = vld [vmem:[%s12825_s1 + $0x170] sm:$0xff]  ;;  %v305_v3 = vld [vmem:[%s12825_s1 + $0x168] sm:$0xff]  ;;  %s1725_s6 = sand.u32 32, %s4353_s17  ;;  %s1824_s19 = sand.u32 64, %s4353_s17 }
  0x3e   : > { %v166_v2 = vld [vmem:[%s4184_s30 + $0x10] sm:$0xff]  ;;  %v164_v4 = vld [vmem:[%s4184_s30] sm:$0xff]  ;;  %v167_v5 = vld [vmem:[%s4184_s30 + $0x18] sm:$0xff]  ;;  %s3588_s8 = smul.u32 384, %s4124_s13  ;;  %s3485_s13 = scalar_lea.sflag [#allocation4], %s4180_s25 }
  0x3f   : > { %398 = vperm.xlu2 %3644, %v268_v7   ;;  %v165_v7 = vld [vmem:[%s4184_s30 + $0x8] sm:$0xff] }
  0x40   : > { %393 = vperm.xlu1 %3643, %v267_v8   ;;  %388 = vperm.xlu0 %3642, %v266_v9  }
  0x47   : > { %413 = vperm.xlu2 %3644, %v271_v10   ;;  %v4372_v10 = vstv %s1230_s29 }
  0x48   : > { %408 = vperm.xlu1 %3643, %v270_v11   ;;  %403 = vperm.xlu0 %3642, %v269_v12   ;;  %vm1232_vm1 = vcmp.ne.s32.totalorder %v4372_v10, 0 }
  0x4f   : > { %428 = vperm.xlu2 %3644, %v274_v13  }
  0x50   : > { %423 = vperm.xlu1 %3643, %v273_v14   ;;  %418 = vperm.xlu0 %3642, %v272_v15   ;;  %v4374_v14 = vstv %s1329_s7  ;;  %s4034_s7 = scalar_lea.hbm %s12826_s2, 1152 }
  0x51   : > { %vm1331_vm2 = vcmp.ne.s32.totalorder %v4374_v14, 0 }
  0x57   : > { %443 = vperm.xlu2 %3644, %v277_v16  }
  0x58   : > { %438 = vperm.xlu1 %3643, %v276_v17   ;;  %433 = vperm.xlu0 %3642, %v275_v18   ;;  %v310_v18 = vld [vmem:[%s12825_s1 + $0x190] sm:$0xff] }
  0x5f   : > { %458 = vperm.xlu2 %3644, %v280_v19   ;;  %v172_v19 = vld [vmem:[%s4184_s30 + $0x40] sm:$0xff] }
  0x60   : > { %453 = vperm.xlu1 %3643, %v279_v20   ;;  %448 = vperm.xlu0 %3642, %v278_v21  }
  0x67   : > { %473 = vperm.xlu2 %3644, %v283_v22   ;;  %v309_v22 = vld [vmem:[%s12825_s1 + $0x188] sm:$0xff] }
  0x68   : > { %468 = vperm.xlu1 %3643, %v282_v23   ;;  %463 = vperm.xlu0 %3642, %v281_v24   ;;  %v308_v23 = vld [vmem:[%s12825_s1 + $0x180] sm:$0xff] }
  0x6f   : > { %488 = vperm.xlu2 %3644, %v286_v25  }
  0x70   : > { %483 = vperm.xlu1 %3643, %v285_v26   ;;  %478 = vperm.xlu0 %3642, %v284_v27  }
  0x77   : > { %503 = vperm.xlu2 %3644, %v289_v28  }
  0x78   : > { %498 = vperm.xlu1 %3643, %v288_v29   ;;  %493 = vperm.xlu0 %3642, %v287_v30   ;;  %v171_v30 = vld [vmem:[%s4184_s30 + $0x38] sm:$0xff] }
  0x7f   : > { %518 = vperm.xlu2 %3644, %v292_v31  }
  0x80   : > { %513 = vperm.xlu1 %3643, %v291_v32   ;;  %508 = vperm.xlu0 %3642, %v290_v33  }
  0x87   : > { %533 = vperm.xlu2 %3644, %v295_v34   ;;  %v170_v34 = vld [vmem:[%s4184_s30 + $0x30] sm:$0xff] }
  0x88   : > { %528 = vperm.xlu1 %3643, %v294_v35   ;;  %523 = vperm.xlu0 %3642, %v293_v36  }
  0x89   : > { %v379_v37 = vpop.permute.xlu2 %378 }
  0x8a   : > { %v840_v43 = vmul.f32 %v379_v37, %v168_v38 }
  0x8c   : > { %v947_v49 = vrot.slane %v840_v43, %v4312_v44 }
  0x8f   : > { %548 = vperm.xlu2 %3644, %v298_v40  }
  0x90   : > { %543 = vperm.xlu1 %3643, %v297_v41   ;;  %538 = vperm.xlu0 %3642, %v296_v42  }
  0x91   : > { %v384_v48 = vpop.permute.xlu2 %383 }
  0x92   : > { %v841_v50 = vmul.f32 %v384_v48, %v169_v46  ;;  %v175_v46 = vld [vmem:[%s4184_s30 + $0x58] sm:$0xff]  ;;  %v4437_v48 = vstv %s1428_s14 }
  0x93   : > { %vm1430_vm3 = vcmp.ne.s32.totalorder %v4437_v48, 0 }
  0x94   : > { %v4325_v52 = vrot.slane %v841_v50, %v4312_v44 }
  0x96   : > { %v4339_v56 = vsel %vm4320_vm0, %v947_v49, %v4325_v52 }
  0x97   : > { %563 = vperm.xlu2 %3644, %v301_v53   ;;  %v312_v53 = vld [vmem:[%s12825_s1 + $0x1a0] sm:$0xff] }
  0x98   : > { %558 = vperm.xlu1 %3643, %v300_v54   ;;  %553 = vperm.xlu0 %3642, %v299_v55   ;;  %v311_v54 = vld [vmem:[%s12825_s1 + $0x198] sm:$0xff] }
  0x99   : > { %v399_v57 = vpop.permute.xlu2 %398 }
  0x9a   : > { %v844_v31 = vmul.f32 %v399_v57, %v172_v19 }
  0x9c   : > { %v955_v43 = vrot.slane %v844_v31, %v4312_v44 }
  0x9f   : > { %578 = vperm.xlu2 %3644, %v304_v58  }
  0xa0   : > { %573 = vperm.xlu1 %3643, %v303_v59   ;;  %568 = vperm.xlu0 %3642, %v302_v60   ;;  %v174_v60 = vld [vmem:[%s4184_s30 + $0x50] sm:$0xff] }
  0xa1   : > { %v4350_v61 = vpop.permute.xlu2 %413 }
  0xa2   : > { %v369_v62 = vpop.permute.xlu1 %368  ;;  %v359_v63 = vpop.permute.xlu0 %358  ;;  %v847_v57 = vmul.f32 %v4350_v61, %v175_v46 }
  0xa3   : > { %v838_v6 = vmul.f32 %v369_v62, %v166_v2  ;;  %v836_v8 = vmul.f32 %v359_v63, %v164_v4 }
  0xa5   : > { %v943_v16 = vrot.slane %v838_v6, %v4312_v44  ;;  %v4384_v20 = vrot.slane %v836_v8, %v4312_v44  ;;  %v961_v8 = vrot.slane %v847_v57, %v4312_v44  ;;  %v181_v57 = vld [vmem:[%s4184_s30 + $0x88] sm:$0xff] }
  0xa7   : > { %593 = vperm.xlu2 %3644, %v307_v0   ;;  %13413 = vst [vmem:[#allocation9_spill] sm:$0xff] %v4384_v20  ;;  %v173_v0 = vld [vmem:[%s4184_s30 + $0x48] sm:$0xff] }
  0xa8   : > { %588 = vperm.xlu1 %3643, %v306_v1   ;;  %583 = vperm.xlu0 %3642, %v305_v3  }
  0xa9   : > { %v4370_v9 = vpop.permute.xlu2 %428 }
  0xaa   : > { %v374_v11 = vpop.permute.xlu1 %373  ;;  %v364_v13 = vpop.permute.xlu0 %363 }
  0xab   : > { %v839_v12 = vmul.f32 %v374_v11, %v167_v5  ;;  %v837_v15 = vmul.f32 %v364_v13, %v165_v7 }
  0xad   : > { %v945_v17 = vrot.slane %v839_v12, %v4312_v44  ;;  %v941_v21 = vrot.slane %v837_v15, %v4312_v44  ;;  %v316_v12 = vld [vmem:[%s12825_s1 + $0x1c0] sm:$0xff]  ;;  %v315_v15 = vld [vmem:[%s12825_s1 + $0x1b8] sm:$0xff] }
  0xaf   : > { %v1225_v24 = vsel %vm4320_vm0, %v945_v17, %v947_v49  ;;  %v1226_v25 = vsel %vm4320_vm0, %v943_v16, %v945_v17  ;;  %v1227_v28 = vsel %vm4320_vm0, %v941_v21, %v943_v16  ;;  %v4408_v29 = vsel %vm4320_vm0, %v4384_v20, %v941_v21  ;;  %608 = vperm.xlu2 %3644, %v310_v18   ;;  %v313_v49 = vld [vmem:[%s12825_s1 + $0x1a8] sm:$0xff]  ;;  %v314_v16 = vld [vmem:[%s12825_s1 + $0x1b0] sm:$0xff] }
  0xb0   : > { %v1237_v26 = vsel %vm1232_vm1, %v1226_v25, %v1225_v24  ;;  %v1238_v27 = vsel %vm1232_vm1, %v1225_v24, %v4339_v56  ;;  %13414 = vst [vmem:[#allocation10_spill] sm:$0xff] %v4408_v29  ;;  %v4414_v32 = vsel %vm1232_vm1, %v4408_v29, %v1227_v28  ;;  %v4418_v33 = vsel %vm1232_vm1, %v1227_v28, %v1226_v25  ;;  %v178_v17 = vld [vmem:[%s4184_s30 + $0x70] sm:$0xff]  ;;  %v177_v25 = vld [vmem:[%s4184_s30 + $0x68] sm:$0xff] }
  0xb1   : > { %13415 = vst [vmem:[#allocation11_spill] sm:$0xff] %v4414_v32  ;;  %603 = vperm.xlu1 %3643, %v309_v22   ;;  %598 = vperm.xlu0 %3642, %v308_v23   ;;  %v4424_v35 = vsel %vm1331_vm2, %v4414_v32, %v1237_v26  ;;  %v4429_v36 = vsel %vm1331_vm2, %v4418_v33, %v1238_v27  ;;  %v4431_v37 = vpop.permute.xlu2 %443 }
  0xb2   : > { %13416 = vst [vmem:[#allocation12_spill] sm:$0xff] %v4418_v33  ;;  %v394_v38 = vpop.permute.xlu1 %393  ;;  %v389_v41 = vpop.permute.xlu0 %388 }
  0xb3   : > { %13417 = vst [vmem:[#allocation13_spill] sm:$0xff] %v4424_v35  ;;  %v843_v40 = vmul.f32 %v394_v38, %v171_v30  ;;  %v842_v42 = vmul.f32 %v389_v41, %v170_v34 }
  0xb4   : > { %13418 = vst [vmem:[#allocation14_spill] sm:$0xff] %v4429_v36 }
  0xb5   : > { %v953_v47 = vrot.slane %v843_v40, %v4312_v44  ;;  %v951_v50 = vrot.slane %v842_v42, %v4312_v44 }
  0xb7   : > { %v1221_v55 = vsel %vm4320_vm0, %v953_v47, %v955_v43  ;;  %v1222_v58 = vsel %vm4320_vm0, %v951_v50, %v953_v47  ;;  %v1223_v59 = vsel %vm4320_vm0, %v4325_v52, %v951_v50  ;;  %623 = vperm.xlu2 %3644, %v313_v49   ;;  %v319_v47 = vld [vmem:[%s12825_s1 + $0x1d8] sm:$0xff] }
  0xb8   : > { %v1239_v62 = vsel %vm1232_vm1, %v4339_v56, %v1223_v59  ;;  %v1240_v63 = vsel %vm1232_vm1, %v1223_v59, %v1222_v58  ;;  %v1241_v61 = vsel %vm1232_vm1, %v1222_v58, %v1221_v55 }
  0xb9   : > { %618 = vperm.xlu1 %3643, %v312_v53   ;;  %613 = vperm.xlu0 %3642, %v311_v54   ;;  %v4469_v1 = vsel %vm1331_vm2, %v1237_v26, %v1239_v62  ;;  %v4473_v52 = vsel %vm1331_vm2, %v1238_v27, %v1240_v63  ;;  %v1340_v56 = vsel %vm1331_vm2, %v1239_v62, %v1241_v61  ;;  %v4477_v2 = vpop.permute.xlu2 %458  ;;  %v176_v26 = vld [vmem:[%s4184_s30 + $0x60] sm:$0xff]  ;;  %v318_v54 = vld [vmem:[%s12825_s1 + $0x1d0] sm:$0xff] }
  0xba   : > { %13419 = vst [vmem:[#allocation15_spill] sm:$0xff] %v4469_v1  ;;  %v409_v3 = vpop.permute.xlu1 %408  ;;  %v4482_v4 = vsel %vm1430_vm3, %v4424_v35, %v1340_v56  ;;  %v404_v6 = vpop.permute.xlu0 %403  ;;  %v850_v27 = vmul.f32 %v4370_v9, %v178_v17 }
  0xbb   : > { %13420 = vst [vmem:[#allocation16_spill] sm:$0xff] %v4473_v52  ;;  %v846_v5 = vmul.f32 %v409_v3, %v174_v60  ;;  %v845_v7 = vmul.f32 %v404_v6, %v173_v0  ;;  %v180_v0 = vld [vmem:[%s4184_s30 + $0x80] sm:$0xff]  ;;  %v179_v3 = vld [vmem:[%s4184_s30 + $0x78] sm:$0xff] }
  0xbc   : > { %13421 = vst [vmem:[#allocation17_spill] sm:$0xff] %v4482_v4  ;;  %v967_v49 = vrot.slane %v850_v27, %v4312_v44 }
  0xbd   : > { %v959_v11 = vrot.slane %v846_v5, %v4312_v44  ;;  %v957_v13 = vrot.slane %v845_v7, %v4312_v44  ;;  %v853_v5 = vmul.f32 %v4431_v37, %v181_v57 }
  0xbf   : > { %v1218_v18 = vsel %vm4320_vm0, %v959_v11, %v961_v8  ;;  %v1219_v19 = vsel %vm4320_vm0, %v957_v13, %v959_v11  ;;  %v1220_v21 = vsel %vm4320_vm0, %v955_v43, %v957_v13  ;;  %638 = vperm.xlu2 %3644, %v316_v12  }
  0xc0   : > { %v1242_v22 = vsel %vm1232_vm1, %v1221_v55, %v1220_v21  ;;  %v1243_v23 = vsel %vm1232_vm1, %v1220_v21, %v1219_v19  ;;  %v1244_v24 = vsel %vm1232_vm1, %v1219_v19, %v1218_v18  ;;  %v317_v55 = vld [vmem:[%s12825_s1 + $0x1c8] sm:$0xff]  ;;  %v322_v19 = vld [vmem:[%s12825_s1 + $0x1f0] sm:$0xff] }
  0xc1   : > { %633 = vperm.xlu1 %3643, %v315_v15   ;;  %628 = vperm.xlu0 %3642, %v314_v16   ;;  %v1341_v28 = vsel %vm1331_vm2, %v1240_v63, %v1242_v22  ;;  %v1342_v30 = vsel %vm1331_vm2, %v1241_v61, %v1243_v23  ;;  %v4518_v31 = vsel %vm1331_vm2, %v1242_v22, %v1244_v24  ;;  %v4520_v34 = vpop.permute.xlu2 %473  ;;  %v4595_v22 = vstv %s1527_s23 }
  0xc2   : > { %v424_v38 = vpop.permute.xlu1 %423  ;;  %v4525_v40 = vsel %vm1430_vm3, %v4429_v36, %v1341_v28  ;;  %v4530_v9 = vsel %vm1430_vm3, %v4469_v1, %v1342_v30  ;;  %v4536_v41 = vsel %vm1430_vm3, %v4473_v52, %v4518_v31  ;;  %v419_v42 = vpop.permute.xlu0 %418  ;;  %vm1529_vm4 = vcmp.ne.s32.totalorder %v4595_v22, 0 }
  0xc3   : > { %13422 = vst [vmem:[#allocation18_spill] sm:$0xff] %v4525_v40  ;;  %v849_v43 = vmul.f32 %v424_v38, %v177_v25  ;;  %v848_v46 = vmul.f32 %v419_v42, %v176_v26  ;;  %v320_v25 = vld [vmem:[%s12825_s1 + $0x1e0] sm:$0xff] }
  0xc4   : > { %13423 = vst [vmem:[#allocation19_spill] sm:$0xff] %v4530_v9  ;;  %v184_v26 = vld [vmem:[%s4184_s30 + $0xa0] sm:$0xff] }
  0xc5   : > { %13424 = vst [vmem:[#allocation20_spill] sm:$0xff] %v4536_v41  ;;  %v965_v50 = vrot.slane %v849_v43, %v4312_v44  ;;  %v963_v53 = vrot.slane %v848_v46, %v4312_v44  ;;  %v183_v46 = vld [vmem:[%s4184_s30 + $0x98] sm:$0xff] }
  0xc7   : > { %v1215_v58 = vsel %vm4320_vm0, %v965_v50, %v967_v49  ;;  %v1216_v59 = vsel %vm4320_vm0, %v963_v53, %v965_v50  ;;  %v1217_v60 = vsel %vm4320_vm0, %v961_v8, %v963_v53  ;;  %653 = vperm.xlu2 %3644, %v319_v47   ;;  %v182_v47 = vld [vmem:[%s4184_s30 + $0x90] sm:$0xff]  ;;  %v856_v50 = vmul.f32 %v4477_v2, %v184_v26 }
  0xc8   : > { %v1245_v62 = vsel %vm1232_vm1, %v1218_v18, %v1217_v60  ;;  %v1246_v63 = vsel %vm1232_vm1, %v1217_v60, %v1216_v59  ;;  %v1247_v61 = vsel %vm1232_vm1, %v1216_v59, %v1215_v58 }
  0xc9   : > { %648 = vperm.xlu1 %3643, %v318_v54   ;;  %643 = vperm.xlu0 %3642, %v317_v55   ;;  %v1344_v6 = vsel %vm1331_vm2, %v1243_v23, %v1245_v62  ;;  %v1345_v7 = vsel %vm1331_vm2, %v1244_v24, %v1246_v63  ;;  %v4572_v8 = vsel %vm1331_vm2, %v1245_v62, %v1247_v61  ;;  %v4574_v11 = vpop.permute.xlu2 %488  ;;  %v321_v24 = vld [vmem:[%s12825_s1 + $0x1e8] sm:$0xff] }
  0xca   : > { %v439_v12 = vpop.permute.xlu1 %438  ;;  %v4578_v13 = vsel %vm1430_vm3, %v1340_v56, %v1344_v6  ;;  %v4582_v37 = vsel %vm1430_vm3, %v1341_v28, %v1345_v7  ;;  %v4587_v15 = vsel %vm1430_vm3, %v1342_v30, %v4572_v8  ;;  %v434_v16 = vpop.permute.xlu0 %433  ;;  %v973_v56 = vrot.slane %v853_v5, %v4312_v44 }
  0xcb   : > { %13425 = vst [vmem:[#allocation21_spill] sm:$0xff] %v4578_v13  ;;  %v852_v17 = vmul.f32 %v439_v12, %v180_v0  ;;  %v851_v18 = vmul.f32 %v434_v16, %v179_v3  ;;  %v325_v0 = vld [vmem:[%s12825_s1 + $0x208] sm:$0xff]  ;;  %v979_v3 = vrot.slane %v856_v50, %v4312_v44  ;;  %v323_v12 = vld [vmem:[%s12825_s1 + $0x1f8] sm:$0xff] }
  0xcc   : > { %13426 = vst [vmem:[#allocation22_spill] sm:$0xff] %v4582_v37  ;;  %v187_v16 = vld [vmem:[%s4184_s30 + $0xb8] sm:$0xff] }
  0xcd   : > { %13427 = vst [vmem:[#allocation23_spill] sm:$0xff] %v4587_v15  ;;  %v971_v21 = vrot.slane %v852_v17, %v4312_v44  ;;  %v969_v23 = vrot.slane %v851_v18, %v4312_v44  ;;  %v859_v26 = vmul.f32 %v4520_v34, %v187_v16 }
  0xcf   : > { %v1212_v27 = vsel %vm4320_vm0, %v971_v21, %v973_v56  ;;  %v1213_v28 = vsel %vm4320_vm0, %v969_v23, %v971_v21  ;;  %v1214_v30 = vsel %vm4320_vm0, %v967_v49, %v969_v23  ;;  %668 = vperm.xlu2 %3644, %v322_v19  }
  0xd0   : > { %v1248_v38 = vsel %vm1232_vm1, %v1215_v58, %v1214_v30  ;;  %v1249_v42 = vsel %vm1232_vm1, %v1214_v30, %v1213_v28  ;;  %v1250_v43 = vsel %vm1232_vm1, %v1213_v28, %v1212_v27 }
  0xd1   : > { %663 = vperm.xlu1 %3643, %v321_v24   ;;  %658 = vperm.xlu0 %3642, %v320_v25   ;;  %v1347_v49 = vsel %vm1331_vm2, %v1246_v63, %v1248_v38  ;;  %v1348_v53 = vsel %vm1331_vm2, %v1247_v61, %v1249_v42  ;;  %v4627_v54 = vsel %vm1331_vm2, %v1248_v38, %v1250_v43  ;;  %v4629_v55 = vpop.permute.xlu2 %503  ;;  %v186_v25 = vld [vmem:[%s4184_s30 + $0xb0] sm:$0xff] }
  0xd2   : > { %v454_v57 = vpop.permute.xlu1 %453  ;;  %v4634_v58 = vsel %vm1430_vm3, %v4518_v31, %v1347_v49  ;;  %v4638_v2 = vsel %vm1430_vm3, %v1344_v6, %v1348_v53  ;;  %v4643_v59 = vsel %vm1430_vm3, %v1345_v7, %v4627_v54  ;;  %v449_v60 = vpop.permute.xlu0 %448  ;;  %v324_v7 = vld [vmem:[%s12825_s1 + $0x200] sm:$0xff] }
  0xd3   : > { %13428 = vst [vmem:[#allocation24_spill] sm:$0xff] %v4634_v58  ;;  %v4649_v62 = vsel %vm1529_vm4, %v4482_v4, %v4638_v2  ;;  %v4655_v31 = vsel %vm1529_vm4, %v4525_v40, %v4643_v59  ;;  %v855_v63 = vmul.f32 %v454_v57, %v183_v46  ;;  %v854_v61 = vmul.f32 %v449_v60, %v182_v47  ;;  %v185_v46 = vld [vmem:[%s4184_s30 + $0xa8] sm:$0xff]  ;;  %v328_v60 = vld [vmem:[%s12825_s1 + $0x220] sm:$0xff] }
  0xd4   : > { %13429 = vst [vmem:[#allocation25_spill] sm:$0xff] %v4649_v62 }
  0xd5   : > { %13430 = vst [vmem:[#allocation26_spill] sm:$0xff] %v4655_v31  ;;  %v977_v5 = vrot.slane %v855_v63, %v4312_v44  ;;  %v975_v6 = vrot.slane %v854_v61, %v4312_v44  ;;  %v985_v63 = vrot.slane %v859_v26, %v4312_v44 }
  0xd7   : > { %v1209_v17 = vsel %vm4320_vm0, %v977_v5, %v979_v3  ;;  %v1210_v18 = vsel %vm4320_vm0, %v975_v6, %v977_v5  ;;  %v1211_v19 = vsel %vm4320_vm0, %v973_v56, %v975_v6  ;;  %683 = vperm.xlu2 %3644, %v325_v0   ;;  %v327_v0 = vld [vmem:[%s12825_s1 + $0x218] sm:$0xff]  ;;  %v326_v5 = vld [vmem:[%s12825_s1 + $0x210] sm:$0xff] }
  0xd8   : > { %v1251_v21 = vsel %vm1232_vm1, %v1212_v27, %v1211_v19  ;;  %v1252_v23 = vsel %vm1232_vm1, %v1211_v19, %v1210_v18  ;;  %v1253_v24 = vsel %vm1232_vm1, %v1210_v18, %v1209_v17  ;;  %v190_v6 = vld [vmem:[%s4184_s30 + $0xd0] sm:$0xff]  ;;  %v189_v19 = vld [vmem:[%s4184_s30 + $0xc8] sm:$0xff] }
  0xd9   : > { %678 = vperm.xlu1 %3643, %v324_v7   ;;  %673 = vperm.xlu0 %3642, %v323_v12   ;;  %v1350_v28 = vsel %vm1331_vm2, %v1249_v42, %v1251_v21  ;;  %v1351_v56 = vsel %vm1331_vm2, %v1250_v43, %v1252_v23  ;;  %v4690_v27 = vsel %vm1331_vm2, %v1251_v21, %v1253_v24  ;;  %v4692_v30 = vpop.permute.xlu2 %518 }
  0xda   : > { %v469_v38 = vpop.permute.xlu1 %468  ;;  %v4698_v47 = vsel %vm1430_vm3, %v4572_v8, %v1350_v28  ;;  %v4702_v34 = vsel %vm1430_vm3, %v1347_v49, %v1351_v56  ;;  %v4707_v42 = vsel %vm1430_vm3, %v1348_v53, %v4690_v27  ;;  %v464_v43 = vpop.permute.xlu0 %463  ;;  %v862_v21 = vmul.f32 %v4574_v11, %v190_v6  ;;  %v193_v6 = vld [vmem:[%s4184_s30 + $0xe8] sm:$0xff] }
  0xdb   : > { %v4713_v50 = vsel %vm1529_vm4, %v4530_v9, %v4698_v47  ;;  %v4719_v8 = vsel %vm1529_vm4, %v4536_v41, %v4702_v34  ;;  %v4725_v49 = vsel %vm1529_vm4, %v4578_v13, %v4707_v42  ;;  %v858_v53 = vmul.f32 %v469_v38, %v186_v25 }
  0xdc   : > { %13431 = vst [vmem:[#allocation27_spill] sm:$0xff] %v4713_v50  ;;  %v857_v57 = vmul.f32 %v464_v43, %v185_v46 }
  0xdd   : > { %13432 = vst [vmem:[#allocation28_spill] sm:$0xff] %v4719_v8  ;;  %v983_v61 = vrot.slane %v858_v53, %v4312_v44 }
  0xde   : > { %13433 = vst [vmem:[#allocation29_spill] sm:$0xff] %v4725_v49  ;;  %v981_v7 = vrot.slane %v857_v57, %v4312_v44  ;;  %v188_v57 = vld [vmem:[%s4184_s30 + $0xc0] sm:$0xff] }
  0xdf   : > { %v1206_v12 = vsel %vm4320_vm0, %v983_v61, %v985_v63  ;;  %698 = vperm.xlu2 %3644, %v328_v60  }
  0xe0   : > { %v1207_v16 = vsel %vm4320_vm0, %v981_v7, %v983_v61  ;;  %v1208_v18 = vsel %vm4320_vm0, %v979_v3, %v981_v7 }
  0xe1   : > { %693 = vperm.xlu1 %3643, %v327_v0   ;;  %688 = vperm.xlu0 %3642, %v326_v5   ;;  %v1254_v25 = vsel %vm1232_vm1, %v1209_v17, %v1208_v18  ;;  %v1255_v26 = vsel %vm1232_vm1, %v1208_v18, %v1207_v16  ;;  %v1256_v38 = vsel %vm1232_vm1, %v1207_v16, %v1206_v12  ;;  %v4754_v46 = vpop.permute.xlu2 %533  ;;  %v330_v18 = vld [vmem:[%s12825_s1 + $0x230] sm:$0xff] }
  0xe2   : > { %v484_v43 = vpop.permute.xlu1 %483  ;;  %v1353_v3 = vsel %vm1331_vm2, %v1252_v23, %v1254_v25  ;;  %v1354_v53 = vsel %vm1331_vm2, %v1253_v24, %v1255_v26  ;;  %v4762_v11 = vsel %vm1331_vm2, %v1254_v25, %v1256_v38  ;;  %v479_v17 = vpop.permute.xlu0 %478  ;;  %v991_v5 = vrot.slane %v862_v21, %v4312_v44 }
  0xe3   : > { %v4768_v60 = vsel %vm1430_vm3, %v4627_v54, %v1353_v3  ;;  %v4772_v61 = vsel %vm1430_vm3, %v1350_v28, %v1354_v53  ;;  %v4777_v23 = vsel %vm1430_vm3, %v1351_v56, %v4762_v11  ;;  %v861_v24 = vmul.f32 %v484_v43, %v189_v19  ;;  %v331_v56 = vld [vmem:[%s12825_s1 + $0x238] sm:$0xff]  ;;  %v329_v19 = vld [vmem:[%s12825_s1 + $0x228] sm:$0xff] }
  0xe4   : > { %v4783_v0 = vsel %vm1529_vm4, %v4582_v37, %v4768_v60  ;;  %v4789_v54 = vsel %vm1529_vm4, %v4587_v15, %v4772_v61  ;;  %v4795_v28 = vsel %vm1529_vm4, %v4634_v58, %v4777_v23  ;;  %v860_v16 = vmul.f32 %v479_v17, %v188_v57  ;;  %v192_v17 = vld [vmem:[%s4184_s30 + $0xe0] sm:$0xff]  ;;  %v195_v37 = vld [vmem:[%s4184_s30 + $0xf8] sm:$0xff] }
  0xe5   : > { %13434 = vst [vmem:[#allocation30_spill] sm:$0xff] %v4783_v0  ;;  %v989_v7 = vrot.slane %v861_v24, %v4312_v44  ;;  %v865_v21 = vmul.f32 %v4629_v55, %v193_v6  ;;  %v204_v58 = vld [vmem:[%s4184_s30 + $0x140] sm:$0xff] }
  0xe6   : > { %13435 = vst [vmem:[#allocation31_spill] sm:$0xff] %v4789_v54  ;;  %v987_v43 = vrot.slane %v860_v16, %v4312_v44 }
  0xe7   : > { %13436 = vst [vmem:[#allocation32_spill] sm:$0xff] %v4795_v28  ;;  %v1203_v25 = vsel %vm4320_vm0, %v989_v7, %v991_v5  ;;  %713 = vperm.xlu2 %3644, %v331_v56  }
  0xe8   : > { %v1204_v57 = vsel %vm4320_vm0, %v987_v43, %v989_v7  ;;  %v1205_v24 = vsel %vm4320_vm0, %v985_v63, %v987_v43  ;;  %v191_v43 = vld [vmem:[%s4184_s30 + $0xd8] sm:$0xff] }
  0xe9   : > { %708 = vperm.xlu1 %3643, %v330_v18   ;;  %703 = vperm.xlu0 %3642, %v329_v19   ;;  %v4818_v39 = vpop.permute.xlu2 %548  ;;  %v1257_v16 = vsel %vm1232_vm1, %v1206_v12, %v1205_v24  ;;  %v1258_v55 = vsel %vm1232_vm1, %v1205_v24, %v1204_v57  ;;  %v1259_v56 = vsel %vm1232_vm1, %v1204_v57, %v1203_v25  ;;  %v333_v24 = vld [vmem:[%s12825_s1 + $0x248] sm:$0xff] }
  0xea   : > { %v499_v45 = vpop.permute.xlu1 %498  ;;  %v494_v6 = vpop.permute.xlu0 %493  ;;  %v1356_v7 = vsel %vm1331_vm2, %v1255_v26, %v1257_v16  ;;  %v1357_v63 = vsel %vm1331_vm2, %v1256_v38, %v1258_v55  ;;  %v4832_v18 = vsel %vm1331_vm2, %v1257_v16, %v1259_v56  ;;  %v997_v12 = vrot.slane %v865_v21, %v4312_v44  ;;  %v196_v21 = vld [vmem:[%s4184_s30 + $0x100] sm:$0xff] }
  0xeb   : > { %v864_v19 = vmul.f32 %v499_v45, %v192_v17  ;;  %v4839_v57 = vsel %vm1430_vm3, %v4690_v27, %v1356_v7  ;;  %v4843_v26 = vsel %vm1430_vm3, %v1353_v3, %v1357_v63  ;;  %v4848_v38 = vsel %vm1430_vm3, %v1354_v53, %v4832_v18  ;;  %v334_v45 = vld [vmem:[%s12825_s1 + $0x250] sm:$0xff] }
  0xec   : > { %v4858_v27 = vsel %vm1529_vm4, %v4638_v2, %v4839_v57  ;;  %v4864_v3 = vsel %vm1529_vm4, %v4643_v59, %v4843_v26  ;;  %v4870_v53 = vsel %vm1529_vm4, %v4698_v47, %v4848_v38  ;;  %v332_v2 = vld [vmem:[%s12825_s1 + $0x240] sm:$0xff]  ;;  %v863_v16 = vmul.f32 %v494_v6, %v191_v43 }
  0xed   : > { %13437 = vst [vmem:[#allocation33_spill] sm:$0xff] %v4858_v27  ;;  %v995_v17 = vrot.slane %v864_v19, %v4312_v44  ;;  %v868_v13 = vmul.f32 %v4692_v30, %v196_v21  ;;  %v194_v19 = vld [vmem:[%s4184_s30 + $0xf0] sm:$0xff] }
  0xee   : > { %13438 = vst [vmem:[#allocation34_spill] sm:$0xff] %v4864_v3  ;;  %v993_v47 = vrot.slane %v863_v16, %v4312_v44 }
  0xef   : > { %13439 = vst [vmem:[#allocation35_spill] sm:$0xff] %v4870_v53  ;;  %v1200_v59 = vsel %vm4320_vm0, %v995_v17, %v997_v12  ;;  %728 = vperm.xlu2 %3644, %v334_v45   ;;  %v1003_v16 = vrot.slane %v868_v13, %v4312_v44 }
  0xf0   : > { %v1201_v40 = vsel %vm4320_vm0, %v993_v47, %v995_v17  ;;  %v1202_v6 = vsel %vm4320_vm0, %v991_v5, %v993_v47  ;;  %v337_v5 = vld [vmem:[%s12825_s1 + $0x268] sm:$0xff]  ;;  %v199_v47 = vld [vmem:[%s4184_s30 + $0x118] sm:$0xff] }
  0xf1   : > { %723 = vperm.xlu1 %3643, %v333_v24   ;;  %718 = vperm.xlu0 %3642, %v332_v2   ;;  %v4885_v41 = vpop.permute.xlu2 %563  ;;  %v1260_v30 = vsel %vm1232_vm1, %v1203_v25, %v1202_v6  ;;  %v1261_v21 = vsel %vm1232_vm1, %v1202_v6, %v1201_v40  ;;  %v1262_v24 = vsel %vm1232_vm1, %v1201_v40, %v1200_v59 }
  0xf2   : > { %v514_v9 = vpop.permute.xlu1 %513  ;;  %v509_v45 = vpop.permute.xlu0 %508  ;;  %v1359_v17 = vsel %vm1331_vm2, %v1258_v55, %v1260_v30 }
  0xf3   : > { %v867_v43 = vmul.f32 %v514_v9, %v195_v37  ;;  %v866_v2 = vmul.f32 %v509_v45, %v194_v19  ;;  %v1360_v9 = vsel %vm1331_vm2, %v1259_v56, %v1261_v21  ;;  %v4904_v37 = vsel %vm1331_vm2, %v1260_v30, %v1262_v24  ;;  %v336_v56 = vld [vmem:[%s12825_s1 + $0x260] sm:$0xff]  ;;  %v198_v30 = vld [vmem:[%s4184_s30 + $0x110] sm:$0xff] }
  0xf4   : > { %v4913_v40 = vsel %vm1430_vm3, %v4762_v11, %v1359_v17  ;;  %v4917_v13 = vsel %vm1430_vm3, %v1356_v7, %v1360_v9  ;;  %v4922_v25 = vsel %vm1430_vm3, %v1357_v63, %v4904_v37  ;;  %v335_v11 = vld [vmem:[%s12825_s1 + $0x258] sm:$0xff]  ;;  %v4953_v45 = vstv %s1626_s22  ;;  %s3497_s22 = scalar_lea.hbm %s12826_s2, %s3588_s8 }
  0xf5   : > { %v1001_v55 = vrot.slane %v867_v43, %v4312_v44  ;;  %v4936_v7 = vsel %vm1529_vm4, %v4702_v34, %v4913_v40  ;;  %v4942_v63 = vsel %vm1529_vm4, %v4707_v42, %v4917_v13  ;;  %v4948_v19 = vsel %vm1529_vm4, %v4768_v60, %v4922_v25  ;;  %s3500_s24 = sshll.u32 %s3497_s22, 4  ;;  %s3501_s24 = int_to_ptr.hbm [resolvable:$true] %s3500_s24 }
  0xf6   : > { %13440 = vst [vmem:[#allocation36_spill] sm:$0xff] %v4936_v7  ;;  %v999_v6 = vrot.slane %v866_v2, %v4312_v44  ;;  %v871_v60 = vmul.f32 %v4754_v46, %v199_v47  ;;  %vm1628_vm5 = vcmp.ne.s32.totalorder %v4953_v45, 0  ;;  %s4028_s26 = sshra.s32 %s3501_s24, 4  ;;  %s4029_s26 = int_to_ptr.hbm [resolvable:$true] %s4028_s26 }
  0xf7   : > { %13441 = vst [vmem:[#allocation37_spill] sm:$0xff] %v4942_v63  ;;  %v1197_v43 = vsel %vm4320_vm0, %v1001_v55, %v1003_v16  ;;  %743 = vperm.xlu2 %3644, %v337_v5   ;;  %s4030_s27 = scalar_lea.hbm %s4029_s26, 384  ;;  %p4035_p1 = scmp.lt.s32.totalorder %s4029_s26, %s12826_s2 }
  0xf8   : > { %13442 = vst [vmem:[#allocation38_spill] sm:$0xff] %v4948_v19  ;;  %v1198_v34 = vsel %vm4320_vm0, %v999_v6, %v1001_v55  ;;  %v1199_v42 = vsel %vm4320_vm0, %v997_v12, %v999_v6  ;;  %p4031_p6 = scmp.ne.s32.totalorder %s4029_s26, %s4030_s27  ;;  %p4036_p2 = scmp.lt.s32.totalorder %s4034_s7, %s4030_s27 }
  0xf9   : > { %738 = vperm.xlu1 %3643, %v336_v56   ;;  %733 = vperm.xlu0 %3642, %v335_v11   ;;  %v1263_v2 = vsel %vm1232_vm1, %v1200_v59, %v1199_v42  ;;  %v1264_v4 = vsel %vm1232_vm1, %v1199_v42, %v1198_v34  ;;  %v1265_v5 = vsel %vm1232_vm1, %v1198_v34, %v1197_v43  ;;  %v4967_v36 = vpop.permute.xlu2 %578  ;;  %v197_v11 = vld [vmem:[%s4184_s30 + $0x108] sm:$0xff]  ;;  %v202_v42 = vld [vmem:[%s4184_s30 + $0x130] sm:$0xff] }
  0xfa   : > { %v529_v55 = vpop.permute.xlu1 %528  ;;  %v1362_v12 = vsel %vm1331_vm2, %v1261_v21, %v1263_v2  ;;  %v1363_v46 = vsel %vm1331_vm2, %v1262_v24, %v1264_v4  ;;  %v4976_v59 = vsel %vm1331_vm2, %v1263_v2, %v1265_v5  ;;  %v524_v56 = vpop.permute.xlu0 %523  ;;  %p4032_p12 = pnand %p4031_p6, %p4148_p10  ;;  %p4037_p3 = por %p4036_p2, %p4035_p1 }
  0xfb   : > { %v4982_v47 = vsel %vm1430_vm3, %v4832_v18, %v1362_v12  ;;  %v4986_v6 = vsel %vm1430_vm3, %v1359_v17, %v1363_v46  ;;  %v4991_v21 = vsel %vm1430_vm3, %v1360_v9, %v4976_v59  ;;  %v870_v24 = vmul.f32 %v529_v55, %v198_v30  ;;  %v340_v9 = vld [vmem:[%s12825_s1 + $0x280] sm:$0xff]  ;;  %v338_v55 = vld [vmem:[%s12825_s1 + $0x270] sm:$0xff] }
  0xfc   : > { %v4997_v34 = vsel %vm1529_vm4, %v4772_v61, %v4982_v47  ;;  %v5003_v18 = vsel %vm1529_vm4, %v4777_v23, %v4986_v6  ;;  %v5009_v17 = vsel %vm1529_vm4, %v4839_v57, %v4991_v21  ;;  %v1009_v61 = vrot.slane %v871_v60, %v4312_v44  ;;  %v339_v57 = vld [vmem:[%s12825_s1 + $0x278] sm:$0xff]  ;;  %p4033_p13 = pneg %p4032_p12 }
  0xfd   : > { %13443 = vst [vmem:[#allocation39_spill] sm:$0xff] %v4997_v34  ;;  %v5020_v23 = vsel %vm1628_vm5, %v4649_v62, %v5009_v17  ;;  %v1007_v30 = vrot.slane %v870_v24, %v4312_v44  ;;  %v869_v2 = vmul.f32 %v524_v56, %v197_v11  ;;  %v874_v62 = vmul.f32 %v4818_v39, %v202_v42  ;;  %v201_v56 = vld [vmem:[%s4184_s30 + $0x128] sm:$0xff] }
  0xfe   : > { %13444 = vst [vmem:[#allocation40_spill] sm:$0xff] %v5003_v18  ;;  %p4038_p4 = pnand %p4037_p3, %p4033_p13 }
  0xff   : > { %13445 = vst [vmem:[#allocation41_spill] sm:$0xff] %v5020_v23  ;;  %v1194_v60 = vsel %vm4320_vm0, %v1007_v30, %v1009_v61  ;;  %v1005_v35 = vrot.slane %v869_v2, %v4312_v44  ;;  %758 = vperm.xlu2 %3644, %v340_v9  }
 0x101   : > { %753 = vperm.xlu1 %3643, %v339_v57   ;;  %748 = vperm.xlu0 %3642, %v338_v55   ;;  %v1195_v11 = vsel %vm4320_vm0, %v1005_v35, %v1007_v30  ;;  %v1196_v24 = vsel %vm4320_vm0, %v1003_v16, %v1005_v35  ;;  %v5038_v15 = vpop.permute.xlu2 %593  ;;  %v200_v55 = vld [vmem:[%s4184_s30 + $0x120] sm:$0xff] }
 0x102   : > { %v544_v1 = vpop.permute.xlu1 %543  ;;  %v1266_v2 = vsel %vm1232_vm1, %v1197_v43, %v1196_v24  ;;  %v1267_v39 = vsel %vm1232_vm1, %v1196_v24, %v1195_v11  ;;  %v1268_v9 = vsel %vm1232_vm1, %v1195_v11, %v1194_v60  ;;  %v539_v42 = vpop.permute.xlu0 %538  ;;  %v1015_v43 = vrot.slane %v874_v62, %v4312_v44  ;;  %v205_v62 = vld [vmem:[%s4184_s30 + $0x148] sm:$0xff] }
 0x103   : > { %v1365_v30 = vsel %vm1331_vm2, %v1264_v4, %v1266_v2  ;;  %v1366_v35 = vsel %vm1331_vm2, %v1265_v5, %v1267_v39  ;;  %v5052_v16 = vsel %vm1331_vm2, %v1266_v2, %v1268_v9  ;;  %v873_v57 = vmul.f32 %v544_v1, %v201_v56  ;;  %v343_v1 = vld [vmem:[%s12825_s1 + $0x298] sm:$0xff]  ;;  %v341_v56 = vld [vmem:[%s12825_s1 + $0x288] sm:$0xff] }
 0x104   : > { %v5059_v24 = vsel %vm1430_vm3, %v4904_v37, %v1365_v30  ;;  %v5063_v11 = vsel %vm1430_vm3, %v1362_v12, %v1366_v35  ;;  %v5068_v4 = vsel %vm1430_vm3, %v1363_v46, %v5052_v16 }
 0x105   : > { %v5078_v37 = vsel %vm1529_vm4, %v4843_v26, %v5059_v24  ;;  %v5084_v5 = vsel %vm1529_vm4, %v4848_v38, %v5063_v11  ;;  %v5090_v12 = vsel %vm1529_vm4, %v4913_v40, %v5068_v4  ;;  %v1013_v46 = vrot.slane %v873_v57, %v4312_v44  ;;  %v342_v26 = vld [vmem:[%s12825_s1 + $0x290] sm:$0xff] }
 0x106   : > { %v5103_v38 = vsel %vm1628_vm5, %v4655_v31, %v5078_v37  ;;  %v5109_v40 = vsel %vm1628_vm5, %v4713_v50, %v5084_v5  ;;  %v5115_v2 = vsel %vm1628_vm5, %v4719_v8, %v5090_v12  ;;  %v872_v57 = vmul.f32 %v539_v42, %v200_v55  ;;  %v203_v50 = vld [vmem:[%s4184_s30 + $0x138] sm:$0xff] }
 0x107   : > { %13446 = vst [vmem:[#allocation42_spill] sm:$0xff] %v5103_v38  ;;  %v1191_v32 = vsel %vm4320_vm0, %v1013_v46, %v1015_v43  ;;  %773 = vperm.xlu2 %3644, %v343_v1   ;;  %v877_v31 = vmul.f32 %v4885_v41, %v205_v62 }
 0x108   : > { %13447 = vst [vmem:[#allocation43_spill] sm:$0xff] %v5109_v40  ;;  %v1011_v52 = vrot.slane %v872_v57, %v4312_v44 }
 0x109   : > { %13448 = vst [vmem:[#allocation44_spill] sm:$0xff] %v5115_v2  ;;  %768 = vperm.xlu1 %3643, %v342_v26   ;;  %763 = vperm.xlu0 %3642, %v341_v56   ;;  %v5123_v33 = vpop.permute.xlu2 %608  ;;  %v5136_v57 = vrot.slane %v877_v31, %v4312_v44  ;;  %v220_v2 = vld [vmem:[%s4184_s30 + $0x1c0] sm:$0xff] }
 0x10a   : > { %v559_v29 = vpop.permute.xlu1 %558  ;;  %v1192_v8 = vsel %vm4320_vm0, %v1011_v52, %v1013_v46  ;;  %v1193_v42 = vsel %vm4320_vm0, %v1009_v61, %v1011_v52  ;;  %v554_v1 = vpop.permute.xlu0 %553  ;;  %v208_v61 = vld [vmem:[%s4184_s30 + $0x160] sm:$0xff] }
 0x10b   : > { %v876_v55 = vmul.f32 %v559_v29, %v204_v58  ;;  %v1269_v41 = vsel %vm1232_vm1, %v1194_v60, %v1193_v42  ;;  %v1270_v62 = vsel %vm1232_vm1, %v1193_v42, %v1192_v8  ;;  %v1271_v26 = vsel %vm1232_vm1, %v1192_v8, %v1191_v32  ;;  %v346_v58 = vld [vmem:[%s12825_s1 + $0x2b0] sm:$0xff] }
 0x10c   : > { %v875_v56 = vmul.f32 %v554_v1, %v203_v50  ;;  %v1368_v46 = vsel %vm1331_vm2, %v1267_v39, %v1269_v41  ;;  %v1369_v29 = vsel %vm1331_vm2, %v1268_v9, %v1270_v62  ;;  %v5144_v52 = vsel %vm1331_vm2, %v1269_v41, %v1271_v26  ;;  %v345_v39 = vld [vmem:[%s12825_s1 + $0x2a8] sm:$0xff] }
 0x10d   : > { %v5153_v31 = vsel %vm1430_vm3, %v4976_v59, %v1368_v46  ;;  %v5157_v50 = vsel %vm1430_vm3, %v1365_v30, %v1369_v29  ;;  %v5162_v8 = vsel %vm1430_vm3, %v1366_v35, %v5144_v52  ;;  %v1019_v60 = vrot.slane %v876_v55, %v4312_v44  ;;  %v344_v59 = vld [vmem:[%s12825_s1 + $0x2a0] sm:$0xff] }
 0x10e   : > { %v5175_v9 = vsel %vm1529_vm4, %v4917_v13, %v5153_v31  ;;  %v5181_v30 = vsel %vm1529_vm4, %v4922_v25, %v5157_v50  ;;  %v5187_v35 = vsel %vm1529_vm4, %v4982_v47, %v5162_v8  ;;  %v1017_v42 = vrot.slane %v875_v56, %v4312_v44 }
 0x10f   : > { %v5194_v13 = vsel %vm1628_vm5, %v4725_v49, %v5175_v9  ;;  %v5200_v25 = vsel %vm1628_vm5, %v4783_v0, %v5181_v30  ;;  %v5206_v47 = vsel %vm1628_vm5, %v4789_v54, %v5187_v35  ;;  %v1188_v55 = vsel %vm4320_vm0, %v1019_v60, %v5136_v57  ;;  %788 = vperm.xlu2 %3644, %v346_v58   ;;  %v207_v0 = vld [vmem:[%s4184_s30 + $0x158] sm:$0xff] }
 0x110   : > { %13449 = vst [vmem:[#allocation45_spill] sm:$0xff] %v5194_v13  ;;  %v880_v1 = vmul.f32 %v4967_v36, %v208_v61  ;;  %v1189_v41 = vsel %vm4320_vm0, %v1017_v42, %v1019_v60  ;;  %v1190_v56 = vsel %vm4320_vm0, %v1015_v43, %v1017_v42 }
 0x111   : > { %13450 = vst [vmem:[#allocation46_spill] sm:$0xff] %v5200_v25  ;;  %783 = vperm.xlu1 %3643, %v345_v39   ;;  %778 = vperm.xlu0 %3642, %v344_v59   ;;  %v1272_v54 = vsel %vm1232_vm1, %v1191_v32, %v1190_v56  ;;  %v1273_v49 = vsel %vm1232_vm1, %v1190_v56, %v1189_v41  ;;  %v5223_v36 = vpop.permute.xlu2 %623 }
 0x112   : > { %13451 = vst [vmem:[#allocation47_spill] sm:$0xff] %v5206_v47  ;;  %v1274_v58 = vsel %vm1232_vm1, %v1189_v41, %v1188_v55  ;;  %v574_v61 = vpop.permute.xlu1 %573  ;;  %v1371_v43 = vsel %vm1331_vm2, %v1270_v62, %v1272_v54  ;;  %v1372_v60 = vsel %vm1331_vm2, %v1271_v26, %v1273_v49  ;;  %v569_v32 = vpop.permute.xlu0 %568  ;;  %v206_v41 = vld [vmem:[%s4184_s30 + $0x150] sm:$0xff] }
 0x113   : > { %v5231_v39 = vsel %vm1331_vm2, %v1272_v54, %v1274_v58  ;;  %v5236_v59 = vsel %vm1430_vm3, %v5052_v16, %v1371_v43  ;;  %v5240_v42 = vsel %vm1430_vm3, %v1368_v46, %v1372_v60  ;;  %v879_v26 = vmul.f32 %v574_v61, %v207_v0  ;;  %v348_v61 = vld [vmem:[%s12825_s1 + $0x2c0] sm:$0xff] }
 0x114   : > { %v5245_v62 = vsel %vm1430_vm3, %v1369_v29, %v5231_v39  ;;  %v1027_v54 = vrot.slane %v880_v1, %v4312_v44  ;;  %v5253_v16 = vsel %vm1529_vm4, %v4986_v6, %v5236_v59  ;;  %v5259_v46 = vsel %vm1529_vm4, %v4991_v21, %v5240_v42  ;;  %v349_v29 = vld [vmem:[%s12825_s1 + $0x2c8] sm:$0xff]  ;;  %v211_v1 = vld [vmem:[%s4184_s30 + $0x178] sm:$0xff] }
 0x115   : > { %v5265_v0 = vsel %vm1529_vm4, %v5059_v24, %v5245_v62  ;;  %v5275_v6 = vsel %vm1628_vm5, %v4795_v28, %v5253_v16  ;;  %v5281_v21 = vsel %vm1628_vm5, %v4858_v27, %v5259_v46  ;;  %v1025_v56 = vrot.slane %v879_v26, %v4312_v44  ;;  %v347_v28 = vld [vmem:[%s12825_s1 + $0x2b8] sm:$0xff]  ;;  %v209_v26 = vld [vmem:[%s4184_s30 + $0x168] sm:$0xff] }
 0x116   : > { %13452 = vst [vmem:[#allocation48_spill] sm:$0xff] %v5275_v6  ;;  %v5287_v24 = vsel %vm1628_vm5, %v4864_v3, %v5265_v0  ;;  %v878_v6 = vmul.f32 %v569_v32, %v206_v41  ;;  %v883_v47 = vmul.f32 %v5038_v15, %v211_v1 }
 0x117   : > { %13453 = vst [vmem:[#allocation49_spill] sm:$0xff] %v5281_v21  ;;  %v1185_v27 = vsel %vm4320_vm0, %v1025_v56, %v1027_v54  ;;  %803 = vperm.xlu2 %3644, %v349_v29   ;;  %v210_v21 = vld [vmem:[%s4184_s30 + $0x170] sm:$0xff] }
 0x118   : > { %13454 = vst [vmem:[#allocation50_spill] sm:$0xff] %v5287_v24  ;;  %v1023_v3 = vrot.slane %v878_v6, %v4312_v44 }
 0x119   : > { %798 = vperm.xlu1 %3643, %v348_v61   ;;  %793 = vperm.xlu0 %3642, %v347_v28   ;;  %v5302_v24 = vpop.permute.xlu2 %638  ;;  %v5316_v61 = vrot.slane %v883_v47, %v4312_v44 }
 0x11a   : > { %v589_v25 = vpop.permute.xlu1 %588  ;;  %v1186_v20 = vsel %vm4320_vm0, %v1023_v3, %v1025_v56  ;;  %v1187_v32 = vsel %vm4320_vm0, %v5136_v57, %v1023_v3  ;;  %v584_v29 = vpop.permute.xlu0 %583 }
 0x11b   : > { %v882_v41 = vmul.f32 %v589_v25, %v210_v21  ;;  %v1275_v15 = vsel %vm1232_vm1, %v1188_v55, %v1187_v32  ;;  %v1276_v28 = vsel %vm1232_vm1, %v1187_v32, %v1186_v20  ;;  %v1277_v1 = vsel %vm1232_vm1, %v1186_v20, %v1185_v27  ;;  %v352_v25 = vld [vmem:[%s12825_s1 + $0x2e0] sm:$0xff]  ;;  %v214_v55 = vld [vmem:[%s4184_s30 + $0x190] sm:$0xff]  ;;  %v351_v21 = vld [vmem:[%s12825_s1 + $0x2d8] sm:$0xff] }
 0x11c   : > { %v881_v6 = vmul.f32 %v584_v29, %v209_v26  ;;  %v1374_v56 = vsel %vm1331_vm2, %v1273_v49, %v1275_v15  ;;  %v1375_v3 = vsel %vm1331_vm2, %v1274_v58, %v1276_v28  ;;  %v5324_v57 = vsel %vm1331_vm2, %v1275_v15, %v1277_v1 }
 0x11d   : > { %v5333_v20 = vsel %vm1430_vm3, %v5144_v52, %v1374_v56  ;;  %v5337_v49 = vsel %vm1430_vm3, %v1371_v43, %v1375_v3  ;;  %v5342_v47 = vsel %vm1430_vm3, %v1372_v60, %v5324_v57  ;;  %v1031_v58 = vrot.slane %v882_v41, %v4312_v44  ;;  %v350_v52 = vld [vmem:[%s12825_s1 + $0x2d0] sm:$0xff] }
 0x11e   : > { %v5355_v43 = vsel %vm1529_vm4, %v5063_v11, %v5333_v20  ;;  %v5361_v60 = vsel %vm1529_vm4, %v5068_v4, %v5337_v49  ;;  %v5367_v26 = vsel %vm1529_vm4, %v5153_v31, %v5342_v47  ;;  %v1029_v32 = vrot.slane %v881_v6, %v4312_v44 }
 0x11f   : > { %v5374_v11 = vsel %vm1628_vm5, %v4870_v53, %v5355_v43  ;;  %v5380_v4 = vsel %vm1628_vm5, %v4936_v7, %v5361_v60  ;;  %v5386_v31 = vsel %vm1628_vm5, %v4942_v63, %v5367_v26  ;;  %v1182_v41 = vsel %vm4320_vm0, %v1031_v58, %v5316_v61  ;;  %818 = vperm.xlu2 %3644, %v352_v25   ;;  %v213_v7 = vld [vmem:[%s4184_s30 + $0x188] sm:$0xff] }
 0x120   : > { %13455 = vst [vmem:[#allocation51_spill] sm:$0xff] %v5374_v11  ;;  %v886_v29 = vmul.f32 %v5123_v33, %v214_v55  ;;  %v1183_v15 = vsel %vm4320_vm0, %v1029_v32, %v1031_v58  ;;  %v1184_v6 = vsel %vm4320_vm0, %v1027_v54, %v1029_v32 }
 0x121   : > { %13456 = vst [vmem:[#allocation52_spill] sm:$0xff] %v5380_v4  ;;  %813 = vperm.xlu1 %3643, %v351_v21   ;;  %808 = vperm.xlu0 %3642, %v350_v52   ;;  %v1278_v63 = vsel %vm1232_vm1, %v1185_v27, %v1184_v6  ;;  %v1279_v53 = vsel %vm1232_vm1, %v1184_v6, %v1183_v15  ;;  %v5403_v33 = vpop.permute.xlu2 %653  ;;  %v217_v52 = vld [vmem:[%s4184_s30 + $0x1a8] sm:$0xff] }
 0x122   : > { %13457 = vst [vmem:[#allocation53_spill] sm:$0xff] %v5386_v31  ;;  %v1280_v25 = vsel %vm1232_vm1, %v1183_v15, %v1182_v41  ;;  %v1377_v55 = vsel %vm1331_vm2, %v1276_v28, %v1278_v63  ;;  %v1378_v54 = vsel %vm1331_vm2, %v1277_v1, %v1279_v53  ;;  %v1039_v6 = vrot.slane %v886_v29, %v4312_v44  ;;  %v354_v29 = vld [vmem:[%s12825_s1 + $0x2f0] sm:$0xff] }
 0x123   : > { %v5411_v58 = vsel %vm1331_vm2, %v1278_v63, %v1280_v25  ;;  %v604_v21 = vpop.permute.xlu1 %603  ;;  %v599_v27 = vpop.permute.xlu0 %598  ;;  %v5417_v32 = vsel %vm1430_vm3, %v5231_v39, %v1377_v55  ;;  %v5421_v15 = vsel %vm1430_vm3, %v1374_v56, %v1378_v54  ;;  %v212_v63 = vld [vmem:[%s4184_s30 + $0x180] sm:$0xff]  ;;  %v355_v56 = vld [vmem:[%s12825_s1 + $0x2f8] sm:$0xff] }
 0x124   : > { %v5426_v28 = vsel %vm1430_vm3, %v1375_v3, %v5411_v58  ;;  %v885_v1 = vmul.f32 %v604_v21, %v213_v7  ;;  %v5434_v11 = vsel %vm1529_vm4, %v5157_v50, %v5417_v32  ;;  %v5440_v39 = vsel %vm1529_vm4, %v5162_v8, %v5421_v15  ;;  %v353_v21 = vld [vmem:[%s12825_s1 + $0x2e8] sm:$0xff] }
 0x125   : > { %v5446_v7 = vsel %vm1529_vm4, %v5236_v59, %v5426_v28  ;;  %v5455_v50 = vsel %vm1628_vm5, %v4948_v19, %v5434_v11  ;;  %v5461_v8 = vsel %vm1628_vm5, %v4997_v34, %v5440_v39  ;;  %v889_v19 = vmul.f32 %v5223_v36, %v217_v52 }
 0x126   : > { %13458 = vst [vmem:[#allocation54_spill] sm:$0xff] %v5455_v50  ;;  %v5467_v59 = vsel %vm1628_vm5, %v5003_v18, %v5446_v7  ;;  %v1037_v3 = vrot.slane %v885_v1, %v4312_v44  ;;  %v884_v34 = vmul.f32 %v599_v27, %v212_v63  ;;  %v216_v1 = vld [vmem:[%s4184_s30 + $0x1a0] sm:$0xff] }
 0x127   : > { %13459 = vst [vmem:[#allocation55_spill] sm:$0xff] %v5461_v8  ;;  %833 = vperm.xlu2 %3644, %v355_v56   ;;  %v892_v8 = vmul.f32 %v5302_v24, %v220_v2 }
 0x128   : > { %13460 = vst [vmem:[#allocation56_spill] sm:$0xff] %v5467_v59  ;;  %v1179_v13 = vsel %vm4320_vm0, %v1037_v3, %v1039_v6  ;;  %v1035_v18 = vrot.slane %v884_v34, %v4312_v44  ;;  %v5485_v59 = vrot.slane %v889_v19, %v4312_v44 }
 0x129   : > { %828 = vperm.xlu1 %3643, %v354_v29   ;;  %823 = vperm.xlu0 %3642, %v353_v21   ;;  %v5482_v40 = vpop.permute.xlu2 %668  ;;  %v215_v21 = vld [vmem:[%s4184_s30 + $0x198] sm:$0xff] }
 0x12a   : > { %v1180_v36 = vsel %vm4320_vm0, %v1035_v18, %v1037_v3  ;;  %v1181_v27 = vsel %vm4320_vm0, %v5316_v61, %v1035_v18 }
 0x12b   : > { %v619_v52 = vpop.permute.xlu1 %618  ;;  %v614_v63 = vpop.permute.xlu0 %613  ;;  %v1281_v34 = vsel %vm1232_vm1, %v1182_v41, %v1181_v27  ;;  %v1282_v56 = vsel %vm1232_vm1, %v1181_v27, %v1180_v36  ;;  %v1283_v29 = vsel %vm1232_vm1, %v1180_v36, %v1179_v13  ;;  %v219_v36 = vld [vmem:[%s4184_s30 + $0x1b8] sm:$0xff] }
 0x12c   : > { %v888_v19 = vmul.f32 %v619_v52, %v216_v1  ;;  %v1380_v3 = vsel %vm1331_vm2, %v1279_v53, %v1281_v34  ;;  %v1381_v18 = vsel %vm1331_vm2, %v1280_v25, %v1282_v56  ;;  %v1382_v61 = vsel %vm1331_vm2, %v1281_v34, %v1283_v29  ;;  %v223_v27 = vld [vmem:[%s4184_s30 + $0x1d8] sm:$0xff] }
 0x12d   : > { %v5509_v41 = vsel %vm1430_vm3, %v5324_v57, %v1380_v3  ;;  %v5513_v1 = vsel %vm1430_vm3, %v1377_v55, %v1381_v18  ;;  %v5517_v53 = vsel %vm1430_vm3, %v1378_v54, %v1382_v61  ;;  %v887_v55 = vmul.f32 %v614_v63, %v215_v21 }
 0x12e   : > { %v1043_v2 = vrot.slane %v888_v19, %v4312_v44  ;;  %v5524_v24 = vsel %vm1529_vm4, %v5240_v42, %v5509_v41  ;;  %v5530_v57 = vsel %vm1529_vm4, %v5245_v62, %v5513_v1  ;;  %v5536_v25 = vsel %vm1529_vm4, %v5333_v20, %v5517_v53 }
 0x12f   : > { %v5542_v54 = vsel %vm1628_vm5, %v5009_v17, %v5524_v24  ;;  %v5548_v42 = vsel %vm1628_vm5, %v5078_v37, %v5530_v57  ;;  %v5554_v62 = vsel %vm1628_vm5, %v5084_v5, %v5536_v25  ;;  %v1041_v17 = vrot.slane %v887_v55, %v4312_v44 }
 0x130   : > { %13461 = vst [vmem:[#allocation57_spill] sm:$0xff] %v5542_v54  ;;  %v1176_v20 = vsel %vm4320_vm0, %v1043_v2, %v5485_v59  ;;  %v5565_v37 = vrot.slane %v892_v8, %v4312_v44  ;;  %v218_v8 = vld [vmem:[%s4184_s30 + $0x1b0] sm:$0xff]  ;;  %v895_v54 = vmul.f32 %v5403_v33, %v223_v27 }
 0x131   : > { %13462 = vst [vmem:[#allocation58_spill] sm:$0xff] %v5548_v42  ;;  %v5562_v52 = vpop.permute.xlu2 %683  ;;  %v1177_v63 = vsel %vm4320_vm0, %v1041_v17, %v1043_v2  ;;  %v1178_v5 = vsel %vm4320_vm0, %v1039_v6, %v1041_v17  ;;  %v222_v27 = vld [vmem:[%s4184_s30 + $0x1d0] sm:$0xff] }
 0x132   : > { %13463 = vst [vmem:[#allocation59_spill] sm:$0xff] %v5554_v62  ;;  %v1284_v21 = vsel %vm1232_vm1, %v1179_v13, %v1178_v5  ;;  %v1285_v55 = vsel %vm1232_vm1, %v1178_v5, %v1177_v63  ;;  %v1286_v62 = vsel %vm1232_vm1, %v1177_v63, %v1176_v20  ;;  %v226_v63 = vld [vmem:[%s4184_s30 + $0x1f0] sm:$0xff] }
 0x133   : > { %v634_v34 = vpop.permute.xlu1 %633  ;;  %v629_v19 = vpop.permute.xlu0 %628  ;;  %v1383_v2 = vsel %vm1331_vm2, %v1282_v56, %v1284_v21  ;;  %v1384_v6 = vsel %vm1331_vm2, %v1283_v29, %v1285_v55  ;;  %v1385_v13 = vsel %vm1331_vm2, %v1284_v21, %v1286_v62 }
 0x134   : > { %v891_v42 = vmul.f32 %v634_v34, %v219_v36  ;;  %v5588_v17 = vsel %vm1430_vm3, %v5411_v58, %v1383_v2  ;;  %v5592_v36 = vsel %vm1430_vm3, %v1380_v3, %v1384_v6  ;;  %v5596_v33 = vsel %vm1430_vm3, %v1381_v18, %v1385_v13 }
 0x135   : > { %v5603_v29 = vsel %vm1529_vm4, %v5337_v49, %v5588_v17  ;;  %v5609_v58 = vsel %vm1529_vm4, %v5342_v47, %v5592_v36  ;;  %v5615_v3 = vsel %vm1529_vm4, %v5417_v32, %v5596_v33  ;;  %v890_v18 = vmul.f32 %v629_v19, %v218_v8 }
 0x136   : > { %v1049_v56 = vrot.slane %v891_v42, %v4312_v44  ;;  %v5621_v42 = vsel %vm1628_vm5, %v5090_v12, %v5603_v29  ;;  %v5627_v49 = vsel %vm1628_vm5, %v5175_v9, %v5609_v58  ;;  %v5633_v47 = vsel %vm1628_vm5, %v5181_v30, %v5615_v3 }
 0x137   : > { %13464 = vst [vmem:[#allocation60_spill] sm:$0xff] %v5621_v42  ;;  %v1047_v12 = vrot.slane %v890_v18, %v4312_v44  ;;  %v5644_v9 = vrot.slane %v895_v54, %v4312_v44  ;;  %v898_v42 = vmul.f32 %v5482_v40, %v226_v63 }
 0x138   : > { %13465 = vst [vmem:[#allocation61_spill] sm:$0xff] %v5627_v49  ;;  %v1173_v32 = vsel %vm4320_vm0, %v1049_v56, %v5565_v37  ;;  %v221_v49 = vld [vmem:[%s4184_s30 + $0x1c8] sm:$0xff] }
 0x139   : > { %13466 = vst [vmem:[#allocation62_spill] sm:$0xff] %v5633_v47  ;;  %v5641_v5 = vpop.permute.xlu2 %698  ;;  %v1174_v34 = vsel %vm4320_vm0, %v1047_v12, %v1049_v56  ;;  %v1175_v30 = vsel %vm4320_vm0, %v5485_v59, %v1047_v12 }
 0x13a   : > { %v1287_v8 = vsel %vm1232_vm1, %v1176_v20, %v1175_v30  ;;  %v1288_v18 = vsel %vm1232_vm1, %v1175_v30, %v1174_v34  ;;  %v1289_v47 = vsel %vm1232_vm1, %v1174_v34, %v1173_v32  ;;  %v229_v34 = vld [vmem:[%s4184_s30 + $0x208] sm:$0xff] }
 0x13b   : > { %v649_v19 = vpop.permute.xlu1 %648  ;;  %v644_v21 = vpop.permute.xlu0 %643  ;;  %v1386_v56 = vsel %vm1331_vm2, %v1285_v55, %v1287_v8  ;;  %v1387_v59 = vsel %vm1331_vm2, %v1286_v62, %v1288_v18  ;;  %v1388_v20 = vsel %vm1331_vm2, %v1287_v8, %v1289_v47 }
 0x13c   : > { %v894_v54 = vmul.f32 %v649_v19, %v222_v27  ;;  %v5667_v12 = vsel %vm1430_vm3, %v1382_v61, %v1386_v56  ;;  %v5671_v27 = vsel %vm1430_vm3, %v1383_v2, %v1387_v59  ;;  %v5675_v40 = vsel %vm1430_vm3, %v1384_v6, %v1388_v20 }
 0x13d   : > { %v5682_v62 = vsel %vm1529_vm4, %v5421_v15, %v5667_v12  ;;  %v5688_v61 = vsel %vm1529_vm4, %v5426_v28, %v5671_v27  ;;  %v5694_v2 = vsel %vm1529_vm4, %v5509_v41, %v5675_v40  ;;  %v893_v6 = vmul.f32 %v644_v21, %v221_v49  ;;  %v225_v49 = vld [vmem:[%s4184_s30 + $0x1e8] sm:$0xff] }
 0x13e   : > { %v1055_v55 = vrot.slane %v894_v54, %v4312_v44  ;;  %v5700_v63 = vsel %vm1628_vm5, %v5187_v35, %v5682_v62  ;;  %v5706_v15 = vsel %vm1628_vm5, %v5253_v16, %v5688_v61  ;;  %v5712_v28 = vsel %vm1628_vm5, %v5259_v46, %v5694_v2 }
 0x13f   : > { %13467 = vst [vmem:[#allocation63_spill] sm:$0xff] %v5700_v63  ;;  %v1053_v35 = vrot.slane %v893_v6, %v4312_v44  ;;  %v5723_v16 = vrot.slane %v898_v42, %v4312_v44  ;;  %v901_v63 = vmul.f32 %v5562_v52, %v229_v34 }
 0x140   : > { %13468 = vst [vmem:[#allocation64_spill] sm:$0xff] %v5706_v15  ;;  %v1170_v41 = vsel %vm4320_vm0, %v1055_v55, %v5644_v9  ;;  %v224_v15 = vld [vmem:[%s4184_s30 + $0x1e0] sm:$0xff] }
 0x141   : > { %13469 = vst [vmem:[#allocation65_spill] sm:$0xff] %v5712_v28  ;;  %v5720_v30 = vpop.permute.xlu2 %713  ;;  %v1171_v19 = vsel %vm4320_vm0, %v1053_v35, %v1055_v55  ;;  %v1172_v46 = vsel %vm4320_vm0, %v5565_v37, %v1053_v35 }
 0x142   : > { %v1290_v54 = vsel %vm1232_vm1, %v1173_v32, %v1172_v46  ;;  %v1291_v6 = vsel %vm1232_vm1, %v1172_v46, %v1171_v19  ;;  %v1292_v28 = vsel %vm1232_vm1, %v1171_v19, %v1170_v41  ;;  %v232_v19 = vld [vmem:[%s4184_s30 + $0x220] sm:$0xff] }
 0x143   : > { %v664_v21 = vpop.permute.xlu1 %663  ;;  %v659_v8 = vpop.permute.xlu0 %658  ;;  %v1389_v55 = vsel %vm1331_vm2, %v1288_v18, %v1290_v54  ;;  %v1390_v37 = vsel %vm1331_vm2, %v1289_v47, %v1291_v6  ;;  %v1391_v32 = vsel %vm1331_vm2, %v1290_v54, %v1292_v28 }
 0x144   : > { %v897_v42 = vmul.f32 %v664_v21, %v225_v49  ;;  %v5746_v35 = vsel %vm1430_vm3, %v1385_v13, %v1389_v55  ;;  %v5750_v49 = vsel %vm1430_vm3, %v1386_v56, %v1390_v37  ;;  %v5754_v52 = vsel %vm1430_vm3, %v1387_v59, %v1391_v32 }
 0x145   : > { %v5761_v47 = vsel %vm1529_vm4, %v5513_v1, %v5746_v35  ;;  %v5767_v13 = vsel %vm1529_vm4, %v5517_v53, %v5750_v49  ;;  %v5773_v56 = vsel %vm1529_vm4, %v5588_v17, %v5754_v52  ;;  %v896_v59 = vmul.f32 %v659_v8, %v224_v15  ;;  %v228_v15 = vld [vmem:[%s4184_s30 + $0x200] sm:$0xff] }
 0x146   : > { %v1061_v18 = vrot.slane %v897_v42, %v4312_v44  ;;  %v5779_v34 = vsel %vm1628_vm5, %v5265_v0, %v5761_v47  ;;  %v5785_v1 = vsel %vm1628_vm5, %v5355_v43, %v5767_v13  ;;  %v5791_v53 = vsel %vm1628_vm5, %v5361_v60, %v5773_v56 }
 0x147   : > { %13470 = vst [vmem:[#allocation66_spill] sm:$0xff] %v5779_v34  ;;  %v1059_v0 = vrot.slane %v896_v59, %v4312_v44  ;;  %v5802_v43 = vrot.slane %v901_v63, %v4312_v44  ;;  %v904_v34 = vmul.f32 %v5641_v5, %v232_v19 }
 0x148   : > { %13471 = vst [vmem:[#allocation67_spill] sm:$0xff] %v5785_v1  ;;  %v1167_v17 = vsel %vm4320_vm0, %v1061_v18, %v5723_v16  ;;  %v227_v1 = vld [vmem:[%s4184_s30 + $0x1f8] sm:$0xff] }
 0x149   : > { %13472 = vst [vmem:[#allocation68_spill] sm:$0xff] %v5791_v53  ;;  %v5799_v46 = vpop.permute.xlu2 %728  ;;  %v1168_v21 = vsel %vm4320_vm0, %v1059_v0, %v1061_v18  ;;  %v1169_v60 = vsel %vm4320_vm0, %v5644_v9, %v1059_v0 }
 0x14a   : > { %v1293_v42 = vsel %vm1232_vm1, %v1170_v41, %v1169_v60  ;;  %v1294_v59 = vsel %vm1232_vm1, %v1169_v60, %v1168_v21  ;;  %v1295_v53 = vsel %vm1232_vm1, %v1168_v21, %v1167_v17  ;;  %v235_v21 = vld [vmem:[%s4184_s30 + $0x238] sm:$0xff] }
 0x14b   : > { %v679_v8 = vpop.permute.xlu1 %678  ;;  %v674_v54 = vpop.permute.xlu0 %673  ;;  %v1392_v18 = vsel %vm1331_vm2, %v1291_v6, %v1293_v42  ;;  %v1393_v9 = vsel %vm1331_vm2, %v1292_v28, %v1294_v59  ;;  %v1394_v41 = vsel %vm1331_vm2, %v1293_v42, %v1295_v53 }
 0x14c   : > { %v900_v63 = vmul.f32 %v679_v8, %v228_v15  ;;  %v5825_v0 = vsel %vm1430_vm3, %v1388_v20, %v1392_v18  ;;  %v5829_v15 = vsel %vm1430_vm3, %v1389_v55, %v1393_v9  ;;  %v5833_v5 = vsel %vm1430_vm3, %v1390_v37, %v1394_v41 }
 0x14d   : > { %v5840_v28 = vsel %vm1529_vm4, %v5592_v36, %v5825_v0  ;;  %v5846_v20 = vsel %vm1529_vm4, %v5596_v33, %v5829_v15  ;;  %v5852_v55 = vsel %vm1529_vm4, %v5667_v12, %v5833_v5  ;;  %v899_v37 = vmul.f32 %v674_v54, %v227_v1  ;;  %v231_v1 = vld [vmem:[%s4184_s30 + $0x218] sm:$0xff] }
 0x14e   : > { %v1067_v6 = vrot.slane %v900_v63, %v4312_v44  ;;  %v5858_v19 = vsel %vm1628_vm5, %v5367_v26, %v5840_v28  ;;  %v5864_v36 = vsel %vm1628_vm5, %v5434_v11, %v5846_v20  ;;  %v5870_v33 = vsel %vm1628_vm5, %v5440_v39, %v5852_v55 }
 0x14f   : > { %13473 = vst [vmem:[#allocation69_spill] sm:$0xff] %v5858_v19  ;;  %v1065_v26 = vrot.slane %v899_v37, %v4312_v44  ;;  %v5881_v11 = vrot.slane %v904_v34, %v4312_v44  ;;  %v907_v19 = vmul.f32 %v5720_v30, %v235_v21 }
 0x150   : > { %13474 = vst [vmem:[#allocation70_spill] sm:$0xff] %v5864_v36  ;;  %v1164_v12 = vsel %vm4320_vm0, %v1067_v6, %v5802_v43 }
 0x151   : > { %13475 = vst [vmem:[#allocation71_spill] sm:$0xff] %v5870_v33  ;;  %v5878_v60 = vpop.permute.xlu2 %743  ;;  %v1165_v8 = vsel %vm4320_vm0, %v1065_v26, %v1067_v6  ;;  %v1166_v39 = vsel %vm4320_vm0, %v5723_v16, %v1065_v26  ;;  %v230_v33 = vld [vmem:[%s4184_s30 + $0x210] sm:$0xff] }
 0x152   : > { %v1296_v63 = vsel %vm1232_vm1, %v1167_v17, %v1166_v39  ;;  %v1297_v37 = vsel %vm1232_vm1, %v1166_v39, %v1165_v8  ;;  %v1298_v36 = vsel %vm1232_vm1, %v1165_v8, %v1164_v12  ;;  %v238_v8 = vld [vmem:[%s4184_s30 + $0x250] sm:$0xff] }
 0x153   : > { %v694_v54 = vpop.permute.xlu1 %693  ;;  %v689_v42 = vpop.permute.xlu0 %688  ;;  %v1395_v6 = vsel %vm1331_vm2, %v1294_v59, %v1296_v63  ;;  %v1396_v16 = vsel %vm1331_vm2, %v1295_v53, %v1297_v37  ;;  %v1397_v17 = vsel %vm1331_vm2, %v1296_v63, %v1298_v36 }
 0x154   : > { %v903_v34 = vmul.f32 %v694_v54, %v231_v1  ;;  %v5904_v26 = vsel %vm1430_vm3, %v1391_v32, %v1395_v6  ;;  %v5908_v1 = vsel %vm1430_vm3, %v1392_v18, %v1396_v16  ;;  %v5912_v30 = vsel %vm1430_vm3, %v1393_v9, %v1397_v17 }
 0x155   : > { %v5919_v53 = vsel %vm1529_vm4, %v5671_v27, %v5904_v26  ;;  %v5925_v32 = vsel %vm1529_vm4, %v5675_v40, %v5908_v1  ;;  %v5931_v18 = vsel %vm1529_vm4, %v5746_v35, %v5912_v30  ;;  %v902_v9 = vmul.f32 %v689_v42, %v230_v33  ;;  %v234_v33 = vld [vmem:[%s4184_s30 + $0x230] sm:$0xff] }
 0x156   : > { %v1073_v59 = vrot.slane %v903_v34, %v4312_v44  ;;  %13476 = vst [vmem:[#allocation72_spill] sm:$0xff] %v5925_v32  ;;  %v5937_v21 = vsel %vm1628_vm5, %v5446_v7, %v5919_v53  ;;  %v5943_v27 = vsel %vm1628_vm5, %v5524_v24, %v5925_v32  ;;  %v5949_v40 = vsel %vm1628_vm5, %v5530_v57, %v5931_v18 }
 0x157   : > { %13477 = vst [vmem:[#allocation73_spill] sm:$0xff] %v5931_v18  ;;  %v1071_v7 = vrot.slane %v902_v9, %v4312_v44  ;;  %v5960_v24 = vrot.slane %v907_v19, %v4312_v44  ;;  %v233_v18 = vld [vmem:[%s4184_s30 + $0x228] sm:$0xff]  ;;  %v910_v32 = vmul.f32 %v5799_v46, %v238_v8 }
 0x158   : > { %13478 = vst [vmem:[#allocation74_spill] sm:$0xff] %v5937_v21  ;;  %v1161_v35 = vsel %vm4320_vm0, %v1073_v59, %v5881_v11  ;;  %v13591_v14 = vld [vmem:[#allocation71_spill] sm:$0xff] }
 0x159   : > { %v5957_v39 = vpop.permute.xlu2 %758  ;;  %v1162_v54 = vsel %vm4320_vm0, %v1071_v7, %v1073_v59  ;;  %v1163_v57 = vsel %vm4320_vm0, %v5802_v43, %v1071_v7 }
 0x15a   : > { %v1299_v34 = vsel %vm1232_vm1, %v1164_v12, %v1163_v57  ;;  %v1300_v9 = vsel %vm1232_vm1, %v1163_v57, %v1162_v54  ;;  %v1301_v21 = vsel %vm1232_vm1, %v1162_v54, %v1161_v35  ;;  %v241_v54 = vld [vmem:[%s4184_s30 + $0x268] sm:$0xff] }
 0x15b   : > { %v709_v42 = vpop.permute.xlu1 %708  ;;  %v704_v63 = vpop.permute.xlu0 %703  ;;  %v1398_v59 = vsel %vm1331_vm2, %v1297_v37, %v1299_v34  ;;  %v1399_v43 = vsel %vm1331_vm2, %v1298_v36, %v1300_v9  ;;  %v5981_v12 = vsel %vm1331_vm2, %v1299_v34, %v1301_v21 }
 0x15c   : > { %v906_v19 = vmul.f32 %v709_v42, %v234_v33  ;;  %v5985_v7 = vsel %vm1430_vm3, %v1394_v41, %v1398_v59  ;;  %v5989_v33 = vsel %vm1430_vm3, %v1395_v6, %v1399_v43  ;;  %v5994_v46 = vsel %vm1430_vm3, %v1396_v16, %v5981_v12 }
 0x15d   : > { %v6001_v37 = vsel %vm1529_vm4, %v5750_v49, %v5985_v7  ;;  %v6007_v41 = vsel %vm1529_vm4, %v5754_v52, %v5989_v33  ;;  %v6013_v6 = vsel %vm1529_vm4, %v5825_v0, %v5994_v46  ;;  %v905_v16 = vmul.f32 %v704_v63, %v233_v18  ;;  %v237_v18 = vld [vmem:[%s4184_s30 + $0x248] sm:$0xff] }
 0x15e   : > { %v1079_v36 = vrot.slane %v906_v19, %v4312_v44  ;;  %13479 = vst [vmem:[#allocation75_spill] sm:$0xff] %v6001_v37  ;;  %v6019_v8 = vsel %vm1628_vm5, %v5536_v25, %v6001_v37  ;;  %v6025_v49 = vsel %vm1628_vm5, %v5603_v29, %v6007_v41  ;;  %v6031_v52 = vsel %vm1628_vm5, %v5609_v58, %v6013_v6 }
 0x15f   : > { %13480 = vst [vmem:[#allocation76_spill] sm:$0xff] %v6007_v41  ;;  %v1077_v25 = vrot.slane %v905_v16, %v4312_v44  ;;  %v6042_v29 = vrot.slane %v910_v32, %v4312_v44  ;;  %v236_v41 = vld [vmem:[%s4184_s30 + $0x240] sm:$0xff]  ;;  %v913_v37 = vmul.f32 %v5878_v60, %v241_v54 }
 0x160   : > { %13481 = vst [vmem:[#allocation77_spill] sm:$0xff] %v6013_v6  ;;  %v1158_v0 = vsel %vm4320_vm0, %v1079_v36, %v5960_v24 }
 0x161   : > { %13482 = vst [vmem:[#allocation78_spill] sm:$0xff] %v6025_v49  ;;  %v6039_v57 = vpop.permute.xlu2 %773  ;;  %v1159_v42 = vsel %vm4320_vm0, %v1077_v25, %v1079_v36  ;;  %v1160_v58 = vsel %vm4320_vm0, %v5881_v11, %v1077_v25 }
 0x162   : > { %13483 = vst [vmem:[#allocation79_spill] sm:$0xff] %v6031_v52  ;;  %v1302_v19 = vsel %vm1232_vm1, %v1161_v35, %v1160_v58  ;;  %v1303_v16 = vsel %vm1232_vm1, %v1160_v58, %v1159_v42  ;;  %v1304_v6 = vsel %vm1232_vm1, %v1159_v42, %v1158_v0  ;;  %v244_v42 = vld [vmem:[%s4184_s30 + $0x280] sm:$0xff] }
 0x163   : > { %v724_v63 = vpop.permute.xlu1 %723  ;;  %v719_v34 = vpop.permute.xlu0 %718  ;;  %v1401_v36 = vsel %vm1331_vm2, %v1300_v9, %v1302_v19  ;;  %v1402_v11 = vsel %vm1331_vm2, %v1301_v21, %v1303_v16  ;;  %v6063_v35 = vsel %vm1331_vm2, %v1302_v19, %v1304_v6 }
 0x164   : > { %v909_v32 = vmul.f32 %v724_v63, %v237_v18  ;;  %v6067_v25 = vsel %vm1430_vm3, %v1397_v17, %v1401_v36  ;;  %v6071_v18 = vsel %vm1430_vm3, %v1398_v59, %v1402_v11  ;;  %v6076_v60 = vsel %vm1430_vm3, %v1399_v43, %v6063_v35 }
 0x165   : > { %v6083_v9 = vsel %vm1529_vm4, %v5829_v15, %v6067_v25  ;;  %v6089_v17 = vsel %vm1529_vm4, %v5833_v5, %v6071_v18  ;;  %v6095_v59 = vsel %vm1529_vm4, %v5904_v26, %v6076_v60  ;;  %v908_v43 = vmul.f32 %v719_v34, %v236_v41  ;;  %v240_v41 = vld [vmem:[%s4184_s30 + $0x260] sm:$0xff] }
 0x166   : > { %v1085_v21 = vrot.slane %v909_v32, %v4312_v44  ;;  %13484 = vst [vmem:[#allocation80_spill] sm:$0xff] %v6083_v9  ;;  %v6101_v54 = vsel %vm1628_vm5, %v5615_v3, %v6083_v9  ;;  %v6107_v15 = vsel %vm1628_vm5, %v5682_v62, %v6089_v17  ;;  %v6113_v5 = vsel %vm1628_vm5, %v5688_v61, %v6095_v59 }
 0x167   : > { %13485 = vst [vmem:[#allocation81_spill] sm:$0xff] %v6089_v17  ;;  %v1083_v3 = vrot.slane %v908_v43, %v4312_v44  ;;  %v6124_v62 = vrot.slane %v913_v37, %v4312_v44  ;;  %v239_v17 = vld [vmem:[%s4184_s30 + $0x258] sm:$0xff] }
 0x168   : > { %13486 = vst [vmem:[#allocation82_spill] sm:$0xff] %v6095_v59  ;;  %v1155_v26 = vsel %vm4320_vm0, %v1085_v21, %v6042_v29  ;;  %v13618_v45 = vld [vmem:[#allocation78_spill] sm:$0xff] }
 0x169   : > { %13487 = vst [vmem:[#allocation83_spill] sm:$0xff] %v6101_v54  ;;  %v6121_v58 = vpop.permute.xlu2 %788  ;;  %v1156_v63 = vsel %vm4320_vm0, %v1083_v3, %v1085_v21  ;;  %v1157_v61 = vsel %vm4320_vm0, %v5960_v24, %v1083_v3  ;;  %v916_v21 = vmul.f32 %v5957_v39, %v244_v42  ;;  %v6181_v42 = vstv %s1725_s6 }
 0x16a   : > { %13488 = vst [vmem:[#allocation84_spill] sm:$0xff] %v6107_v15  ;;  %v1305_v32 = vsel %vm1232_vm1, %v1158_v0, %v1157_v61  ;;  %v1306_v43 = vsel %vm1232_vm1, %v1157_v61, %v1156_v63  ;;  %v1307_v59 = vsel %vm1232_vm1, %v1156_v63, %v1155_v26  ;;  %v243_v63 = vld [vmem:[%s4184_s30 + $0x278] sm:$0xff]  ;;  %vm1727_vm6 = vcmp.ne.s32.totalorder %v6181_v42, 0 }
 0x16b   : > { %13489 = vst [vmem:[#allocation85_spill] sm:$0xff] %v6113_v5  ;;  %v739_v34 = vpop.permute.xlu1 %738  ;;  %v734_v19 = vpop.permute.xlu0 %733  ;;  %v1404_v9 = vsel %vm1331_vm2, %v1303_v16, %v1305_v32  ;;  %v1405_v24 = vsel %vm1331_vm2, %v1304_v6, %v1306_v43  ;;  %v6146_v0 = vsel %vm1331_vm2, %v1305_v32, %v1307_v59  ;;  %v247_v61 = vld [vmem:[%s4184_s30 + $0x298] sm:$0xff] }
 0x16c   : > { %v912_v37 = vmul.f32 %v739_v34, %v240_v41  ;;  %v6151_v3 = vsel %vm1430_vm3, %v5981_v12, %v1404_v9  ;;  %v6155_v39 = vsel %vm1430_vm3, %v1401_v36, %v1405_v24  ;;  %v6160_v16 = vsel %vm1430_vm3, %v1402_v11, %v6146_v0 }
 0x16d   : > { %v6167_v41 = vsel %vm1529_vm4, %v5908_v1, %v6151_v3  ;;  %v6173_v12 = vsel %vm1529_vm4, %v5912_v30, %v6155_v39  ;;  %v6179_v36 = vsel %vm1529_vm4, %v5985_v7, %v6160_v16  ;;  %v911_v11 = vmul.f32 %v734_v19, %v239_v17 }
 0x16e   : > { %v1091_v6 = vrot.slane %v912_v37, %v4312_v44  ;;  %13490 = vst [vmem:[#allocation86_spill] sm:$0xff] %v6167_v41  ;;  %v6187_v1 = vsel %vm1628_vm5, %v5694_v2, %v6167_v41  ;;  %v6193_v30 = vsel %vm1628_vm5, %v5761_v47, %v6173_v12  ;;  %v6199_v7 = vsel %vm1628_vm5, %v5767_v13, %v6179_v36 }
 0x16f   : > { %13491 = vst [vmem:[#allocation87_spill] sm:$0xff] %v6173_v12  ;;  %v1089_v2 = vrot.slane %v911_v11, %v4312_v44  ;;  %v6211_v47 = vrot.slane %v916_v21, %v4312_v44  ;;  %v242_v12 = vld [vmem:[%s4184_s30 + $0x270] sm:$0xff]  ;;  %v919_v41 = vmul.f32 %v6039_v57, %v247_v61 }
 0x170   : > { %13492 = vst [vmem:[#allocation88_spill] sm:$0xff] %v6179_v36  ;;  %v1152_v17 = vsel %vm4320_vm0, %v1091_v6, %v6124_v62 }
 0x171   : > { %13493 = vst [vmem:[#allocation89_spill] sm:$0xff] %v6187_v1  ;;  %v6207_v34 = vpop.permute.xlu2 %803  ;;  %v1153_v13 = vsel %vm4320_vm0, %v1089_v2, %v1091_v6  ;;  %v1154_v19 = vsel %vm4320_vm0, %v6042_v29, %v1089_v2 }
 0x172   : > { %13494 = vst [vmem:[#allocation90_spill] sm:$0xff] %v6193_v30  ;;  %v1308_v11 = vsel %vm1232_vm1, %v1155_v26, %v1154_v19  ;;  %v1309_v36 = vsel %vm1232_vm1, %v1154_v19, %v1153_v13  ;;  %v6312_v19 = vsel %vm1727_vm6, %v5020_v23, %v5943_v27  ;;  %v13514_v23 = vld [vmem:[#allocation43_spill] sm:$0xff] }
 0x173   : > { %13495 = vst [vmem:[#allocation91_spill] sm:$0xff] %v6199_v7  ;;  %v754_v32 = vpop.permute.xlu1 %753  ;;  %v749_v37 = vpop.permute.xlu0 %748  ;;  %v1310_v7 = vsel %vm1232_vm1, %v1153_v13, %v1152_v17  ;;  %v1407_v6 = vsel %vm1331_vm2, %v1306_v43, %v1308_v11  ;;  %v1408_v29 = vsel %vm1331_vm2, %v1307_v59, %v1309_v36  ;;  %v246_v13 = vld [vmem:[%s4184_s30 + $0x290] sm:$0xff] }
 0x174   : > { %v915_v21 = vmul.f32 %v754_v32, %v243_v63  ;;  %v6232_v2 = vsel %vm1331_vm2, %v1308_v11, %v1310_v7  ;;  %v6237_v26 = vsel %vm1430_vm3, %v6063_v35, %v1407_v6  ;;  %v6241_v63 = vsel %vm1430_vm3, %v1404_v9, %v1408_v29  ;;  %13502 = vst [vmem:[#allocation98_spill] sm:$0xff] %v6312_v19  ;;  %v250_v32 = vld [vmem:[%s4184_s30 + $0x2b0] sm:$0xff] }
 0x175   : > { %v6246_v57 = vsel %vm1430_vm3, %v1405_v24, %v6232_v2  ;;  %v6253_v43 = vsel %vm1529_vm4, %v5989_v33, %v6237_v26  ;;  %v6259_v35 = vsel %vm1529_vm4, %v5994_v46, %v6241_v63  ;;  %v914_v24 = vmul.f32 %v749_v37, %v242_v12 }
 0x176   : > { %v1097_v59 = vrot.slane %v915_v21, %v4312_v44  ;;  %v6265_v9 = vsel %vm1529_vm4, %v6067_v25, %v6246_v57  ;;  %v6271_v61 = vsel %vm1628_vm5, %v5773_v56, %v6253_v43  ;;  %v6277_v33 = vsel %vm1628_vm5, %v5840_v28, %v6259_v35 }
 0x177   : > { %13496 = vst [vmem:[#allocation92_spill] sm:$0xff] %v6271_v61  ;;  %v6283_v46 = vsel %vm1628_vm5, %v5846_v20, %v6265_v9  ;;  %v6292_v56 = vsel %vm1727_vm6, %v5380_v4, %v6271_v61  ;;  %v6298_v28 = vsel %vm1727_vm6, %v5386_v31, %v6277_v33  ;;  %v1095_v12 = vrot.slane %v914_v24, %v4312_v44  ;;  %v245_v31 = vld [vmem:[%s4184_s30 + $0x288] sm:$0xff] }
 0x178   : > { %13497 = vst [vmem:[#allocation93_spill] sm:$0xff] %v6277_v33  ;;  %v1149_v25 = vsel %vm4320_vm0, %v1097_v59, %v6211_v47  ;;  %v6304_v20 = vsel %vm1727_vm6, %v5455_v50, %v6283_v46  ;;  %v6321_v11 = vsel %vm1727_vm6, %v5103_v38, %v5949_v40  ;;  %v6324_v21 = vrot.slane %v919_v41, %v4312_v44  ;;  %v249_v38 = vld [vmem:[%s4184_s30 + $0x2a8] sm:$0xff] }
 0x179   : > { %13498 = vst [vmem:[#allocation94_spill] sm:$0xff] %v6283_v46  ;;  %v6315_v37 = vpop.permute.xlu2 %818  ;;  %v1150_v24 = vsel %vm4320_vm0, %v1095_v12, %v1097_v59  ;;  %v922_v59 = vmul.f32 %v6121_v58, %v250_v32 }
 0x17a   : > { %13499 = vst [vmem:[#allocation95_spill] sm:$0xff] %v6292_v56  ;;  %v1313_v41 = vsel %vm1232_vm1, %v1150_v24, %v1149_v25 }
 0x17b   : > { %13500 = vst [vmem:[#allocation96_spill] sm:$0xff] %v6298_v28  ;;  %v769_v28 = vpop.permute.xlu1 %768  ;;  %v764_v56 = vpop.permute.xlu0 %763 }
 0x17c   : > { %13501 = vst [vmem:[#allocation97_spill] sm:$0xff] %v6304_v20  ;;  %v1151_v20 = vsel %vm4320_vm0, %v6124_v62, %v1095_v12  ;;  %v253_v12 = vld [vmem:[%s4184_s30 + $0x2c8] sm:$0xff] }
 0x17d   : > { %13503 = vst [vmem:[#allocation99_spill] sm:$0xff] %v6321_v11  ;;  %v1311_v19 = vsel %vm1232_vm1, %v1152_v17, %v1151_v20  ;;  %v1312_v50 = vsel %vm1232_vm1, %v1151_v20, %v1150_v24  ;;  %v918_v11 = vmul.f32 %v769_v28, %v246_v13  ;;  %v13506_v13 = vld [vmem:[#allocation72_spill] sm:$0xff] }
 0x17e   : > { %v1410_v4 = vsel %vm1331_vm2, %v1309_v36, %v1311_v19  ;;  %v1411_v62 = vsel %vm1331_vm2, %v1310_v7, %v1312_v50  ;;  %v6345_v17 = vsel %vm1331_vm2, %v1311_v19, %v1313_v41 }
 0x17f   : > { %v6350_v20 = vsel %vm1430_vm3, %v6146_v0, %v1410_v4  ;;  %v6354_v28 = vsel %vm1430_vm3, %v1407_v6, %v1411_v62  ;;  %v6359_v58 = vsel %vm1430_vm3, %v1408_v29, %v6345_v17  ;;  %v1103_v36 = vrot.slane %v918_v11, %v4312_v44  ;;  %v13512_v11 = vld [vmem:[#allocation57_spill] sm:$0xff] }
 0x180   : > { %v6366_v7 = vsel %vm1529_vm4, %v6071_v18, %v6350_v20  ;;  %v6372_v0 = vsel %vm1529_vm4, %v6076_v60, %v6354_v28  ;;  %v6378_v6 = vsel %vm1529_vm4, %v6151_v3, %v6359_v58  ;;  %v917_v29 = vmul.f32 %v764_v56, %v245_v31  ;;  %v259_v56 = vld [vmem:[%s4184_s30 + $0x2f8] sm:$0xff] }
 0x181   : > { %v6385_v18 = vsel %vm1628_vm5, %v5852_v55, %v6366_v7  ;;  %v6391_v60 = vsel %vm1628_vm5, %v5919_v53, %v6372_v0  ;;  %v6397_v3 = vsel %vm1628_vm5, %v13506_v13, %v6378_v6  ;;  %v6402_v31 = vsel %vm4320_vm0, %v1103_v36, %v6324_v21  ;;  %v13508_v55 = vld [vmem:[#allocation55_spill] sm:$0xff]  ;;  %v13510_v53 = vld [vmem:[#allocation56_spill] sm:$0xff] }
 0x182   : > { %13504 = vst [vmem:[#allocation100_spill] sm:$0xff] %v6385_v18  ;;  %v6409_v19 = vsel %vm1727_vm6, %v13508_v55, %v6385_v18  ;;  %v6415_v32 = vsel %vm1727_vm6, %v13510_v53, %v6391_v60  ;;  %v6421_v24 = vsel %vm1727_vm6, %v13512_v11, %v6397_v3  ;;  %v1101_v13 = vrot.slane %v917_v29, %v4312_v44  ;;  %v13516_v55 = vld [vmem:[#allocation44_spill] sm:$0xff]  ;;  %v13518_v53 = vld [vmem:[#allocation45_spill] sm:$0xff]  ;;  %v834_v11 = vpop.permute.xlu2 %833 }
 0x183   : > { %13505 = vst [vmem:[#allocation101_spill] sm:$0xff] %v6391_v60  ;;  %v6444_v29 = vrot.slane %v922_v59, %v4312_v44  ;;  %v779_v60 = vpop.permute.xlu0 %778 }
 0x184   : > { %13507 = vst [vmem:[#allocation72_spill] sm:$0xff] %v6397_v3  ;;  %v925_v3 = vmul.f32 %v6207_v34, %v253_v12 }
 0x185   : > { %13509 = vst [vmem:[#allocation102_spill] sm:$0xff] %v6409_v19  ;;  %v6429_v19 = vsel %vm1727_vm6, %v13514_v23, %v6019_v8  ;;  %v784_v23 = vpop.permute.xlu1 %783 }
 0x186   : > { %13511 = vst [vmem:[#allocation103_spill] sm:$0xff] %v6415_v32  ;;  %v6435_v32 = vsel %vm1727_vm6, %v13516_v55, %v6025_v49  ;;  %v1148_v55 = vsel %vm4320_vm0, %v6211_v47, %v1101_v13  ;;  %v1117_v49 = vrot.slane %v925_v3, %v4312_v44 }
 0x187   : > { %13513 = vst [vmem:[#allocation104_spill] sm:$0xff] %v6421_v24  ;;  %v6441_v24 = vsel %vm1727_vm6, %v13518_v53, %v6031_v52  ;;  %v1314_v53 = vsel %vm1232_vm1, %v1149_v25, %v1148_v55 }
 0x188   : > { %13515 = vst [vmem:[#allocation105_spill] sm:$0xff] %v6429_v19  ;;  %v1147_v19 = vsel %vm4320_vm0, %v1101_v13, %v1103_v36  ;;  %v921_v36 = vmul.f32 %v784_v23, %v249_v38  ;;  %v1413_v12 = vsel %vm1331_vm2, %v1312_v50, %v1314_v53  ;;  %v13525_v13 = vld [vmem:[#allocation76_spill] sm:$0xff] }
 0x189   : > { %13517 = vst [vmem:[#allocation106_spill] sm:$0xff] %v6435_v32  ;;  %v931_v32 = vmul.f32 %v834_v11, %v259_v56  ;;  %v1315_v59 = vsel %vm1232_vm1, %v1148_v55, %v1147_v19  ;;  %v1316_v34 = vsel %vm1232_vm1, %v1147_v19, %v6402_v31  ;;  %v6473_v55 = vsel %vm1430_vm3, %v6232_v2, %v1413_v12  ;;  %v13523_v11 = vld [vmem:[#allocation75_spill] sm:$0xff] }
 0x18a   : > { %13519 = vst [vmem:[#allocation107_spill] sm:$0xff] %v6441_v24  ;;  %v1414_v47 = vsel %vm1331_vm2, %v1313_v41, %v1315_v59  ;;  %v6465_v56 = vsel %vm1331_vm2, %v1314_v53, %v1316_v34  ;;  %v1109_v50 = vrot.slane %v921_v36, %v4312_v44  ;;  %v6489_v41 = vsel %vm1529_vm4, %v6155_v39, %v6473_v55  ;;  %v248_v39 = vld [vmem:[%s4184_s30 + $0x2a0] sm:$0xff] }
 0x18b   : > { %v6468_v25 = vrot.slane %v931_v32, %v4312_v44  ;;  %v6477_v23 = vsel %vm1430_vm3, %v1410_v4, %v1414_v47  ;;  %v6482_v38 = vsel %vm1430_vm3, %v1411_v62, %v6465_v56  ;;  %v13520_v62 = vld [vmem:[#allocation9_spill] sm:$0xff]  ;;  %v256_v53 = vld [vmem:[%s4184_s30 + $0x2e0] sm:$0xff] }
 0x18c   : > { %v6495_v4 = vsel %vm1529_vm4, %v6160_v16, %v6477_v23  ;;  %v6501_v2 = vsel %vm1529_vm4, %v6237_v26, %v6482_v38  ;;  %v13521_v32 = vld [vmem:[#allocation73_spill] sm:$0xff] }
 0x18d   : > { %v6507_v19 = vsel %vm4320_vm0, %v6468_v25, %v13520_v62  ;;  %v6515_v16 = vsel %vm1628_vm5, %v13521_v32, %v6489_v41  ;;  %v6521_v26 = vsel %vm1628_vm5, %v13523_v11, %v6495_v4  ;;  %v6527_v36 = vsel %vm1628_vm5, %v13525_v13, %v6501_v2  ;;  %v13527_v62 = vld [vmem:[#allocation10_spill] sm:$0xff]  ;;  %v13530_v11 = vld [vmem:[#allocation59_spill] sm:$0xff]  ;;  %v13532_v13 = vld [vmem:[#allocation60_spill] sm:$0xff] }
 0x18e   : > { %13522 = vst [vmem:[#allocation9_spill] sm:$0xff] %v6515_v16  ;;  %v6533_v24 = vsel %vm1232_vm1, %v6507_v19, %v13527_v62  ;;  %v13528_v32 = vld [vmem:[#allocation58_spill] sm:$0xff]  ;;  %v6545_v46 = vsel %vm1727_vm6, %v13530_v11, %v6521_v26  ;;  %v6551_v33 = vsel %vm1727_vm6, %v13532_v13, %v6527_v36  ;;  %v13534_v62 = vld [vmem:[#allocation12_spill] sm:$0xff] }
 0x18f   : > { %13524 = vst [vmem:[#allocation73_spill] sm:$0xff] %v6521_v26  ;;  %v6539_v18 = vsel %vm1727_vm6, %v13528_v32, %v6515_v16  ;;  %v6557_v61 = vsel %vm1331_vm2, %v6533_v24, %v13534_v62  ;;  %v252_v32 = vld [vmem:[%s4184_s30 + $0x2c0] sm:$0xff]  ;;  %v13535_v16 = vld [vmem:[#allocation46_spill] sm:$0xff] }
 0x190   : > { %13526 = vst [vmem:[#allocation75_spill] sm:$0xff] %v6527_v36  ;;  %v6565_v11 = vsel %vm1727_vm6, %v13535_v16, %v6101_v54  ;;  %v920_v36 = vmul.f32 %v779_v60, %v248_v39  ;;  %v13540_v26 = vld [vmem:[#allocation48_spill] sm:$0xff]  ;;  %v794_v60 = vpop.permute.xlu0 %793 }
 0x191   : > { %13529 = vst [vmem:[#allocation76_spill] sm:$0xff] %v6539_v18  ;;  %v251_v18 = vld [vmem:[%s4184_s30 + $0x2b8] sm:$0xff]  ;;  %v6583_v52 = vsel %vm1727_vm6, %v13540_v26, %v6113_v5  ;;  %v13542_v16 = vld [vmem:[#allocation24_spill] sm:$0xff]  ;;  %v13545_v5 = vld [vmem:[#allocation49_spill] sm:$0xff] }
 0x192   : > { %13531 = vst [vmem:[#allocation10_spill] sm:$0xff] %v6545_v46  ;;  %v13537_v46 = vld [vmem:[#allocation47_spill] sm:$0xff]  ;;  %v13543_v39 = vld [vmem:[#allocation40_spill] sm:$0xff] }
 0x193   : > { %13533 = vst [vmem:[#allocation108_spill] sm:$0xff] %v6551_v33  ;;  %v6571_v13 = vsel %vm1727_vm6, %v13537_v46, %v6107_v15  ;;  %v13539_v33 = vld [vmem:[#allocation16_spill] sm:$0xff]  ;;  %v799_v46 = vpop.permute.xlu1 %798  ;;  %v13547_v15 = vld [vmem:[#allocation50_spill] sm:$0xff] }
 0x194   : > { %13536 = vst [vmem:[#allocation12_spill] sm:$0xff] %v6565_v11  ;;  %v6577_v62 = vsel %vm1430_vm3, %v6557_v61, %v13539_v33  ;;  %v928_v11 = vmul.f32 %v6315_v37, %v256_v53  ;;  %v1143_v33 = vsel %vm4320_vm0, %v1109_v50, %v6444_v29  ;;  %v1107_v37 = vrot.slane %v920_v36, %v4312_v44 }
 0x195   : > { %13538 = vst [vmem:[#allocation109_spill] sm:$0xff] %v6571_v13  ;;  %v6590_v13 = vsel %vm1529_vm4, %v6577_v62, %v13542_v16  ;;  %v924_v53 = vmul.f32 %v799_v46, %v252_v32  ;;  %v6606_v16 = vsel %vm1727_vm6, %v13545_v5, %v6187_v1  ;;  %v6612_v54 = vsel %vm1727_vm6, %v13547_v15, %v6193_v30  ;;  %v254_v15 = vld [vmem:[%s4184_s30 + $0x2d0] sm:$0xff] }
 0x196   : > { %13541 = vst [vmem:[#allocation16_spill] sm:$0xff] %v6583_v52  ;;  %v6599_v26 = vsel %vm1628_vm5, %v6590_v13, %v13543_v39  ;;  %v923_v52 = vmul.f32 %v794_v60, %v251_v18  ;;  %v13549_v39 = vld [vmem:[#allocation74_spill] sm:$0xff]  ;;  %v1144_v18 = vsel %vm4320_vm0, %v1107_v37, %v1109_v50  ;;  %v1145_v36 = vsel %vm4320_vm0, %v6324_v21, %v1107_v37 }
 0x197   : > { %13544 = vst [vmem:[#allocation24_spill] sm:$0xff] %v6599_v26  ;;  %v6619_v46 = vsel %vm1727_vm6, %v6599_v26, %v13549_v39  ;;  %v1115_v32 = vrot.slane %v924_v53, %v4312_v44  ;;  %v1317_v3 = vsel %vm1232_vm1, %v6402_v31, %v1145_v36  ;;  %v1319_v50 = vsel %vm1232_vm1, %v1144_v18, %v1143_v33 }
 0x198   : > { %13546 = vst [vmem:[#allocation40_spill] sm:$0xff] %v6606_v16  ;;  %v1113_v60 = vrot.slane %v923_v52, %v4312_v44  ;;  %v1318_v16 = vsel %vm1232_vm1, %v1145_v36, %v1144_v18  ;;  %v1416_v21 = vsel %vm1331_vm2, %v1315_v59, %v1317_v3  ;;  %v255_v36 = vld [vmem:[%s4184_s30 + $0x2d8] sm:$0xff]  ;;  %v809_v39 = vpop.permute.xlu0 %808 }
 0x199   : > { %13548 = vst [vmem:[#allocation110_spill] sm:$0xff] %v6612_v54  ;;  %v6629_v54 = vrot.slane %v928_v11, %v4312_v44  ;;  %v1417_v52 = vsel %vm1331_vm2, %v1316_v34, %v1318_v16  ;;  %v1418_v11 = vsel %vm1331_vm2, %v1317_v3, %v1319_v50  ;;  %v1140_v37 = vsel %vm4320_vm0, %v1115_v32, %v1117_v49 }
 0x19a   : > { %13550 = vst [vmem:[#allocation111_spill] sm:$0xff] %v6619_v46  ;;  %v6649_v31 = vsel %vm1430_vm3, %v6345_v17, %v1416_v21  ;;  %v6653_v53 = vsel %vm1430_vm3, %v1413_v12, %v1417_v52  ;;  %v6657_v59 = vsel %vm1430_vm3, %v1414_v47, %v1418_v11  ;;  %v1141_v34 = vsel %vm4320_vm0, %v1113_v60, %v1115_v32 }
 0x19b   : > { %v6665_v18 = vsel %vm1529_vm4, %v6241_v63, %v6649_v31  ;;  %v6671_v17 = vsel %vm1529_vm4, %v6246_v57, %v6653_v53  ;;  %v6677_v12 = vsel %vm1529_vm4, %v6350_v20, %v6657_v59  ;;  %v1142_v47 = vsel %vm4320_vm0, %v6444_v29, %v1113_v60  ;;  %v13551_v63 = vld [vmem:[#allocation77_spill] sm:$0xff]  ;;  %v13553_v57 = vld [vmem:[#allocation80_spill] sm:$0xff]  ;;  %v814_v60 = vpop.permute.xlu1 %813 }
 0x19c   : > { %v6687_v32 = vsel %vm1628_vm5, %v13551_v63, %v6665_v18  ;;  %v6693_v3 = vsel %vm1628_vm5, %v13553_v57, %v6671_v17  ;;  %v13555_v20 = vld [vmem:[#allocation81_spill] sm:$0xff]  ;;  %v1320_v29 = vsel %vm1232_vm1, %v1143_v33, %v1142_v47  ;;  %v13559_v57 = vld [vmem:[#allocation62_spill] sm:$0xff]  ;;  %v1321_v30 = vsel %vm1232_vm1, %v1142_v47, %v1141_v34 }
 0x19d   : > { %13552 = vst [vmem:[#allocation77_spill] sm:$0xff] %v6687_v32  ;;  %v6699_v46 = vsel %vm1628_vm5, %v13555_v20, %v6677_v12  ;;  %v13557_v63 = vld [vmem:[#allocation61_spill] sm:$0xff]  ;;  %v6714_v26 = vsel %vm1727_vm6, %v13559_v57, %v6693_v3  ;;  %v13561_v20 = vld [vmem:[#allocation63_spill] sm:$0xff]  ;;  %v1322_v1 = vsel %vm1232_vm1, %v1141_v34, %v1140_v37  ;;  %v1420_v57 = vsel %vm1331_vm2, %v1319_v50, %v1321_v30 }
 0x19e   : > { %13554 = vst [vmem:[#allocation80_spill] sm:$0xff] %v6693_v3  ;;  %v6708_v5 = vsel %vm1727_vm6, %v13557_v63, %v6687_v32  ;;  %v6720_v33 = vsel %vm1727_vm6, %v13561_v20, %v6699_v46  ;;  %v6732_v63 = vsel %vm1331_vm2, %v1320_v29, %v1322_v1  ;;  %v6741_v34 = vsel %vm1430_vm3, %v1416_v21, %v1420_v57  ;;  %v13563_v21 = vld [vmem:[#allocation82_spill] sm:$0xff] }
 0x19f   : > { %13556 = vst [vmem:[#allocation81_spill] sm:$0xff] %v6699_v46  ;;  %v926_v47 = vmul.f32 %v809_v39, %v254_v15  ;;  %v258_v20 = vld [vmem:[%s4184_s30 + $0x2f0] sm:$0xff]  ;;  %v13572_v46 = vld [vmem:[#allocation91_spill] sm:$0xff]  ;;  %v6826_v32 = vstv %s1824_s19 }
 0x1a0   : > { %13558 = vst [vmem:[#allocation112_spill] sm:$0xff] %v6708_v5  ;;  %v1419_v5 = vsel %vm1331_vm2, %v1318_v16, %v1320_v29  ;;  %v6746_v16 = vsel %vm1430_vm3, %v1417_v52, %v6732_v63  ;;  %v13565_v52 = vld [vmem:[#allocation86_spill] sm:$0xff]  ;;  %v13568_v29 = vld [vmem:[#allocation64_spill] sm:$0xff] }
 0x1a1   : > { %13560 = vst [vmem:[#allocation113_spill] sm:$0xff] %v6714_v26  ;;  %v927_v26 = vmul.f32 %v814_v60, %v255_v36  ;;  %v6765_v39 = vsel %vm1529_vm4, %v6473_v55, %v6746_v16  ;;  %v13567_v36 = vld [vmem:[#allocation87_spill] sm:$0xff] }
 0x1a2   : > { %13562 = vst [vmem:[#allocation114_spill] sm:$0xff] %v6720_v33  ;;  %v6737_v33 = vsel %vm1430_vm3, %v6465_v56, %v1419_v5  ;;  %v6758_v56 = vsel %vm1529_vm4, %v6359_v58, %v6741_v34  ;;  %v6785_v55 = vsel %vm1628_vm5, %v13567_v36, %v6765_v39  ;;  %v13573_v36 = vld [vmem:[#allocation51_spill] sm:$0xff] }
 0x1a3   : > { %v6752_v50 = vsel %vm1529_vm4, %v6354_v28, %v6737_v33  ;;  %v1121_v15 = vrot.slane %v927_v26, %v4312_v44  ;;  %v6777_v58 = vsel %vm1628_vm5, %v13565_v52, %v6758_v56  ;;  %v1119_v26 = vrot.slane %v926_v47, %v4312_v44  ;;  %13577 = vst [vmem:[#allocation118_spill] sm:$0xff] %v6826_v32 }
 0x1a4   : > { %v6771_v28 = vsel %vm1628_vm5, %v13563_v21, %v6752_v50  ;;  %13566 = vst [vmem:[#allocation86_spill] sm:$0xff] %v6777_v58  ;;  %v13570_v21 = vld [vmem:[#allocation65_spill] sm:$0xff]  ;;  %v6807_v3 = vsel %vm1727_vm6, %v13573_v36, %v13572_v46  ;;  %v829_v36 = vpop.permute.xlu1 %828 }
 0x1a5   : > { %13564 = vst [vmem:[#allocation82_spill] sm:$0xff] %v6771_v28  ;;  %v6791_v60 = vsel %vm1727_vm6, %v13568_v29, %v6771_v28  ;;  %v6797_v52 = vsel %vm1727_vm6, %v13570_v21, %v6777_v58  ;;  %v1137_v47 = vsel %vm4320_vm0, %v1121_v15, %v6629_v54  ;;  %v13575_v29 = vld [vmem:[#allocation66_spill] sm:$0xff]  ;;  %v1139_v21 = vsel %vm4320_vm0, %v1117_v49, %v1119_v26  ;;  %v257_v58 = vld [vmem:[%s4184_s30 + $0x2e8] sm:$0xff]  ;;  %s3587_s30 = smul.u32 384, %s4180_s25 }
 0x1a6   : > { %13569 = vst [vmem:[#allocation87_spill] sm:$0xff] %v6791_v60  ;;  %v6813_v60 = vsel %vm1727_vm6, %v13575_v29, %v6785_v55  ;;  %v1323_v28 = vsel %vm1232_vm1, %v1140_v37, %v1139_v21  ;;  %v930_v37 = vmul.f32 %v829_v36, %v258_v20  ;;  %v13583_v36 = vld [vmem:[#allocation69_spill] sm:$0xff] }
 0x1a7   : > { %13571 = vst [vmem:[#allocation115_spill] sm:$0xff] %v6797_v52  ;;  %v1138_v52 = vsel %vm4320_vm0, %v1119_v26, %v1121_v15  ;;  %v1422_v15 = vsel %vm1331_vm2, %v1321_v30, %v1323_v28  ;;  %s12741_s17 = scalar_lea.vmem [#allocation5], %s3587_s30 }
 0x1a8   : > { %13574 = vst [vmem:[#allocation116_spill] sm:$0xff] %v6807_v3  ;;  %v1324_v46 = vsel %vm1232_vm1, %v1139_v21, %v1138_v52  ;;  %v1325_v3 = vsel %vm1232_vm1, %v1138_v52, %v1137_v47  ;;  %v1521_v21 = vsel %vm1430_vm3, %v1418_v11, %v1422_v15  ;;  %s3498_s23 = sshll.u32 %s12741_s17, 4  ;;  %s3499_s23 = int_to_ptr.vmem [resolvable:$true] %s3498_s23 }
 0x1a9   : > { %13576 = vst [vmem:[#allocation117_spill] sm:$0xff] %v6813_v60  ;;  %v824_v60 = vpop.permute.xlu0 %823  ;;  %v1423_v49 = vsel %vm1331_vm2, %v1322_v1, %v1324_v46  ;;  %v1424_v26 = vsel %vm1331_vm2, %v1323_v28, %v1325_v3  ;;  %v6843_v30 = vsel %vm1529_vm4, %v6477_v23, %v1521_v21  ;;  %v13579_v28 = vld [vmem:[#allocation67_spill] sm:$0xff] }
 0x1aa   : > { %v1522_v52 = vsel %vm1430_vm3, %v1419_v5, %v1423_v49  ;;  %v1523_v29 = vsel %vm1430_vm3, %v1420_v57, %v1424_v26  ;;  %v929_v32 = vmul.f32 %v824_v60, %v257_v58  ;;  %v1127_v5 = vrot.slane %v930_v37, %v4312_v44  ;;  %v13578_v57 = vld [vmem:[#allocation88_spill] sm:$0xff] }
 0x1ab   : > { %v6848_v1 = vsel %vm1529_vm4, %v6482_v38, %v1522_v52  ;;  %v6853_v11 = vsel %vm1529_vm4, %v6649_v31, %v1523_v29  ;;  %v6860_v20 = vsel %vm1628_vm5, %v13578_v57, %v6843_v30  ;;  %v13581_v60 = vld [vmem:[#allocation68_spill] sm:$0xff]  ;;  %v13585_v37 = vlaneseq }
 0x1ac   : > { %v6866_v23 = vsel %vm1628_vm5, %v6253_v43, %v6848_v1  ;;  %v6872_v38 = vsel %vm1628_vm5, %v6259_v35, %v6853_v11  ;;  %v1125_v31 = vrot.slane %v929_v32, %v4312_v44  ;;  %v6879_v58 = vsel %vm1727_vm6, %v13579_v28, %v6860_v20 }
 0x1ad   : > { %13580 = vst [vmem:[#allocation88_spill] sm:$0xff] %v6879_v58  ;;  %v6885_v43 = vsel %vm1727_vm6, %v13581_v60, %v6866_v23  ;;  %v6891_v35 = vsel %vm1727_vm6, %v13583_v36, %v6872_v38  ;;  %v1134_v44 = vsel %vm4320_vm0, %v1127_v5, %v6468_v25  ;;  %v6900_v57 = vand.u32 127, %v13585_v37  ;;  %v13587_v36 = vld [vmem:[#allocation11_spill] sm:$0xff] }
 0x1ae   : > { %13582 = vst [vmem:[#allocation67_spill] sm:$0xff] %v6885_v43  ;;  %v1233_v32 = vsel %vm1232_vm1, %v1134_v44, %v6507_v19  ;;  %v1135_v43 = vsel %vm4320_vm0, %v1125_v31, %v1127_v5  ;;  %v1136_v58 = vsel %vm4320_vm0, %v6629_v54, %v1125_v31  ;;  %v13588_v60 = vld [vmem:[#allocation15_spill] sm:$0xff] }
 0x1af   : > { %13584 = vst [vmem:[#allocation119_spill] sm:$0xff] %v6891_v35  ;;  %v1334_v35 = vsel %vm1331_vm2, %v1233_v32, %v13587_v36  ;;  %v1326_v25 = vsel %vm1232_vm1, %v1137_v47, %v1136_v58  ;;  %v1327_v19 = vsel %vm1232_vm1, %v1136_v58, %v1135_v43  ;;  %v1328_v37 = vsel %vm1232_vm1, %v1135_v43, %v1134_v44  ;;  %v13589_v31 = vld [vmem:[#allocation23_spill] sm:$0xff] }
 0x1b0   : > { %13586 = vst [vmem:[#allocation120_spill] sm:$0xff] %v6900_v57  ;;  %v1437_v5 = vsel %vm1430_vm3, %v1334_v35, %v13588_v60  ;;  %v1332_v51 = vsel %vm1331_vm2, %v1327_v19, %v1233_v32  ;;  %v1333_v54 = vsel %vm1331_vm2, %v1328_v37, %v6533_v24  ;;  %v1425_v47 = vsel %vm1331_vm2, %v1324_v46, %v1326_v25  ;;  %v13590_v36 = vld [vmem:[#allocation39_spill] sm:$0xff]  ;;  %v13593_v32 = vld [vmem:[#allocation13_spill] sm:$0xff] }
 0x1b1   : > { %v1544_v58 = vsel %vm1529_vm4, %v1437_v5, %v13589_v31  ;;  %v1426_v10 = vsel %vm1331_vm2, %v1325_v3, %v1327_v19  ;;  %v1427_v60 = vsel %vm1331_vm2, %v1326_v25, %v1328_v37  ;;  %v1431_v43 = vsel %vm1430_vm3, %v1424_v26, %v1332_v51  ;;  %v13594_v19 = vld [vmem:[#allocation14_spill] sm:$0xff] }
 0x1b2   : > { %v6938_v24 = vsel %vm1628_vm5, %v1544_v58, %v13590_v36  ;;  %v1432_v46 = vsel %vm1430_vm3, %v1425_v47, %v1333_v54  ;;  %v1433_v44 = vsel %vm1430_vm3, %v1426_v10, %v1334_v35  ;;  %v1434_v3 = vsel %vm1430_vm3, %v1427_v60, %v6557_v61 }
 0x1b3   : > { %v6951_v26 = vsel %vm1727_vm6, %v6938_v24, %v13591_v14  ;;  %v1435_v25 = vsel %vm1430_vm3, %v1332_v51, %v13593_v32  ;;  %v1436_v37 = vsel %vm1430_vm3, %v1333_v54, %v13594_v19  ;;  %v1524_v35 = vsel %vm1430_vm3, %v6732_v63, %v1425_v47  ;;  %v13596_v47 = vld [vmem:[#allocation18_spill] sm:$0xff]  ;;  %v13599_v32 = vld [vmem:[#allocation21_spill] sm:$0xff] }
 0x1b4   : > { %13592 = vst [vmem:[#allocation11_spill] sm:$0xff] %v6951_v26  ;;  %v1525_v61 = vsel %vm1430_vm3, %v1422_v15, %v1426_v10  ;;  %v1526_v31 = vsel %vm1430_vm3, %v1423_v49, %v1427_v60  ;;  %v1530_v36 = vsel %vm1529_vm4, %v6741_v34, %v1431_v43  ;;  %v1531_v51 = vsel %vm1529_vm4, %v6746_v16, %v1432_v46  ;;  %v13595_v16 = vld [vmem:[#allocation17_spill] sm:$0xff]  ;;  %v13597_v10 = vld [vmem:[#allocation19_spill] sm:$0xff]  ;;  %v13598_v60 = vld [vmem:[#allocation20_spill] sm:$0xff] }
 0x1b5   : > { %v1532_v54 = vsel %vm1529_vm4, %v1521_v21, %v1433_v44  ;;  %v1533_v63 = vsel %vm1529_vm4, %v1522_v52, %v1434_v3  ;;  %v1534_v15 = vsel %vm1529_vm4, %v1523_v29, %v1435_v25  ;;  %v1535_v48 = vsel %vm1529_vm4, %v1524_v35, %v1436_v37  ;;  %v13600_v19 = vld [vmem:[#allocation22_spill] sm:$0xff] }
 0x1b6   : > { %v1536_v49 = vsel %vm1529_vm4, %v1525_v61, %v1437_v5  ;;  %v1537_v34 = vsel %vm1529_vm4, %v1526_v31, %v6577_v62  ;;  %v1538_v21 = vsel %vm1529_vm4, %v1431_v43, %v13595_v16  ;;  %v1539_v52 = vsel %vm1529_vm4, %v1432_v46, %v13596_v47  ;;  %v13605_v47 = vld [vmem:[#allocation29_spill] sm:$0xff] }
 0x1b7   : > { %v1540_v29 = vsel %vm1529_vm4, %v1433_v44, %v13597_v10  ;;  %v1541_v5 = vsel %vm1529_vm4, %v1434_v3, %v13598_v60  ;;  %v1542_v62 = vsel %vm1529_vm4, %v1435_v25, %v13599_v32  ;;  %v1543_v43 = vsel %vm1529_vm4, %v1436_v37, %v13600_v19  ;;  %v13606_v10 = vld [vmem:[#allocation30_spill] sm:$0xff]  ;;  %v13607_v60 = vld [vmem:[#allocation31_spill] sm:$0xff]  ;;  %v13608_v32 = vld [vmem:[#allocation32_spill] sm:$0xff] }
 0x1b8   : > { %v1623_v46 = vsel %vm1529_vm4, %v6653_v53, %v1524_v35  ;;  %v1624_v44 = vsel %vm1529_vm4, %v6657_v59, %v1525_v61  ;;  %v7013_v3 = vsel %vm1628_vm5, %v6378_v6, %v1530_v36  ;;  %v7018_v25 = vsel %vm1628_vm5, %v6489_v41, %v1531_v51  ;;  %v13609_v19 = vld [vmem:[#allocation33_spill] sm:$0xff] }
 0x1b9   : > { %v7023_v37 = vsel %vm1628_vm5, %v6495_v4, %v1532_v54  ;;  %v7028_v53 = vsel %vm1628_vm5, %v6501_v2, %v1533_v63  ;;  %v7033_v6 = vsel %vm1628_vm5, %v6665_v18, %v1534_v15  ;;  %v1625_v41 = vsel %vm1529_vm4, %v6737_v33, %v1526_v31  ;;  %v13604_v31 = vld [vmem:[#allocation28_spill] sm:$0xff] }
 0x1ba   : > { %v7041_v59 = vsel %vm1628_vm5, %v6671_v17, %v1535_v48  ;;  %v7046_v4 = vsel %vm1628_vm5, %v6677_v12, %v1536_v49  ;;  %v7051_v2 = vsel %vm1628_vm5, %v6752_v50, %v1537_v34  ;;  %v7056_v22 = vsel %vm1628_vm5, %v6758_v56, %v1538_v21 }
 0x1bb   : > { %v7061_v18 = vsel %vm1628_vm5, %v6765_v39, %v1539_v52  ;;  %v7066_v17 = vsel %vm1628_vm5, %v6843_v30, %v1540_v29  ;;  %v7071_v12 = vsel %vm1628_vm5, %v6848_v1, %v1541_v5  ;;  %v7076_v33 = vsel %vm1628_vm5, %v6853_v11, %v1542_v62  ;;  %v13601_v39 = vld [vmem:[#allocation25_spill] sm:$0xff]  ;;  %v13602_v1 = vld [vmem:[#allocation26_spill] sm:$0xff]  ;;  %v13603_v11 = vld [vmem:[#allocation27_spill] sm:$0xff] }
 0x1bc   : > { %v7080_v50 = vsel %vm1628_vm5, %v1623_v46, %v1543_v43  ;;  %v7084_v56 = vsel %vm1628_vm5, %v1624_v44, %v1544_v58  ;;  %v7089_v30 = vsel %vm1628_vm5, %v1530_v36, %v13601_v39  ;;  %v7094_v35 = vsel %vm1628_vm5, %v1531_v51, %v13602_v1  ;;  %v13610_v39 = vld [vmem:[#allocation34_spill] sm:$0xff]  ;;  %v13611_v1 = vld [vmem:[#allocation35_spill] sm:$0xff] }
 0x1bd   : > { %v7099_v61 = vsel %vm1628_vm5, %v1532_v54, %v13603_v11  ;;  %v7104_v58 = vsel %vm1628_vm5, %v1533_v63, %v13604_v31  ;;  %v7109_v36 = vsel %vm1628_vm5, %v1534_v15, %v13605_v47  ;;  %v7114_v51 = vsel %vm1628_vm5, %v1535_v48, %v13606_v10  ;;  %v13612_v11 = vld [vmem:[#allocation36_spill] sm:$0xff]  ;;  %v13613_v31 = vld [vmem:[#allocation37_spill] sm:$0xff]  ;;  %v13614_v47 = vld [vmem:[#allocation38_spill] sm:$0xff] }
 0x1be   : > { %v7119_v54 = vsel %vm1628_vm5, %v1536_v49, %v13607_v60  ;;  %v7124_v63 = vsel %vm1628_vm5, %v1537_v34, %v13608_v32  ;;  %v7129_v15 = vsel %vm1628_vm5, %v1538_v21, %v13609_v19  ;;  %v7134_v48 = vsel %vm1628_vm5, %v1539_v52, %v13610_v39  ;;  %v13628_v32 = vld [vmem:[#allocation89_spill] sm:$0xff]  ;;  %v13630_v39 = vld [vmem:[#allocation90_spill] sm:$0xff] }
 0x1bf   : > { %v7139_v49 = vsel %vm1628_vm5, %v1540_v29, %v13611_v1  ;;  %v7144_v34 = vsel %vm1628_vm5, %v1541_v5, %v13612_v11  ;;  %v7149_v21 = vsel %vm1628_vm5, %v1542_v62, %v13613_v31  ;;  %v1644_v52 = vsel %vm1628_vm5, %v1625_v41, %v6590_v13  ;;  %v13632_v11 = vld [vmem:[#allocation92_spill] sm:$0xff] }
 0x1c0   : > { %v7157_v10 = vsel %vm1628_vm5, %v1543_v43, %v13614_v47  ;;  %v7162_v29 = vsel %vm1628_vm5, %v6265_v9, %v1623_v46  ;;  %v7167_v5 = vsel %vm1628_vm5, %v6366_v7, %v1624_v44  ;;  %v7172_v62 = vsel %vm1628_vm5, %v6372_v0, %v1625_v41  ;;  %v13626_v41 = vld [vmem:[#allocation85_spill] sm:$0xff] }
 0x1c1   : > { %v7178_v13 = vsel %vm1727_vm6, %v5943_v27, %v7013_v3  ;;  %v7184_v9 = vsel %vm1727_vm6, %v5949_v40, %v7018_v25  ;;  %v7190_v7 = vsel %vm1727_vm6, %v6019_v8, %v7023_v37  ;;  %v7196_v0 = vsel %vm1727_vm6, %v13618_v45, %v7028_v53  ;;  %v13620_v27 = vld [vmem:[#allocation79_spill] sm:$0xff]  ;;  %v13624_v8 = vld [vmem:[#allocation84_spill] sm:$0xff]  ;;  %v13634_v47 = vld [vmem:[#allocation93_spill] sm:$0xff] }
 0x1c2   : > { %13615 = vst [vmem:[#allocation15_spill] sm:$0xff] %v7178_v13  ;;  %v7202_v43 = vsel %vm1727_vm6, %v13620_v27, %v7033_v6  ;;  %v13622_v40 = vld [vmem:[#allocation83_spill] sm:$0xff]  ;;  %v7214_v44 = vsel %vm1727_vm6, %v13624_v8, %v7046_v4  ;;  %v7220_v60 = vsel %vm1727_vm6, %v13626_v41, %v7051_v2  ;;  %v7226_v19 = vsel %vm1727_vm6, %v13628_v32, %v7056_v22  ;;  %v13636_v27 = vld [vmem:[#allocation94_spill] sm:$0xff]  ;;  %v13638_v8 = vld [vmem:[#allocation100_spill] sm:$0xff] }
 0x1c3   : > { %13616 = vst [vmem:[#allocation23_spill] sm:$0xff] %v7184_v9  ;;  %v7208_v46 = vsel %vm1727_vm6, %v13622_v40, %v7041_v59  ;;  %v7232_v1 = vsel %vm1727_vm6, %v13630_v39, %v7061_v18  ;;  %v7238_v31 = vsel %vm1727_vm6, %v13632_v11, %v7071_v12  ;;  %v7244_v45 = vsel %vm1727_vm6, %v13634_v47, %v7076_v33  ;;  %v13640_v32 = vld [vmem:[#allocation101_spill] sm:$0xff]  ;;  %v13642_v11 = vld [vmem:[#allocation72_spill] sm:$0xff]  ;;  %v13672_v9 = vld [vmem:[#allocation42_spill] sm:$0xff] }
 0x1c4   : > { %13617 = vst [vmem:[#allocation39_spill] sm:$0xff] %v7190_v7  ;;  %v7250_v40 = vsel %vm1727_vm6, %v13636_v27, %v7080_v50  ;;  %v7256_v41 = vsel %vm1727_vm6, %v13638_v8, %v7084_v56  ;;  %v7261_v39 = vsel %vm1727_vm6, %v13640_v32, %v1644_v52  ;;  %v7267_v47 = vsel %vm1727_vm6, %v13642_v11, %v7089_v30  ;;  %v13644_v27 = vld [vmem:[#allocation9_spill] sm:$0xff]  ;;  %v13648_v32 = vld [vmem:[#allocation75_spill] sm:$0xff] }
 0x1c5   : > { %13619 = vst [vmem:[#allocation71_spill] sm:$0xff] %v7196_v0  ;;  %v7273_v16 = vsel %vm1727_vm6, %v13644_v27, %v7094_v35  ;;  %v13646_v8 = vld [vmem:[#allocation73_spill] sm:$0xff]  ;;  %v13652_v27 = vld [vmem:[#allocation80_spill] sm:$0xff]  ;;  %v13674_v13 = vld [vmem:[#allocation43_spill] sm:$0xff] }
 0x1c6   : > { %13621 = vst [vmem:[#allocation13_spill] sm:$0xff] %v7202_v43  ;;  %v13650_v11 = vld [vmem:[#allocation77_spill] sm:$0xff] }
 0x1c7   : > { %13623 = vst [vmem:[#allocation14_spill] sm:$0xff] %v7208_v46  ;;  %v13667_v46 = vld [vmem:[#allocation24_spill] sm:$0xff]  ;;  %v13670_v0 = vld [vmem:[#allocation41_spill] sm:$0xff] }
 0x1c8   : > { %13625 = vst [vmem:[#allocation17_spill] sm:$0xff] %v7214_v44  ;;  %v7358_v43 = vsel %vm1727_vm6, %v7172_v62, %v13667_v46  ;;  %v7365_v7 = vsel %vm1727_vm6, %v7013_v3, %v13670_v0  ;;  %v7377_v46 = vsel %vm1727_vm6, %v7023_v37, %v13674_v13  ;;  %v13678_v3 = vand.u32 1, %v6900_v57  ;;  %v13684_v37 = vld [vmem:[#allocation46_spill] sm:$0xff] }
 0x1c9   : > { %13627 = vst [vmem:[#allocation18_spill] sm:$0xff] %v7220_v60  ;;  %v13679_v0 = vmov 0  ;;  %v7401_v13 = vsel %vm1727_vm6, %v7041_v59, %v13684_v37  ;;  %v13692_v59 = vld [vmem:[#allocation50_spill] sm:$0xff] }
 0x1ca   : > { %13629 = vst [vmem:[#allocation19_spill] sm:$0xff] %v7226_v19  ;;  %vm7387_vm9 = vcmp.eq.s32.totalorder %v13678_v3, 1  ;;  %v13688_v3 = vld [vmem:[#allocation48_spill] sm:$0xff]  ;;  %v7425_v37 = vsel %vm1727_vm6, %v7061_v18, %v13692_v59  ;;  %v13700_v18 = vld [vmem:[#allocation54_spill] sm:$0xff] }
 0x1cb   : > { %13631 = vst [vmem:[#allocation20_spill] sm:$0xff] %v7232_v1  ;;  %v7297_v1 = vsel %vm1727_vm6, %v13652_v27, %v7114_v51  ;;  %v7321_v27 = vsel %vm1727_vm6, %v6785_v55, %v7134_v48  ;;  %v7340_v55 = vsel %vm1727_vm6, %v6872_v38, %v7149_v21  ;;  %v13669_v38 = vld [vmem:[#allocation8_spill] sm:$0xff]  ;;  %v13680_v0 = vsel %vm7387_vm9, 4294967295, %v13679_v0 }
 0x1cc   : > { %13633 = vst [vmem:[#allocation21_spill] sm:$0xff] %v7238_v31  ;;  %v7291_v31 = vsel %vm1727_vm6, %v13650_v11, %v7109_v36  ;;  %v13658_v11 = vld [vmem:[#allocation86_spill] sm:$0xff]  ;;  %vm2021_vm8 = vcmp.lt.s32.totalorder %v13669_v38, 1  ;;  %v7413_v57 = vsel %vm1727_vm6, %v7051_v2, %v13688_v3  ;;  %v13696_v2 = vld [vmem:[#allocation52_spill] sm:$0xff]  ;;  %v7449_v59 = vsel %vm1727_vm6, %v7080_v50, %v13700_v18  ;;  %v13707_v18 = vld [vmem:[#allocation59_spill] sm:$0xff] }
 0x1cd   : > { %13635 = vst [vmem:[#allocation22_spill] sm:$0xff] %v7244_v45  ;;  %v7285_v45 = vsel %vm1727_vm6, %v13648_v32, %v7104_v58  ;;  %v13656_v32 = vld [vmem:[#allocation82_spill] sm:$0xff]  ;;  %v7315_v44 = vsel %vm1727_vm6, %v13658_v11, %v7129_v15  ;;  %v7437_v3 = vsel %vm1727_vm6, %v7071_v12, %v13696_v2  ;;  %v13704_v2 = vld [vmem:[#allocation57_spill] sm:$0xff]  ;;  %vm2312_vm10 = vcmp.lt.s32.totalorder %v13669_v38, 2 }
 0x1ce   : > { %13637 = vst [vmem:[#allocation25_spill] sm:$0xff] %v7250_v40  ;;  %v7279_v40 = vsel %vm1727_vm6, %v13646_v8, %v7099_v61  ;;  %v13654_v8 = vld [vmem:[#allocation81_spill] sm:$0xff]  ;;  %v7309_v60 = vsel %vm1727_vm6, %v13656_v32, %v7124_v63  ;;  %v7333_v32 = vsel %vm1727_vm6, %v6866_v23, %v7144_v34  ;;  %v13663_v11 = vld [vmem:[#allocation118_spill] sm:$0xff]  ;;  %v7352_v23 = vsel %vm1727_vm6, %v7167_v5, %v6938_v24 }
 0x1cf   : > { %13639 = vst [vmem:[#allocation26_spill] sm:$0xff] %v7256_v41  ;;  %v7303_v19 = vsel %vm1727_vm6, %v13654_v8, %v7119_v54  ;;  %v7327_v8 = vsel %vm1727_vm6, %v6860_v20, %v7139_v49  ;;  %vm1826_vm7 = vcmp.ne.s32.totalorder %v13663_v11, 0  ;;  %v7346_v20 = vsel %vm1727_vm6, %v7162_v29, %v7157_v10 }
 0x1d0   : > { %13641 = vst [vmem:[#allocation27_spill] sm:$0xff] %v7261_v39  ;;  %v7371_v24 = vsel %vm1727_vm6, %v7018_v25, %v13672_v9  ;;  %v13682_v25 = vld [vmem:[#allocation45_spill] sm:$0xff] }
 0x1d1   : > { %13643 = vst [vmem:[#allocation28_spill] sm:$0xff] %v7267_v47  ;;  %v7395_v9 = vsel %vm1727_vm6, %v7033_v6, %v13682_v25  ;;  %v13690_v6 = vld [vmem:[#allocation49_spill] sm:$0xff] }
 0x1d2   : > { %13645 = vst [vmem:[#allocation29_spill] sm:$0xff] %v7273_v16  ;;  %v7419_v25 = vsel %vm1727_vm6, %v7056_v22, %v13690_v6  ;;  %v13698_v22 = vld [vmem:[#allocation53_spill] sm:$0xff] }
 0x1d3   : > { %13647 = vst [vmem:[#allocation30_spill] sm:$0xff] %v7279_v40  ;;  %v7443_v6 = vsel %vm1727_vm6, %v7076_v33, %v13698_v22  ;;  %v1776_v33 = vsel %vm1727_vm6, %v7089_v30, %v13704_v2  ;;  %v13705_v22 = vld [vmem:[#allocation58_spill] sm:$0xff] }
 0x1d4   : > { %13649 = vst [vmem:[#allocation31_spill] sm:$0xff] %v7285_v45  ;;  %v7466_v50 = vsel %vm1727_vm6, %v7094_v35, %v13705_v22  ;;  %v13713_v35 = vld [vmem:[#allocation62_spill] sm:$0xff] }
 0x1d5   : > { %13651 = vst [vmem:[#allocation32_spill] sm:$0xff] %v7291_v31  ;;  %v7490_v2 = vsel %vm1727_vm6, %v7114_v51, %v13713_v35  ;;  %v13721_v51 = vld [vmem:[#allocation66_spill] sm:$0xff] }
 0x1d6   : > { %13653 = vst [vmem:[#allocation33_spill] sm:$0xff] %v7297_v1 }
 0x1d7   : > { %13655 = vst [vmem:[#allocation34_spill] sm:$0xff] %v7303_v19 }
 0x1d8   : > { %13657 = vst [vmem:[#allocation35_spill] sm:$0xff] %v7309_v60 }
 0x1d9   : > { %13659 = vst [vmem:[#allocation36_spill] sm:$0xff] %v7315_v44 }
 0x1da   : > { %13660 = vst [vmem:[#allocation37_spill] sm:$0xff] %v7321_v27 }
 0x1db   : > { %13661 = vst [vmem:[#allocation38_spill] sm:$0xff] %v7327_v8 }
 0x1dc   : > { %13662 = vst [vmem:[#allocation78_spill] sm:$0xff] %v7333_v32 }
 0x1dd   : > { %13664 = vst [vmem:[#allocation79_spill] sm:$0xff] %v7340_v55 }
 0x1de   : > { %13665 = vst [vmem:[#allocation83_spill] sm:$0xff] %v7346_v20 }
 0x1df   : > { %13666 = vst [vmem:[#allocation84_spill] sm:$0xff] %v7352_v23 }
 0x1e0   : > { %13668 = vst [vmem:[#allocation85_spill] sm:$0xff] %v7358_v43  ;;  %v13676_v43 = vld [vmem:[#allocation44_spill] sm:$0xff] }
 0x1e1   : > { %13671 = vst [vmem:[#allocation89_spill] sm:$0xff] %v7365_v7  ;;  %v7383_v26 = vsel %vm1727_vm6, %v7028_v53, %v13676_v43  ;;  %v13686_v53 = vld [vmem:[#allocation47_spill] sm:$0xff] }
 0x1e2   : > { %13673 = vst [vmem:[#allocation90_spill] sm:$0xff] %v7371_v24  ;;  %v7407_v43 = vsel %vm1727_vm6, %v7046_v4, %v13686_v53  ;;  %v13694_v4 = vld [vmem:[#allocation51_spill] sm:$0xff] }
 0x1e3   : > { %13675 = vst [vmem:[#allocation92_spill] sm:$0xff] %v7377_v46  ;;  %v7431_v53 = vsel %vm1727_vm6, %v7066_v17, %v13694_v4  ;;  %v13702_v4 = vld [vmem:[#allocation55_spill] sm:$0xff] }
 0x1e4   : > { %13677 = vst [vmem:[#allocation93_spill] sm:$0xff] %v7383_v26 }
 0x1e5   : > { %13681 = vst [vmem:[#allocation94_spill] sm:$0xff] %v13680_v0 }
 0x1e6   : > { %13683 = vst [vmem:[#allocation100_spill] sm:$0xff] %v7395_v9 }
 0x1e7   : > { %13685 = vst [vmem:[#allocation101_spill] sm:$0xff] %v7401_v13 }
 0x1e8   : > { %13687 = vst [vmem:[#allocation72_spill] sm:$0xff] %v7407_v43 }
 0x1e9   : > { %13689 = vst [vmem:[#allocation9_spill] sm:$0xff] %v7413_v57 }
 0x1ea   : > { %13691 = vst [vmem:[#allocation73_spill] sm:$0xff] %v7419_v25 }
 0x1eb   : > { %13693 = vst [vmem:[#allocation75_spill] sm:$0xff] %v7425_v37  ;;  %v13703_v37 = vld [vmem:[#allocation56_spill] sm:$0xff] }
 0x1ec   : > { %13695 = vst [vmem:[#allocation77_spill] sm:$0xff] %v7431_v53  ;;  %v1774_v53 = vsel %vm1727_vm6, %v7084_v56, %v13702_v4  ;;  %v1775_v12 = vsel %vm1727_vm6, %v1644_v52, %v13703_v37  ;;  %v7472_v56 = vsel %vm1727_vm6, %v7099_v61, %v13707_v18  ;;  %v13709_v4 = vld [vmem:[#allocation60_spill] sm:$0xff]  ;;  %v13711_v37 = vld [vmem:[#allocation61_spill] sm:$0xff]  ;;  %v13715_v61 = vld [vmem:[#allocation63_spill] sm:$0xff] }
 0x1ed   : > { %13697 = vst [vmem:[#allocation80_spill] sm:$0xff] %v7437_v3  ;;  %v7478_v52 = vsel %vm1727_vm6, %v7104_v58, %v13709_v4  ;;  %v7484_v30 = vsel %vm1727_vm6, %v7109_v36, %v13711_v37  ;;  %v7496_v22 = vsel %vm1727_vm6, %v7119_v54, %v13715_v61  ;;  %v13717_v58 = vld [vmem:[#allocation64_spill] sm:$0xff]  ;;  %v13719_v36 = vld [vmem:[#allocation65_spill] sm:$0xff]  ;;  %v7514_v37 = vsel %vm1727_vm6, %v7134_v48, %v13721_v51  ;;  %v13728_v48 = vld [vmem:[#allocation70_spill] sm:$0xff] }
 0x1ee   : > { %13699 = vst [vmem:[#allocation81_spill] sm:$0xff] %v7443_v6  ;;  %v7502_v18 = vsel %vm1727_vm6, %v7124_v63, %v13717_v58  ;;  %v7508_v4 = vsel %vm1727_vm6, %v7129_v15, %v13719_v36  ;;  %v7520_v54 = vsel %vm1727_vm6, %v7139_v49, %v13579_v28  ;;  %v13724_v63 = vld [vmem:[#allocation68_spill] sm:$0xff]  ;;  %v13726_v15 = vld [vmem:[#allocation69_spill] sm:$0xff]  ;;  %v7538_v58 = vsel %vm1727_vm6, %v7157_v10, %v13728_v48 }
 0x1ef   : > { %13701 = vst [vmem:[#allocation82_spill] sm:$0xff] %v7449_v59  ;;  %v7526_v35 = vsel %vm1727_vm6, %v7144_v34, %v13724_v63  ;;  %v7532_v61 = vsel %vm1727_vm6, %v7149_v21, %v13726_v15  ;;  %v7544_v28 = vsel %vm1727_vm6, %v13728_v48, %v7162_v29  ;;  %v7550_v49 = vsel %vm1727_vm6, %v13591_v14, %v7167_v5  ;;  %v13732_v34 = vld [vmem:[#allocation74_spill] sm:$0xff]  ;;  %v13735_v5 = vld [vmem:[#allocation91_spill] sm:$0xff] }
 0x1f0   : > { %13706 = vst [vmem:[#allocation86_spill] sm:$0xff] %v7466_v50  ;;  %v7556_v21 = vsel %vm1727_vm6, %v13732_v34, %v7172_v62  ;;  %v7561_v10 = vsel %vm1826_vm7, %v1774_v53, %v7256_v41  ;;  %v7566_v29 = vsel %vm1826_vm7, %v1775_v12, %v7261_v39  ;;  %v7571_v14 = vsel %vm1826_vm7, %v1776_v33, %v7267_v47 }
 0x1f1   : > { %13708 = vst [vmem:[#allocation24_spill] sm:$0xff] %v7472_v56  ;;  %v7577_v62 = vsel %vm1727_vm6, %v13735_v5, %v7066_v17  ;;  %v12980_v36 = vrot.slane %v7561_v10, 7  ;;  %v12981_v51 = vrot.slane %v7566_v29, 7  ;;  %v7586_v15 = vsel %vm1826_vm7, %v7466_v50, %v7273_v16 }
 0x1f2   : > { %13710 = vst [vmem:[#allocation41_spill] sm:$0xff] %v7478_v52  ;;  %v7592_v48 = vsel %vm1826_vm7, %v7472_v56, %v7279_v40  ;;  %v7598_v42 = vsel %vm1826_vm7, %v7478_v52, %v7285_v45  ;;  %v7604_v17 = vsel %vm1826_vm7, %v7484_v30, %v7291_v31  ;;  %v7616_v5 = vsel %vm1826_vm7, %v7490_v2, %v7297_v1  ;;  %v13740_v31 = vld [vmem:[#allocation111_spill] sm:$0xff] }
 0x1f3   : > { %13712 = vst [vmem:[#allocation42_spill] sm:$0xff] %v7484_v30  ;;  %v2102_v34 = vsel %vm2021_vm8, %v12980_v36, %v12981_v51  ;;  %v7622_v63 = vsel %vm1826_vm7, %v7496_v22, %v7303_v19  ;;  %v7639_v51 = vsel %vm1826_vm7, %v7508_v4, %v7315_v44  ;;  %v7645_v19 = vsel %vm1826_vm7, %v7514_v37, %v7321_v27 }
 0x1f4   : > { %13714 = vst [vmem:[#allocation43_spill] sm:$0xff] %v7490_v2  ;;  %v7633_v36 = vsel %vm7387_vm9, %v2102_v34, %v7566_v29  ;;  %v7658_v44 = vsel %vm1826_vm7, %v7526_v35, %v7333_v32  ;;  %v7664_v27 = vsel %vm1826_vm7, %v7532_v61, %v7340_v55  ;;  %v13738_v34 = vld [vmem:[#allocation11_spill] sm:$0xff]  ;;  %v13739_v32 = vld [vmem:[#allocation85_spill] sm:$0xff]  ;;  %v13741_v55 = vld [vmem:[#allocation98_spill] sm:$0xff] }
 0x1f5   : > { %13716 = vst [vmem:[#allocation44_spill] sm:$0xff] %v7496_v22  ;;  %v7676_v1 = vsel %vm1826_vm7, %v13738_v34, %v7352_v23  ;;  %v7682_v45 = vsel %vm1826_vm7, %v13740_v31, %v13739_v32  ;;  %v7688_v40 = vsel %vm1826_vm7, %v13741_v55, %v7365_v7  ;;  %v13743_v23 = vld [vmem:[#allocation105_spill] sm:$0xff]  ;;  %v13744_v32 = vld [vmem:[#allocation106_spill] sm:$0xff]  ;;  %v13745_v7 = vld [vmem:[#allocation107_spill] sm:$0xff]  ;;  %v1945_v31 = vrot.slane %v7604_v17, 7 }
 0x1f6   : > { %13718 = vst [vmem:[#allocation45_spill] sm:$0xff] %v7502_v18  ;;  %v7700_v47 = vsel %vm1826_vm7, %v13743_v23, %v7377_v46  ;;  %v7706_v39 = vsel %vm1826_vm7, %v13744_v32, %v7383_v26  ;;  %v7712_v41 = vsel %vm1826_vm7, %v13745_v7, %v7395_v9  ;;  %v13748_v46 = vld [vmem:[#allocation109_spill] sm:$0xff]  ;;  %v13750_v26 = vld [vmem:[#allocation16_spill] sm:$0xff] }
 0x1f7   : > { %13720 = vst [vmem:[#allocation46_spill] sm:$0xff] %v7508_v4  ;;  %v7724_v23 = vsel %vm1826_vm7, %v13748_v46, %v7407_v43  ;;  %v7730_v32 = vsel %vm1826_vm7, %v13750_v26, %v7413_v57  ;;  %v13752_v9 = vld [vmem:[#allocation40_spill] sm:$0xff]  ;;  %v13757_v43 = vld [vmem:[#allocation77_spill] sm:$0xff]  ;;  %v13760_v57 = vld [vmem:[#allocation95_spill] sm:$0xff] }
 0x1f8   : > { %13722 = vst [vmem:[#allocation47_spill] sm:$0xff] %v7514_v37  ;;  %v7736_v7 = vsel %vm1826_vm7, %v13752_v9, %v7419_v25  ;;  %v13758_v46 = vld [vmem:[#allocation116_spill] sm:$0xff]  ;;  %v7754_v26 = vsel %vm1826_vm7, %v13760_v57, %v7437_v3  ;;  %v1961_v37 = vrot.slane %v7712_v41, 7  ;;  %v1964_v22 = vrot.slane %v7730_v32, 7 }
 0x1f9   : > { %13723 = vst [vmem:[#allocation48_spill] sm:$0xff] %v7520_v54  ;;  %v7748_v55 = vsel %vm1826_vm7, %v13758_v46, %v13757_v43  ;;  %v13762_v25 = vld [vmem:[#allocation96_spill] sm:$0xff]  ;;  %v13766_v43 = vld [vmem:[#allocation102_spill] sm:$0xff]  ;;  %v1965_v2 = vrot.slane %v7736_v7, 7  ;;  %v1968_v56 = vrot.slane %v7754_v26, 7  ;;  %v13826_v38 = vld [vmem:[#allocation41_spill] sm:$0xff] }
 0x1fa   : > { %13725 = vst [vmem:[#allocation49_spill] sm:$0xff] %v7526_v35  ;;  %v7760_v9 = vsel %vm1826_vm7, %v13762_v25, %v7443_v6  ;;  %v7771_v46 = vsel %vm1826_vm7, %v13766_v43, %v1774_v53  ;;  %v13770_v57 = vld [vmem:[#allocation104_spill] sm:$0xff]  ;;  %v1946_v53 = vrot.slane %v7616_v5, 7  ;;  %v1947_v43 = vrot.slane %v7622_v63, 7 }
 0x1fb   : > { %13727 = vst [vmem:[#allocation50_spill] sm:$0xff] %v7532_v61  ;;  %v7781_v6 = vsel %vm1826_vm7, %v13770_v57, %v1776_v33  ;;  %v1952_v25 = vrot.slane %v7658_v44, 7  ;;  %v1953_v57 = vrot.slane %v7664_v27, 7  ;;  %v1957_v61 = vrot.slane %v7688_v40, 7 }
 0x1fc   : > { %13729 = vst [vmem:[#allocation51_spill] sm:$0xff] %v7538_v58  ;;  %v1967_v52 = vrot.slane %v7748_v55, 7  ;;  %v1969_v11 = vrot.slane %v7760_v9, 7 }
 0x1fd   : > { %13730 = vst [vmem:[#allocation52_spill] sm:$0xff] %v7544_v28  ;;  %v1955_v28 = vrot.slane %v7676_v1, 7 }
 0x1fe   : > { %13731 = vst [vmem:[#allocation53_spill] sm:$0xff] %v7550_v49  ;;  %v1950_v49 = vrot.slane %v7645_v19, 7 }
 0x1ff   : > { %13733 = vst [vmem:[#allocation54_spill] sm:$0xff] %v7556_v21  ;;  %v13768_v21 = vld [vmem:[#allocation103_spill] sm:$0xff] }
 0x200   : > { %13734 = vst [vmem:[#allocation55_spill] sm:$0xff] %v7561_v10  ;;  %v7628_v10 = vsel %vm1826_vm7, %v7502_v18, %v7309_v60  ;;  %v7651_v60 = vsel %vm1826_vm7, %v7520_v54, %v7327_v8  ;;  %v7670_v8 = vsel %vm1826_vm7, %v7538_v58, %v7346_v20  ;;  %v13742_v20 = vld [vmem:[#allocation99_spill] sm:$0xff]  ;;  %v7776_v3 = vsel %vm1826_vm7, %v13768_v21, %v1775_v12 }
 0x201   : > { %13736 = vst [vmem:[#allocation56_spill] sm:$0xff] %v7577_v62  ;;  %v7694_v16 = vsel %vm1826_vm7, %v13742_v20, %v7371_v24  ;;  %v13746_v24 = vld [vmem:[#allocation12_spill] sm:$0xff]  ;;  %v1948_v12 = vrot.slane %v7628_v10, 7  ;;  %v1949_v21 = vrot.slane %v7639_v51, 7  ;;  %v1951_v33 = vrot.slane %v7651_v60, 7 }
 0x202   : > { %13737 = vst [vmem:[#allocation57_spill] sm:$0xff] %v7633_v36  ;;  %v7718_v62 = vsel %vm1826_vm7, %v13746_v24, %v7401_v13  ;;  %v13754_v13 = vld [vmem:[#allocation75_spill] sm:$0xff]  ;;  %v13755_v24 = vld [vmem:[#allocation110_spill] sm:$0xff]  ;;  %v1954_v34 = vrot.slane %v7670_v8, 7  ;;  %v1956_v58 = vrot.slane %v7682_v45, 7  ;;  %v1958_v35 = vrot.slane %v7694_v16, 7 }
 0x203   : > { %13747 = vst [vmem:[#allocation58_spill] sm:$0xff] %v7718_v62  ;;  %v7742_v20 = vsel %vm1826_vm7, %v13755_v24, %v13754_v13  ;;  %v13764_v13 = vld [vmem:[#allocation97_spill] sm:$0xff]  ;;  %v1960_v54 = vrot.slane %v7706_v39, 7  ;;  %v1962_v4 = vrot.slane %v7718_v62, 7  ;;  %v1963_v18 = vrot.slane %v7724_v23, 7 }
 0x204   : > { %13749 = vst [vmem:[#allocation59_spill] sm:$0xff] %v7724_v23  ;;  %v7766_v24 = vsel %vm1826_vm7, %v13764_v13, %v7449_v59  ;;  %v1943_v59 = vrot.slane %v7592_v48, 7  ;;  %v1944_v13 = vrot.slane %v7598_v42, 7  ;;  %v1966_v30 = vrot.slane %v7742_v20, 7 }
 0x205   : > { %13751 = vst [vmem:[#allocation60_spill] sm:$0xff] %v7730_v32  ;;  %v1970_v50 = vrot.slane %v7766_v24, 7  ;;  %v1971_v36 = vrot.slane %v7771_v46, 7  ;;  %v1959_v62 = vrot.slane %v7700_v47, 7  ;;  %v1972_v23 = vrot.slane %v7776_v3, 7 }
 0x206   : > { %13753 = vst [vmem:[#allocation61_spill] sm:$0xff] %v7736_v7  ;;  %v13043_v32 = vrot.slane %v7781_v6, 7  ;;  %v2075_v7 = vsel %vm2021_vm8, %v1966_v30, %v1967_v52 }
 0x207   : > { %13756 = vst [vmem:[#allocation62_spill] sm:$0xff] %v7742_v20  ;;  %v13777_v20 = vrot.slane %v7566_v29, 7 }
 0x208   : > { %13759 = vst [vmem:[#allocation63_spill] sm:$0xff] %v7748_v55  ;;  %v7819_v55 = vsel %vm2021_vm8, %v1970_v50, %v1971_v36 }
 0x209   : > { %13761 = vst [vmem:[#allocation64_spill] sm:$0xff] %v7754_v26  ;;  %v2070_v26 = vsel %vm2021_vm8, %v1971_v36, %v1972_v23  ;;  %v2095_v36 = vsel %vm2021_vm8, %v1946_v53, %v1947_v43 }
 0x20a   : > { %13763 = vst [vmem:[#allocation65_spill] sm:$0xff] %v7760_v9  ;;  %v2072_v9 = vsel %vm2021_vm8, %v1969_v11, %v1970_v50  ;;  %v2077_v50 = vsel %vm2021_vm8, %v1964_v22, %v1965_v2 }
 0x20b   : > { %13765 = vst [vmem:[#allocation66_spill] sm:$0xff] %v7766_v24  ;;  %v2073_v24 = vsel %vm2021_vm8, %v1968_v56, %v1969_v11  ;;  %v2078_v11 = vsel %vm2021_vm8, %v1963_v18, %v1964_v22  ;;  %v2087_v22 = vsel %vm2021_vm8, %v1954_v34, %v1955_v28 }
 0x20c   : > { %13767 = vst [vmem:[#allocation68_spill] sm:$0xff] %v7771_v46  ;;  %v2076_v46 = vsel %vm2021_vm8, %v1965_v2, %v1966_v30  ;;  %v2079_v30 = vsel %vm2021_vm8, %v1962_v4, %v1963_v18  ;;  %v2086_v2 = vsel %vm2021_vm8, %v1955_v28, %v1956_v58  ;;  %v2088_v18 = vsel %vm2021_vm8, %v1953_v57, %v1954_v34 }
 0x20d   : > { %13769 = vst [vmem:[#allocation69_spill] sm:$0xff] %v7776_v3  ;;  %v2069_v3 = vsel %vm2021_vm8, %v1972_v23, %v13043_v32  ;;  %v2081_v32 = vsel %vm2021_vm8, %v1960_v54, %v1961_v37  ;;  %v2082_v23 = vsel %vm2021_vm8, %v1959_v62, %v1960_v54  ;;  %v2091_v54 = vsel %vm2021_vm8, %v1950_v49, %v1951_v33 }
 0x20e   : > { %13771 = vst [vmem:[#allocation70_spill] sm:$0xff] %v7781_v6  ;;  %v2080_v6 = vsel %vm2021_vm8, %v1961_v37, %v1962_v4  ;;  %v2089_v4 = vsel %vm2021_vm8, %v1952_v25, %v1953_v57  ;;  %v2090_v37 = vsel %vm2021_vm8, %v1951_v33, %v1952_v25  ;;  %v2094_v28 = vsel %vm2021_vm8, %v1947_v43, %v1948_v12 }
 0x20f   : > { %13772 = vst [vmem:[#allocation74_spill] sm:$0xff] %v7819_v55  ;;  %v2074_v55 = vsel %vm2021_vm8, %v1967_v52, %v1968_v56  ;;  %v2083_v56 = vsel %vm2021_vm8, %v1958_v35, %v1959_v62  ;;  %v2084_v52 = vsel %vm2021_vm8, %v1957_v61, %v1958_v35  ;;  %v2092_v35 = vsel %vm2021_vm8, %v1949_v21, %v1950_v49 }
 0x210   : > { %v2093_v62 = vsel %vm2021_vm8, %v1948_v12, %v1949_v21  ;;  %v2096_v57 = vsel %vm2021_vm8, %v1945_v31, %v1946_v53  ;;  %v2097_v25 = vsel %vm2021_vm8, %v1944_v13, %v1945_v31  ;;  %v2098_v34 = vsel %vm2021_vm8, %v1943_v59, %v1944_v13 }
 0x211   : > { %v13773_v49 = vrot.slane %v7586_v15, 7  ;;  %v13775_v12 = vrot.slane %v7571_v14, 7  ;;  %v7896_v13 = vsel %vm7387_vm9, %v2098_v34, %v7598_v42  ;;  %v2085_v42 = vsel %vm2021_vm8, %v1956_v58, %v1957_v61 }
 0x212   : > { %v7943_v61 = vsel %vm7387_vm9, %v2092_v35, %v7645_v19  ;;  %v7948_v58 = vsel %vm7387_vm9, %v2091_v54, %v7651_v60  ;;  %v7963_v19 = vsel %vm7387_vm9, %v2088_v18, %v7670_v8  ;;  %v7968_v60 = vsel %vm7387_vm9, %v2087_v22, %v7676_v1  ;;  %v13790_v22 = vld [vmem:[#allocation65_spill] sm:$0xff]  ;;  %v13792_v18 = vld [vmem:[#allocation66_spill] sm:$0xff] }
 0x213   : > { %v2099_v21 = vsel %vm2021_vm8, %v13773_v49, %v1943_v59  ;;  %v13774_v33 = vmov %v13773_v49  ;;  %v13776_v53 = vmov %v13775_v12  ;;  %v7983_v8 = vsel %vm7387_vm9, %v2084_v52, %v7694_v16  ;;  %v13786_v52 = vld [vmem:[#allocation63_spill] sm:$0xff]  ;;  %v13798_v54 = vld [vmem:[#allocation68_spill] sm:$0xff] }
 0x214   : > { %v2100_v43 = vsel %vm2021_vm8, %v13775_v12, %v13774_v33  ;;  %v2101_v31 = vsel %vm2021_vm8, %v13777_v20, %v13776_v53  ;;  %v7911_v29 = vsel %vm7387_vm9, %v2099_v21, %v7592_v48  ;;  %v7916_v20 = vsel %vm7387_vm9, %v2097_v25, %v7604_v17 }
 0x215   : > { %v7901_v59 = vsel %vm7387_vm9, %v2101_v31, %v7571_v14  ;;  %v7906_v49 = vsel %vm7387_vm9, %v2100_v43, %v7586_v15  ;;  %v7923_v14 = vsel %vm7387_vm9, %v2096_v57, %v7616_v5  ;;  %v7928_v15 = vsel %vm7387_vm9, %v2095_v36, %v7622_v63  ;;  %v13778_v63 = vld [vmem:[#allocation58_spill] sm:$0xff]  ;;  %v13779_v5 = vld [vmem:[#allocation59_spill] sm:$0xff] }
 0x216   : > { %v7933_v48 = vsel %vm7387_vm9, %v2094_v28, %v7628_v10  ;;  %v7938_v17 = vsel %vm7387_vm9, %v2093_v62, %v7639_v51  ;;  %v7953_v10 = vsel %vm7387_vm9, %v2090_v37, %v7658_v44  ;;  %v7958_v51 = vsel %vm7387_vm9, %v2089_v4, %v7664_v27  ;;  %v13794_v4 = vld [vmem:[#allocation69_spill] sm:$0xff]  ;;  %v13796_v37 = vld [vmem:[#allocation70_spill] sm:$0xff] }
 0x217   : > { %v7973_v44 = vsel %vm7387_vm9, %v2086_v2, %v7682_v45  ;;  %v7978_v27 = vsel %vm7387_vm9, %v2085_v42, %v7688_v40  ;;  %v7988_v1 = vsel %vm7387_vm9, %v2083_v56, %v7700_v47  ;;  %v7993_v45 = vsel %vm7387_vm9, %v2082_v23, %v7706_v39  ;;  %v13780_v56 = vld [vmem:[#allocation60_spill] sm:$0xff]  ;;  %v13782_v23 = vld [vmem:[#allocation61_spill] sm:$0xff]  ;;  %v13799_v35 = vld [vmem:[#allocation74_spill] sm:$0xff] }
 0x218   : > { %v7998_v40 = vsel %vm7387_vm9, %v2081_v32, %v7712_v41  ;;  %v8003_v16 = vsel %vm7387_vm9, %v2080_v6, %v13778_v63  ;;  %v8008_v47 = vsel %vm7387_vm9, %v2079_v30, %v13779_v5  ;;  %v8013_v39 = vsel %vm7387_vm9, %v2078_v11, %v13780_v56  ;;  %v13784_v32 = vld [vmem:[#allocation62_spill] sm:$0xff]  ;;  %v13788_v2 = vld [vmem:[#allocation64_spill] sm:$0xff] }
 0x219   : > { %13781 = vst [vmem:[#allocation91_spill] sm:$0xff] %v8013_v39  ;;  %v8018_v41 = vsel %vm7387_vm9, %v2077_v50, %v13782_v23  ;;  %v8023_v6 = vsel %vm7387_vm9, %v2076_v46, %v13784_v32  ;;  %v8028_v30 = vsel %vm7387_vm9, %v2075_v7, %v13786_v52  ;;  %v8033_v11 = vsel %vm7387_vm9, %v2074_v55, %v13788_v2 }
 0x21a   : > { %13783 = vst [vmem:[#allocation58_spill] sm:$0xff] %v8018_v41  ;;  %v8038_v50 = vsel %vm7387_vm9, %v2073_v24, %v13790_v22  ;;  %v8043_v46 = vsel %vm7387_vm9, %v2072_v9, %v13792_v18  ;;  %v8048_v7 = vsel %vm7387_vm9, %v2070_v26, %v13794_v4  ;;  %v8053_v55 = vsel %vm7387_vm9, %v2069_v3, %v13796_v37 }
 0x21b   : > { %13785 = vst [vmem:[#allocation59_spill] sm:$0xff] %v8023_v6  ;;  %v8059_v24 = vsel %vm7387_vm9, %v13799_v35, %v13798_v54  ;;  %v2235_v26 = vrot.slane %v7896_v13, 6  ;;  %v2236_v36 = vrot.slane %v7916_v20, 6  ;;  %v2237_v57 = vrot.slane %v7923_v14, 6 }
 0x21c   : > { %13787 = vst [vmem:[#allocation60_spill] sm:$0xff] %v8028_v30  ;;  %v2238_v3 = vrot.slane %v7928_v15, 6  ;;  %v2239_v25 = vrot.slane %v7933_v48, 6  ;;  %v2240_v34 = vrot.slane %v7938_v17, 6  ;;  %v2241_v21 = vrot.slane %v7943_v61, 6 }
 0x21d   : > { %13789 = vst [vmem:[#allocation61_spill] sm:$0xff] %v8033_v11  ;;  %v2242_v33 = vrot.slane %v7948_v58, 6  ;;  %v2243_v12 = vrot.slane %v7953_v10, 6  ;;  %v2244_v43 = vrot.slane %v7958_v51, 6  ;;  %v2245_v53 = vrot.slane %v7963_v19, 6 }
 0x21e   : > { %13791 = vst [vmem:[#allocation62_spill] sm:$0xff] %v8038_v50  ;;  %v2246_v31 = vrot.slane %v7968_v60, 6  ;;  %v2247_v42 = vrot.slane %v7973_v44, 6  ;;  %v2248_v63 = vrot.slane %v7978_v27, 6  ;;  %v2249_v5 = vrot.slane %v7983_v8, 6 }
 0x21f   : > { %13793 = vst [vmem:[#allocation63_spill] sm:$0xff] %v8043_v46  ;;  %v2250_v56 = vrot.slane %v7988_v1, 6  ;;  %v2252_v23 = vrot.slane %v7998_v40, 6  ;;  %v2253_v32 = vrot.slane %v8003_v16, 6  ;;  %v2254_v52 = vrot.slane %v8008_v47, 6 }
 0x220   : > { %13795 = vst [vmem:[#allocation64_spill] sm:$0xff] %v8048_v7  ;;  %v2255_v2 = vrot.slane %v8013_v39, 6  ;;  %v2256_v22 = vrot.slane %v8018_v41, 6  ;;  %v2257_v18 = vrot.slane %v8023_v6, 6  ;;  %v2258_v4 = vrot.slane %v8028_v30, 6  ;;  %v13801_v41 = vld [vmem:[#allocation120_spill] sm:$0xff] }
 0x221   : > { %13797 = vst [vmem:[#allocation65_spill] sm:$0xff] %v8053_v55  ;;  %v2259_v54 = vrot.slane %v8033_v11, 6  ;;  %v2260_v35 = vrot.slane %v8038_v50, 6  ;;  %v2261_v62 = vrot.slane %v8043_v46, 6  ;;  %v2262_v9 = vrot.slane %v8059_v24, 6  ;;  %v13820_v11 = vld [vmem:[#allocation76_spill] sm:$0xff] }
 0x222   : > { %13800 = vst [vmem:[#allocation66_spill] sm:$0xff] %v8059_v24  ;;  %v2263_v28 = vrot.slane %v8048_v7, 6  ;;  %v2251_v0 = vrot.slane %v7993_v45, 6  ;;  %v13056_v37 = vrot.slane %v8053_v55, 6  ;;  %v2409_v6 = vshra.s32 %v13801_v41, 1 }
 0x223   : > { %v8102_v50 = vsel %vm2312_vm10, %v2261_v62, %v2262_v9  ;;  %v8106_v24 = vsel %vm2312_vm10, %v2260_v35, %v2261_v62  ;;  %v8110_v7 = vsel %vm2312_vm10, %v2259_v54, %v2260_v35  ;;  %v8128_v62 = vsel %vm2312_vm10, %v2256_v22, %v2257_v18 }
 0x224   : > { %v8098_v30 = vsel %vm2312_vm10, %v2262_v9, %v2263_v28  ;;  %13803 = vst [vmem:[#allocation68_spill] sm:$0xff] %v8102_v50  ;;  %v8116_v46 = vsel %vm2312_vm10, %v2263_v28, %v13056_v37  ;;  %v8124_v9 = vsel %vm2312_vm10, %v2257_v18, %v2258_v4  ;;  %v2368_v35 = vsel %vm2312_vm10, %v2255_v2, %v2256_v22 }
 0x225   : > { %13802 = vst [vmem:[#allocation69_spill] sm:$0xff] %v8098_v30  ;;  %v8120_v30 = vsel %vm2312_vm10, %v2258_v4, %v2259_v54  ;;  %v2369_v55 = vsel %vm2312_vm10, %v2254_v52, %v2255_v2  ;;  %v2370_v28 = vsel %vm2312_vm10, %v2253_v32, %v2254_v52  ;;  %v2371_v54 = vsel %vm2312_vm10, %v2252_v23, %v2253_v32 }
 0x226   : > { %13804 = vst [vmem:[#allocation74_spill] sm:$0xff] %v8106_v24  ;;  %v2372_v4 = vsel %vm2312_vm10, %v2251_v0, %v2252_v23  ;;  %v2373_v37 = vsel %vm2312_vm10, %v2250_v56, %v2251_v0  ;;  %v2374_v18 = vsel %vm2312_vm10, %v2249_v5, %v2250_v56  ;;  %v2375_v22 = vsel %vm2312_vm10, %v2248_v63, %v2249_v5  ;;  %v13816_v24 = vld [vmem:[#allocation57_spill] sm:$0xff] }
 0x227   : > { %13805 = vst [vmem:[#allocation121_spill] sm:$0xff] %v8110_v7  ;;  %v2376_v2 = vsel %vm2312_vm10, %v2247_v42, %v2248_v63  ;;  %v2377_v52 = vsel %vm2312_vm10, %v2246_v31, %v2247_v42  ;;  %v2378_v32 = vsel %vm2312_vm10, %v2245_v53, %v2246_v31  ;;  %v2379_v23 = vsel %vm2312_vm10, %v2244_v43, %v2245_v53 }
 0x228   : > { %13806 = vst [vmem:[#allocation122_spill] sm:$0xff] %v8116_v46  ;;  %v2380_v0 = vsel %vm2312_vm10, %v2243_v12, %v2244_v43  ;;  %v2381_v56 = vsel %vm2312_vm10, %v2242_v33, %v2243_v12  ;;  %v2382_v5 = vsel %vm2312_vm10, %v2241_v21, %v2242_v33  ;;  %v2383_v63 = vsel %vm2312_vm10, %v2240_v34, %v2241_v21 }
 0x229   : > { %13807 = vst [vmem:[#allocation123_spill] sm:$0xff] %v8120_v30  ;;  %v2384_v42 = vsel %vm2312_vm10, %v2239_v25, %v2240_v34  ;;  %v2385_v31 = vsel %vm2312_vm10, %v2238_v3, %v2239_v25  ;;  %v2386_v53 = vsel %vm2312_vm10, %v2237_v57, %v2238_v3  ;;  %v2387_v43 = vsel %vm2312_vm10, %v2236_v36, %v2237_v57 }
 0x22a   : > { %13808 = vst [vmem:[#allocation124_spill] sm:$0xff] %v8124_v9  ;;  %v2388_v12 = vsel %vm2312_vm10, %v2235_v26, %v2236_v36  ;;  %v13810_v33 = vrot.slane %v7911_v29, 6  ;;  %v13812_v34 = vrot.slane %v7906_v49, 6  ;;  %v13814_v50 = vrot.slane %v7901_v59, 6 }
 0x22b   : > { %13809 = vst [vmem:[#allocation125_spill] sm:$0xff] %v8128_v62  ;;  %v13817_v7 = vrot.slane %v13816_v24, 6  ;;  %v2701_v30 = vshra.s32 %v13801_v41, 2 }
 0x22c   : > { %v2389_v21 = vsel %vm2312_vm10, %v13810_v33, %v2235_v26  ;;  %v13811_v46 = vmov %v13810_v33  ;;  %v13813_v3 = vmov %v13812_v34  ;;  %v13815_v36 = vmov %v13814_v50 }
 0x22d   : > { %v2390_v25 = vsel %vm2312_vm10, %v13812_v34, %v13811_v46  ;;  %v2391_v57 = vsel %vm2312_vm10, %v13814_v50, %v13813_v3  ;;  %v2392_v26 = vsel %vm2312_vm10, %v13817_v7, %v13815_v36  ;;  %v8194_v33 = vand.u32 1, %v2409_v6  ;;  %v13819_v34 = vld [vmem:[#allocation86_spill] sm:$0xff]  ;;  %v13823_v50 = vld [vmem:[#allocation24_spill] sm:$0xff] }
 0x22e   : > { %v2800_v46 = vshra.s32 %v13801_v41, 3  ;;  %v8202_v62 = vsel %vm1826_vm7, %v13820_v11, %v13819_v34  ;;  %v13824_v3 = vld [vmem:[#allocation10_spill] sm:$0xff]  ;;  %v13827_v7 = vld [vmem:[#allocation108_spill] sm:$0xff]  ;;  %v8223_v34 = vand.u32 1, %v2701_v30 }
 0x22f   : > { %13818 = vst [vmem:[#allocation126_spill] sm:$0xff] %v8194_v33  ;;  %v8208_v24 = vsel %vm1826_vm7, %v13824_v3, %v13823_v50  ;;  %v8214_v6 = vsel %vm1826_vm7, %v13827_v7, %v13826_v38  ;;  %v13829_v36 = vld [vmem:[#allocation42_spill] sm:$0xff]  ;;  %v13830_v41 = vld [vmem:[#allocation112_spill] sm:$0xff]  ;;  %vm2411_vm11 = vcmp.eq.s32.totalorder %v8194_v33, 1  ;;  %v13834_v50 = vld [vmem:[#allocation43_spill] sm:$0xff] }
 0x230   : > { %13822 = vst [vmem:[#allocation86_spill] sm:$0xff] %v8202_v62  ;;  %v8220_v39 = vsel %vm1826_vm7, %v13830_v41, %v13829_v36  ;;  %v8225_v11 = vand.u32 1, %v2800_v46  ;;  %v13835_v3 = vld [vmem:[#allocation113_spill] sm:$0xff]  ;;  %v8236_v38 = vsel %vm2411_vm11, %v2392_v26, %v7901_v59  ;;  %v8241_v36 = vsel %vm2411_vm11, %v2391_v57, %v7906_v49  ;;  %v13867_v57 = vld [vmem:[#allocation122_spill] sm:$0xff] }
 0x231   : > { %13825 = vst [vmem:[#allocation24_spill] sm:$0xff] %v8208_v24  ;;  %v8231_v24 = vsel %vm1826_vm7, %v13835_v3, %v13834_v50  ;;  %v8246_v30 = vsel %vm2411_vm11, %v2390_v25, %v7911_v29  ;;  %v8251_v46 = vsel %vm2411_vm11, %v2389_v21, %v7896_v13  ;;  %v8256_v59 = vsel %vm2411_vm11, %v2388_v12, %v7916_v20  ;;  %v13864_v12 = vld [vmem:[#allocation69_spill] sm:$0xff] }
 0x232   : > { %13828 = vst [vmem:[#allocation41_spill] sm:$0xff] %v8214_v6  ;;  %v8261_v49 = vsel %vm2411_vm11, %v2387_v43, %v7923_v14  ;;  %v8266_v29 = vsel %vm2411_vm11, %v2386_v53, %v7928_v15  ;;  %v8271_v13 = vsel %vm2411_vm11, %v2385_v31, %v7933_v48  ;;  %v8276_v20 = vsel %vm2411_vm11, %v2384_v42, %v7938_v17  ;;  %v13860_v42 = vld [vmem:[#allocation66_spill] sm:$0xff]  ;;  %v13861_v31 = vld [vmem:[#allocation68_spill] sm:$0xff]  ;;  %v13866_v25 = vld [vmem:[#allocation65_spill] sm:$0xff] }
 0x233   : > { %13831 = vst [vmem:[#allocation42_spill] sm:$0xff] %v8220_v39  ;;  %v8281_v14 = vsel %vm2411_vm11, %v2383_v63, %v7943_v61  ;;  %v8286_v15 = vsel %vm2411_vm11, %v2382_v5, %v7948_v58  ;;  %v8291_v48 = vsel %vm2411_vm11, %v2381_v56, %v7953_v10  ;;  %v8296_v17 = vsel %vm2411_vm11, %v2380_v0, %v7958_v51  ;;  %v13857_v56 = vld [vmem:[#allocation63_spill] sm:$0xff]  ;;  %v13858_v5 = vld [vmem:[#allocation74_spill] sm:$0xff]  ;;  %v13863_v43 = vld [vmem:[#allocation64_spill] sm:$0xff] }
 0x234   : > { %13832 = vst [vmem:[#allocation127_spill] sm:$0xff] %v8223_v34  ;;  %v8301_v61 = vsel %vm2411_vm11, %v2379_v23, %v7963_v19  ;;  %v8306_v58 = vsel %vm2411_vm11, %v2378_v32, %v7968_v60  ;;  %v8311_v10 = vsel %vm2411_vm11, %v2377_v52, %v7973_v44  ;;  %v8316_v51 = vsel %vm2411_vm11, %v2376_v2, %v7978_v27  ;;  %v13852_v52 = vld [vmem:[#allocation123_spill] sm:$0xff]  ;;  %v13855_v23 = vld [vmem:[#allocation121_spill] sm:$0xff] }
 0x235   : > { %13833 = vst [vmem:[#allocation128_spill] sm:$0xff] %v8225_v11  ;;  %v8321_v19 = vsel %vm2411_vm11, %v2375_v22, %v7983_v8  ;;  %v8326_v60 = vsel %vm2411_vm11, %v2374_v18, %v7988_v1  ;;  %v8331_v44 = vsel %vm2411_vm11, %v2373_v37, %v7993_v45  ;;  %v8336_v27 = vsel %vm2411_vm11, %v2372_v4, %v7998_v40  ;;  %v13841_v18 = vld [vmem:[#allocation91_spill] sm:$0xff]  ;;  %v13843_v37 = vld [vmem:[#allocation8_spill] sm:$0xff]  ;;  %v13844_v22 = vld [vmem:[#allocation58_spill] sm:$0xff] }
 0x236   : > { %13836 = vst [vmem:[#allocation43_spill] sm:$0xff] %v8231_v24  ;;  %v8341_v8 = vsel %vm2411_vm11, %v2371_v54, %v8003_v16  ;;  %v8346_v1 = vsel %vm2411_vm11, %v2370_v28, %v8008_v47  ;;  %v8351_v45 = vsel %vm2411_vm11, %v2369_v55, %v13841_v18  ;;  %vm2604_vm12 = vcmp.lt.s32.totalorder %v13843_v37, 4  ;;  %v13845_v4 = vld [vmem:[#allocation59_spill] sm:$0xff]  ;;  %v13846_v16 = vld [vmem:[#allocation125_spill] sm:$0xff]  ;;  %v13848_v47 = vld [vmem:[#allocation60_spill] sm:$0xff] }
 0x237   : > { %13837 = vst [vmem:[#allocation129_spill] sm:$0xff] %v8236_v38  ;;  %v8357_v40 = vsel %vm2411_vm11, %v2368_v35, %v13844_v22  ;;  %v8363_v54 = vsel %vm2411_vm11, %v13846_v16, %v13845_v4  ;;  %v13849_v28 = vld [vmem:[#allocation124_spill] sm:$0xff]  ;;  %v13851_v55 = vld [vmem:[#allocation61_spill] sm:$0xff]  ;;  %v13854_v35 = vld [vmem:[#allocation62_spill] sm:$0xff]  ;;  %v8387_v63 = vsel %vm2411_vm11, %v13858_v5, %v13857_v56  ;;  %v8393_v53 = vsel %vm2411_vm11, %v13861_v31, %v13860_v42 }
 0x238   : > { %13838 = vst [vmem:[#allocation130_spill] sm:$0xff] %v8336_v27  ;;  %v8369_v2 = vsel %vm2411_vm11, %v13849_v28, %v13848_v47  ;;  %v8375_v32 = vsel %vm2411_vm11, %v13852_v52, %v13851_v55  ;;  %v8381_v0 = vsel %vm2411_vm11, %v13855_v23, %v13854_v35  ;;  %v8399_v21 = vsel %vm2411_vm11, %v13864_v12, %v13863_v43 }
 0x239   : > { %13839 = vst [vmem:[#allocation131_spill] sm:$0xff] %v8341_v8  ;;  %v8405_v26 = vsel %vm2411_vm11, %v13867_v57, %v13866_v25  ;;  %v2526_v22 = vrot.slane %v8246_v30, 4  ;;  %v2527_v4 = vrot.slane %v8251_v46, 4  ;;  %v2528_v16 = vrot.slane %v8256_v59, 4 }
 0x23a   : > { %13840 = vst [vmem:[#allocation132_spill] sm:$0xff] %v8346_v1  ;;  %v2529_v47 = vrot.slane %v8261_v49, 4  ;;  %v2530_v28 = vrot.slane %v8266_v29, 4  ;;  %v2531_v55 = vrot.slane %v8271_v13, 4  ;;  %v2532_v52 = vrot.slane %v8276_v20, 4 }
 0x23b   : > { %13842 = vst [vmem:[#allocation91_spill] sm:$0xff] %v8351_v45  ;;  %v2533_v35 = vrot.slane %v8281_v14, 4  ;;  %v2534_v23 = vrot.slane %v8286_v15, 4  ;;  %v2535_v56 = vrot.slane %v8291_v48, 4  ;;  %v2536_v5 = vrot.slane %v8296_v17, 4 }
 0x23c   : > { %13847 = vst [vmem:[#allocation8_spill] sm:$0xff] %v8363_v54  ;;  %v2537_v42 = vrot.slane %v8301_v61, 4  ;;  %v2538_v31 = vrot.slane %v8306_v58, 4  ;;  %v2539_v43 = vrot.slane %v8311_v10, 4  ;;  %v2540_v12 = vrot.slane %v8316_v51, 4 }
 0x23d   : > { %13850 = vst [vmem:[#allocation58_spill] sm:$0xff] %v8369_v2  ;;  %v2541_v57 = vrot.slane %v8321_v19, 4  ;;  %v2542_v50 = vrot.slane %v8326_v60, 4  ;;  %v2543_v18 = vrot.slane %v8331_v44, 4  ;;  %v2544_v3 = vrot.slane %v8336_v27, 4 }
 0x23e   : > { %13853 = vst [vmem:[#allocation59_spill] sm:$0xff] %v8375_v32  ;;  %v2545_v41 = vrot.slane %v8341_v8, 4  ;;  %v2546_v7 = vrot.slane %v8346_v1, 4  ;;  %v2547_v33 = vrot.slane %v8351_v45, 4  ;;  %v2548_v25 = vrot.slane %v8357_v40, 4 }
 0x23f   : > { %13856 = vst [vmem:[#allocation125_spill] sm:$0xff] %v8381_v0  ;;  %v2549_v24 = vrot.slane %v8363_v54, 4  ;;  %v2550_v39 = vrot.slane %v8369_v2, 4  ;;  %v2551_v6 = vrot.slane %v8375_v32, 4  ;;  %v2552_v62 = vrot.slane %v8381_v0, 4 }
 0x240   : > { %13859 = vst [vmem:[#allocation60_spill] sm:$0xff] %v8387_v63  ;;  %v2553_v9 = vrot.slane %v8387_v63, 4  ;;  %v2554_v27 = vrot.slane %v8393_v53, 4  ;;  %v2555_v8 = vrot.slane %v8399_v21, 4  ;;  %v13080_v1 = vrot.slane %v8405_v26, 4 }
 0x241   : > { %13862 = vst [vmem:[#allocation124_spill] sm:$0xff] %v8393_v53  ;;  %v2658_v45 = vsel %vm2604_vm12, %v2549_v24, %v2550_v39  ;;  %v2659_v54 = vsel %vm2604_vm12, %v2548_v25, %v2549_v24  ;;  %v2656_v63 = vsel %vm2604_vm12, %v2551_v6, %v2552_v62  ;;  %v2660_v32 = vsel %vm2604_vm12, %v2547_v33, %v2548_v25 }
 0x242   : > { %13865 = vst [vmem:[#allocation61_spill] sm:$0xff] %v8399_v21  ;;  %v2654_v2 = vsel %vm2604_vm12, %v2553_v9, %v2554_v27  ;;  %v2655_v0 = vsel %vm2604_vm12, %v2552_v62, %v2553_v9  ;;  %v2657_v21 = vsel %vm2604_vm12, %v2550_v39, %v2551_v6  ;;  %v2652_v53 = vsel %vm2604_vm12, %v2555_v8, %v13080_v1 }
 0x243   : > { %13868 = vst [vmem:[#allocation123_spill] sm:$0xff] %v8405_v26  ;;  %v2653_v24 = vsel %vm2604_vm12, %v2554_v27, %v2555_v8  ;;  %v2661_v9 = vsel %vm2604_vm12, %v2546_v7, %v2547_v33  ;;  %v2662_v62 = vsel %vm2604_vm12, %v2545_v41, %v2546_v7  ;;  %v2663_v39 = vsel %vm2604_vm12, %v2544_v3, %v2545_v41 }
 0x244   : > { %v2664_v6 = vsel %vm2604_vm12, %v2543_v18, %v2544_v3  ;;  %v2665_v1 = vsel %vm2604_vm12, %v2542_v50, %v2543_v18  ;;  %v2666_v27 = vsel %vm2604_vm12, %v2541_v57, %v2542_v50  ;;  %v2667_v8 = vsel %vm2604_vm12, %v2540_v12, %v2541_v57 }
 0x245   : > { %v2668_v33 = vsel %vm2604_vm12, %v2539_v43, %v2540_v12  ;;  %v2669_v7 = vsel %vm2604_vm12, %v2538_v31, %v2539_v43  ;;  %v2670_v41 = vsel %vm2604_vm12, %v2537_v42, %v2538_v31  ;;  %v2671_v3 = vsel %vm2604_vm12, %v2536_v5, %v2537_v42 }
 0x246   : > { %v2672_v25 = vsel %vm2604_vm12, %v2535_v56, %v2536_v5  ;;  %v2673_v50 = vsel %vm2604_vm12, %v2534_v23, %v2535_v56  ;;  %v2674_v18 = vsel %vm2604_vm12, %v2533_v35, %v2534_v23  ;;  %v2675_v12 = vsel %vm2604_vm12, %v2532_v52, %v2533_v35 }
 0x247   : > { %v2676_v43 = vsel %vm2604_vm12, %v2531_v55, %v2532_v52  ;;  %v2677_v31 = vsel %vm2604_vm12, %v2530_v28, %v2531_v55  ;;  %v2678_v42 = vsel %vm2604_vm12, %v2529_v47, %v2530_v28  ;;  %v2679_v5 = vsel %vm2604_vm12, %v2528_v16, %v2529_v47 }
 0x248   : > { %v2680_v56 = vsel %vm2604_vm12, %v2527_v4, %v2528_v16  ;;  %v2681_v23 = vsel %vm2604_vm12, %v2526_v22, %v2527_v4  ;;  %v13869_v35 = vrot.slane %v8241_v36, 4  ;;  %v13871_v55 = vrot.slane %v8236_v38, 4 }
 0x249   : > { %vm2703_vm13 = vcmp.eq.s32.totalorder %v8223_v34, 1  ;;  %vm2802_vm14 = vcmp.eq.s32.totalorder %v8225_v11, 1 }
 0x24a   : > { %v2682_v52 = vsel %vm2604_vm12, %v13869_v35, %v2526_v22  ;;  %v13870_v57 = vmov %v13869_v35  ;;  %v8527_v16 = vsel %vm2703_vm13, %v2681_v23, %v8251_v46  ;;  %v8532_v47 = vsel %vm2703_vm13, %v2680_v56, %v8256_v59 }
 0x24b   : > { %v2683_v28 = vsel %vm2604_vm12, %v13871_v55, %v13870_v57  ;;  %v8522_v22 = vsel %vm2703_vm13, %v2682_v52, %v8246_v30  ;;  %13874 = vst [vmem:[#allocation63_spill] sm:$0xff] %v8527_v16  ;;  %v8542_v30 = vsel %vm2703_vm13, %v2678_v42, %v8266_v29  ;;  %v8547_v46 = vsel %vm2703_vm13, %v2677_v31, %v8271_v13 }
 0x24c   : > { %v8517_v4 = vsel %vm2703_vm13, %v2683_v28, %v8241_v36  ;;  %13873 = vst [vmem:[#allocation121_spill] sm:$0xff] %v8522_v22  ;;  %v8537_v36 = vsel %vm2703_vm13, %v2679_v5, %v8261_v49  ;;  %v8552_v59 = vsel %vm2703_vm13, %v2676_v43, %v8276_v20  ;;  %v8557_v49 = vsel %vm2703_vm13, %v2675_v12, %v8281_v14 }
 0x24d   : > { %13872 = vst [vmem:[#allocation62_spill] sm:$0xff] %v8517_v4  ;;  %v8562_v29 = vsel %vm2703_vm13, %v2674_v18, %v8286_v15  ;;  %v8567_v13 = vsel %vm2703_vm13, %v2673_v50, %v8291_v48  ;;  %v8572_v20 = vsel %vm2703_vm13, %v2672_v25, %v8296_v17  ;;  %v8577_v14 = vsel %vm2703_vm13, %v2671_v3, %v8301_v61  ;;  %v13904_v3 = vld [vmem:[#allocation59_spill] sm:$0xff]  ;;  %v13906_v25 = vld [vmem:[#allocation125_spill] sm:$0xff]  ;;  %v13910_v50 = vld [vmem:[#allocation124_spill] sm:$0xff] }
 0x24e   : > { %13875 = vst [vmem:[#allocation74_spill] sm:$0xff] %v8532_v47  ;;  %v8582_v15 = vsel %vm2703_vm13, %v2670_v41, %v8306_v58  ;;  %v8587_v48 = vsel %vm2703_vm13, %v2669_v7, %v8311_v10  ;;  %v8592_v17 = vsel %vm2703_vm13, %v2668_v33, %v8316_v51  ;;  %v8597_v61 = vsel %vm2703_vm13, %v2667_v8, %v8321_v19  ;;  %v13891_v7 = vld [vmem:[#allocation130_spill] sm:$0xff]  ;;  %v13893_v33 = vld [vmem:[#allocation131_spill] sm:$0xff]  ;;  %v13895_v8 = vld [vmem:[#allocation132_spill] sm:$0xff] }
 0x24f   : > { %13876 = vst [vmem:[#allocation66_spill] sm:$0xff] %v8537_v36  ;;  %v8602_v58 = vsel %vm2703_vm13, %v2666_v27, %v8326_v60  ;;  %v8607_v10 = vsel %vm2703_vm13, %v2665_v1, %v8331_v44  ;;  %v8612_v51 = vsel %vm2703_vm13, %v2664_v6, %v13891_v7  ;;  %v8617_v19 = vsel %vm2703_vm13, %v2663_v39, %v13893_v33  ;;  %v13897_v27 = vld [vmem:[#allocation91_spill] sm:$0xff]  ;;  %v13900_v6 = vld [vmem:[#allocation8_spill] sm:$0xff]  ;;  %v13902_v41 = vld [vmem:[#allocation58_spill] sm:$0xff] }
 0x250   : > { %13877 = vst [vmem:[#allocation68_spill] sm:$0xff] %v8542_v30  ;;  %v8622_v60 = vsel %vm2703_vm13, %v2662_v62, %v13895_v8  ;;  %v8627_v44 = vsel %vm2703_vm13, %v2661_v9, %v13897_v27  ;;  %v8632_v1 = vsel %vm2703_vm13, %v2660_v32, %v8357_v40  ;;  %v8637_v39 = vsel %vm2703_vm13, %v2659_v54, %v13900_v6  ;;  %v13908_v32 = vld [vmem:[#allocation60_spill] sm:$0xff]  ;;  %v13912_v18 = vld [vmem:[#allocation61_spill] sm:$0xff] }
 0x251   : > { %13878 = vst [vmem:[#allocation64_spill] sm:$0xff] %v8547_v46  ;;  %v8642_v62 = vsel %vm2703_vm13, %v2658_v45, %v13902_v41  ;;  %v8647_v9 = vsel %vm2703_vm13, %v2657_v21, %v13904_v3  ;;  %v8652_v40 = vsel %vm2703_vm13, %v2656_v63, %v13906_v25  ;;  %v8657_v54 = vsel %vm2703_vm13, %v2655_v0, %v13908_v32  ;;  %v13931_v7 = vld [vmem:[#allocation120_spill] sm:$0xff]  ;;  %v13933_v41 = vld [vmem:[#allocation114_spill] sm:$0xff]  ;;  %v13935_v32 = vld [vmem:[#allocation45_spill] sm:$0xff] }
 0x252   : > { %13879 = vst [vmem:[#allocation69_spill] sm:$0xff] %v8552_v59  ;;  %v8662_v45 = vsel %vm2703_vm13, %v2654_v2, %v13910_v50  ;;  %v8667_v21 = vsel %vm2703_vm13, %v2653_v24, %v13912_v18  ;;  %v8672_v63 = vsel %vm2703_vm13, %v2652_v53, %v8405_v26  ;;  %v8678_v0 = vsel %vm2802_vm14, %v8517_v4, %v8522_v22  ;;  %v13932_v6 = vld [vmem:[#allocation44_spill] sm:$0xff]  ;;  %v13936_v50 = vld [vmem:[#allocation87_spill] sm:$0xff]  ;;  %v13937_v4 = vld [vmem:[#allocation46_spill] sm:$0xff] }
 0x253   : > { %13880 = vst [vmem:[#allocation122_spill] sm:$0xff] %v8557_v49  ;;  %v8684_v2 = vsel %vm2802_vm14, %v8527_v16, %v8532_v47  ;;  %v8690_v24 = vsel %vm2802_vm14, %v8537_v36, %v8542_v30  ;;  %v8696_v53 = vsel %vm2802_vm14, %v8547_v46, %v8552_v59  ;;  %v8702_v12 = vsel %vm2802_vm14, %v8557_v49, %v8562_v29  ;;  %v13995_v59 = vld [vmem:[#allocation21_spill] sm:$0xff]  ;;  %v13998_v30 = vld [vmem:[#allocation22_spill] sm:$0xff]  ;;  %v14007_v16 = vld [vmem:[#allocation27_spill] sm:$0xff] }
 0x254   : > { %13881 = vst [vmem:[#allocation133_spill] sm:$0xff] %v8562_v29  ;;  %v8708_v43 = vsel %vm2802_vm14, %v8567_v13, %v8572_v20  ;;  %v8714_v31 = vsel %vm2802_vm14, %v8577_v14, %v8582_v15  ;;  %v8720_v42 = vsel %vm2802_vm14, %v8587_v48, %v8592_v17  ;;  %v8726_v5 = vsel %vm2802_vm14, %v8597_v61, %v8602_v58  ;;  %v13992_v29 = vld [vmem:[#allocation56_spill] sm:$0xff]  ;;  %v14004_v36 = vld [vmem:[#allocation26_spill] sm:$0xff] }
 0x255   : > { %13882 = vst [vmem:[#allocation134_spill] sm:$0xff] %v8567_v13  ;;  %v8732_v56 = vsel %vm2802_vm14, %v8607_v10, %v8612_v51  ;;  %v8738_v23 = vsel %vm2802_vm14, %v8617_v19, %v8622_v60  ;;  %v8744_v35 = vsel %vm2802_vm14, %v8627_v44, %v8632_v1  ;;  %v8750_v52 = vsel %vm2802_vm14, %v8637_v39, %v8642_v62 }
 0x256   : > { %13883 = vst [vmem:[#allocation135_spill] sm:$0xff] %v8572_v20  ;;  %v8756_v57 = vsel %vm2802_vm14, %v8647_v9, %v8652_v40  ;;  %v8762_v55 = vsel %vm2802_vm14, %v8657_v54, %v8662_v45  ;;  %v8768_v28 = vsel %vm2802_vm14, %v8667_v21, %v8672_v63  ;;  %v2899_v33 = vshra.s32 %v13931_v7, 4  ;;  %v13989_v20 = vld [vmem:[#allocation20_spill] sm:$0xff] }
 0x257   : > { %13884 = vst [vmem:[#allocation136_spill] sm:$0xff] %v8577_v14  ;;  %v2998_v8 = vshra.s32 %v13931_v7, 5  ;;  %v3097_v27 = vshra.s32 %v13931_v7, 6  ;;  %v8777_v25 = vsel %vm1826_vm7, %v13933_v41, %v13932_v6  ;;  %v8783_v18 = vsel %vm1826_vm7, %v13936_v50, %v13935_v32  ;;  %v13940_v7 = vld [vmem:[#allocation117_spill] sm:$0xff]  ;;  %v13941_v6 = vld [vmem:[#allocation48_spill] sm:$0xff] }
 0x258   : > { %13885 = vst [vmem:[#allocation137_spill] sm:$0xff] %v8582_v15  ;;  %v8803_v32 = vand.u32 1, %v2899_v33  ;;  %v1979_v41 = vrot.slane %v8777_v25, 7 }
 0x259   : > { %13886 = vst [vmem:[#allocation138_spill] sm:$0xff] %v8587_v48 }
 0x25a   : > { %13887 = vst [vmem:[#allocation139_spill] sm:$0xff] %v8592_v17  ;;  %vm2901_vm15 = vcmp.eq.s32.totalorder %v8803_v32, 1 }
 0x25b   : > { %13888 = vst [vmem:[#allocation140_spill] sm:$0xff] %v8597_v61  ;;  %v8864_v15 = vsel %vm2901_vm15, %v8702_v12, %v8708_v43 }
 0x25c   : > { %13889 = vst [vmem:[#allocation141_spill] sm:$0xff] %v8602_v58 }
 0x25d   : > { %13890 = vst [vmem:[#allocation142_spill] sm:$0xff] %v8607_v10  ;;  %v13955_v10 = vld [vmem:[#allocation54_spill] sm:$0xff] }
 0x25e   : > { %13892 = vst [vmem:[#allocation130_spill] sm:$0xff] %v8612_v51 }
 0x25f   : > { %13894 = vst [vmem:[#allocation131_spill] sm:$0xff] %v8617_v19  ;;  %v13951_v19 = vld [vmem:[#allocation52_spill] sm:$0xff] }
 0x260   : > { %13896 = vst [vmem:[#allocation132_spill] sm:$0xff] %v8622_v60 }
 0x261   : > { %13898 = vst [vmem:[#allocation91_spill] sm:$0xff] %v8627_v44  ;;  %v13949_v44 = vld [vmem:[#allocation119_spill] sm:$0xff] }
 0x262   : > { %13899 = vst [vmem:[#allocation143_spill] sm:$0xff] %v8632_v1  ;;  %v8807_v1 = vand.u32 1, %v3097_v27  ;;  %v13953_v27 = vld [vmem:[#allocation53_spill] sm:$0xff] }
 0x263   : > { %13901 = vst [vmem:[#allocation8_spill] sm:$0xff] %v8637_v39  ;;  %v13947_v39 = vld [vmem:[#allocation67_spill] sm:$0xff] }
 0x264   : > { %13903 = vst [vmem:[#allocation58_spill] sm:$0xff] %v8642_v62  ;;  %vm3099_vm1 = vcmp.eq.s32.totalorder %v8807_v1, 1 }
 0x265   : > { %13905 = vst [vmem:[#allocation59_spill] sm:$0xff] %v8647_v9  ;;  %v8805_v9 = vand.u32 1, %v2998_v8  ;;  %v13952_v8 = vld [vmem:[#allocation11_spill] sm:$0xff] }
 0x266   : > { %13907 = vst [vmem:[#allocation125_spill] sm:$0xff] %v8652_v40  ;;  %v8831_v58 = vsel %vm1826_vm7, %v13953_v27, %v13952_v8  ;;  %v8852_v8 = vsel %vm2901_vm15, %v8678_v0, %v8684_v2 }
 0x267   : > { %13909 = vst [vmem:[#allocation60_spill] sm:$0xff] %v8657_v54  ;;  %v13942_v54 = vld [vmem:[#allocation88_spill] sm:$0xff]  ;;  %vm3000_vm0 = vcmp.eq.s32.totalorder %v8805_v9, 1 }
 0x268   : > { %13911 = vst [vmem:[#allocation124_spill] sm:$0xff] %v8662_v45  ;;  %v8801_v62 = vsel %vm1826_vm7, %v13942_v54, %v13941_v6  ;;  %v13950_v6 = vld [vmem:[#allocation51_spill] sm:$0xff]  ;;  %v14014_v54 = vld [vmem:[#allocation41_spill] sm:$0xff] }
 0x269   : > { %13913 = vst [vmem:[#allocation61_spill] sm:$0xff] %v8667_v21  ;;  %v13939_v21 = vld [vmem:[#allocation47_spill] sm:$0xff]  ;;  %v8825_v33 = vsel %vm1826_vm7, %v13951_v19, %v13950_v6 }
 0x26a   : > { %13914 = vst [vmem:[#allocation144_spill] sm:$0xff] %v8672_v63  ;;  %v13938_v63 = vld [vmem:[#allocation115_spill] sm:$0xff]  ;;  %v8795_v40 = vsel %vm1826_vm7, %v13940_v7, %v13939_v21  ;;  %v13948_v21 = vld [vmem:[#allocation50_spill] sm:$0xff]  ;;  %v1976_v7 = vrot.slane %v14014_v54, 7 }
 0x26b   : > { %13915 = vst [vmem:[#allocation145_spill] sm:$0xff] %v8678_v0  ;;  %v8789_v45 = vsel %vm1826_vm7, %v13938_v63, %v13937_v4  ;;  %v13946_v4 = vld [vmem:[#allocation49_spill] sm:$0xff]  ;;  %v8819_v51 = vsel %vm1826_vm7, %v13949_v44, %v13948_v21  ;;  %v13956_v21 = vld [vmem:[#allocation98_spill] sm:$0xff]  ;;  %v13957_v6 = vld [vmem:[#allocation15_spill] sm:$0xff]  ;;  %v8876_v0 = vsel %vm2901_vm15, %v8726_v5, %v8732_v56 }
 0x26c   : > { %13916 = vst [vmem:[#allocation146_spill] sm:$0xff] %v8684_v2  ;;  %v8813_v60 = vsel %vm1826_vm7, %v13947_v39, %v13946_v4  ;;  %v13954_v4 = vld [vmem:[#allocation111_spill] sm:$0xff]  ;;  %v8846_v61 = vsel %vm1826_vm7, %v13957_v6, %v13956_v21  ;;  %v8870_v21 = vsel %vm2901_vm15, %v8714_v31, %v8720_v42  ;;  %v14013_v44 = vld [vmem:[#allocation24_spill] sm:$0xff]  ;;  %v1985_v19 = vrot.slane %v8819_v51, 7 }
 0x26d   : > { %13917 = vst [vmem:[#allocation147_spill] sm:$0xff] %v8690_v24  ;;  %v8837_v17 = vsel %vm1826_vm7, %v13955_v10, %v13954_v4  ;;  %v8858_v4 = vsel %vm2901_vm15, %v8690_v24, %v8696_v53  ;;  %v13986_v24 = vld [vmem:[#allocation19_spill] sm:$0xff]  ;;  %v14010_v10 = vld [vmem:[#allocation28_spill] sm:$0xff]  ;;  %v1975_v39 = vrot.slane %v14013_v44, 7 }
 0x26e   : > { %13918 = vst [vmem:[#allocation148_spill] sm:$0xff] %v8696_v53  ;;  %v8882_v53 = vsel %vm2901_vm15, %v8738_v23, %v8744_v35  ;;  %v14016_v63 = vld [vmem:[#allocation43_spill] sm:$0xff] }
 0x26f   : > { %13919 = vst [vmem:[#allocation149_spill] sm:$0xff] %v8702_v12  ;;  %v13983_v12 = vld [vmem:[#allocation18_spill] sm:$0xff]  ;;  %v1978_v50 = vrot.slane %v14016_v63, 7 }
 0x270   : > { %13920 = vst [vmem:[#allocation150_spill] sm:$0xff] %v8708_v43  ;;  %v8888_v43 = vsel %vm2901_vm15, %v8750_v52, %v8756_v57 }
 0x271   : > { %13921 = vst [vmem:[#allocation151_spill] sm:$0xff] %v8714_v31 }
 0x272   : > { %13922 = vst [vmem:[#allocation152_spill] sm:$0xff] %v8720_v42  ;;  %v8894_v42 = vsel %vm2901_vm15, %v8762_v55, %v8768_v28 }
 0x273   : > { %13923 = vst [vmem:[#allocation153_spill] sm:$0xff] %v8726_v5  ;;  %v13979_v5 = vld [vmem:[#allocation14_spill] sm:$0xff] }
 0x274   : > { %13924 = vst [vmem:[#allocation154_spill] sm:$0xff] %v8732_v56  ;;  %v8900_v56 = vsel %vm3000_vm0, %v8852_v8, %v8858_v4 }
 0x275   : > { %13925 = vst [vmem:[#allocation155_spill] sm:$0xff] %v8738_v23 }
 0x276   : > { %13926 = vst [vmem:[#allocation156_spill] sm:$0xff] %v8744_v35  ;;  %v8906_v35 = vsel %vm3000_vm0, %v8864_v15, %v8870_v21 }
 0x277   : > { %13927 = vst [vmem:[#allocation157_spill] sm:$0xff] %v8750_v52  ;;  %v13974_v52 = vld [vmem:[#allocation106_spill] sm:$0xff] }
 0x278   : > { %13928 = vst [vmem:[#allocation158_spill] sm:$0xff] %v8756_v57  ;;  %v8912_v57 = vsel %vm3000_vm0, %v8876_v0, %v8882_v53 }
 0x279   : > { %13929 = vst [vmem:[#allocation159_spill] sm:$0xff] %v8762_v55  ;;  %v13973_v55 = vld [vmem:[#allocation39_spill] sm:$0xff] }
 0x27a   : > { %13930 = vst [vmem:[#allocation160_spill] sm:$0xff] %v8768_v28  ;;  %v8918_v28 = vsel %vm3000_vm0, %v8888_v43, %v8894_v42 }
 0x27b   : > { %13943 = vst [vmem:[#allocation120_spill] sm:$0xff] %v8803_v32 }
 0x27c   : > { %13944 = vst [vmem:[#allocation44_spill] sm:$0xff] %v8805_v9 }
 0x27d   : > { %13945 = vst [vmem:[#allocation45_spill] sm:$0xff] %v8807_v1 }
 0x27e   : > { %13958 = vst [vmem:[#allocation46_spill] sm:$0xff] %v8852_v8  ;;  %v3132_v8 = vsel %vm3099_vm1, %v8900_v56, %v8906_v35 }
 0x27f   : > { %13959 = vst [vmem:[#allocation47_spill] sm:$0xff] %v8858_v4  ;;  %v13970_v4 = vld [vmem:[#allocation99_spill] sm:$0xff] }
 0x280   : > { %13960 = vst [vmem:[#allocation48_spill] sm:$0xff] %v8864_v15  ;;  %v13971_v15 = vld [vmem:[#allocation23_spill] sm:$0xff] }
 0x281   : > { %13961 = vst [vmem:[#allocation49_spill] sm:$0xff] %v8870_v21  ;;  %v3148_v21 = vsel %vm3099_vm1, %v8912_v57, %v8918_v28 }
 0x282   : > { %13962 = vst [vmem:[#allocation50_spill] sm:$0xff] %v8876_v0  ;;  %v13972_v0 = vld [vmem:[#allocation105_spill] sm:$0xff] }
 0x283   : > { %13963 = vst [vmem:[#allocation51_spill] sm:$0xff] %v8882_v53  ;;  %v8932_v53 = vsel %vm1826_vm7, %v13971_v15, %v13970_v4  ;;  %v13978_v4 = vld [vmem:[#allocation12_spill] sm:$0xff] }
 0x284   : > { %13964 = vst [vmem:[#allocation11_spill] sm:$0xff] %v8888_v43  ;;  %v3757_v43 = vpack.i.bf16 %v3148_v21, %v3132_v8  ;;  %v8956_v31 = vsel %vm1826_vm7, %v13979_v5, %v13978_v4  ;;  %v13981_v8 = vld [vmem:[#allocation17_spill] sm:$0xff]  ;;  %v13988_v4 = vld [vmem:[#allocation110_spill] sm:$0xff] }
 0x285   : > { %13965 = vst [vmem:[#allocation111_spill] sm:$0xff] %v8894_v42  ;;  %v8938_v42 = vsel %vm1826_vm7, %v13973_v55, %v13972_v0  ;;  %v13980_v0 = vld [vmem:[#allocation109_spill] sm:$0xff]  ;;  %v8980_v14 = vsel %vm1826_vm7, %v13989_v20, %v13988_v4  ;;  %v1989_v20 = vrot.slane %v8846_v61, 7 }
 0x286   : > { %13966 = vst [vmem:[#allocation98_spill] sm:$0xff] %v8900_v56  ;;  %v13975_v56 = vld [vmem:[#allocation71_spill] sm:$0xff]  ;;  %v8962_v21 = vsel %vm1826_vm7, %v13981_v8, %v13980_v0  ;;  %3758 = vxpose.xlu1.b32.start [1/16] %v3757_v43, 128  ;;  %v13991_v0 = vld [vmem:[#allocation116_spill] sm:$0xff]  ;;  %v14000_v4 = vld [vmem:[#allocation97_spill] sm:$0xff]  ;;  %v1998_v1 = vrot.slane %v8980_v14, 7 }
 0x287   : > { %13967 = vst [vmem:[#allocation161_spill] sm:$0xff] %v8906_v35  ;;  %v8944_v35 = vsel %vm1826_vm7, %v13975_v56, %v13974_v52  ;;  %v13982_v52 = vld [vmem:[#allocation16_spill] sm:$0xff]  ;;  %v8986_v13 = vsel %vm1826_vm7, %v13992_v29, %v13991_v0  ;;  %v14001_v43 = vld [vmem:[#allocation25_spill] sm:$0xff]  ;;  %v14003_v0 = vld [vmem:[#allocation102_spill] sm:$0xff]  ;;  %v1988_v29 = vrot.slane %v8837_v17, 7  ;;  %v1995_v56 = vrot.slane %v8962_v21, 7 }
 0x288   : > { %13968 = vst [vmem:[#allocation162_spill] sm:$0xff] %v8912_v57  ;;  %v13977_v57 = vld [vmem:[#allocation13_spill] sm:$0xff]  ;;  %v8968_v2 = vsel %vm1826_vm7, %v13983_v12, %v13982_v52  ;;  %v13994_v52 = vld [vmem:[#allocation95_spill] sm:$0xff]  ;;  %v9004_v47 = vsel %vm1826_vm7, %v14001_v43, %v14000_v4  ;;  %v9010_v22 = vsel %vm1826_vm7, %v14004_v36, %v14003_v0  ;;  %v14012_v4 = vld [vmem:[#allocation86_spill] sm:$0xff]  ;;  %v1982_v43 = vrot.slane %v8795_v40, 7 }
 0x289   : > { %13969 = vst [vmem:[#allocation163_spill] sm:$0xff] %v8918_v28  ;;  %v13976_v28 = vld [vmem:[#allocation107_spill] sm:$0xff]  ;;  %v8992_v49 = vsel %vm1826_vm7, %v13995_v59, %v13994_v52  ;;  %v14015_v36 = vld [vmem:[#allocation42_spill] sm:$0xff]  ;;  %v1987_v59 = vrot.slane %v8831_v58, 7  ;;  %v1991_v12 = vrot.slane %v8938_v42, 7  ;;  %v1992_v8 = vrot.slane %v8944_v35, 7 }
 0x28a   : > { %v8950_v23 = vsel %vm1826_vm7, %v13977_v57, %v13976_v28  ;;  %13984 = vst [vmem:[#allocation99_spill] sm:$0xff] %v8968_v2  ;;  %v13985_v28 = vld [vmem:[#allocation40_spill] sm:$0xff]  ;;  %v14006_v52 = vld [vmem:[#allocation103_spill] sm:$0xff]  ;;  %v1977_v0 = vrot.slane %v14015_v36, 7  ;;  %v1994_v57 = vrot.slane %v8956_v31, 7  ;;  %v1996_v55 = vrot.slane %v8968_v2, 7 }
 0x28b   : > { %v8974_v48 = vsel %vm1826_vm7, %v13986_v24, %v13985_v28  ;;  %13990 = vst [vmem:[#allocation106_spill] sm:$0xff] %v8980_v14  ;;  %v13997_v28 = vld [vmem:[#allocation96_spill] sm:$0xff]  ;;  %v9016_v38 = vsel %vm1826_vm7, %v14007_v16, %v14006_v52  ;;  %v1980_v16 = vrot.slane %v8783_v18, 7  ;;  %v1981_v52 = vrot.slane %v8789_v45, 7 }
 0x28c   : > { %13987 = vst [vmem:[#allocation105_spill] sm:$0xff] %v8974_v48  ;;  %v8998_v46 = vsel %vm1826_vm7, %v13998_v30, %v13997_v28  ;;  %v14009_v28 = vld [vmem:[#allocation104_spill] sm:$0xff]  ;;  %v1986_v30 = vrot.slane %v8825_v33, 7  ;;  %v1990_v24 = vrot.slane %v8932_v53, 7  ;;  %v1993_v5 = vrot.slane %v8950_v23, 7 }
 0x28d   : > { %13993 = vst [vmem:[#allocation107_spill] sm:$0xff] %v8986_v13  ;;  %v9022_v27 = vsel %vm1826_vm7, %v14010_v10, %v14009_v28  ;;  %v1983_v10 = vrot.slane %v8801_v62, 7  ;;  %v1984_v28 = vrot.slane %v8813_v60, 7  ;;  %v1997_v15 = vrot.slane %v8974_v48, 7 }
 0x28e   : > { %13996 = vst [vmem:[#allocation12_spill] sm:$0xff] %v8992_v49  ;;  %v1999_v3 = vrot.slane %v8986_v13, 7  ;;  %v2000_v6 = vrot.slane %v8992_v49, 7  ;;  %v2001_v9 = vrot.slane %v8998_v46, 7  ;;  %v2002_v32 = vrot.slane %v9004_v47, 7 }
 0x28f   : > { %13999 = vst [vmem:[#allocation109_spill] sm:$0xff] %v8998_v46  ;;  %v2003_v11 = vrot.slane %v9010_v22, 7  ;;  %v2004_v34 = vrot.slane %v9016_v38, 7  ;;  %v13163_v26 = vrot.slane %v9022_v27, 7  ;;  %v2044_v2 = vsel %vm2021_vm8, %v1997_v15, %v1998_v1 }
 0x290   : > { %14002 = vst [vmem:[#allocation16_spill] sm:$0xff] %v9004_v47  ;;  %v2040_v14 = vsel %vm2021_vm8, %v2001_v9, %v2002_v32  ;;  %v2041_v13 = vsel %vm2021_vm8, %v2000_v6, %v2001_v9  ;;  %v2042_v46 = vsel %vm2021_vm8, %v1999_v3, %v2000_v6  ;;  %v2043_v47 = vsel %vm2021_vm8, %v1998_v1, %v1999_v3 }
 0x291   : > { %14005 = vst [vmem:[#allocation40_spill] sm:$0xff] %v9010_v22  ;;  %v2038_v22 = vsel %vm2021_vm8, %v2003_v11, %v2004_v34  ;;  %v2039_v49 = vsel %vm2021_vm8, %v2002_v32, %v2003_v11  ;;  %v2045_v9 = vsel %vm2021_vm8, %v1996_v55, %v1997_v15  ;;  %v2046_v6 = vsel %vm2021_vm8, %v1995_v56, %v1996_v55 }
 0x292   : > { %14008 = vst [vmem:[#allocation110_spill] sm:$0xff] %v9016_v38  ;;  %v2037_v38 = vsel %vm2021_vm8, %v2004_v34, %v13163_v26  ;;  %v2047_v1 = vsel %vm2021_vm8, %v1994_v57, %v1995_v56  ;;  %v2048_v3 = vsel %vm2021_vm8, %v1993_v5, %v1994_v57  ;;  %v2049_v26 = vsel %vm2021_vm8, %v1992_v8, %v1993_v5 }
 0x293   : > { %14011 = vst [vmem:[#allocation116_spill] sm:$0xff] %v9022_v27  ;;  %v2050_v34 = vsel %vm2021_vm8, %v1991_v12, %v1992_v8  ;;  %v2051_v11 = vsel %vm2021_vm8, %v1990_v24, %v1991_v12  ;;  %v2052_v15 = vsel %vm2021_vm8, %v1989_v20, %v1990_v24  ;;  %v2053_v55 = vsel %vm2021_vm8, %v1988_v29, %v1989_v20 }
 0x294   : > { %v2054_v56 = vsel %vm2021_vm8, %v1987_v59, %v1988_v29  ;;  %v2055_v57 = vsel %vm2021_vm8, %v1986_v30, %v1987_v59  ;;  %v2056_v5 = vsel %vm2021_vm8, %v1985_v19, %v1986_v30  ;;  %v2057_v32 = vsel %vm2021_vm8, %v1984_v28, %v1985_v19 }
 0x295   : > { %v2058_v12 = vsel %vm2021_vm8, %v1983_v10, %v1984_v28  ;;  %v2059_v24 = vsel %vm2021_vm8, %v1982_v43, %v1983_v10  ;;  %v2060_v20 = vsel %vm2021_vm8, %v1981_v52, %v1982_v43  ;;  %v2061_v29 = vsel %vm2021_vm8, %v1980_v16, %v1981_v52 }
 0x296   : > { %v2062_v59 = vsel %vm2021_vm8, %v1979_v41, %v1980_v16  ;;  %v2063_v30 = vsel %vm2021_vm8, %v1978_v50, %v1979_v41  ;;  %v2064_v19 = vsel %vm2021_vm8, %v1977_v0, %v1978_v50  ;;  %v2065_v8 = vsel %vm2021_vm8, %v1976_v7, %v1977_v0  ;;  %v14019_v16 = vld [vmem:[#allocation70_spill] sm:$0xff] }
 0x297   : > { %v2066_v10 = vsel %vm2021_vm8, %v1975_v39, %v1976_v7  ;;  %v14017_v43 = vrot.slane %v14012_v4, 7  ;;  %v14020_v27 = vrot.slane %v14019_v16, 7  ;;  %v9131_v48 = vsel %vm7387_vm9, %v2065_v8, %v14015_v36  ;;  %v14022_v36 = vld [vmem:[#allocation99_spill] sm:$0xff] }
 0x298   : > { %v9146_v0 = vsel %vm7387_vm9, %v2066_v10, %v14014_v54  ;;  %v9166_v54 = vsel %vm7387_vm9, %v2061_v29, %v8789_v45  ;;  %v9186_v45 = vsel %vm7387_vm9, %v2057_v32, %v8819_v51  ;;  %v9206_v51 = vsel %vm7387_vm9, %v2053_v55, %v8846_v61  ;;  %v14036_v55 = vld [vmem:[#allocation40_spill] sm:$0xff] }
 0x299   : > { %v2067_v52 = vsel %vm2021_vm8, %v14017_v43, %v1975_v39  ;;  %v14018_v28 = vmov %v14017_v43  ;;  %v9226_v61 = vsel %vm7387_vm9, %v2049_v26, %v8950_v23  ;;  %v14026_v23 = vld [vmem:[#allocation106_spill] sm:$0xff]  ;;  %v2267_v32 = vrot.slane %v9146_v0, 6 }
 0x29a   : > { %v2068_v41 = vsel %vm2021_vm8, %v14020_v27, %v14018_v28  ;;  %v9141_v39 = vsel %vm7387_vm9, %v2067_v52, %v14013_v44  ;;  %v9151_v27 = vsel %vm7387_vm9, %v2064_v19, %v14016_v63  ;;  %v9161_v44 = vsel %vm7387_vm9, %v2062_v59, %v8783_v18 }
 0x29b   : > { %v9136_v7 = vsel %vm7387_vm9, %v2068_v41, %v14012_v4  ;;  %v9156_v4 = vsel %vm7387_vm9, %v2063_v30, %v8777_v25  ;;  %v9171_v63 = vsel %vm7387_vm9, %v2060_v20, %v8795_v40  ;;  %v9176_v25 = vsel %vm7387_vm9, %v2059_v24, %v8801_v62 }
 0x29c   : > { %v9181_v18 = vsel %vm7387_vm9, %v2058_v12, %v8813_v60  ;;  %v9191_v40 = vsel %vm7387_vm9, %v2056_v5, %v8825_v33  ;;  %v9196_v62 = vsel %vm7387_vm9, %v2055_v57, %v8831_v58  ;;  %v9201_v60 = vsel %vm7387_vm9, %v2054_v56, %v8837_v17  ;;  %v14038_v56 = vld [vmem:[#allocation110_spill] sm:$0xff]  ;;  %v14040_v57 = vld [vmem:[#allocation116_spill] sm:$0xff] }
 0x29d   : > { %v9211_v33 = vsel %vm7387_vm9, %v2052_v15, %v8932_v53  ;;  %v9216_v58 = vsel %vm7387_vm9, %v2051_v11, %v8938_v42  ;;  %v9221_v17 = vsel %vm7387_vm9, %v2050_v34, %v8944_v35  ;;  %v9231_v53 = vsel %vm7387_vm9, %v2048_v3, %v8956_v31  ;;  %v14024_v34 = vld [vmem:[#allocation105_spill] sm:$0xff]  ;;  %v14028_v3 = vld [vmem:[#allocation107_spill] sm:$0xff]  ;;  %v14034_v15 = vld [vmem:[#allocation16_spill] sm:$0xff] }
 0x29e   : > { %v9236_v42 = vsel %vm7387_vm9, %v2047_v1, %v8962_v21  ;;  %v9241_v35 = vsel %vm7387_vm9, %v2046_v6, %v14022_v36  ;;  %v9246_v26 = vsel %vm7387_vm9, %v2045_v9, %v14024_v34  ;;  %v9251_v31 = vsel %vm7387_vm9, %v2044_v2, %v14026_v23  ;;  %v14030_v1 = vld [vmem:[#allocation12_spill] sm:$0xff]  ;;  %v14032_v11 = vld [vmem:[#allocation109_spill] sm:$0xff] }
 0x29f   : > { %14023 = vst [vmem:[#allocation95_spill] sm:$0xff] %v9241_v35  ;;  %v9256_v21 = vsel %vm7387_vm9, %v2043_v47, %v14028_v3  ;;  %v9261_v6 = vsel %vm7387_vm9, %v2042_v46, %v14030_v1  ;;  %v9266_v9 = vsel %vm7387_vm9, %v2041_v13, %v14032_v11  ;;  %v9271_v2 = vsel %vm7387_vm9, %v2040_v14, %v14034_v15 }
 0x2a0   : > { %14025 = vst [vmem:[#allocation96_spill] sm:$0xff] %v9246_v26  ;;  %v9276_v47 = vsel %vm7387_vm9, %v2039_v49, %v14036_v55  ;;  %v9281_v46 = vsel %vm7387_vm9, %v2038_v22, %v14038_v56  ;;  %v9286_v13 = vsel %vm7387_vm9, %v2037_v38, %v14040_v57  ;;  %v2266_v14 = vrot.slane %v9141_v39, 6 }
 0x2a1   : > { %14027 = vst [vmem:[#allocation97_spill] sm:$0xff] %v9251_v31  ;;  %v2268_v12 = vrot.slane %v9131_v48, 6  ;;  %v2269_v49 = vrot.slane %v9151_v27, 6  ;;  %v2270_v24 = vrot.slane %v9156_v4, 6  ;;  %v2271_v22 = vrot.slane %v9161_v44, 6 }
 0x2a2   : > { %14029 = vst [vmem:[#allocation102_spill] sm:$0xff] %v9256_v21  ;;  %v2272_v20 = vrot.slane %v9166_v54, 6  ;;  %v2273_v29 = vrot.slane %v9171_v63, 6  ;;  %v2274_v38 = vrot.slane %v9176_v25, 6  ;;  %v2275_v59 = vrot.slane %v9181_v18, 6 }
 0x2a3   : > { %14031 = vst [vmem:[#allocation26_spill] sm:$0xff] %v9261_v6  ;;  %v2276_v30 = vrot.slane %v9186_v45, 6  ;;  %v2277_v19 = vrot.slane %v9191_v40, 6  ;;  %v2278_v8 = vrot.slane %v9196_v62, 6  ;;  %v2279_v10 = vrot.slane %v9201_v60, 6 }
 0x2a4   : > { %14033 = vst [vmem:[#allocation103_spill] sm:$0xff] %v9266_v9  ;;  %v2280_v43 = vrot.slane %v9206_v51, 6  ;;  %v2281_v52 = vrot.slane %v9211_v33, 6  ;;  %v2282_v28 = vrot.slane %v9216_v58, 6  ;;  %v2283_v16 = vrot.slane %v9221_v17, 6 }
 0x2a5   : > { %14035 = vst [vmem:[#allocation27_spill] sm:$0xff] %v9271_v2  ;;  %v2284_v41 = vrot.slane %v9226_v61, 6  ;;  %v2285_v36 = vrot.slane %v9231_v53, 6  ;;  %v2286_v34 = vrot.slane %v9236_v42, 6  ;;  %v2287_v23 = vrot.slane %v9241_v35, 6 }
 0x2a6   : > { %14037 = vst [vmem:[#allocation104_spill] sm:$0xff] %v9276_v47  ;;  %v2288_v3 = vrot.slane %v9246_v26, 6  ;;  %v2289_v1 = vrot.slane %v9251_v31, 6  ;;  %v2290_v11 = vrot.slane %v9256_v21, 6  ;;  %v2291_v15 = vrot.slane %v9261_v6, 6 }
 0x2a7   : > { %14039 = vst [vmem:[#allocation28_spill] sm:$0xff] %v9281_v46  ;;  %v2292_v55 = vrot.slane %v9266_v9, 6  ;;  %v2293_v56 = vrot.slane %v9271_v2, 6  ;;  %v2294_v5 = vrot.slane %v9276_v47, 6  ;;  %v2295_v50 = vrot.slane %v9281_v46, 6 }
 0x2a8   : > { %14041 = vst [vmem:[#allocation86_spill] sm:$0xff] %v9286_v13  ;;  %v13176_v57 = vrot.slane %v9286_v13, 6  ;;  %v2335_v35 = vsel %vm2312_vm10, %v2288_v3, %v2289_v1  ;;  %v2333_v9 = vsel %vm2312_vm10, %v2290_v11, %v2291_v15  ;;  %v2334_v2 = vsel %vm2312_vm10, %v2289_v1, %v2290_v11 }
 0x2a9   : > { %v2331_v31 = vsel %vm2312_vm10, %v2292_v55, %v2293_v56  ;;  %v2332_v21 = vsel %vm2312_vm10, %v2291_v15, %v2292_v55  ;;  %v2329_v47 = vsel %vm2312_vm10, %v2294_v5, %v2295_v50  ;;  %v2330_v6 = vsel %vm2312_vm10, %v2293_v56, %v2294_v5 }
 0x2aa   : > { %v2328_v46 = vsel %vm2312_vm10, %v2295_v50, %v13176_v57  ;;  %v2336_v55 = vsel %vm2312_vm10, %v2287_v23, %v2288_v3  ;;  %v2337_v15 = vsel %vm2312_vm10, %v2286_v34, %v2287_v23  ;;  %v2338_v1 = vsel %vm2312_vm10, %v2285_v36, %v2286_v34 }
 0x2ab   : > { %v2339_v11 = vsel %vm2312_vm10, %v2284_v41, %v2285_v36  ;;  %v2340_v57 = vsel %vm2312_vm10, %v2283_v16, %v2284_v41  ;;  %v2341_v50 = vsel %vm2312_vm10, %v2282_v28, %v2283_v16  ;;  %v2342_v5 = vsel %vm2312_vm10, %v2281_v52, %v2282_v28 }
 0x2ac   : > { %v2343_v3 = vsel %vm2312_vm10, %v2280_v43, %v2281_v52  ;;  %v2344_v23 = vsel %vm2312_vm10, %v2279_v10, %v2280_v43  ;;  %v2345_v34 = vsel %vm2312_vm10, %v2278_v8, %v2279_v10  ;;  %v2346_v36 = vsel %vm2312_vm10, %v2277_v19, %v2278_v8 }
 0x2ad   : > { %v2347_v41 = vsel %vm2312_vm10, %v2276_v30, %v2277_v19  ;;  %v2348_v16 = vsel %vm2312_vm10, %v2275_v59, %v2276_v30  ;;  %v2349_v28 = vsel %vm2312_vm10, %v2274_v38, %v2275_v59  ;;  %v2350_v52 = vsel %vm2312_vm10, %v2273_v29, %v2274_v38 }
 0x2ae   : > { %v2351_v43 = vsel %vm2312_vm10, %v2272_v20, %v2273_v29  ;;  %v2352_v10 = vsel %vm2312_vm10, %v2271_v22, %v2272_v20  ;;  %v2353_v8 = vsel %vm2312_vm10, %v2270_v24, %v2271_v22  ;;  %v2354_v19 = vsel %vm2312_vm10, %v2269_v49, %v2270_v24  ;;  %v14044_v22 = vld [vmem:[#allocation65_spill] sm:$0xff] }
 0x2af   : > { %v2355_v30 = vsel %vm2312_vm10, %v2268_v12, %v2269_v49  ;;  %v2356_v59 = vsel %vm2312_vm10, %v2267_v32, %v2268_v12  ;;  %v2357_v38 = vsel %vm2312_vm10, %v2266_v14, %v2267_v32  ;;  %v14042_v29 = vrot.slane %v9136_v7, 6 }
 0x2b0   : > { %v14045_v13 = vrot.slane %v14044_v22, 6  ;;  %v9395_v26 = vsel %vm2411_vm11, %v2356_v59, %v9131_v48  ;;  %v9410_v12 = vsel %vm2411_vm11, %v2357_v38, %v9146_v0  ;;  %v9415_v48 = vsel %vm2411_vm11, %v2355_v30, %v9151_v27 }
 0x2b1   : > { %v2358_v20 = vsel %vm2312_vm10, %v14042_v29, %v2266_v14  ;;  %v14043_v56 = vmov %v14042_v29  ;;  %v9430_v0 = vsel %vm2411_vm11, %v2352_v10, %v9166_v54  ;;  %v9435_v27 = vsel %vm2411_vm11, %v2351_v43, %v9171_v63 }
 0x2b2   : > { %v2359_v24 = vsel %vm2312_vm10, %v14045_v13, %v14043_v56  ;;  %v9405_v14 = vsel %vm2411_vm11, %v2358_v20, %v9141_v39  ;;  %v9425_v39 = vsel %vm2411_vm11, %v2353_v8, %v9161_v44  ;;  %v9445_v44 = vsel %vm2411_vm11, %v2349_v28, %v9181_v18  ;;  %v14047_v13 = vld [vmem:[#allocation95_spill] sm:$0xff] }
 0x2b3   : > { %v9400_v32 = vsel %vm2411_vm11, %v2359_v24, %v9136_v7  ;;  %v9420_v7 = vsel %vm2411_vm11, %v2354_v19, %v9156_v4  ;;  %v9440_v4 = vsel %vm2411_vm11, %v2350_v52, %v9176_v25  ;;  %v9450_v54 = vsel %vm2411_vm11, %v2348_v16, %v9186_v45 }
 0x2b4   : > { %v9455_v63 = vsel %vm2411_vm11, %v2347_v41, %v9191_v40  ;;  %v9460_v25 = vsel %vm2411_vm11, %v2346_v36, %v9196_v62  ;;  %v9465_v18 = vsel %vm2411_vm11, %v2345_v34, %v9201_v60  ;;  %v9470_v45 = vsel %vm2411_vm11, %v2344_v23, %v9206_v51  ;;  %v14061_v23 = vld [vmem:[#allocation104_spill] sm:$0xff]  ;;  %v14065_v36 = vld [vmem:[#allocation86_spill] sm:$0xff] }
 0x2b5   : > { %v9475_v40 = vsel %vm2411_vm11, %v2343_v3, %v9211_v33  ;;  %v9480_v62 = vsel %vm2411_vm11, %v2342_v5, %v9216_v58  ;;  %v9485_v60 = vsel %vm2411_vm11, %v2341_v50, %v9221_v17  ;;  %v9490_v51 = vsel %vm2411_vm11, %v2340_v57, %v9226_v61  ;;  %v14049_v50 = vld [vmem:[#allocation96_spill] sm:$0xff]  ;;  %v14051_v57 = vld [vmem:[#allocation97_spill] sm:$0xff]  ;;  %v14057_v5 = vld [vmem:[#allocation103_spill] sm:$0xff] }
 0x2b6   : > { %v9495_v33 = vsel %vm2411_vm11, %v2339_v11, %v9231_v53  ;;  %v9500_v58 = vsel %vm2411_vm11, %v2338_v1, %v9236_v42  ;;  %v9505_v17 = vsel %vm2411_vm11, %v2337_v15, %v14047_v13  ;;  %v9510_v61 = vsel %vm2411_vm11, %v2336_v55, %v14049_v50  ;;  %v14053_v11 = vld [vmem:[#allocation102_spill] sm:$0xff]  ;;  %v14059_v3 = vld [vmem:[#allocation27_spill] sm:$0xff]  ;;  %v14063_v34 = vld [vmem:[#allocation28_spill] sm:$0xff] }
 0x2b7   : > { %14048 = vst [vmem:[#allocation24_spill] sm:$0xff] %v9505_v17  ;;  %v9515_v53 = vsel %vm2411_vm11, %v2335_v35, %v14051_v57  ;;  %v9520_v42 = vsel %vm2411_vm11, %v2334_v2, %v14053_v11  ;;  %v14055_v1 = vld [vmem:[#allocation26_spill] sm:$0xff]  ;;  %v9530_v55 = vsel %vm2411_vm11, %v2332_v21, %v14057_v5  ;;  %v9535_v35 = vsel %vm2411_vm11, %v2331_v31, %v14059_v3 }
 0x2b8   : > { %14050 = vst [vmem:[#allocation41_spill] sm:$0xff] %v9510_v61  ;;  %v9525_v15 = vsel %vm2411_vm11, %v2333_v9, %v14055_v1  ;;  %v9540_v2 = vsel %vm2411_vm11, %v2330_v6, %v14061_v23  ;;  %v9545_v9 = vsel %vm2411_vm11, %v2329_v47, %v14063_v34  ;;  %v9550_v21 = vsel %vm2411_vm11, %v2328_v46, %v14065_v36 }
 0x2b9   : > { %14052 = vst [vmem:[#allocation42_spill] sm:$0xff] %v9515_v53  ;;  %v2558_v31 = vrot.slane %v9405_v14, 4  ;;  %v2559_v16 = vrot.slane %v9410_v12, 4  ;;  %v2560_v28 = vrot.slane %v9395_v26, 4  ;;  %v2561_v6 = vrot.slane %v9415_v48, 4 }
 0x2ba   : > { %14054 = vst [vmem:[#allocation43_spill] sm:$0xff] %v9520_v42  ;;  %v2562_v52 = vrot.slane %v9420_v7, 4  ;;  %v2563_v47 = vrot.slane %v9425_v39, 4  ;;  %v2564_v43 = vrot.slane %v9430_v0, 4  ;;  %v2565_v10 = vrot.slane %v9435_v27, 4 }
 0x2bb   : > { %14056 = vst [vmem:[#allocation70_spill] sm:$0xff] %v9525_v15  ;;  %v2566_v46 = vrot.slane %v9440_v4, 4  ;;  %v2567_v8 = vrot.slane %v9445_v44, 4  ;;  %v2568_v19 = vrot.slane %v9450_v54, 4  ;;  %v2569_v30 = vrot.slane %v9455_v63, 4 }
 0x2bc   : > { %14058 = vst [vmem:[#allocation99_spill] sm:$0xff] %v9530_v55  ;;  %v2570_v59 = vrot.slane %v9460_v25, 4  ;;  %v2571_v38 = vrot.slane %v9465_v18, 4  ;;  %v2572_v29 = vrot.slane %v9470_v45, 4  ;;  %v2573_v20 = vrot.slane %v9475_v40, 4 }
 0x2bd   : > { %14060 = vst [vmem:[#allocation105_spill] sm:$0xff] %v9535_v35  ;;  %v2574_v56 = vrot.slane %v9480_v62, 4  ;;  %v2575_v22 = vrot.slane %v9485_v60, 4  ;;  %v2576_v24 = vrot.slane %v9490_v51, 4  ;;  %v2577_v13 = vrot.slane %v9495_v33, 4 }
 0x2be   : > { %14062 = vst [vmem:[#allocation106_spill] sm:$0xff] %v9540_v2  ;;  %v2578_v50 = vrot.slane %v9500_v58, 4  ;;  %v2579_v57 = vrot.slane %v9505_v17, 4  ;;  %v2580_v11 = vrot.slane %v9510_v61, 4  ;;  %v2581_v1 = vrot.slane %v9515_v53, 4 }
 0x2bf   : > { %14064 = vst [vmem:[#allocation107_spill] sm:$0xff] %v9545_v9  ;;  %v2582_v5 = vrot.slane %v9520_v42, 4  ;;  %v2583_v3 = vrot.slane %v9525_v15, 4  ;;  %v2584_v23 = vrot.slane %v9530_v55, 4  ;;  %v2585_v34 = vrot.slane %v9535_v35, 4 }
 0x2c0   : > { %14066 = vst [vmem:[#allocation12_spill] sm:$0xff] %v9550_v21  ;;  %v2586_v41 = vrot.slane %v9540_v2, 4  ;;  %v2587_v49 = vrot.slane %v9545_v9, 4  ;;  %v13189_v36 = vrot.slane %v9550_v21, 4  ;;  %v2627_v17 = vsel %vm2604_vm12, %v2580_v11, %v2581_v1 }
 0x2c1   : > { %v2623_v53 = vsel %vm2604_vm12, %v2584_v23, %v2585_v34  ;;  %v2624_v42 = vsel %vm2604_vm12, %v2583_v3, %v2584_v23  ;;  %v2625_v55 = vsel %vm2604_vm12, %v2582_v5, %v2583_v3  ;;  %v2626_v35 = vsel %vm2604_vm12, %v2581_v1, %v2582_v5 }
 0x2c2   : > { %v2620_v9 = vsel %vm2604_vm12, %v2587_v49, %v13189_v36  ;;  %v2621_v2 = vsel %vm2604_vm12, %v2586_v41, %v2587_v49  ;;  %v2622_v15 = vsel %vm2604_vm12, %v2585_v34, %v2586_v41  ;;  %v2628_v23 = vsel %vm2604_vm12, %v2579_v57, %v2580_v11 }
 0x2c3   : > { %v2629_v3 = vsel %vm2604_vm12, %v2578_v50, %v2579_v57  ;;  %v2630_v1 = vsel %vm2604_vm12, %v2577_v13, %v2578_v50  ;;  %v2631_v5 = vsel %vm2604_vm12, %v2576_v24, %v2577_v13  ;;  %v2632_v36 = vsel %vm2604_vm12, %v2575_v22, %v2576_v24 }
 0x2c4   : > { %v2633_v49 = vsel %vm2604_vm12, %v2574_v56, %v2575_v22  ;;  %v2634_v41 = vsel %vm2604_vm12, %v2573_v20, %v2574_v56  ;;  %v2635_v11 = vsel %vm2604_vm12, %v2572_v29, %v2573_v20  ;;  %v2636_v57 = vsel %vm2604_vm12, %v2571_v38, %v2572_v29 }
 0x2c5   : > { %v2637_v50 = vsel %vm2604_vm12, %v2570_v59, %v2571_v38  ;;  %v2638_v13 = vsel %vm2604_vm12, %v2569_v30, %v2570_v59  ;;  %v2639_v24 = vsel %vm2604_vm12, %v2568_v19, %v2569_v30  ;;  %v2640_v22 = vsel %vm2604_vm12, %v2567_v8, %v2568_v19 }
 0x2c6   : > { %v2641_v56 = vsel %vm2604_vm12, %v2566_v46, %v2567_v8  ;;  %v2642_v20 = vsel %vm2604_vm12, %v2565_v10, %v2566_v46  ;;  %v2643_v29 = vsel %vm2604_vm12, %v2564_v43, %v2565_v10  ;;  %v2644_v38 = vsel %vm2604_vm12, %v2563_v47, %v2564_v43 }
 0x2c7   : > { %v2645_v59 = vsel %vm2604_vm12, %v2562_v52, %v2563_v47  ;;  %v2646_v30 = vsel %vm2604_vm12, %v2561_v6, %v2562_v52  ;;  %v2647_v19 = vsel %vm2604_vm12, %v2560_v28, %v2561_v6  ;;  %v2648_v8 = vsel %vm2604_vm12, %v2559_v16, %v2560_v28  ;;  %v14069_v47 = vld [vmem:[#allocation123_spill] sm:$0xff] }
 0x2c8   : > { %v2649_v46 = vsel %vm2604_vm12, %v2558_v31, %v2559_v16  ;;  %v14067_v10 = vrot.slane %v9400_v32, 4  ;;  %v14070_v21 = vrot.slane %v14069_v47, 4  ;;  %v9659_v61 = vsel %vm2703_vm13, %v2648_v8, %v9395_v26 }
 0x2c9   : > { %14072 = vst [vmem:[#allocation109_spill] sm:$0xff] %v9659_v61  ;;  %v9674_v28 = vsel %vm2703_vm13, %v2649_v46, %v9410_v12  ;;  %v9679_v26 = vsel %vm2703_vm13, %v2647_v19, %v9415_v48  ;;  %v9694_v12 = vsel %vm2703_vm13, %v2644_v38, %v9430_v0  ;;  %v9699_v48 = vsel %vm2703_vm13, %v2643_v29, %v9435_v27 }
 0x2ca   : > { %v2650_v43 = vsel %vm2604_vm12, %v14067_v10, %v2558_v31  ;;  %v14068_v34 = vmov %v14067_v10  ;;  %14075 = vst [vmem:[#allocation110_spill] sm:$0xff] %v9674_v28  ;;  %v9714_v0 = vsel %vm2703_vm13, %v2640_v22, %v9450_v54  ;;  %v9719_v27 = vsel %vm2703_vm13, %v2639_v24, %v9455_v63 }
 0x2cb   : > { %v2651_v52 = vsel %vm2604_vm12, %v14070_v21, %v14068_v34  ;;  %v9669_v31 = vsel %vm2703_vm13, %v2650_v43, %v9405_v14  ;;  %14076 = vst [vmem:[#allocation65_spill] sm:$0xff] %v9679_v26  ;;  %v9689_v14 = vsel %vm2703_vm13, %v2645_v59, %v9425_v39  ;;  %v9709_v39 = vsel %vm2703_vm13, %v2641_v56, %v9445_v44  ;;  %v14094_v21 = vld [vmem:[#allocation24_spill] sm:$0xff] }
 0x2cc   : > { %v9664_v16 = vsel %vm2703_vm13, %v2651_v52, %v9400_v32  ;;  %14074 = vst [vmem:[#allocation40_spill] sm:$0xff] %v9669_v31  ;;  %v9684_v32 = vsel %vm2703_vm13, %v2646_v30, %v9420_v7  ;;  %v9704_v7 = vsel %vm2703_vm13, %v2642_v20, %v9440_v4  ;;  %v9724_v4 = vsel %vm2703_vm13, %v2638_v13, %v9460_v25  ;;  %v14112_v13 = vld [vmem:[#allocation12_spill] sm:$0xff] }
 0x2cd   : > { %14073 = vst [vmem:[#allocation16_spill] sm:$0xff] %v9664_v16  ;;  %v9729_v44 = vsel %vm2703_vm13, %v2637_v50, %v9465_v18  ;;  %v9734_v54 = vsel %vm2703_vm13, %v2636_v57, %v9470_v45  ;;  %v9739_v63 = vsel %vm2703_vm13, %v2635_v11, %v9475_v40  ;;  %v9744_v25 = vsel %vm2703_vm13, %v2634_v41, %v9480_v62  ;;  %v14104_v41 = vld [vmem:[#allocation99_spill] sm:$0xff]  ;;  %v14106_v11 = vld [vmem:[#allocation105_spill] sm:$0xff]  ;;  %v14108_v57 = vld [vmem:[#allocation106_spill] sm:$0xff] }
 0x2ce   : > { %14077 = vst [vmem:[#allocation95_spill] sm:$0xff] %v9684_v32  ;;  %v9749_v18 = vsel %vm2703_vm13, %v2633_v49, %v9485_v60  ;;  %v9754_v45 = vsel %vm2703_vm13, %v2632_v36, %v9490_v51  ;;  %v9759_v40 = vsel %vm2703_vm13, %v2631_v5, %v9495_v33  ;;  %v9764_v62 = vsel %vm2703_vm13, %v2630_v1, %v9500_v58  ;;  %v14096_v49 = vld [vmem:[#allocation41_spill] sm:$0xff]  ;;  %v14098_v36 = vld [vmem:[#allocation42_spill] sm:$0xff]  ;;  %v14100_v5 = vld [vmem:[#allocation43_spill] sm:$0xff] }
 0x2cf   : > { %14078 = vst [vmem:[#allocation96_spill] sm:$0xff] %v9689_v14  ;;  %v9769_v60 = vsel %vm2703_vm13, %v2629_v3, %v14094_v21  ;;  %v9774_v51 = vsel %vm2703_vm13, %v2628_v23, %v14096_v49  ;;  %v9779_v33 = vsel %vm2703_vm13, %v2627_v17, %v14098_v36  ;;  %v9784_v58 = vsel %vm2703_vm13, %v2626_v35, %v14100_v5  ;;  %v14102_v1 = vld [vmem:[#allocation70_spill] sm:$0xff]  ;;  %v14110_v50 = vld [vmem:[#allocation107_spill] sm:$0xff] }
 0x2d0   : > { %14079 = vst [vmem:[#allocation97_spill] sm:$0xff] %v9694_v12  ;;  %v9789_v3 = vsel %vm2703_vm13, %v2625_v55, %v14102_v1  ;;  %v9794_v23 = vsel %vm2703_vm13, %v2624_v42, %v14104_v41  ;;  %v9799_v17 = vsel %vm2703_vm13, %v2623_v53, %v14106_v11  ;;  %v9804_v35 = vsel %vm2703_vm13, %v2622_v15, %v14108_v57 }
 0x2d1   : > { %14080 = vst [vmem:[#allocation102_spill] sm:$0xff] %v9699_v48  ;;  %v9809_v55 = vsel %vm2703_vm13, %v2621_v2, %v14110_v50  ;;  %v9814_v42 = vsel %vm2703_vm13, %v2620_v9, %v14112_v13  ;;  %v9820_v53 = vsel %vm2802_vm14, %v9664_v16, %v9669_v31  ;;  %v9826_v15 = vsel %vm2802_vm14, %v9674_v28, %v9659_v61 }
 0x2d2   : > { %14081 = vst [vmem:[#allocation26_spill] sm:$0xff] %v9704_v7  ;;  %v9832_v2 = vsel %vm2802_vm14, %v9679_v26, %v9684_v32  ;;  %v9838_v9 = vsel %vm2802_vm14, %v9689_v14, %v9694_v12  ;;  %v9844_v22 = vsel %vm2802_vm14, %v9699_v48, %v9704_v7  ;;  %v9850_v56 = vsel %vm2802_vm14, %v9709_v39, %v9714_v0 }
 0x2d3   : > { %14082 = vst [vmem:[#allocation103_spill] sm:$0xff] %v9709_v39  ;;  %v9856_v20 = vsel %vm2802_vm14, %v9719_v27, %v9724_v4  ;;  %v9862_v29 = vsel %vm2802_vm14, %v9729_v44, %v9734_v54  ;;  %v9868_v38 = vsel %vm2802_vm14, %v9739_v63, %v9744_v25  ;;  %v9874_v59 = vsel %vm2802_vm14, %v9749_v18, %v9754_v45 }
 0x2d4   : > { %14083 = vst [vmem:[#allocation27_spill] sm:$0xff] %v9714_v0  ;;  %v9880_v30 = vsel %vm2802_vm14, %v9759_v40, %v9764_v62  ;;  %v9886_v19 = vsel %vm2802_vm14, %v9769_v60, %v9774_v51  ;;  %v9892_v8 = vsel %vm2802_vm14, %v9779_v33, %v9784_v58  ;;  %v9898_v46 = vsel %vm2802_vm14, %v9789_v3, %v9794_v23 }
 0x2d5   : > { %14084 = vst [vmem:[#allocation104_spill] sm:$0xff] %v9719_v27  ;;  %v9904_v10 = vsel %vm2802_vm14, %v9799_v17, %v9804_v35  ;;  %v9910_v43 = vsel %vm2802_vm14, %v9809_v55, %v9814_v42  ;;  %v9916_v47 = vsel %vm2901_vm15, %v9820_v53, %v9826_v15  ;;  %v9922_v52 = vsel %vm2901_vm15, %v9832_v2, %v9838_v9 }
 0x2d6   : > { %14085 = vst [vmem:[#allocation28_spill] sm:$0xff] %v9724_v4  ;;  %v9928_v21 = vsel %vm2901_vm15, %v9844_v22, %v9850_v56  ;;  %v9934_v49 = vsel %vm2901_vm15, %v9856_v20, %v9862_v29  ;;  %v9940_v36 = vsel %vm2901_vm15, %v9868_v38, %v9874_v59  ;;  %v9946_v5 = vsel %vm2901_vm15, %v9880_v30, %v9886_v19 }
 0x2d7   : > { %14086 = vst [vmem:[#allocation123_spill] sm:$0xff] %v9729_v44  ;;  %v9952_v1 = vsel %vm2901_vm15, %v9892_v8, %v9898_v46  ;;  %v9958_v41 = vsel %vm2901_vm15, %v9904_v10, %v9910_v43  ;;  %v9964_v57 = vsel %vm3000_vm0, %v9916_v47, %v9922_v52  ;;  %v9970_v50 = vsel %vm3000_vm0, %v9928_v21, %v9934_v49 }
 0x2d8   : > { %14087 = vst [vmem:[#allocation164_spill] sm:$0xff] %v9734_v54 }
 0x2d9   : > { %14088 = vst [vmem:[#allocation165_spill] sm:$0xff] %v9739_v63 }
 0x2da   : > { %14089 = vst [vmem:[#allocation166_spill] sm:$0xff] %v9744_v25 }
 0x2db   : > { %14090 = vst [vmem:[#allocation167_spill] sm:$0xff] %v9749_v18 }
 0x2dc   : > { %14091 = vst [vmem:[#allocation168_spill] sm:$0xff] %v9754_v45 }
 0x2dd   : > { %14092 = vst [vmem:[#allocation169_spill] sm:$0xff] %v9759_v40 }
 0x2de   : > { %14093 = vst [vmem:[#allocation170_spill] sm:$0xff] %v9764_v62 }
 0x2df   : > { %14095 = vst [vmem:[#allocation24_spill] sm:$0xff] %v9769_v60 }
 0x2e0   : > { %14097 = vst [vmem:[#allocation41_spill] sm:$0xff] %v9774_v51 }
 0x2e1   : > { %14099 = vst [vmem:[#allocation42_spill] sm:$0xff] %v9779_v33 }
 0x2e2   : > { %14101 = vst [vmem:[#allocation43_spill] sm:$0xff] %v9784_v58 }
 0x2e3   : > { %14103 = vst [vmem:[#allocation70_spill] sm:$0xff] %v9789_v3 }
 0x2e4   : > { %14105 = vst [vmem:[#allocation99_spill] sm:$0xff] %v9794_v23 }
 0x2e5   : > { %14107 = vst [vmem:[#allocation105_spill] sm:$0xff] %v9799_v17 }
 0x2e6   : > { %14109 = vst [vmem:[#allocation106_spill] sm:$0xff] %v9804_v35 }
 0x2e7   : > { %14111 = vst [vmem:[#allocation107_spill] sm:$0xff] %v9809_v55 }
 0x2e8   : > { %14113 = vst [vmem:[#allocation171_spill] sm:$0xff] %v9814_v42 }
 0x2e9   : > { %14115 = vst [vmem:[#allocation172_spill] sm:$0xff] %v9820_v53 }
 0x2ea   : > { %14116 = vst [vmem:[#allocation173_spill] sm:$0xff] %v9826_v15 }
 0x2eb   : > { %14117 = vst [vmem:[#allocation174_spill] sm:$0xff] %v9832_v2 }
 0x2ec   : > { %14118 = vst [vmem:[#allocation175_spill] sm:$0xff] %v9838_v9 }
 0x2ed   : > { %14119 = vst [vmem:[#allocation176_spill] sm:$0xff] %v9844_v22 }
 0x2ee   : > { %14120 = vst [vmem:[#allocation177_spill] sm:$0xff] %v9850_v56 }
 0x2ef   : > { %14121 = vst [vmem:[#allocation178_spill] sm:$0xff] %v9856_v20 }
 0x2f0   : > { %14122 = vst [vmem:[#allocation179_spill] sm:$0xff] %v9862_v29 }
 0x2f1   : > { %14123 = vst [vmem:[#allocation180_spill] sm:$0xff] %v9868_v38 }
 0x2f2   : > { %14124 = vst [vmem:[#allocation181_spill] sm:$0xff] %v9874_v59  ;;  %v14152_v59 = vld [vmem:[#allocation92_spill] sm:$0xff] }
 0x2f3   : > { %14125 = vst [vmem:[#allocation182_spill] sm:$0xff] %v9880_v30  ;;  %v14153_v30 = vld [vmem:[#allocation71_spill] sm:$0xff] }
 0x2f4   : > { %14126 = vst [vmem:[#allocation183_spill] sm:$0xff] %v9886_v19 }
 0x2f5   : > { %14127 = vst [vmem:[#allocation184_spill] sm:$0xff] %v9892_v8  ;;  %v14150_v8 = vld [vmem:[#allocation90_spill] sm:$0xff] }
 0x2f6   : > { %14128 = vst [vmem:[#allocation185_spill] sm:$0xff] %v9898_v46  ;;  %v9976_v46 = vsel %vm3000_vm0, %v9940_v36, %v9946_v5 }
 0x2f7   : > { %14129 = vst [vmem:[#allocation186_spill] sm:$0xff] %v9904_v10 }
 0x2f8   : > { %14130 = vst [vmem:[#allocation187_spill] sm:$0xff] %v9910_v43  ;;  %v9982_v43 = vsel %vm3000_vm0, %v9952_v1, %v9958_v41 }
 0x2f9   : > { %14132 = vst [vmem:[#allocation188_spill] sm:$0xff] %v9916_v47  ;;  %v14146_v47 = vld [vmem:[#allocation89_spill] sm:$0xff] }
 0x2fa   : > { %14133 = vst [vmem:[#allocation189_spill] sm:$0xff] %v9922_v52  ;;  %v14145_v52 = vld [vmem:[#allocation15_spill] sm:$0xff] }
 0x2fb   : > { %14134 = vst [vmem:[#allocation190_spill] sm:$0xff] %v9928_v21  ;;  %v9988_v19 = vsel %vm1826_vm7, %v14146_v47, %v14145_v52  ;;  %v3164_v21 = vsel %vm3099_vm1, %v9964_v57, %v9970_v50 }
 0x2fc   : > { %14135 = vst [vmem:[#allocation191_spill] sm:$0xff] %v9934_v49 }
 0x2fd   : > { %14136 = vst [vmem:[#allocation192_spill] sm:$0xff] %v9940_v36  ;;  %v14149_v36 = vld [vmem:[#allocation23_spill] sm:$0xff] }
 0x2fe   : > { %14137 = vst [vmem:[#allocation193_spill] sm:$0xff] %v9946_v5  ;;  %v3180_v5 = vsel %vm3099_vm1, %v9976_v46, %v9982_v43 }
 0x2ff   : > { %14138 = vst [vmem:[#allocation194_spill] sm:$0xff] %v9952_v1  ;;  %v14151_v1 = vld [vmem:[#allocation39_spill] sm:$0xff]  ;;  %v3869_v52 = vpack.i.bf16 %v3180_v5, %v3164_v21  ;;  %v14160_v21 = vld [vmem:[#allocation72_spill] sm:$0xff] }
 0x300   : > { %14139 = vst [vmem:[#allocation195_spill] sm:$0xff] %v9958_v41  ;;  %v10002_v41 = vsel %vm1826_vm7, %v14150_v8, %v14149_v36  ;;  %v10008_v47 = vsel %vm1826_vm7, %v14152_v59, %v14151_v1  ;;  %v14157_v8 = vld [vmem:[#allocation14_spill] sm:$0xff]  ;;  %v14158_v36 = vld [vmem:[#allocation101_spill] sm:$0xff] }
 0x301   : > { %14141 = vst [vmem:[#allocation196_spill] sm:$0xff] %v9964_v57  ;;  %v10026_v38 = vsel %vm1826_vm7, %v14158_v36, %v14157_v8  ;;  %v14159_v59 = vld [vmem:[#allocation17_spill] sm:$0xff]  ;;  %v14165_v8 = vld [vmem:[#allocation20_spill] sm:$0xff]  ;;  %v14166_v36 = vld [vmem:[#allocation75_spill] sm:$0xff]  ;;  %3870 = vxpose.xlu2.b32.start [1/16] %v3869_v52, 128  ;;  %v1927_v25 = vrot.slane %v10008_v47, 7 }
 0x302   : > { %14142 = vst [vmem:[#allocation197_spill] sm:$0xff] %v9970_v50  ;;  %v14154_v50 = vld [vmem:[#allocation93_spill] sm:$0xff]  ;;  %v10032_v5 = vsel %vm1826_vm7, %v14160_v21, %v14159_v59  ;;  %v10050_v20 = vsel %vm1826_vm7, %v14166_v36, %v14165_v8  ;;  %v14167_v59 = vld [vmem:[#allocation56_spill] sm:$0xff]  ;;  %v14174_v52 = vld [vmem:[#allocation82_spill] sm:$0xff]  ;;  %v1930_v18 = vrot.slane %v10026_v38, 7 }
 0x303   : > { %14143 = vst [vmem:[#allocation198_spill] sm:$0xff] %v9976_v46  ;;  %v10014_v57 = vsel %vm1826_vm7, %v14154_v50, %v14153_v30  ;;  %v14156_v46 = vld [vmem:[#allocation100_spill] sm:$0xff]  ;;  %v14161_v30 = vld [vmem:[#allocation18_spill] sm:$0xff]  ;;  %v14162_v1 = vld [vmem:[#allocation9_spill] sm:$0xff] }
 0x304   : > { %14144 = vst [vmem:[#allocation199_spill] sm:$0xff] %v9982_v43  ;;  %v14155_v43 = vld [vmem:[#allocation13_spill] sm:$0xff]  ;;  %v10038_v50 = vsel %vm1826_vm7, %v14162_v1, %v14161_v30  ;;  %v14170_v1 = vld [vmem:[#allocation80_spill] sm:$0xff] }
 0x305   : > { %v10020_v29 = vsel %vm1826_vm7, %v14156_v46, %v14155_v43  ;;  %v14163_v46 = vld [vmem:[#allocation19_spill] sm:$0xff]  ;;  %v14164_v43 = vld [vmem:[#allocation73_spill] sm:$0xff] }
 0x306   : > { %v10044_v56 = vsel %vm1826_vm7, %v14164_v43, %v14163_v46  ;;  %v14168_v21 = vld [vmem:[#allocation77_spill] sm:$0xff]  ;;  %v14171_v46 = vld [vmem:[#allocation22_spill] sm:$0xff] }
 0x307   : > { %v10056_v9 = vsel %vm1826_vm7, %v14168_v21, %v14167_v59  ;;  %v14169_v30 = vld [vmem:[#allocation21_spill] sm:$0xff]  ;;  %v14175_v59 = vld [vmem:[#allocation76_spill] sm:$0xff]  ;;  %v1933_v10 = vrot.slane %v10044_v56, 7 }
 0x308   : > { %v10062_v22 = vsel %vm1826_vm7, %v14170_v1, %v14169_v30  ;;  %v14172_v43 = vld [vmem:[#allocation81_spill] sm:$0xff]  ;;  %v14177_v30 = vld [vmem:[#allocation10_spill] sm:$0xff] }
 0x309   : > { %v10068_v15 = vsel %vm1826_vm7, %v14172_v43, %v14171_v46  ;;  %v14173_v8 = vld [vmem:[#allocation25_spill] sm:$0xff]  ;;  %v14178_v1 = vld [vmem:[#allocation30_spill] sm:$0xff]  ;;  %v14179_v46 = vld [vmem:[#allocation108_spill] sm:$0xff]  ;;  %v1936_v54 = vrot.slane %v10062_v22, 7 }
 0x30a   : > { %v10074_v36 = vsel %vm1826_vm7, %v14174_v52, %v14173_v8  ;;  %v14176_v21 = vld [vmem:[#allocation29_spill] sm:$0xff]  ;;  %v10086_v53 = vsel %vm1826_vm7, %v14178_v1, %v14177_v30  ;;  %v14180_v43 = vld [vmem:[#allocation31_spill] sm:$0xff]  ;;  %v14181_v8 = vld [vmem:[#allocation112_spill] sm:$0xff]  ;;  %v1937_v63 = vrot.slane %v10068_v15, 7 }
 0x30b   : > { %v10080_v2 = vsel %vm1826_vm7, %v14176_v21, %v14175_v59  ;;  %v10092_v42 = vsel %vm1826_vm7, %v14180_v43, %v14179_v46  ;;  %v14182_v52 = vld [vmem:[#allocation32_spill] sm:$0xff]  ;;  %v14183_v59 = vld [vmem:[#allocation113_spill] sm:$0xff]  ;;  %v14185_v30 = vld [vmem:[#allocation114_spill] sm:$0xff]  ;;  %v1938_v4 = vrot.slane %v10074_v36, 7  ;;  %v2007_v0 = vrot.slane %v10086_v53, 7 }
 0x30c   : > { %v10098_v35 = vsel %vm1826_vm7, %v14182_v52, %v14181_v8  ;;  %v14184_v21 = vld [vmem:[#allocation33_spill] sm:$0xff]  ;;  %v14186_v1 = vld [vmem:[#allocation34_spill] sm:$0xff]  ;;  %v14187_v46 = vld [vmem:[#allocation87_spill] sm:$0xff]  ;;  %v2006_v44 = vrot.slane %v10080_v2, 7  ;;  %v2008_v27 = vrot.slane %v10092_v42, 7 }
 0x30d   : > { %v10104_v55 = vsel %vm1826_vm7, %v14184_v21, %v14183_v59  ;;  %v10110_v23 = vsel %vm1826_vm7, %v14186_v1, %v14185_v30  ;;  %v14188_v43 = vld [vmem:[#allocation35_spill] sm:$0xff]  ;;  %v14190_v52 = vld [vmem:[#allocation36_spill] sm:$0xff]  ;;  %v14191_v59 = vld [vmem:[#allocation117_spill] sm:$0xff]  ;;  %v2009_v7 = vrot.slane %v10098_v35, 7 }
 0x30e   : > { %v10116_v17 = vsel %vm1826_vm7, %v14188_v43, %v14187_v46  ;;  %v14189_v8 = vld [vmem:[#allocation115_spill] sm:$0xff]  ;;  %v14192_v21 = vld [vmem:[#allocation37_spill] sm:$0xff]  ;;  %v14193_v30 = vld [vmem:[#allocation88_spill] sm:$0xff]  ;;  %v2010_v39 = vrot.slane %v10104_v55, 7  ;;  %v2011_v12 = vrot.slane %v10110_v23, 7 }
 0x30f   : > { %v10122_v58 = vsel %vm1826_vm7, %v14190_v52, %v14189_v8  ;;  %v10128_v3 = vsel %vm1826_vm7, %v14192_v21, %v14191_v59  ;;  %v14194_v1 = vld [vmem:[#allocation38_spill] sm:$0xff]  ;;  %v14196_v46 = vld [vmem:[#allocation67_spill] sm:$0xff]  ;;  %v14202_v59 = vld [vmem:[#allocation52_spill] sm:$0xff]  ;;  %v2012_v48 = vrot.slane %v10116_v17, 7 }
 0x310   : > { %v10134_v51 = vsel %vm1826_vm7, %v14194_v1, %v14193_v30  ;;  %v14197_v43 = vld [vmem:[#allocation78_spill] sm:$0xff]  ;;  %v14199_v8 = vld [vmem:[#allocation119_spill] sm:$0xff]  ;;  %v14205_v30 = vld [vmem:[#allocation53_spill] sm:$0xff]  ;;  %v2013_v32 = vrot.slane %v10122_v58, 7  ;;  %v2014_v14 = vrot.slane %v10128_v3, 7 }
 0x311   : > { %14195 = vst [vmem:[#allocation15_spill] sm:$0xff] %v10134_v51  ;;  %v10140_v33 = vsel %vm1826_vm7, %v14197_v43, %v14196_v46  ;;  %v14200_v52 = vld [vmem:[#allocation79_spill] sm:$0xff]  ;;  %v14206_v1 = vld [vmem:[#allocation84_spill] sm:$0xff]  ;;  %v14208_v46 = vld [vmem:[#allocation54_spill] sm:$0xff]  ;;  %v2015_v61 = vrot.slane %v10134_v51, 7 }
 0x312   : > { %14198 = vst [vmem:[#allocation89_spill] sm:$0xff] %v10140_v33  ;;  %v10146_v62 = vsel %vm1826_vm7, %v14200_v52, %v14199_v8  ;;  %v14203_v21 = vld [vmem:[#allocation83_spill] sm:$0xff]  ;;  %v10158_v45 = vsel %vm1826_vm7, %v14206_v1, %v14205_v30  ;;  %v14209_v43 = vld [vmem:[#allocation85_spill] sm:$0xff]  ;;  %v1925_v8 = vrot.slane %v9988_v19, 7  ;;  %v1926_v52 = vrot.slane %v10002_v41, 7 }
 0x313   : > { %14201 = vst [vmem:[#allocation118_spill] sm:$0xff] %v10146_v62  ;;  %v10152_v60 = vsel %vm1826_vm7, %v14203_v21, %v14202_v59  ;;  %v10164_v40 = vsel %vm1826_vm7, %v14209_v43, %v14208_v46  ;;  %v1928_v59 = vrot.slane %v10014_v57, 7  ;;  %v1929_v21 = vrot.slane %v10020_v29, 7 }
 0x314   : > { %14204 = vst [vmem:[#allocation23_spill] sm:$0xff] %v10152_v60  ;;  %v1931_v30 = vrot.slane %v10032_v5, 7  ;;  %v1932_v1 = vrot.slane %v10038_v50, 7  ;;  %v1934_v46 = vrot.slane %v10050_v20, 7  ;;  %v1935_v43 = vrot.slane %v10056_v9, 7 }
 0x315   : > { %14207 = vst [vmem:[#allocation90_spill] sm:$0xff] %v10158_v45  ;;  %v2016_v26 = vrot.slane %v10140_v33, 7  ;;  %v2017_v31 = vrot.slane %v10146_v62, 7  ;;  %v2018_v28 = vrot.slane %v10152_v60, 7  ;;  %v2019_v16 = vrot.slane %v10158_v45, 7  ;;  %v14211_v33 = vld [vmem:[#allocation116_spill] sm:$0xff] }
 0x316   : > { %14210 = vst [vmem:[#allocation39_spill] sm:$0xff] %v10164_v40  ;;  %v2020_v49 = vrot.slane %v10164_v40, 7  ;;  %v2027_v34 = vsel %vm2021_vm8, %v2014_v14, %v2015_v61  ;;  %v2028_v24 = vsel %vm2021_vm8, %v2013_v32, %v2014_v14  ;;  %v2029_v6 = vsel %vm2021_vm8, %v2012_v48, %v2013_v32 }
 0x317   : > { %v2026_v11 = vsel %vm2021_vm8, %v2015_v61, %v2016_v26  ;;  %v2023_v45 = vsel %vm2021_vm8, %v2018_v28, %v2019_v16  ;;  %v2024_v40 = vsel %vm2021_vm8, %v2017_v31, %v2018_v28  ;;  %v2025_v60 = vsel %vm2021_vm8, %v2016_v26, %v2017_v31 }
 0x318   : > { %v2022_v13 = vsel %vm2021_vm8, %v2019_v16, %v2020_v49  ;;  %v2030_v61 = vsel %vm2021_vm8, %v2011_v12, %v2012_v48  ;;  %v2031_v14 = vsel %vm2021_vm8, %v2010_v39, %v2011_v12  ;;  %v2032_v32 = vsel %vm2021_vm8, %v2009_v7, %v2010_v39  ;;  %v14213_v48 = vld [vmem:[#allocation55_spill] sm:$0xff] }
 0x319   : > { %v2033_v62 = vsel %vm2021_vm8, %v2008_v27, %v2009_v7  ;;  %v2034_v16 = vsel %vm2021_vm8, %v2007_v0, %v2008_v27  ;;  %v2035_v28 = vsel %vm2021_vm8, %v2006_v44, %v2007_v0  ;;  %v14212_v31 = vrot.slane %v14211_v33, 7 }
 0x31a   : > { %v14214_v51 = vrot.slane %v14213_v48, 7  ;;  %v2104_v39 = vsel %vm2021_vm8, %v1937_v63, %v1938_v4  ;;  %v2105_v7 = vsel %vm2021_vm8, %v1936_v54, %v1937_v63  ;;  %v2106_v27 = vsel %vm2021_vm8, %v1935_v43, %v1936_v54 }
 0x31b   : > { %v2036_v26 = vsel %vm2021_vm8, %v14212_v31, %v2006_v44  ;;  %v2107_v0 = vsel %vm2021_vm8, %v1934_v46, %v1935_v43  ;;  %v2108_v44 = vsel %vm2021_vm8, %v1933_v10, %v1934_v46  ;;  %v2109_v33 = vsel %vm2021_vm8, %v1932_v1, %v1933_v10 }
 0x31c   : > { %v2103_v12 = vsel %vm2021_vm8, %v1938_v4, %v14214_v51  ;;  %v2110_v51 = vsel %vm2021_vm8, %v1931_v30, %v1932_v1  ;;  %v2111_v4 = vsel %vm2021_vm8, %v1930_v18, %v1931_v30  ;;  %v2112_v63 = vsel %vm2021_vm8, %v1929_v21, %v1930_v18 }
 0x31d   : > { %v2113_v54 = vsel %vm2021_vm8, %v1928_v59, %v1929_v21  ;;  %v2114_v43 = vsel %vm2021_vm8, %v1927_v25, %v1928_v59  ;;  %v2115_v46 = vsel %vm2021_vm8, %v1926_v52, %v1927_v25  ;;  %v2116_v10 = vsel %vm2021_vm8, %v1925_v8, %v1926_v52  ;;  %v14222_v59 = vld [vmem:[#allocation118_spill] sm:$0xff]  ;;  %v14228_v21 = vld [vmem:[#allocation39_spill] sm:$0xff] }
 0x31e   : > { %v2117_v1 = vsel %vm2021_vm8, %v2020_v49, %v1925_v8  ;;  %v10262_v31 = vsel %vm7387_vm9, %v2115_v46, %v10008_v47  ;;  %v10267_v18 = vsel %vm7387_vm9, %v2114_v43, %v10014_v57  ;;  %v10277_v52 = vsel %vm7387_vm9, %v2116_v10, %v10002_v41  ;;  %v14220_v8 = vld [vmem:[#allocation89_spill] sm:$0xff] }
 0x31f   : > { %v10272_v25 = vsel %vm7387_vm9, %v2117_v1, %v9988_v19  ;;  %v10282_v49 = vsel %vm7387_vm9, %v2113_v54, %v10020_v29  ;;  %v10287_v57 = vsel %vm7387_vm9, %v2112_v63, %v10026_v38  ;;  %v10292_v19 = vsel %vm7387_vm9, %v2111_v4, %v10032_v5 }
 0x320   : > { %v10297_v41 = vsel %vm7387_vm9, %v2110_v51, %v10038_v50  ;;  %v10302_v29 = vsel %vm7387_vm9, %v2109_v33, %v10044_v56  ;;  %v10307_v38 = vsel %vm7387_vm9, %v2108_v44, %v10050_v20  ;;  %v10312_v47 = vsel %vm7387_vm9, %v2107_v0, %v10056_v9 }
 0x321   : > { %v10317_v5 = vsel %vm7387_vm9, %v2106_v27, %v10062_v22  ;;  %v10322_v56 = vsel %vm7387_vm9, %v2105_v7, %v10068_v15  ;;  %v10327_v20 = vsel %vm7387_vm9, %v2104_v39, %v10074_v36  ;;  %v10332_v9 = vsel %vm7387_vm9, %v2103_v12, %v14213_v48 }
 0x322   : > { %v10337_v22 = vsel %vm7387_vm9, %v2036_v26, %v10080_v2  ;;  %v10342_v15 = vsel %vm7387_vm9, %v2035_v28, %v10086_v53  ;;  %v10347_v50 = vsel %vm7387_vm9, %v2034_v16, %v10092_v42  ;;  %v10352_v36 = vsel %vm7387_vm9, %v2033_v62, %v10098_v35 }
 0x323   : > { %v10357_v2 = vsel %vm7387_vm9, %v2032_v32, %v10104_v55  ;;  %v10362_v53 = vsel %vm7387_vm9, %v2031_v14, %v10110_v23  ;;  %v10367_v42 = vsel %vm7387_vm9, %v2030_v61, %v10116_v17  ;;  %v10372_v62 = vsel %vm7387_vm9, %v2029_v6, %v10122_v58  ;;  %v14218_v55 = vld [vmem:[#allocation15_spill] sm:$0xff] }
 0x324   : > { %14216 = vst [vmem:[#allocation92_spill] sm:$0xff] %v10372_v62  ;;  %v10377_v35 = vsel %vm7387_vm9, %v2028_v24, %v10128_v3  ;;  %v10382_v23 = vsel %vm7387_vm9, %v2027_v34, %v14218_v55  ;;  %v10387_v17 = vsel %vm7387_vm9, %v2026_v11, %v14220_v8  ;;  %v10392_v6 = vsel %vm7387_vm9, %v2025_v60, %v14222_v59  ;;  %v14224_v58 = vld [vmem:[#allocation23_spill] sm:$0xff]  ;;  %v14226_v24 = vld [vmem:[#allocation90_spill] sm:$0xff] }
 0x325   : > { %14217 = vst [vmem:[#allocation71_spill] sm:$0xff] %v10377_v35  ;;  %v10397_v3 = vsel %vm7387_vm9, %v2024_v40, %v14224_v58  ;;  %v10402_v34 = vsel %vm7387_vm9, %v2023_v45, %v14226_v24  ;;  %v10407_v11 = vsel %vm7387_vm9, %v2022_v13, %v14228_v21  ;;  %v2216_v61 = vrot.slane %v10272_v25, 6 }
 0x326   : > { %14219 = vst [vmem:[#allocation93_spill] sm:$0xff] %v10382_v23  ;;  %v2217_v60 = vrot.slane %v10277_v52, 6  ;;  %v2218_v14 = vrot.slane %v10262_v31, 6  ;;  %v2219_v32 = vrot.slane %v10267_v18, 6  ;;  %v2220_v40 = vrot.slane %v10282_v49, 6 }
 0x327   : > { %14221 = vst [vmem:[#allocation13_spill] sm:$0xff] %v10387_v17  ;;  %v2221_v16 = vrot.slane %v10287_v57, 6  ;;  %v2222_v45 = vrot.slane %v10292_v19, 6  ;;  %v2223_v28 = vrot.slane %v10297_v41, 6  ;;  %v2224_v26 = vrot.slane %v10302_v29, 6 }
 0x328   : > { %14223 = vst [vmem:[#allocation100_spill] sm:$0xff] %v10392_v6  ;;  %v2225_v13 = vrot.slane %v10307_v38, 6  ;;  %v2226_v48 = vrot.slane %v10312_v47, 6  ;;  %v2227_v12 = vrot.slane %v10317_v5, 6  ;;  %v2228_v39 = vrot.slane %v10322_v56, 6 }
 0x329   : > { %14225 = vst [vmem:[#allocation14_spill] sm:$0xff] %v10397_v3  ;;  %v2229_v7 = vrot.slane %v10327_v20, 6  ;;  %v2230_v27 = vrot.slane %v10332_v9, 6  ;;  %v2297_v0 = vrot.slane %v10337_v22, 6  ;;  %v2298_v44 = vrot.slane %v10342_v15, 6 }
 0x32a   : > { %14227 = vst [vmem:[#allocation101_spill] sm:$0xff] %v10402_v34  ;;  %v2299_v33 = vrot.slane %v10347_v50, 6  ;;  %v2300_v51 = vrot.slane %v10352_v36, 6  ;;  %v2301_v4 = vrot.slane %v10357_v2, 6  ;;  %v2302_v63 = vrot.slane %v10362_v53, 6 }
 0x32b   : > { %14229 = vst [vmem:[#allocation17_spill] sm:$0xff] %v10407_v11  ;;  %v2303_v54 = vrot.slane %v10367_v42, 6  ;;  %v2304_v43 = vrot.slane %v10372_v62, 6  ;;  %v2305_v46 = vrot.slane %v10377_v35, 6  ;;  %v2306_v10 = vrot.slane %v10382_v23, 6  ;;  %v14230_v35 = vld [vmem:[#allocation86_spill] sm:$0xff] }
 0x32c   : > { %v2307_v1 = vrot.slane %v10387_v17, 6  ;;  %v2308_v30 = vrot.slane %v10392_v6, 6  ;;  %v2309_v55 = vrot.slane %v10397_v3, 6  ;;  %v2310_v8 = vrot.slane %v10402_v34, 6 }
 0x32d   : > { %v2311_v59 = vrot.slane %v10407_v11, 6  ;;  %v2319_v58 = vsel %vm2312_vm10, %v2304_v43, %v2305_v46  ;;  %v2320_v24 = vsel %vm2312_vm10, %v2303_v54, %v2304_v43  ;;  %v2318_v34 = vsel %vm2312_vm10, %v2305_v46, %v2306_v10 }
 0x32e   : > { %v2315_v21 = vsel %vm2312_vm10, %v2308_v30, %v2309_v55  ;;  %v2316_v17 = vsel %vm2312_vm10, %v2307_v1, %v2308_v30  ;;  %v2317_v6 = vsel %vm2312_vm10, %v2306_v10, %v2307_v1  ;;  %v2314_v3 = vsel %vm2312_vm10, %v2309_v55, %v2310_v8 }
 0x32f   : > { %v2313_v11 = vsel %vm2312_vm10, %v2310_v8, %v2311_v59  ;;  %v2321_v43 = vsel %vm2312_vm10, %v2302_v63, %v2303_v54  ;;  %v2322_v23 = vsel %vm2312_vm10, %v2301_v4, %v2302_v63  ;;  %v2323_v30 = vsel %vm2312_vm10, %v2300_v51, %v2301_v4  ;;  %v14232_v8 = vld [vmem:[#allocation57_spill] sm:$0xff] }
 0x330   : > { %v2324_v1 = vsel %vm2312_vm10, %v2299_v33, %v2300_v51  ;;  %v2325_v46 = vsel %vm2312_vm10, %v2298_v44, %v2299_v33  ;;  %v2326_v10 = vsel %vm2312_vm10, %v2297_v0, %v2298_v44  ;;  %v14231_v55 = vrot.slane %v14230_v35, 6 }
 0x331   : > { %v14233_v62 = vrot.slane %v14232_v8, 6  ;;  %v2394_v4 = vsel %vm2312_vm10, %v2229_v7, %v2230_v27  ;;  %v2395_v51 = vsel %vm2312_vm10, %v2228_v39, %v2229_v7  ;;  %v2396_v33 = vsel %vm2312_vm10, %v2227_v12, %v2228_v39 }
 0x332   : > { %v2327_v54 = vsel %vm2312_vm10, %v14231_v55, %v2297_v0  ;;  %v2397_v35 = vsel %vm2312_vm10, %v2226_v48, %v2227_v12  ;;  %v2398_v0 = vsel %vm2312_vm10, %v2225_v13, %v2226_v48  ;;  %v2399_v44 = vsel %vm2312_vm10, %v2224_v26, %v2225_v13 }
 0x333   : > { %v2393_v63 = vsel %vm2312_vm10, %v2230_v27, %v14233_v62  ;;  %v2400_v62 = vsel %vm2312_vm10, %v2223_v28, %v2224_v26  ;;  %v2401_v27 = vsel %vm2312_vm10, %v2222_v45, %v2223_v28  ;;  %v2402_v7 = vsel %vm2312_vm10, %v2221_v16, %v2222_v45 }
 0x334   : > { %v2403_v39 = vsel %vm2312_vm10, %v2220_v40, %v2221_v16  ;;  %v2404_v12 = vsel %vm2312_vm10, %v2219_v32, %v2220_v40  ;;  %v2405_v48 = vsel %vm2312_vm10, %v2218_v14, %v2219_v32  ;;  %v2406_v13 = vsel %vm2312_vm10, %v2217_v60, %v2218_v14  ;;  %v14236_v32 = vld [vmem:[#allocation92_spill] sm:$0xff]  ;;  %v14238_v16 = vld [vmem:[#allocation71_spill] sm:$0xff] }
 0x335   : > { %v2407_v26 = vsel %vm2312_vm10, %v2216_v61, %v2217_v60  ;;  %v2408_v28 = vsel %vm2312_vm10, %v2311_v59, %v2216_v61  ;;  %v10513_v40 = vsel %vm2411_vm11, %v2406_v13, %v10262_v31  ;;  %v10518_v14 = vsel %vm2411_vm11, %v2405_v48, %v10267_v18  ;;  %v14240_v59 = vld [vmem:[#allocation93_spill] sm:$0xff] }
 0x336   : > { %v10508_v55 = vsel %vm2411_vm11, %v2407_v26, %v10277_v52  ;;  %v10523_v60 = vsel %vm2411_vm11, %v2408_v28, %v10272_v25  ;;  %v10528_v52 = vsel %vm2411_vm11, %v2404_v12, %v10282_v49  ;;  %v10533_v31 = vsel %vm2411_vm11, %v2403_v39, %v10287_v57 }
 0x337   : > { %v10538_v18 = vsel %vm2411_vm11, %v2402_v7, %v10292_v19  ;;  %v10543_v25 = vsel %vm2411_vm11, %v2401_v27, %v10297_v41  ;;  %v10548_v49 = vsel %vm2411_vm11, %v2400_v62, %v10302_v29  ;;  %v10553_v57 = vsel %vm2411_vm11, %v2399_v44, %v10307_v38 }
 0x338   : > { %v10558_v19 = vsel %vm2411_vm11, %v2398_v0, %v10312_v47  ;;  %v10563_v41 = vsel %vm2411_vm11, %v2397_v35, %v10317_v5  ;;  %v10568_v29 = vsel %vm2411_vm11, %v2396_v33, %v10322_v56  ;;  %v10573_v38 = vsel %vm2411_vm11, %v2395_v51, %v10327_v20 }
 0x339   : > { %v10578_v47 = vsel %vm2411_vm11, %v2394_v4, %v10332_v9  ;;  %v10583_v5 = vsel %vm2411_vm11, %v2393_v63, %v14232_v8  ;;  %v10588_v56 = vsel %vm2411_vm11, %v2327_v54, %v10337_v22  ;;  %v10593_v20 = vsel %vm2411_vm11, %v2326_v10, %v10342_v15 }
 0x33a   : > { %v10598_v9 = vsel %vm2411_vm11, %v2325_v46, %v10347_v50  ;;  %v10603_v61 = vsel %vm2411_vm11, %v2324_v1, %v10352_v36  ;;  %v10608_v22 = vsel %vm2411_vm11, %v2323_v30, %v10357_v2  ;;  %v10613_v15 = vsel %vm2411_vm11, %v2322_v23, %v10362_v53  ;;  %v14242_v23 = vld [vmem:[#allocation13_spill] sm:$0xff]  ;;  %v14246_v30 = vld [vmem:[#allocation14_spill] sm:$0xff] }
 0x33b   : > { %v10618_v50 = vsel %vm2411_vm11, %v2321_v43, %v10367_v42  ;;  %v10623_v36 = vsel %vm2411_vm11, %v2320_v24, %v14236_v32  ;;  %v10628_v2 = vsel %vm2411_vm11, %v2319_v58, %v14238_v16  ;;  %v10633_v53 = vsel %vm2411_vm11, %v2318_v34, %v14240_v59  ;;  %v14244_v43 = vld [vmem:[#allocation100_spill] sm:$0xff]  ;;  %v14248_v1 = vld [vmem:[#allocation101_spill] sm:$0xff] }
 0x33c   : > { %14235 = vst [vmem:[#allocation72_spill] sm:$0xff] %v10618_v50  ;;  %v10638_v42 = vsel %vm2411_vm11, %v2317_v6, %v14242_v23  ;;  %v10643_v24 = vsel %vm2411_vm11, %v2316_v17, %v14244_v43  ;;  %v10648_v58 = vsel %vm2411_vm11, %v2315_v21, %v14246_v30  ;;  %v10653_v34 = vsel %vm2411_vm11, %v2314_v3, %v14248_v1  ;;  %v14250_v46 = vld [vmem:[#allocation17_spill] sm:$0xff] }
 0x33d   : > { %14237 = vst [vmem:[#allocation18_spill] sm:$0xff] %v10623_v36  ;;  %v10658_v6 = vsel %vm2411_vm11, %v2313_v11, %v14250_v46  ;;  %v2509_v17 = vrot.slane %v10508_v55, 4  ;;  %v2510_v54 = vrot.slane %v10513_v40, 4  ;;  %v2511_v8 = vrot.slane %v10518_v14, 4 }
 0x33e   : > { %14239 = vst [vmem:[#allocation9_spill] sm:$0xff] %v10628_v2  ;;  %v2512_v21 = vrot.slane %v10528_v52, 4  ;;  %v2513_v63 = vrot.slane %v10533_v31, 4  ;;  %v2514_v3 = vrot.slane %v10538_v18, 4  ;;  %v2515_v4 = vrot.slane %v10543_v25, 4 }
 0x33f   : > { %14241 = vst [vmem:[#allocation19_spill] sm:$0xff] %v10633_v53  ;;  %v2516_v51 = vrot.slane %v10548_v49, 4  ;;  %v2517_v11 = vrot.slane %v10553_v57, 4  ;;  %v2518_v33 = vrot.slane %v10558_v19, 4  ;;  %v2519_v35 = vrot.slane %v10563_v41, 4 }
 0x340   : > { %14243 = vst [vmem:[#allocation73_spill] sm:$0xff] %v10638_v42  ;;  %v2520_v0 = vrot.slane %v10568_v29, 4  ;;  %v2521_v44 = vrot.slane %v10573_v38, 4  ;;  %v2522_v62 = vrot.slane %v10578_v47, 4  ;;  %v2523_v27 = vrot.slane %v10583_v5, 4 }
 0x341   : > { %14245 = vst [vmem:[#allocation20_spill] sm:$0xff] %v10643_v24  ;;  %v2589_v7 = vrot.slane %v10588_v56, 4  ;;  %v2590_v39 = vrot.slane %v10593_v20, 4  ;;  %v2591_v12 = vrot.slane %v10598_v9, 4  ;;  %v2592_v48 = vrot.slane %v10603_v61, 4 }
 0x342   : > { %14247 = vst [vmem:[#allocation75_spill] sm:$0xff] %v10648_v58  ;;  %v2593_v13 = vrot.slane %v10608_v22, 4  ;;  %v2594_v26 = vrot.slane %v10613_v15, 4  ;;  %v2595_v28 = vrot.slane %v10618_v50, 4  ;;  %v2596_v45 = vrot.slane %v10623_v36, 4  ;;  %v14252_v36 = vld [vmem:[#allocation12_spill] sm:$0xff] }
 0x343   : > { %14249 = vst [vmem:[#allocation56_spill] sm:$0xff] %v10653_v34  ;;  %v2597_v32 = vrot.slane %v10628_v2, 4  ;;  %v2598_v16 = vrot.slane %v10633_v53, 4  ;;  %v2599_v59 = vrot.slane %v10638_v42, 4  ;;  %v2600_v23 = vrot.slane %v10643_v24, 4 }
 0x344   : > { %14251 = vst [vmem:[#allocation77_spill] sm:$0xff] %v10658_v6  ;;  %v2601_v43 = vrot.slane %v10648_v58, 4  ;;  %v2602_v30 = vrot.slane %v10653_v34, 4  ;;  %v2603_v1 = vrot.slane %v10658_v6, 4  ;;  %v2612_v46 = vsel %vm2604_vm12, %v2595_v28, %v2596_v45 }
 0x345   : > { %v2608_v10 = vsel %vm2604_vm12, %v2599_v59, %v2600_v23  ;;  %v2609_v2 = vsel %vm2604_vm12, %v2598_v16, %v2599_v59  ;;  %v2610_v42 = vsel %vm2604_vm12, %v2597_v32, %v2598_v16  ;;  %v2611_v24 = vsel %vm2604_vm12, %v2596_v45, %v2597_v32 }
 0x346   : > { %v2605_v34 = vsel %vm2604_vm12, %v2602_v30, %v2603_v1  ;;  %v2606_v6 = vsel %vm2604_vm12, %v2601_v43, %v2602_v30  ;;  %v2607_v58 = vsel %vm2604_vm12, %v2600_v23, %v2601_v43  ;;  %v2613_v53 = vsel %vm2604_vm12, %v2594_v26, %v2595_v28  ;;  %v14254_v43 = vld [vmem:[#allocation129_spill] sm:$0xff] }
 0x347   : > { %v2614_v59 = vsel %vm2604_vm12, %v2593_v13, %v2594_v26  ;;  %v2615_v16 = vsel %vm2604_vm12, %v2592_v48, %v2593_v13  ;;  %v2616_v45 = vsel %vm2604_vm12, %v2591_v12, %v2592_v48  ;;  %v2617_v32 = vsel %vm2604_vm12, %v2590_v39, %v2591_v12 }
 0x348   : > { %v2618_v30 = vsel %vm2604_vm12, %v2589_v7, %v2590_v39  ;;  %v14253_v23 = vrot.slane %v14252_v36, 4  ;;  %v14255_v50 = vrot.slane %v14254_v43, 4  ;;  %v2685_v13 = vsel %vm2604_vm12, %v2522_v62, %v2523_v27 }
 0x349   : > { %v2686_v48 = vsel %vm2604_vm12, %v2521_v44, %v2522_v62  ;;  %v2687_v12 = vsel %vm2604_vm12, %v2520_v0, %v2521_v44  ;;  %v2688_v36 = vsel %vm2604_vm12, %v2519_v35, %v2520_v0  ;;  %v2690_v39 = vsel %vm2604_vm12, %v2517_v11, %v2518_v33 }
 0x34a   : > { %v2619_v28 = vsel %vm2604_vm12, %v14253_v23, %v2589_v7  ;;  %v2684_v26 = vsel %vm2604_vm12, %v2523_v27, %v14255_v50  ;;  %v2689_v7 = vsel %vm2604_vm12, %v2518_v33, %v2519_v35  ;;  %v2691_v50 = vsel %vm2604_vm12, %v2516_v51, %v2517_v11 }
 0x34b   : > { %v2692_v27 = vsel %vm2604_vm12, %v2515_v4, %v2516_v51  ;;  %v2693_v62 = vsel %vm2604_vm12, %v2514_v3, %v2515_v4  ;;  %v2694_v44 = vsel %vm2604_vm12, %v2513_v63, %v2514_v3  ;;  %v2695_v0 = vsel %vm2604_vm12, %v2512_v21, %v2513_v63 }
 0x34c   : > { %v2696_v35 = vsel %vm2604_vm12, %v2511_v8, %v2512_v21  ;;  %v2697_v33 = vsel %vm2604_vm12, %v2510_v54, %v2511_v8  ;;  %v2698_v11 = vsel %vm2604_vm12, %v2509_v17, %v2510_v54  ;;  %v14256_v51 = vrot.slane %v10523_v60, 4 }
 0x34d   : > { %v10766_v21 = vsel %vm2703_vm13, %v2697_v33, %v10518_v14  ;;  %v10781_v37 = vsel %vm2703_vm13, %v2698_v11, %v10513_v40  ;;  %v10786_v14 = vsel %vm2703_vm13, %v2696_v35, %v10528_v52  ;;  %v10801_v40 = vsel %vm2703_vm13, %v2693_v62, %v10543_v25 }
 0x34e   : > { %v2699_v4 = vsel %vm2604_vm12, %v14256_v51, %v2509_v17  ;;  %v14257_v23 = vmov %v14256_v51  ;;  %v10806_v52 = vsel %vm2703_vm13, %v2692_v27, %v10548_v49  ;;  %v10821_v25 = vsel %vm2703_vm13, %v2689_v7, %v10563_v41 }
 0x34f   : > { %v2700_v3 = vsel %vm2604_vm12, %v2603_v1, %v14257_v23  ;;  %v10776_v54 = vsel %vm2703_vm13, %v2699_v4, %v10508_v55  ;;  %v10796_v55 = vsel %vm2703_vm13, %v2694_v44, %v10538_v18  ;;  %v10816_v18 = vsel %vm2703_vm13, %v2690_v39, %v10558_v19  ;;  %v14259_v1 = vld [vmem:[#allocation72_spill] sm:$0xff] }
 0x350   : > { %v10771_v8 = vsel %vm2703_vm13, %v2700_v3, %v10523_v60  ;;  %v10791_v60 = vsel %vm2703_vm13, %v2695_v0, %v10533_v31  ;;  %v10811_v31 = vsel %vm2703_vm13, %v2691_v50, %v10553_v57  ;;  %v10826_v49 = vsel %vm2703_vm13, %v2688_v36, %v10568_v29 }
 0x351   : > { %v10831_v57 = vsel %vm2703_vm13, %v2687_v12, %v10573_v38  ;;  %v10836_v19 = vsel %vm2703_vm13, %v2686_v48, %v10578_v47  ;;  %v10841_v41 = vsel %vm2703_vm13, %v2685_v13, %v10583_v5  ;;  %v10846_v29 = vsel %vm2703_vm13, %v2684_v26, %v14254_v43  ;;  %v14266_v43 = vld [vmem:[#allocation56_spill] sm:$0xff]  ;;  %v14267_v26 = vld [vmem:[#allocation77_spill] sm:$0xff] }
 0x352   : > { %v10851_v38 = vsel %vm2703_vm13, %v2619_v28, %v10588_v56  ;;  %v10856_v47 = vsel %vm2703_vm13, %v2618_v30, %v10593_v20  ;;  %v10861_v5 = vsel %vm2703_vm13, %v2617_v32, %v10598_v9  ;;  %v10866_v17 = vsel %vm2703_vm13, %v2616_v45, %v10603_v61  ;;  %v14260_v32 = vld [vmem:[#allocation18_spill] sm:$0xff]  ;;  %v14261_v45 = vld [vmem:[#allocation9_spill] sm:$0xff]  ;;  %v14264_v30 = vld [vmem:[#allocation20_spill] sm:$0xff] }
 0x353   : > { %v10871_v56 = vsel %vm2703_vm13, %v2615_v16, %v10608_v22  ;;  %v10876_v20 = vsel %vm2703_vm13, %v2614_v59, %v10613_v15  ;;  %v10881_v9 = vsel %vm2703_vm13, %v2613_v53, %v14259_v1  ;;  %v10886_v61 = vsel %vm2703_vm13, %v2612_v46, %v14260_v32  ;;  %v14262_v16 = vld [vmem:[#allocation19_spill] sm:$0xff]  ;;  %v14263_v59 = vld [vmem:[#allocation73_spill] sm:$0xff] }
 0x354   : > { %v10891_v22 = vsel %vm2703_vm13, %v2611_v24, %v14261_v45  ;;  %v10896_v15 = vsel %vm2703_vm13, %v2610_v42, %v14262_v16  ;;  %v10901_v53 = vsel %vm2703_vm13, %v2609_v2, %v14263_v59  ;;  %v10906_v46 = vsel %vm2703_vm13, %v2608_v10, %v14264_v30  ;;  %v14265_v28 = vld [vmem:[#allocation75_spill] sm:$0xff]  ;;  %v14581_v16 = vld [vmem:[#allocation196_spill] sm:$0xff] }
 0x355   : > { %v10911_v24 = vsel %vm2703_vm13, %v2607_v58, %v14265_v28  ;;  %v10916_v42 = vsel %vm2703_vm13, %v2606_v6, %v14266_v43  ;;  %v10921_v2 = vsel %vm2703_vm13, %v2605_v34, %v14267_v26  ;;  %v10927_v10 = vsel %vm2802_vm14, %v10776_v54, %v10781_v37  ;;  %v14295_v26 = vld [vmem:[#allocation63_spill] sm:$0xff] }
 0x356   : > { %v10933_v58 = vsel %vm2802_vm14, %v10921_v2, %v10771_v8  ;;  %v10939_v6 = vsel %vm2802_vm14, %v10766_v21, %v10786_v14  ;;  %v10945_v34 = vsel %vm2802_vm14, %v10791_v60, %v10796_v55  ;;  %v10951_v48 = vsel %vm2802_vm14, %v10801_v40, %v10806_v52 }
 0x357   : > { %14269 = vst [vmem:[#allocation21_spill] sm:$0xff] %v10939_v6  ;;  %v10957_v12 = vsel %vm2802_vm14, %v10811_v31, %v10816_v18  ;;  %v10963_v36 = vsel %vm2802_vm14, %v10821_v25, %v10826_v49  ;;  %v10969_v7 = vsel %vm2802_vm14, %v10831_v57, %v10836_v19  ;;  %v10975_v39 = vsel %vm2802_vm14, %v10841_v41, %v10846_v29 }
 0x358   : > { %14270 = vst [vmem:[#allocation80_spill] sm:$0xff] %v10951_v48  ;;  %v10981_v50 = vsel %vm2802_vm14, %v10851_v38, %v10856_v47  ;;  %v10987_v27 = vsel %vm2802_vm14, %v10861_v5, %v10866_v17  ;;  %v10993_v62 = vsel %vm2802_vm14, %v10871_v56, %v10876_v20  ;;  %v10999_v44 = vsel %vm2802_vm14, %v10881_v9, %v10886_v61 }
 0x359   : > { %14271 = vst [vmem:[#allocation22_spill] sm:$0xff] %v10957_v12  ;;  %v11005_v0 = vsel %vm2802_vm14, %v10891_v22, %v10896_v15  ;;  %v11011_v35 = vsel %vm2802_vm14, %v10901_v53, %v10906_v46  ;;  %v11017_v33 = vsel %vm2802_vm14, %v10911_v24, %v10916_v42  ;;  %v11023_v51 = vsel %vm2901_vm15, %v10927_v10, %v10939_v6 }
 0x35a   : > { %14272 = vst [vmem:[#allocation81_spill] sm:$0xff] %v10963_v36  ;;  %v11029_v4 = vsel %vm2901_vm15, %v11017_v33, %v10933_v58  ;;  %v11035_v23 = vsel %vm2901_vm15, %v10945_v34, %v10951_v48  ;;  %v11041_v3 = vsel %vm2901_vm15, %v10957_v12, %v10963_v36  ;;  %v11047_v63 = vsel %vm2901_vm15, %v10969_v7, %v10975_v39 }
 0x35b   : > { %14273 = vst [vmem:[#allocation25_spill] sm:$0xff] %v10969_v7  ;;  %v11053_v1 = vsel %vm2901_vm15, %v10981_v50, %v10987_v27  ;;  %v11059_v32 = vsel %vm2901_vm15, %v10993_v62, %v10999_v44  ;;  %v11065_v45 = vsel %vm2901_vm15, %v11005_v0, %v11011_v35  ;;  %v11071_v59 = vsel %vm3000_vm0, %v11023_v51, %v11035_v23 }
 0x35c   : > { %14274 = vst [vmem:[#allocation82_spill] sm:$0xff] %v10975_v39  ;;  %v11077_v30 = vsel %vm3000_vm0, %v11065_v45, %v11029_v4  ;;  %v11083_v28 = vsel %vm3000_vm0, %v11041_v3, %v11047_v63  ;;  %v11089_v43 = vsel %vm3000_vm0, %v11053_v1, %v11059_v32 }
 0x35d   : > { %14275 = vst [vmem:[#allocation76_spill] sm:$0xff] %v10987_v27 }
 0x35e   : > { %14276 = vst [vmem:[#allocation29_spill] sm:$0xff] %v10993_v62 }
 0x35f   : > { %14277 = vst [vmem:[#allocation10_spill] sm:$0xff] %v10999_v44  ;;  %v14304_v44 = vld [vmem:[#allocation122_spill] sm:$0xff] }
 0x360   : > { %14278 = vst [vmem:[#allocation30_spill] sm:$0xff] %v11005_v0 }
 0x361   : > { %14279 = vst [vmem:[#allocation108_spill] sm:$0xff] %v11011_v35  ;;  %v14300_v35 = vld [vmem:[#allocation74_spill] sm:$0xff] }
 0x362   : > { %14280 = vst [vmem:[#allocation31_spill] sm:$0xff] %v11017_v33  ;;  %v14303_v33 = vld [vmem:[#allocation68_spill] sm:$0xff] }
 0x363   : > { %14282 = vst [vmem:[#allocation112_spill] sm:$0xff] %v11023_v51 }
 0x364   : > { %14283 = vst [vmem:[#allocation32_spill] sm:$0xff] %v11029_v4  ;;  %v3100_v4 = vsel %vm3099_vm1, %v11089_v43, %v11077_v30 }
 0x365   : > { %14284 = vst [vmem:[#allocation113_spill] sm:$0xff] %v11035_v23  ;;  %v14296_v23 = vld [vmem:[#allocation121_spill] sm:$0xff] }
 0x366   : > { %14285 = vst [vmem:[#allocation33_spill] sm:$0xff] %v11041_v3  ;;  %v11095_v51 = vsel %vm2802_vm14, %v14296_v23, %v14295_v26  ;;  %v14299_v3 = vld [vmem:[#allocation66_spill] sm:$0xff] }
 0x367   : > { %14286 = vst [vmem:[#allocation114_spill] sm:$0xff] %v11047_v63  ;;  %v3116_v63 = vsel %vm3099_vm1, %v11071_v59, %v11083_v28 }
 0x368   : > { %14287 = vst [vmem:[#allocation34_spill] sm:$0xff] %v11053_v1  ;;  %v14302_v1 = vld [vmem:[#allocation64_spill] sm:$0xff]  ;;  %v3645_v26 = vpack.i.bf16 %v3116_v63, %v3100_v4  ;;  %v14314_v4 = vld [vmem:[#allocation137_spill] sm:$0xff] }
 0x369   : > { %14288 = vst [vmem:[#allocation87_spill] sm:$0xff] %v11059_v32  ;;  %v11109_v32 = vsel %vm2802_vm14, %v14300_v35, %v14299_v3  ;;  %v11115_v23 = vsel %vm2802_vm14, %v14303_v33, %v14302_v1  ;;  %v14310_v35 = vld [vmem:[#allocation136_spill] sm:$0xff]  ;;  %v14311_v3 = vld [vmem:[#allocation135_spill] sm:$0xff]  ;;  %v14313_v33 = vld [vmem:[#allocation138_spill] sm:$0xff] }
 0x36a   : > { %14289 = vst [vmem:[#allocation35_spill] sm:$0xff] %v11065_v45  ;;  %v11133_v27 = vsel %vm2802_vm14, %v14311_v3, %v14310_v35  ;;  %v11139_v63 = vsel %vm2802_vm14, %v14314_v4, %v14313_v33  ;;  %v14317_v1 = vld [vmem:[#allocation139_spill] sm:$0xff]  ;;  %v14323_v3 = vld [vmem:[#allocation130_spill] sm:$0xff]  ;;  %3646 = vxpose.xlu0.b32.start [1/16] %v3645_v26, 128  ;;  %v14326_v4 = vld [vmem:[#allocation132_spill] sm:$0xff] }
 0x36b   : > { %14291 = vst [vmem:[#allocation115_spill] sm:$0xff] %v11071_v59  ;;  %v14308_v59 = vld [vmem:[#allocation133_spill] sm:$0xff]  ;;  %v14322_v35 = vld [vmem:[#allocation131_spill] sm:$0xff] }
 0x36c   : > { %14292 = vst [vmem:[#allocation36_spill] sm:$0xff] %v11077_v30  ;;  %v14305_v30 = vld [vmem:[#allocation69_spill] sm:$0xff]  ;;  %v11157_v39 = vsel %vm2802_vm14, %v14323_v3, %v14322_v35  ;;  %v14325_v33 = vld [vmem:[#allocation91_spill] sm:$0xff]  ;;  %v14334_v35 = vld [vmem:[#allocation60_spill] sm:$0xff] }
 0x36d   : > { %14293 = vst [vmem:[#allocation117_spill] sm:$0xff] %v11083_v28  ;;  %v14307_v28 = vld [vmem:[#allocation134_spill] sm:$0xff]  ;;  %v11163_v36 = vsel %vm2802_vm14, %v14326_v4, %v14325_v33  ;;  %v14335_v26 = vld [vmem:[#allocation125_spill] sm:$0xff]  ;;  %v14338_v4 = vld [vmem:[#allocation124_spill] sm:$0xff] }
 0x36e   : > { %14294 = vst [vmem:[#allocation37_spill] sm:$0xff] %v11089_v43  ;;  %v11121_v43 = vsel %vm2802_vm14, %v14305_v30, %v14304_v44  ;;  %v11127_v0 = vsel %vm2802_vm14, %v14308_v59, %v14307_v28  ;;  %v14316_v44 = vld [vmem:[#allocation140_spill] sm:$0xff]  ;;  %v14319_v59 = vld [vmem:[#allocation142_spill] sm:$0xff]  ;;  %v14320_v28 = vld [vmem:[#allocation141_spill] sm:$0xff]  ;;  %v11181_v3 = vsel %vm2802_vm14, %v14335_v26, %v14334_v35 }
 0x36f   : > { %14297 = vst [vmem:[#allocation88_spill] sm:$0xff] %v11095_v51  ;;  %v11145_v30 = vsel %vm2802_vm14, %v14317_v1, %v14316_v44  ;;  %v11151_v62 = vsel %vm2802_vm14, %v14320_v28, %v14319_v59  ;;  %v14328_v44 = vld [vmem:[#allocation8_spill] sm:$0xff]  ;;  %v14329_v1 = vld [vmem:[#allocation143_spill] sm:$0xff]  ;;  %v14332_v28 = vld [vmem:[#allocation58_spill] sm:$0xff]  ;;  %v11211_v35 = vsel %vm2901_vm15, %v11127_v0, %v11133_v27 }
 0x370   : > { %14301 = vst [vmem:[#allocation38_spill] sm:$0xff] %v11109_v32  ;;  %v11169_v7 = vsel %vm2802_vm14, %v14329_v1, %v14328_v44  ;;  %v14331_v59 = vld [vmem:[#allocation59_spill] sm:$0xff]  ;;  %v14337_v33 = vld [vmem:[#allocation61_spill] sm:$0xff]  ;;  %v14340_v44 = vld [vmem:[#allocation16_spill] sm:$0xff]  ;;  %v11217_v26 = vsel %vm2901_vm15, %v11139_v63, %v11145_v30 }
 0x371   : > { %14306 = vst [vmem:[#allocation67_spill] sm:$0xff] %v11121_v43  ;;  %v11175_v48 = vsel %vm2802_vm14, %v14332_v28, %v14331_v59  ;;  %v11187_v12 = vsel %vm2802_vm14, %v14338_v4, %v14337_v33  ;;  %v14341_v1 = vld [vmem:[#allocation144_spill] sm:$0xff]  ;;  %v11199_v59 = vsel %vm2901_vm15, %v11095_v51, %v11109_v32  ;;  %v11205_v28 = vsel %vm2901_vm15, %v11115_v23, %v11121_v43 }
 0x372   : > { %14309 = vst [vmem:[#allocation78_spill] sm:$0xff] %v11127_v0  ;;  %v11193_v6 = vsel %vm2802_vm14, %v14341_v1, %v14340_v44  ;;  %v11223_v33 = vsel %vm2901_vm15, %v11151_v62, %v11157_v39  ;;  %v11229_v4 = vsel %vm2901_vm15, %v11163_v36, %v11169_v7  ;;  %v11235_v44 = vsel %vm2901_vm15, %v11175_v48, %v11181_v3 }
 0x373   : > { %14312 = vst [vmem:[#allocation119_spill] sm:$0xff] %v11133_v27  ;;  %v11241_v1 = vsel %vm2901_vm15, %v11187_v12, %v11193_v6  ;;  %v11247_v51 = vsel %vm3000_vm0, %v11199_v59, %v11205_v28 }
 0x374   : > { %14315 = vst [vmem:[#allocation79_spill] sm:$0xff] %v11139_v63 }
 0x375   : > { %14318 = vst [vmem:[#allocation52_spill] sm:$0xff] %v11145_v30 }
 0x376   : > { %14321 = vst [vmem:[#allocation83_spill] sm:$0xff] %v11151_v62 }
 0x377   : > { %14324 = vst [vmem:[#allocation53_spill] sm:$0xff] %v11157_v39 }
 0x378   : > { %14327 = vst [vmem:[#allocation84_spill] sm:$0xff] %v11163_v36 }
 0x379   : > { %14330 = vst [vmem:[#allocation54_spill] sm:$0xff] %v11169_v7  ;;  %v11253_v7 = vsel %vm3000_vm0, %v11211_v35, %v11217_v26 }
 0x37a   : > { %14333 = vst [vmem:[#allocation85_spill] sm:$0xff] %v11175_v48  ;;  %v14360_v48 = vld [vmem:[#allocation95_spill] sm:$0xff] }
 0x37b   : > { %14336 = vst [vmem:[#allocation116_spill] sm:$0xff] %v11181_v3  ;;  %v11259_v3 = vsel %vm3000_vm0, %v11223_v33, %v11229_v4 }
 0x37c   : > { %14339 = vst [vmem:[#allocation55_spill] sm:$0xff] %v11187_v12  ;;  %v14358_v12 = vld [vmem:[#allocation109_spill] sm:$0xff] }
 0x37d   : > { %14342 = vst [vmem:[#allocation94_spill] sm:$0xff] %v11193_v6  ;;  %v11265_v6 = vsel %vm3000_vm0, %v11235_v44, %v11241_v1 }
 0x37e   : > { %14343 = vst [vmem:[#allocation15_spill] sm:$0xff] %v11199_v59  ;;  %v3133_v59 = vsel %vm3099_vm1, %v11247_v51, %v11253_v7 }
 0x37f   : > { %14344 = vst [vmem:[#allocation89_spill] sm:$0xff] %v11205_v28  ;;  %v14355_v28 = vld [vmem:[#allocation110_spill] sm:$0xff] }
 0x380   : > { %14345 = vst [vmem:[#allocation118_spill] sm:$0xff] %v11211_v35 }
 0x381   : > { %14346 = vst [vmem:[#allocation23_spill] sm:$0xff] %v11217_v26  ;;  %v14356_v26 = vld [vmem:[#allocation40_spill] sm:$0xff] }
 0x382   : > { %14347 = vst [vmem:[#allocation90_spill] sm:$0xff] %v11223_v33  ;;  %v11275_v35 = vsel %vm2802_vm14, %v14356_v26, %v14355_v28  ;;  %v14357_v33 = vld [vmem:[#allocation65_spill] sm:$0xff] }
 0x383   : > { %14348 = vst [vmem:[#allocation39_spill] sm:$0xff] %v11229_v4  ;;  %v3149_v4 = vsel %vm3099_vm1, %v11259_v3, %v11265_v6  ;;  %v14362_v28 = vld [vmem:[#allocation97_spill] sm:$0xff] }
 0x384   : > { %14349 = vst [vmem:[#allocation86_spill] sm:$0xff] %v11235_v44  ;;  %v14359_v44 = vld [vmem:[#allocation96_spill] sm:$0xff]  ;;  %v3759_v39 = vpack.i.bf16 %v3149_v4, %v3133_v59 }
 0x385   : > { %14350 = vst [vmem:[#allocation57_spill] sm:$0xff] %v11241_v1  ;;  %v11285_v1 = vsel %vm2802_vm14, %v14358_v12, %v14357_v33  ;;  %v14365_v12 = vld [vmem:[#allocation104_spill] sm:$0xff]  ;;  %v14366_v33 = vld [vmem:[#allocation27_spill] sm:$0xff] }
 0x386   : > { %14351 = vst [vmem:[#allocation126_spill] sm:$0xff] %v11247_v51  ;;  %v11291_v51 = vsel %vm2802_vm14, %v14360_v48, %v14359_v44  ;;  %v11309_v30 = vsel %vm2802_vm14, %v14366_v33, %v14365_v12  ;;  %v14367_v48 = vld [vmem:[#allocation123_spill] sm:$0xff]  ;;  %v14368_v44 = vld [vmem:[#allocation28_spill] sm:$0xff]  ;;  %v14373_v12 = vld [vmem:[#allocation169_spill] sm:$0xff]  ;;  %3760 = vxpose.xlu1.b32.cont [2/16] %v3759_v39, 128 }
 0x387   : > { %14352 = vst [vmem:[#allocation92_spill] sm:$0xff] %v11253_v7  ;;  %v14361_v7 = vld [vmem:[#allocation102_spill] sm:$0xff]  ;;  %v11315_v62 = vsel %vm2802_vm14, %v14368_v44, %v14367_v48  ;;  %v14370_v59 = vld [vmem:[#allocation164_spill] sm:$0xff] }
 0x388   : > { %14353 = vst [vmem:[#allocation71_spill] sm:$0xff] %v11259_v3  ;;  %v11297_v26 = vsel %vm2802_vm14, %v14362_v28, %v14361_v7  ;;  %v14364_v3 = vld [vmem:[#allocation26_spill] sm:$0xff]  ;;  %v14369_v7 = vld [vmem:[#allocation165_spill] sm:$0xff]  ;;  %v14374_v33 = vld [vmem:[#allocation168_spill] sm:$0xff] }
 0x389   : > { %14354 = vst [vmem:[#allocation93_spill] sm:$0xff] %v11265_v6  ;;  %v14363_v6 = vld [vmem:[#allocation103_spill] sm:$0xff]  ;;  %v11321_v4 = vsel %vm2802_vm14, %v14370_v59, %v14369_v7  ;;  %v11333_v27 = vsel %vm2802_vm14, %v14374_v33, %v14373_v12  ;;  %v14376_v48 = vld [vmem:[#allocation24_spill] sm:$0xff]  ;;  %v14377_v44 = vld [vmem:[#allocation170_spill] sm:$0xff] }
 0x38a   : > { %v11303_v36 = vsel %vm2802_vm14, %v14364_v3, %v14363_v6  ;;  %v14371_v6 = vld [vmem:[#allocation167_spill] sm:$0xff]  ;;  %v14372_v3 = vld [vmem:[#allocation166_spill] sm:$0xff]  ;;  %14375 = vst [vmem:[#allocation13_spill] sm:$0xff] %v11333_v27  ;;  %v11339_v63 = vsel %vm2802_vm14, %v14377_v44, %v14376_v48  ;;  %v14379_v59 = vld [vmem:[#allocation41_spill] sm:$0xff] }
 0x38b   : > { %v11327_v28 = vsel %vm2802_vm14, %v14372_v3, %v14371_v6  ;;  %v14378_v7 = vld [vmem:[#allocation42_spill] sm:$0xff]  ;;  %v14382_v3 = vld [vmem:[#allocation43_spill] sm:$0xff]  ;;  %v14383_v12 = vld [vmem:[#allocation105_spill] sm:$0xff] }
 0x38c   : > { %v11345_v43 = vsel %vm2802_vm14, %v14379_v59, %v14378_v7  ;;  %v14381_v6 = vld [vmem:[#allocation70_spill] sm:$0xff]  ;;  %v14384_v33 = vld [vmem:[#allocation99_spill] sm:$0xff] }
 0x38d   : > { %14380 = vst [vmem:[#allocation100_spill] sm:$0xff] %v11345_v43  ;;  %v11351_v0 = vsel %vm2802_vm14, %v14382_v3, %v14381_v6  ;;  %v11357_v32 = vsel %vm2802_vm14, %v14384_v33, %v14383_v12  ;;  %v14386_v48 = vld [vmem:[#allocation107_spill] sm:$0xff]  ;;  %v14387_v39 = vld [vmem:[#allocation106_spill] sm:$0xff]  ;;  %v11375_v6 = vsel %vm2901_vm15, %v11275_v35, %v11285_v1  ;;  %v11381_v3 = vsel %vm2901_vm15, %v11291_v51, %v11297_v26 }
 0x38e   : > { %14385 = vst [vmem:[#allocation14_spill] sm:$0xff] %v11357_v32  ;;  %v11363_v44 = vsel %vm2802_vm14, %v14387_v39, %v14386_v48  ;;  %v14388_v7 = vld [vmem:[#allocation171_spill] sm:$0xff]  ;;  %v11387_v12 = vsel %vm2901_vm15, %v11303_v36, %v11309_v30  ;;  %v11399_v33 = vsel %vm2901_vm15, %v11327_v28, %v11333_v27  ;;  %v11405_v48 = vsel %vm2901_vm15, %v11339_v63, %v11345_v43 }
 0x38f   : > { %v11369_v59 = vsel %vm2802_vm14, %v14388_v7, %v10851_v38  ;;  %14390 = vst [vmem:[#allocation17_spill] sm:$0xff] %v11381_v3  ;;  %v11393_v38 = vsel %vm2901_vm15, %v11315_v62, %v11321_v4  ;;  %v11411_v39 = vsel %vm2901_vm15, %v11351_v0, %v11357_v32  ;;  %v11423_v27 = vsel %vm3000_vm0, %v11375_v6, %v11381_v3 }
 0x390   : > { %14389 = vst [vmem:[#allocation101_spill] sm:$0xff] %v11369_v59  ;;  %v11417_v7 = vsel %vm2901_vm15, %v11363_v44, %v11369_v59  ;;  %v11429_v43 = vsel %vm3000_vm0, %v11387_v12, %v11393_v38  ;;  %v11435_v32 = vsel %vm3000_vm0, %v11399_v33, %v11405_v48 }
 0x391   : > { %14391 = vst [vmem:[#allocation12_spill] sm:$0xff] %v11393_v38  ;;  %v11441_v59 = vsel %vm3000_vm0, %v11411_v39, %v11417_v7  ;;  %v3165_v3 = vsel %vm3099_vm1, %v11423_v27, %v11429_v43  ;;  %v11451_v38 = vsel %vm2802_vm14, %v10771_v8, %v10776_v54  ;;  %v11473_v8 = vsel %vm2802_vm14, %v10796_v55, %v10801_v40  ;;  %v14398_v55 = vld [vmem:[#allocation62_spill] sm:$0xff] }
 0x392   : > { %14392 = vst [vmem:[#allocation129_spill] sm:$0xff] %v11405_v48  ;;  %v11457_v48 = vsel %vm2802_vm14, %v10781_v37, %v10766_v21  ;;  %v11479_v21 = vsel %vm2802_vm14, %v10806_v52, %v10811_v31  ;;  %v11485_v37 = vsel %vm2802_vm14, %v10816_v18, %v10821_v25  ;;  %v11503_v40 = vsel %vm2802_vm14, %v10846_v29, %v14398_v55 }
 0x393   : > { %14393 = vst [vmem:[#allocation127_spill] sm:$0xff] %v11417_v7  ;;  %v3181_v7 = vsel %vm3099_vm1, %v11435_v32, %v11441_v59  ;;  %v11509_v52 = vsel %vm2802_vm14, %v10856_v47, %v10861_v5  ;;  %v11515_v31 = vsel %vm2802_vm14, %v10866_v17, %v10871_v56  ;;  %v11521_v18 = vsel %vm2802_vm14, %v10876_v20, %v10881_v9 }
 0x394   : > { %14394 = vst [vmem:[#allocation72_spill] sm:$0xff] %v11423_v27  ;;  %v3871_v54 = vpack.i.bf16 %v3181_v7, %v3165_v3  ;;  %v11527_v25 = vsel %vm2802_vm14, %v10886_v61, %v10891_v22  ;;  %v11563_v47 = vsel %vm2901_vm15, %v11473_v8, %v11479_v21  ;;  %v11581_v56 = vsel %vm2901_vm15, %v11509_v52, %v11515_v31  ;;  %v14407_v3 = vld [vmem:[#allocation149_spill] sm:$0xff]  ;;  %v14408_v7 = vld [vmem:[#allocation148_spill] sm:$0xff] }
 0x395   : > { %14395 = vst [vmem:[#allocation18_spill] sm:$0xff] %v11429_v43  ;;  %v11467_v43 = vsel %vm2802_vm14, %v10786_v14, %v10791_v60  ;;  %v11491_v14 = vsel %vm2802_vm14, %v10826_v49, %v10831_v57  ;;  %v11497_v60 = vsel %vm2802_vm14, %v10836_v19, %v10841_v41  ;;  %v11533_v49 = vsel %vm2802_vm14, %v10896_v15, %v10901_v53 }
 0x396   : > { %14396 = vst [vmem:[#allocation9_spill] sm:$0xff] %v11435_v32  ;;  %3872 = vxpose.xlu2.b32.cont [2/16] %v3871_v54, 128  ;;  %v11539_v57 = vsel %vm2802_vm14, %v10906_v46, %v10911_v24  ;;  %v11545_v19 = vsel %vm2802_vm14, %v10916_v42, %v10921_v2  ;;  %v11557_v29 = vsel %vm2901_vm15, %v11457_v48, %v11467_v43  ;;  %v14404_v42 = vld [vmem:[#allocation147_spill] sm:$0xff]  ;;  %v14405_v2 = vld [vmem:[#allocation146_spill] sm:$0xff] }
 0x397   : > { %14397 = vst [vmem:[#allocation19_spill] sm:$0xff] %v11441_v59  ;;  %v11551_v41 = vsel %vm2901_vm15, %v11545_v19, %v11451_v38  ;;  %v11569_v5 = vsel %vm2901_vm15, %v11485_v37, %v11491_v14  ;;  %v11575_v17 = vsel %vm2901_vm15, %v11497_v60, %v11503_v40  ;;  %v11587_v20 = vsel %vm2901_vm15, %v11521_v18, %v11527_v25  ;;  %v14410_v59 = vld [vmem:[#allocation151_spill] sm:$0xff] }
 0x398   : > { %14399 = vst [vmem:[#allocation73_spill] sm:$0xff] %v11587_v20  ;;  %v11593_v9 = vsel %vm2901_vm15, %v11533_v49, %v11539_v57  ;;  %v11605_v22 = vsel %vm3000_vm0, %v11557_v29, %v11563_v47  ;;  %v11611_v15 = vsel %vm3000_vm0, %v11569_v5, %v11575_v17  ;;  %v11617_v53 = vsel %vm3000_vm0, %v11581_v56, %v11587_v20 }
 0x399   : > { %v11599_v61 = vsel %vm3000_vm0, %v11593_v9, %v11551_v41  ;;  %14401 = vst [vmem:[#allocation75_spill] sm:$0xff] %v11605_v22  ;;  %v3117_v24 = vsel %vm3099_vm1, %v11605_v22, %v11611_v15  ;;  %v11631_v13 = vsel %vm2901_vm15, %v14405_v2, %v14404_v42  ;;  %v11637_v54 = vsel %vm2901_vm15, %v14408_v7, %v14407_v3  ;;  %v14414_v22 = vld [vmem:[#allocation152_spill] sm:$0xff]  ;;  %v14416_v42 = vld [vmem:[#allocation155_spill] sm:$0xff]  ;;  %v14417_v2 = vld [vmem:[#allocation154_spill] sm:$0xff] }
 0x39a   : > { %14400 = vst [vmem:[#allocation20_spill] sm:$0xff] %v11599_v61  ;;  %v3101_v46 = vsel %vm3099_vm1, %v11617_v53, %v11599_v61  ;;  %v14411_v61 = vld [vmem:[#allocation150_spill] sm:$0xff]  ;;  %v11655_v27 = vsel %vm2901_vm15, %v14417_v2, %v14416_v42  ;;  %v14419_v3 = vld [vmem:[#allocation157_spill] sm:$0xff]  ;;  %v11679_v42 = vsel %vm3000_vm0, %v11631_v13, %v11637_v54 }
 0x39b   : > { %14402 = vst [vmem:[#allocation56_spill] sm:$0xff] %v11611_v15  ;;  %v3647_v55 = vpack.i.bf16 %v3117_v24, %v3101_v46  ;;  %v14413_v15 = vld [vmem:[#allocation153_spill] sm:$0xff]  ;;  %v14420_v46 = vld [vmem:[#allocation156_spill] sm:$0xff] }
 0x39c   : > { %14403 = vst [vmem:[#allocation77_spill] sm:$0xff] %v11617_v53  ;;  %v11643_v53 = vsel %vm2901_vm15, %v14411_v61, %v14410_v59  ;;  %v11649_v32 = vsel %vm2901_vm15, %v14414_v22, %v14413_v15  ;;  %v11661_v24 = vsel %vm2901_vm15, %v14420_v46, %v14419_v3  ;;  %v14422_v59 = vld [vmem:[#allocation159_spill] sm:$0xff]  ;;  %v14423_v61 = vld [vmem:[#allocation158_spill] sm:$0xff]  ;;  %v14425_v22 = vld [vmem:[#allocation172_spill] sm:$0xff] }
 0x39d   : > { %14406 = vst [vmem:[#allocation128_spill] sm:$0xff] %v11631_v13  ;;  %v11667_v7 = vsel %vm2901_vm15, %v14423_v61, %v14422_v59  ;;  %v14426_v15 = vld [vmem:[#allocation160_spill] sm:$0xff]  ;;  %3648 = vxpose.xlu0.b32.cont [2/16] %v3647_v55, 128  ;;  %v11685_v2 = vsel %vm3000_vm0, %v11643_v53, %v11649_v32  ;;  %v11691_v3 = vsel %vm3000_vm0, %v11655_v27, %v11661_v24  ;;  %v14432_v59 = vld [vmem:[#allocation174_spill] sm:$0xff]  ;;  %v14433_v55 = vld [vmem:[#allocation173_spill] sm:$0xff] }
 0x39e   : > { %14409 = vst [vmem:[#allocation120_spill] sm:$0xff] %v11637_v54  ;;  %v11673_v20 = vsel %vm2901_vm15, %v14426_v15, %v14425_v22  ;;  %v11703_v61 = vsel %vm2901_vm15, %v14433_v55, %v14432_v59  ;;  %v3134_v22 = vsel %vm3099_vm1, %v11679_v42, %v11685_v2  ;;  %v14434_v13 = vld [vmem:[#allocation176_spill] sm:$0xff] }
 0x39f   : > { %14412 = vst [vmem:[#allocation44_spill] sm:$0xff] %v11643_v53  ;;  %v11697_v46 = vsel %vm3000_vm0, %v11667_v7, %v11673_v20 }
 0x3a0   : > { %14415 = vst [vmem:[#allocation63_spill] sm:$0xff] %v11649_v32  ;;  %v3150_v15 = vsel %vm3099_vm1, %v11691_v3, %v11697_v46  ;;  %v14437_v32 = vld [vmem:[#allocation177_spill] sm:$0xff] }
 0x3a1   : > { %14418 = vst [vmem:[#allocation121_spill] sm:$0xff] %v11655_v27  ;;  %v3761_v55 = vpack.i.bf16 %v3150_v15, %v3134_v22  ;;  %v14438_v27 = vld [vmem:[#allocation180_spill] sm:$0xff] }
 0x3a2   : > { %14421 = vst [vmem:[#allocation45_spill] sm:$0xff] %v11661_v24  ;;  %v14435_v24 = vld [vmem:[#allocation175_spill] sm:$0xff] }
 0x3a3   : > { %14424 = vst [vmem:[#allocation66_spill] sm:$0xff] %v11667_v7  ;;  %v14436_v7 = vld [vmem:[#allocation178_spill] sm:$0xff]  ;;  %3762 = vxpose.xlu1.b32.cont [3/16] %v3761_v55, 128  ;;  %v11787_v55 = vsel %vm2901_vm15, %v10933_v58, %v10927_v10  ;;  %v14463_v10 = vld [vmem:[#allocation81_spill] sm:$0xff] }
 0x3a4   : > { %14427 = vst [vmem:[#allocation74_spill] sm:$0xff] %v11673_v20  ;;  %v11717_v20 = vsel %vm2901_vm15, %v14435_v24, %v14434_v13  ;;  %v11723_v59 = vsel %vm2901_vm15, %v14437_v32, %v14436_v7  ;;  %v14444_v13 = vld [vmem:[#allocation184_spill] sm:$0xff]  ;;  %v14445_v24 = vld [vmem:[#allocation183_spill] sm:$0xff]  ;;  %v14447_v32 = vld [vmem:[#allocation186_spill] sm:$0xff] }
 0x3a5   : > { %14428 = vst [vmem:[#allocation64_spill] sm:$0xff] %v11679_v42  ;;  %v14439_v42 = vld [vmem:[#allocation179_spill] sm:$0xff]  ;;  %v11741_v53 = vsel %vm2901_vm15, %v14445_v24, %v14444_v13  ;;  %v14448_v7 = vld [vmem:[#allocation185_spill] sm:$0xff] }
 0x3a6   : > { %14429 = vst [vmem:[#allocation68_spill] sm:$0xff] %v11685_v2  ;;  %v11729_v2 = vsel %vm2901_vm15, %v14439_v42, %v14438_v27  ;;  %v11747_v22 = vsel %vm2901_vm15, %v14448_v7, %v14447_v32  ;;  %v14450_v27 = vld [vmem:[#allocation187_spill] sm:$0xff]  ;;  %v14457_v32 = vld [vmem:[#allocation21_spill] sm:$0xff] }
 0x3a7   : > { %14430 = vst [vmem:[#allocation122_spill] sm:$0xff] %v11691_v3  ;;  %v14442_v3 = vld [vmem:[#allocation181_spill] sm:$0xff]  ;;  %v11753_v42 = vsel %vm2901_vm15, %v14450_v27, %v10981_v50  ;;  %v11797_v7 = vsel %vm2901_vm15, %v14457_v32, %v10945_v34  ;;  %v14459_v27 = vld [vmem:[#allocation22_spill] sm:$0xff]  ;;  %v14469_v32 = vld [vmem:[#allocation76_spill] sm:$0xff] }
 0x3a8   : > { %14431 = vst [vmem:[#allocation69_spill] sm:$0xff] %v11697_v46  ;;  %v14441_v46 = vld [vmem:[#allocation182_spill] sm:$0xff]  ;;  %v11777_v50 = vsel %vm3000_vm0, %v11747_v22, %v11753_v42  ;;  %v14468_v34 = vld [vmem:[#allocation29_spill] sm:$0xff] }
 0x3a9   : > { %14440 = vst [vmem:[#allocation134_spill] sm:$0xff] %v11729_v2  ;;  %v11735_v54 = vsel %vm2901_vm15, %v14442_v3, %v14441_v46  ;;  %v11759_v3 = vsel %vm3000_vm0, %v11703_v61, %v11717_v20  ;;  %v11765_v46 = vsel %vm3000_vm0, %v11723_v59, %v11729_v2  ;;  %v11821_v2 = vsel %vm2901_vm15, %v14469_v32, %v14468_v34 }
 0x3aa   : > { %14443 = vst [vmem:[#allocation133_spill] sm:$0xff] %v11735_v54  ;;  %v11771_v15 = vsel %vm3000_vm0, %v11735_v54, %v11741_v53  ;;  %v3166_v13 = vsel %vm3099_vm1, %v11759_v3, %v11765_v46 }
 0x3ab   : > { %14446 = vst [vmem:[#allocation136_spill] sm:$0xff] %v11741_v53  ;;  %v3182_v24 = vsel %vm3099_vm1, %v11771_v15, %v11777_v50 }
 0x3ac   : > { %14449 = vst [vmem:[#allocation135_spill] sm:$0xff] %v11747_v22  ;;  %v3873_v53 = vpack.i.bf16 %v3182_v24, %v3166_v13  ;;  %v14474_v13 = vld [vmem:[#allocation108_spill] sm:$0xff] }
 0x3ad   : > { %14451 = vst [vmem:[#allocation138_spill] sm:$0xff] %v11753_v42  ;;  %v14460_v42 = vld [vmem:[#allocation80_spill] sm:$0xff] }
 0x3ae   : > { %14452 = vst [vmem:[#allocation137_spill] sm:$0xff] %v11759_v3  ;;  %v14462_v3 = vld [vmem:[#allocation25_spill] sm:$0xff]  ;;  %3874 = vxpose.xlu2.b32.cont [3/16] %v3873_v53, 128 }
 0x3af   : > { %14453 = vst [vmem:[#allocation140_spill] sm:$0xff] %v11765_v46  ;;  %v11803_v46 = vsel %vm2901_vm15, %v14460_v42, %v14459_v27  ;;  %v11809_v58 = vsel %vm2901_vm15, %v14463_v10, %v14462_v3  ;;  %v14470_v42 = vld [vmem:[#allocation30_spill] sm:$0xff]  ;;  %v14473_v3 = vld [vmem:[#allocation31_spill] sm:$0xff] }
 0x3b0   : > { %14454 = vst [vmem:[#allocation139_spill] sm:$0xff] %v11771_v15  ;;  %v14466_v15 = vld [vmem:[#allocation82_spill] sm:$0xff]  ;;  %v11833_v24 = vsel %vm2901_vm15, %v14474_v13, %v14473_v3  ;;  %v14482_v13 = vld [vmem:[#allocation67_spill] sm:$0xff] }
 0x3b1   : > { %14455 = vst [vmem:[#allocation142_spill] sm:$0xff] %v11777_v50  ;;  %v14465_v50 = vld [vmem:[#allocation145_spill] sm:$0xff]  ;;  %v14471_v27 = vld [vmem:[#allocation10_spill] sm:$0xff]  ;;  %v11857_v34 = vsel %vm3000_vm0, %v11833_v24, %v11787_v55 }
 0x3b2   : > { %14456 = vst [vmem:[#allocation141_spill] sm:$0xff] %v11787_v55  ;;  %v11815_v22 = vsel %vm2901_vm15, %v14466_v15, %v14465_v50  ;;  %v11827_v54 = vsel %vm2901_vm15, %v14471_v27, %v14470_v42  ;;  %v11839_v15 = vsel %vm3000_vm0, %v11797_v7, %v11803_v46  ;;  %v14480_v42 = vld [vmem:[#allocation38_spill] sm:$0xff] }
 0x3b3   : > { %14458 = vst [vmem:[#allocation131_spill] sm:$0xff] %v11797_v7  ;;  %v11845_v50 = vsel %vm3000_vm0, %v11809_v58, %v11815_v22  ;;  %v11851_v10 = vsel %vm3000_vm0, %v11821_v2, %v11827_v54  ;;  %v11867_v27 = vsel %vm2901_vm15, %v14480_v42, %v11115_v23  ;;  %v14481_v3 = vld [vmem:[#allocation78_spill] sm:$0xff]  ;;  %v14486_v23 = vld [vmem:[#allocation52_spill] sm:$0xff] }
 0x3b4   : > { %14461 = vst [vmem:[#allocation130_spill] sm:$0xff] %v11803_v46  ;;  %v3118_v32 = vsel %vm3099_vm1, %v11839_v15, %v11845_v50  ;;  %v11873_v53 = vsel %vm2901_vm15, %v14482_v13, %v14481_v3  ;;  %v14487_v46 = vld [vmem:[#allocation84_spill] sm:$0xff]  ;;  %v14488_v3 = vld [vmem:[#allocation53_spill] sm:$0xff] }
 0x3b5   : > { %14464 = vst [vmem:[#allocation91_spill] sm:$0xff] %v11809_v58  ;;  %v11895_v13 = vsel %vm2901_vm15, %v14488_v3, %v14487_v46  ;;  %v11951_v3 = vsel %vm2901_vm15, %v11285_v1, %v11291_v51  ;;  %v14495_v51 = vld [vmem:[#allocation13_spill] sm:$0xff] }
 0x3b6   : > { %14467 = vst [vmem:[#allocation132_spill] sm:$0xff] %v11815_v22  ;;  %v14484_v22 = vld [vmem:[#allocation119_spill] sm:$0xff]  ;;  %v11975_v1 = vsel %vm2901_vm15, %v14495_v51, %v11339_v63  ;;  %v12037_v51 = vsel %vm2901_vm15, %v11467_v43, %v11473_v8  ;;  %v12061_v43 = vsel %vm2901_vm15, %v11515_v31, %v11521_v18  ;;  %v12067_v8 = vsel %vm2901_vm15, %v11527_v25, %v11533_v49  ;;  %v14504_v31 = vld [vmem:[#allocation48_spill] sm:$0xff] }
 0x3b7   : > { %14472 = vst [vmem:[#allocation8_spill] sm:$0xff] %v11827_v54  ;;  %v3102_v54 = vsel %vm3099_vm1, %v11851_v10, %v11857_v34  ;;  %v14505_v18 = vld [vmem:[#allocation47_spill] sm:$0xff] }
 0x3b8   : > { %14475 = vst [vmem:[#allocation143_spill] sm:$0xff] %v11833_v24  ;;  %v14483_v24 = vld [vmem:[#allocation79_spill] sm:$0xff]  ;;  %v3649_v58 = vpack.i.bf16 %v3118_v32, %v3102_v54  ;;  %v11919_v54 = vsel %vm3000_vm0, %v11867_v27, %v11873_v53  ;;  %v12107_v25 = vsel %vm3000_vm0, %v14505_v18, %v14504_v31 }
 0x3b9   : > { %14476 = vst [vmem:[#allocation59_spill] sm:$0xff] %v11839_v15  ;;  %v14485_v15 = vld [vmem:[#allocation83_spill] sm:$0xff] }
 0x3ba   : > { %14477 = vst [vmem:[#allocation58_spill] sm:$0xff] %v11845_v50  ;;  %v11883_v50 = vsel %vm2901_vm15, %v14484_v22, %v14483_v24  ;;  %v11889_v42 = vsel %vm2901_vm15, %v14486_v23, %v14485_v15  ;;  %v14491_v22 = vld [vmem:[#allocation55_spill] sm:$0xff]  ;;  %v14492_v24 = vld [vmem:[#allocation116_spill] sm:$0xff]  ;;  %v14493_v15 = vld [vmem:[#allocation94_spill] sm:$0xff]  ;;  %3650 = vxpose.xlu0.b32.cont [3/16] %v3649_v58, 128  ;;  %v11957_v58 = vsel %vm2901_vm15, %v11297_v26, %v11303_v36 }
 0x3bb   : > { %14478 = vst [vmem:[#allocation60_spill] sm:$0xff] %v11851_v10  ;;  %v14490_v10 = vld [vmem:[#allocation54_spill] sm:$0xff]  ;;  %v11907_v7 = vsel %vm2901_vm15, %v14492_v24, %v14491_v22  ;;  %v11913_v23 = vsel %vm2901_vm15, %v14493_v15, %v11275_v35  ;;  %v11925_v46 = vsel %vm3000_vm0, %v11883_v50, %v11889_v42  ;;  %v11963_v24 = vsel %vm2901_vm15, %v11309_v30, %v11315_v62  ;;  %v14496_v36 = vld [vmem:[#allocation100_spill] sm:$0xff]  ;;  %v14514_v31 = vld [vmem:[#allocation111_spill] sm:$0xff] }
 0x3bc   : > { %14479 = vst [vmem:[#allocation125_spill] sm:$0xff] %v11857_v34  ;;  %v14489_v34 = vld [vmem:[#allocation85_spill] sm:$0xff]  ;;  %v11937_v35 = vsel %vm3000_vm0, %v11907_v7, %v11913_v23  ;;  %v11969_v15 = vsel %vm2901_vm15, %v11321_v4, %v11327_v28  ;;  %v11981_v26 = vsel %vm2901_vm15, %v14496_v36, %v11351_v0  ;;  %v14497_v62 = vld [vmem:[#allocation14_spill] sm:$0xff]  ;;  %v11999_v63 = vsel %vm3000_vm0, %v11951_v3, %v11957_v58 }
 0x3bd   : > { %v11901_v55 = vsel %vm2901_vm15, %v14490_v10, %v14489_v34  ;;  %14494 = vst [vmem:[#allocation61_spill] sm:$0xff] %v11919_v54  ;;  %v3135_v34 = vsel %vm3099_vm1, %v11919_v54, %v11925_v46  ;;  %v11987_v30 = vsel %vm2901_vm15, %v14497_v62, %v11363_v44  ;;  %v14498_v4 = vld [vmem:[#allocation101_spill] sm:$0xff]  ;;  %v12005_v0 = vsel %vm3000_vm0, %v11963_v24, %v11969_v15  ;;  %v14500_v62 = vld [vmem:[#allocation88_spill] sm:$0xff] }
 0x3be   : > { %v11931_v10 = vsel %vm3000_vm0, %v11895_v13, %v11901_v55  ;;  %v11993_v28 = vsel %vm2901_vm15, %v14498_v4, %v11509_v52  ;;  %v12011_v44 = vsel %vm3000_vm0, %v11975_v1, %v11981_v26  ;;  %v12049_v36 = vsel %vm2901_vm15, %v11491_v14, %v11497_v60  ;;  %14506 = vst [vmem:[#allocation40_spill] sm:$0xff] %v12107_v25 }
 0x3bf   : > { %v3151_v32 = vsel %vm3099_vm1, %v11931_v10, %v11937_v35  ;;  %v12017_v52 = vsel %vm3000_vm0, %v11987_v30, %v11993_v28  ;;  %v12055_v4 = vsel %vm2901_vm15, %v11503_v40, %v14500_v62  ;;  %v12097_v60 = vsel %vm3000_vm0, %v12061_v43, %v12067_v8 }
 0x3c0   : > { %v3763_v22 = vpack.i.bf16 %v3151_v32, %v3135_v34  ;;  %14499 = vst [vmem:[#allocation124_spill] sm:$0xff] %v12017_v52  ;;  %v12023_v34 = vsel %vm2901_vm15, %v11451_v38, %v11457_v48  ;;  %v3167_v32 = vsel %vm3099_vm1, %v11999_v63, %v12005_v0  ;;  %v12043_v38 = vsel %vm2901_vm15, %v11479_v21, %v11485_v37 }
 0x3c1   : > { %v12073_v21 = vsel %vm2901_vm15, %v11539_v57, %v11545_v19  ;;  %v12079_v37 = vsel %vm3000_vm0, %v12037_v51, %v12043_v38  ;;  %v12085_v14 = vsel %vm3000_vm0, %v12049_v36, %v12055_v4  ;;  %v14507_v57 = vld [vmem:[#allocation50_spill] sm:$0xff]  ;;  %v14508_v19 = vld [vmem:[#allocation49_spill] sm:$0xff] }
 0x3c2   : > { %3764 = vxpose.xlu1.b32.cont [4/16] %v3763_v22, 128  ;;  %v3183_v22 = vsel %vm3099_vm1, %v12011_v44, %v12017_v52  ;;  %14501 = vst [vmem:[#allocation16_spill] sm:$0xff] %v12079_v37  ;;  %v12091_v11 = vsel %vm3000_vm0, %v12073_v21, %v12023_v34  ;;  %v3119_v40 = vsel %vm3099_vm1, %v12079_v37, %v12085_v14 }
 0x3c3   : > { %v3875_v48 = vpack.i.bf16 %v3183_v22, %v3167_v32  ;;  %14502 = vst [vmem:[#allocation144_spill] sm:$0xff] %v12085_v14  ;;  %v3103_v49 = vsel %vm3099_vm1, %v12097_v60, %v12091_v11  ;;  %v12117_v32 = vsel %vm3000_vm0, %v14508_v19, %v14507_v57  ;;  %v14510_v22 = vld [vmem:[#allocation11_spill] sm:$0xff]  ;;  %v14513_v14 = vld [vmem:[#allocation188_spill] sm:$0xff]  ;;  %v14516_v19 = vld [vmem:[#allocation190_spill] sm:$0xff] }
 0x3c4   : > { %14503 = vst [vmem:[#allocation110_spill] sm:$0xff] %v12091_v11  ;;  %v12129_v18 = vsel %vm3000_vm0, %v14514_v31, %v14513_v14  ;;  %v3651_v54 = vpack.i.bf16 %v3119_v40, %v3103_v49  ;;  %v3136_v11 = vsel %vm3099_vm1, %v12107_v25, %v12117_v32  ;;  %v14519_v14 = vld [vmem:[#allocation192_spill] sm:$0xff]  ;;  %v14520_v31 = vld [vmem:[#allocation191_spill] sm:$0xff]  ;;  %v14522_v49 = vld [vmem:[#allocation194_spill] sm:$0xff] }
 0x3c5   : > { %3876 = vxpose.xlu2.b32.cont [4/16] %v3875_v48, 128  ;;  %14509 = vst [vmem:[#allocation65_spill] sm:$0xff] %v12117_v32  ;;  %v14511_v48 = vld [vmem:[#allocation51_spill] sm:$0xff]  ;;  %v12149_v40 = vsel %vm3000_vm0, %v14520_v31, %v14519_v14  ;;  %v14523_v25 = vld [vmem:[#allocation193_spill] sm:$0xff]  ;;  %v14532_v31 = vld [vmem:[#allocation46_spill] sm:$0xff] }
 0x3c6   : > { %v12123_v62 = vsel %vm3000_vm0, %v14511_v48, %v14510_v22  ;;  %14515 = vst [vmem:[#allocation96_spill] sm:$0xff] %v12129_v18  ;;  %v14517_v22 = vld [vmem:[#allocation189_spill] sm:$0xff]  ;;  %v12155_v32 = vsel %vm3000_vm0, %v14523_v25, %v14522_v49  ;;  %3652 = vxpose.xlu0.b32.cont [4/16] %v3651_v54, 128  ;;  %v14529_v25 = vld [vmem:[#allocation32_spill] sm:$0xff]  ;;  %v14533_v49 = vld [vmem:[#allocation114_spill] sm:$0xff] }
 0x3c7   : > { %14512 = vst [vmem:[#allocation109_spill] sm:$0xff] %v12123_v62  ;;  %v3152_v57 = vsel %vm3099_vm1, %v12123_v62, %v12129_v18  ;;  %v12143_v48 = vsel %vm3000_vm0, %v14517_v22, %v14516_v19  ;;  %v14525_v18 = vld [vmem:[#allocation34_spill] sm:$0xff]  ;;  %v14526_v62 = vld [vmem:[#allocation195_spill] sm:$0xff]  ;;  %v14528_v19 = vld [vmem:[#allocation112_spill] sm:$0xff] }
 0x3c8   : > { %14518 = vst [vmem:[#allocation95_spill] sm:$0xff] %v12143_v48  ;;  %v3765_v37 = vpack.i.bf16 %v3152_v57, %v3136_v11  ;;  %v12161_v52 = vsel %vm3000_vm0, %v14526_v62, %v14525_v18  ;;  %v3168_v11 = vsel %vm3099_vm1, %v12143_v48, %v12149_v40  ;;  %v12175_v22 = vsel %vm3000_vm0, %v14529_v25, %v14528_v19  ;;  %v14530_v14 = vld [vmem:[#allocation33_spill] sm:$0xff]  ;;  %v14537_v25 = vld [vmem:[#allocation118_spill] sm:$0xff] }
 0x3c9   : > { %14521 = vst [vmem:[#allocation102_spill] sm:$0xff] %v12149_v40  ;;  %v3184_v57 = vsel %vm3099_vm1, %v12155_v32, %v12161_v52  ;;  %v14531_v62 = vld [vmem:[#allocation113_spill] sm:$0xff]  ;;  %v12187_v40 = vsel %vm3000_vm0, %v14533_v49, %v14532_v31  ;;  %v14543_v31 = vld [vmem:[#allocation39_spill] sm:$0xff] }
 0x3ca   : > { %14524 = vst [vmem:[#allocation97_spill] sm:$0xff] %v12155_v32  ;;  %v12181_v54 = vsel %vm3000_vm0, %v14531_v62, %v14530_v14  ;;  %3766 = vxpose.xlu1.b32.cont [5/16] %v3765_v37, 128  ;;  %v3877_v18 = vpack.i.bf16 %v3184_v57, %v3168_v11  ;;  %v14536_v32 = vld [vmem:[#allocation87_spill] sm:$0xff]  ;;  %v14538_v48 = vld [vmem:[#allocation89_spill] sm:$0xff]  ;;  %v14540_v57 = vld [vmem:[#allocation90_spill] sm:$0xff] }
 0x3cb   : > { %14527 = vst [vmem:[#allocation103_spill] sm:$0xff] %v12161_v52  ;;  %v14535_v52 = vld [vmem:[#allocation35_spill] sm:$0xff]  ;;  %v12199_v14 = vsel %vm3000_vm0, %v14538_v48, %v14537_v25  ;;  %v3120_v11 = vsel %vm3099_vm1, %v12181_v54, %v12187_v40  ;;  %v14544_v49 = vld [vmem:[#allocation57_spill] sm:$0xff] }
 0x3cc   : > { %14534 = vst [vmem:[#allocation26_spill] sm:$0xff] %v12187_v40  ;;  %v12193_v19 = vsel %vm3000_vm0, %v14536_v32, %v14535_v52  ;;  %v14541_v62 = vld [vmem:[#allocation23_spill] sm:$0xff]  ;;  %v14542_v32 = vld [vmem:[#allocation86_spill] sm:$0xff]  ;;  %v12225_v25 = vsel %vm3000_vm0, %v14544_v49, %v11375_v6  ;;  %v14547_v6 = vld [vmem:[#allocation12_spill] sm:$0xff] }
 0x3cd   : > { %14539 = vst [vmem:[#allocation104_spill] sm:$0xff] %v12199_v14  ;;  %v3104_v37 = vsel %vm3099_vm1, %v12193_v19, %v12175_v22  ;;  %v12213_v52 = vsel %vm3000_vm0, %v14541_v62, %v14540_v57  ;;  %v12219_v48 = vsel %vm3000_vm0, %v14543_v31, %v14542_v32  ;;  %v14546_v57 = vld [vmem:[#allocation17_spill] sm:$0xff]  ;;  %3878 = vxpose.xlu2.b32.cont [5/16] %v3877_v18, 128 }
 0x3ce   : > { %14545 = vst [vmem:[#allocation27_spill] sm:$0xff] %v12225_v25  ;;  %v3137_v40 = vsel %vm3099_vm1, %v12199_v14, %v12213_v52  ;;  %v12235_v62 = vsel %vm3000_vm0, %v14546_v57, %v11387_v12  ;;  %v3153_v32 = vsel %vm3099_vm1, %v12219_v48, %v12225_v25  ;;  %v12245_v31 = vsel %vm3000_vm0, %v14547_v6, %v11399_v33  ;;  %v14548_v49 = vld [vmem:[#allocation129_spill] sm:$0xff]  ;;  %v14549_v12 = vld [vmem:[#allocation127_spill] sm:$0xff] }
 0x3cf   : > { %v12251_v14 = vsel %vm3000_vm0, %v14548_v49, %v11411_v39  ;;  %v12257_v18 = vsel %vm3000_vm0, %v14549_v12, %v11581_v56  ;;  %v3653_v57 = vpack.i.bf16 %v3120_v11, %v3104_v37  ;;  %v3169_v25 = vsel %vm3099_vm1, %v12235_v62, %v12245_v31  ;;  %v14552_v37 = vld [vmem:[#allocation15_spill] sm:$0xff]  ;;  %v14554_v49 = vld [vmem:[#allocation73_spill] sm:$0xff] }
 0x3d0   : > { %14550 = vst [vmem:[#allocation123_spill] sm:$0xff] %v12257_v18  ;;  %v3185_v33 = vsel %vm3099_vm1, %v12251_v14, %v12257_v18  ;;  %v12271_v39 = vsel %vm3000_vm0, %v11551_v41, %v11557_v29  ;;  %v3767_v6 = vpack.i.bf16 %v3153_v32, %v3137_v40  ;;  %v12277_v56 = vsel %vm3000_vm0, %v11563_v47, %v11569_v5  ;;  %v14555_v47 = vld [vmem:[#allocation44_spill] sm:$0xff]  ;;  %v14558_v40 = vld [vmem:[#allocation121_spill] sm:$0xff]  ;;  %v14559_v32 = vld [vmem:[#allocation63_spill] sm:$0xff] }
 0x3d1   : > { %14551 = vst [vmem:[#allocation28_spill] sm:$0xff] %v12271_v39  ;;  %v12283_v11 = vsel %vm3000_vm0, %v11575_v17, %v14552_v37  ;;  %v12289_v12 = vsel %vm3000_vm0, %v14554_v49, %v11593_v9  ;;  %v14556_v5 = vld [vmem:[#allocation120_spill] sm:$0xff]  ;;  %v12309_v9 = vsel %vm3000_vm0, %v14559_v32, %v14558_v40  ;;  %3654 = vxpose.xlu0.b32.cont [5/16] %v3653_v57, 128  ;;  %v14560_v49 = vld [vmem:[#allocation66_spill] sm:$0xff] }
 0x3d2   : > { %14553 = vst [vmem:[#allocation165_spill] sm:$0xff] %v12283_v11  ;;  %v3105_v41 = vsel %vm3099_vm1, %v12289_v12, %v12271_v39  ;;  %v3121_v29 = vsel %vm3099_vm1, %v12277_v56, %v12283_v11  ;;  %v12303_v17 = vsel %vm3000_vm0, %v14556_v5, %v14555_v47  ;;  %v3879_v37 = vpack.i.bf16 %v3185_v33, %v3169_v25  ;;  %v14561_v39 = vld [vmem:[#allocation45_spill] sm:$0xff]  ;;  %v14562_v11 = vld [vmem:[#allocation74_spill] sm:$0xff]  ;;  %v14568_v40 = vld [vmem:[#allocation136_spill] sm:$0xff] }
 0x3d3   : > { %14557 = vst [vmem:[#allocation164_spill] sm:$0xff] %v12303_v17  ;;  %v12315_v18 = vsel %vm3000_vm0, %v14561_v39, %v14560_v49  ;;  %v12321_v47 = vsel %vm3000_vm0, %v14562_v11, %v11703_v61  ;;  %v3138_v5 = vsel %vm3099_vm1, %v12303_v17, %v12309_v9  ;;  %3768 = vxpose.xlu1.b32.cont [6/16] %v3767_v6, 128  ;;  %v14564_v33 = vld [vmem:[#allocation133_spill] sm:$0xff]  ;;  %v14565_v61 = vld [vmem:[#allocation134_spill] sm:$0xff]  ;;  %v14567_v11 = vld [vmem:[#allocation135_spill] sm:$0xff] }
 0x3d4   : > { %14563 = vst [vmem:[#allocation167_spill] sm:$0xff] %v12321_v47  ;;  %v3154_v25 = vsel %vm3099_vm1, %v12315_v18, %v12321_v47  ;;  %v12335_v57 = vsel %vm3000_vm0, %v11717_v20, %v11723_v59  ;;  %v12341_v39 = vsel %vm3000_vm0, %v14565_v61, %v14564_v33  ;;  %v12347_v6 = vsel %vm3000_vm0, %v14568_v40, %v14567_v11  ;;  %v14569_v49 = vld [vmem:[#allocation138_spill] sm:$0xff]  ;;  %v14571_v59 = vld [vmem:[#allocation131_spill] sm:$0xff]  ;;  %v14572_v33 = vld [vmem:[#allocation141_spill] sm:$0xff] }
 0x3d5   : > { %14566 = vst [vmem:[#allocation166_spill] sm:$0xff] %v12341_v39  ;;  %v3655_v32 = vpack.i.bf16 %v3121_v29, %v3105_v41  ;;  %v12353_v17 = vsel %vm3000_vm0, %v14569_v49, %v11821_v2  ;;  %v3170_v20 = vsel %vm3099_vm1, %v12335_v57, %v12341_v39  ;;  %v12363_v61 = vsel %vm3000_vm0, %v14572_v33, %v14571_v59  ;;  %v14573_v29 = vld [vmem:[#allocation91_spill] sm:$0xff]  ;;  %v14574_v11 = vld [vmem:[#allocation130_spill] sm:$0xff]  ;;  %v14575_v40 = vld [vmem:[#allocation128_spill] sm:$0xff] }
 0x3d6   : > { %14570 = vst [vmem:[#allocation169_spill] sm:$0xff] %v12353_v17  ;;  %v3186_v41 = vsel %vm3099_vm1, %v12347_v6, %v12353_v17  ;;  %v12373_v2 = vsel %vm3000_vm0, %v14574_v11, %v14573_v29  ;;  %v14576_v49 = vld [vmem:[#allocation132_spill] sm:$0xff]  ;;  %v14577_v47 = vld [vmem:[#allocation143_spill] sm:$0xff]  ;;  %3880 = vxpose.xlu2.b32.cont [6/16] %v3879_v37, 128  ;;  %v3769_v17 = vpack.i.bf16 %v3154_v25, %v3138_v5 }
 0x3d7   : > { %v12379_v39 = vsel %vm3000_vm0, %v14576_v49, %v14575_v40  ;;  %v14578_v59 = vld [vmem:[#allocation8_spill] sm:$0xff]  ;;  %v12399_v40 = vsel %vm3000_vm0, %v11873_v53, %v11883_v50  ;;  %v12405_v37 = vsel %vm3000_vm0, %v11889_v42, %v11895_v13  ;;  %v12411_v5 = vsel %vm3000_vm0, %v11901_v55, %v11907_v7 }
 0x3d8   : > { %v12385_v33 = vsel %vm3000_vm0, %v14578_v59, %v14577_v47  ;;  %v3122_v11 = vsel %vm3099_vm1, %v12373_v2, %v12379_v39  ;;  %v3881_v47 = vpack.i.bf16 %v3186_v41, %v3170_v20  ;;  %v12417_v25 = vsel %vm3000_vm0, %v11913_v23, %v11951_v3 }
 0x3d9   : > { %v3106_v29 = vsel %vm3099_vm1, %v12385_v33, %v12363_v61  ;;  %v3139_v50 = vsel %vm3099_vm1, %v12399_v40, %v12405_v37  ;;  %v3155_v53 = vsel %vm3099_vm1, %v12411_v5, %v12417_v25  ;;  %v12431_v55 = vsel %vm3000_vm0, %v11957_v58, %v11963_v24  ;;  %3656 = vxpose.xlu0.b32.cont [6/16] %v3655_v32, 128  ;;  %v14586_v32 = vld [vmem:[#allocation199_spill] sm:$0xff] }
 0x3da   : > { %v12437_v7 = vsel %vm3000_vm0, %v11969_v15, %v11975_v1  ;;  %v3657_v42 = vpack.i.bf16 %v3122_v11, %v3106_v29  ;;  %v12443_v13 = vsel %vm3000_vm0, %v11981_v26, %v11987_v30  ;;  %v12449_v23 = vsel %vm3000_vm0, %v11993_v28, %v12061_v43  ;;  %v14583_v43 = vld [vmem:[#allocation198_spill] sm:$0xff]  ;;  %v14587_v11 = vld [vmem:[#allocation115_spill] sm:$0xff] }
 0x3db   : > { %v3171_v3 = vsel %vm3099_vm1, %v12431_v55, %v12437_v7  ;;  %v3187_v58 = vsel %vm3099_vm1, %v12443_v13, %v12449_v23  ;;  %v12463_v24 = vsel %vm3000_vm0, %v12023_v34, %v12037_v51  ;;  %v12469_v15 = vsel %vm3000_vm0, %v12043_v38, %v12049_v36  ;;  %3770 = vxpose.xlu1.b32.cont [7/16] %v3769_v17, 128  ;;  %v14579_v34 = vld [vmem:[#allocation162_spill] sm:$0xff]  ;;  %v14580_v51 = vld [vmem:[#allocation161_spill] sm:$0xff]  ;;  %v14582_v36 = vld [vmem:[#allocation163_spill] sm:$0xff] }
 0x3dc   : > { %v12475_v1 = vsel %vm3000_vm0, %v12055_v4, %v11867_v27  ;;  %v3771_v26 = vpack.i.bf16 %v3155_v53, %v3139_v50  ;;  %v12481_v30 = vsel %vm3000_vm0, %v12067_v8, %v12073_v21  ;;  %v12493_v27 = vsel %vm3099_vm1, %v14580_v51, %v14579_v34  ;;  %v14584_v8 = vld [vmem:[#allocation197_spill] sm:$0xff]  ;;  %v14588_v50 = vld [vmem:[#allocation36_spill] sm:$0xff]  ;;  %v14589_v34 = vld [vmem:[#allocation71_spill] sm:$0xff] }
 0x3dd   : > { %v12487_v28 = vsel %vm3099_vm1, %v12469_v15, %v12475_v1  ;;  %v3107_v38 = vsel %vm3099_vm1, %v12481_v30, %v12463_v24  ;;  %v12503_v4 = vsel %vm3099_vm1, %v14582_v36, %v14581_v16  ;;  %v12509_v21 = vsel %vm3099_vm1, %v14584_v8, %v14583_v43  ;;  %v14585_v17 = vld [vmem:[#allocation37_spill] sm:$0xff]  ;;  %v14590_v51 = vld [vmem:[#allocation92_spill] sm:$0xff]  ;;  %v14596_v36 = vld [vmem:[#allocation98_spill] sm:$0xff] }
 0x3de   : > { %v12515_v20 = vsel %vm3099_vm1, %v14586_v32, %v14585_v17  ;;  %v3883_v41 = vpack.i.bf16 %v3187_v58, %v3171_v3  ;;  %v3659_v49 = vpack.i.bf16 %v12487_v28, %v3107_v38  ;;  %v3773_v59 = vpack.i.bf16 %v12503_v4, %v12493_v27  ;;  %3882 = vxpose.xlu2.b32.cont [7/16] %v3881_v47, 128  ;;  %v14591_v58 = vld [vmem:[#allocation72_spill] sm:$0xff]  ;;  %v14592_v28 = vld [vmem:[#allocation93_spill] sm:$0xff]  ;;  %v14594_v47 = vld [vmem:[#allocation18_spill] sm:$0xff] }
 0x3df   : > { %v12526_v53 = vsel %vm3099_vm1, %v14588_v50, %v14587_v11  ;;  %v12532_v3 = vsel %vm3099_vm1, %v14590_v51, %v14589_v34  ;;  %v12538_v27 = vsel %vm3099_vm1, %v14592_v28, %v14591_v58  ;;  %v14593_v38 = vld [vmem:[#allocation9_spill] sm:$0xff]  ;;  %v14599_v32 = vld [vmem:[#allocation19_spill] sm:$0xff]  ;;  %v14602_v34 = vld [vmem:[#allocation20_spill] sm:$0xff] }
 0x3e0   : > { %v12544_v16 = vsel %vm3099_vm1, %v14594_v47, %v14593_v38  ;;  %v14597_v4 = vld [vmem:[#allocation117_spill] sm:$0xff]  ;;  %v14601_v50 = vld [vmem:[#allocation75_spill] sm:$0xff]  ;;  %v14603_v28 = vld [vmem:[#allocation126_spill] sm:$0xff] }
 0x3e1   : > { %14595 = vst [vmem:[#allocation168_spill] sm:$0xff] %v12544_v16  ;;  %v12550_v43 = vsel %vm3099_vm1, %v14597_v4, %v14596_v36  ;;  %v14598_v17 = vld [vmem:[#allocation77_spill] sm:$0xff]  ;;  %v12564_v51 = vsel %vm3099_vm1, %v14602_v34, %v14601_v50  ;;  %v14604_v38 = vld [vmem:[#allocation56_spill] sm:$0xff]  ;;  %v14605_v36 = vld [vmem:[#allocation122_spill] sm:$0xff]  ;;  %3658 = vxpose.xlu0.b32.cont [7/16] %v3657_v42, 128  ;;  %v3159_v42 = vsel %vm3099_vm1, %v11937_v35, %v11999_v63 }
 0x3e2   : > { %v12558_v11 = vsel %vm3099_vm1, %v14599_v32, %v14598_v17  ;;  %v12572_v47 = vsel %vm3099_vm1, %v14604_v38, %v14603_v28  ;;  %v14606_v4 = vld [vmem:[#allocation68_spill] sm:$0xff]  ;;  %v14607_v32 = vld [vmem:[#allocation137_spill] sm:$0xff]  ;;  %v14609_v28 = vld [vmem:[#allocation139_spill] sm:$0xff] }
 0x3e3   : > { %14600 = vst [vmem:[#allocation24_spill] sm:$0xff] %v12558_v11  ;;  %v12578_v17 = vsel %vm3099_vm1, %v14606_v4, %v14605_v36  ;;  %v14608_v8 = vld [vmem:[#allocation69_spill] sm:$0xff]  ;;  %v3663_v34 = vpack.i.bf16 %v12572_v47, %v12564_v51  ;;  %v14610_v38 = vld [vmem:[#allocation140_spill] sm:$0xff]  ;;  %v14612_v4 = vld [vmem:[#allocation142_spill] sm:$0xff]  ;;  %3772 = vxpose.xlu1.b32.cont [8/16] %v3771_v26, 128 }
 0x3e4   : > { %v12584_v50 = vsel %vm3099_vm1, %v14608_v8, %v14607_v32  ;;  %v12594_v29 = vsel %vm3099_vm1, %v14610_v38, %v14609_v28  ;;  %v14611_v36 = vld [vmem:[#allocation60_spill] sm:$0xff]  ;;  %v14613_v32 = vld [vmem:[#allocation59_spill] sm:$0xff]  ;;  %v14614_v11 = vld [vmem:[#allocation125_spill] sm:$0xff]  ;;  %v3143_v28 = vsel %vm3099_vm1, %v11925_v46, %v11931_v10 }
 0x3e5   : > { %v3777_v58 = vpack.i.bf16 %v12584_v50, %v12578_v17  ;;  %v3190_v16 = vsel %vm3099_vm1, %v14612_v4, %v14611_v36  ;;  %v3110_v51 = vsel %vm3099_vm1, %v14614_v11, %v14613_v32  ;;  %v14615_v47 = vld [vmem:[#allocation64_spill] sm:$0xff]  ;;  %v14616_v17 = vld [vmem:[#allocation58_spill] sm:$0xff]  ;;  %v3779_v36 = vpack.i.bf16 %v3159_v42, %v3143_v28  ;;  %v14620_v32 = vld [vmem:[#allocation61_spill] sm:$0xff] }
 0x3e6   : > { %v3889_v8 = vpack.i.bf16 %v3190_v16, %v12594_v29  ;;  %v3126_v50 = vsel %vm3099_vm1, %v14616_v17, %v14615_v47  ;;  %v3175_v29 = vsel %vm3099_vm1, %v12005_v0, %v12011_v44  ;;  %v14617_v16 = vld [vmem:[#allocation124_spill] sm:$0xff]  ;;  %v14619_v10 = vld [vmem:[#allocation110_spill] sm:$0xff]  ;;  %v14622_v47 = vld [vmem:[#allocation109_spill] sm:$0xff]  ;;  %3884 = vxpose.xlu2.b32.cont [8/16] %v3883_v41, 128  ;;  %v3145_v41 = vsel %vm3099_vm1, %v12213_v52, %v12219_v48 }
 0x3e7   : > { %v3665_v38 = vpack.i.bf16 %v3126_v50, %v3110_v51  ;;  %v3191_v11 = vsel %vm3099_vm1, %v14617_v16, %v12097_v60  ;;  %v14618_v46 = vld [vmem:[#allocation16_spill] sm:$0xff]  ;;  %v14623_v0 = vld [vmem:[#allocation65_spill] sm:$0xff]  ;;  %v14624_v17 = vld [vmem:[#allocation95_spill] sm:$0xff] }
 0x3e8   : > { %v3891_v4 = vpack.i.bf16 %v3191_v11, %v3175_v29  ;;  %v3111_v26 = vsel %vm3099_vm1, %v14619_v10, %v14618_v46  ;;  %v14621_v51 = vld [vmem:[#allocation144_spill] sm:$0xff]  ;;  %v3144_v44 = vsel %vm3099_vm1, %v14623_v0, %v14622_v47  ;;  %v14626_v28 = vld [vmem:[#allocation97_spill] sm:$0xff]  ;;  %v14627_v42 = vld [vmem:[#allocation102_spill] sm:$0xff]  ;;  %v3112_v10 = vsel %vm3099_vm1, %v12175_v22, %v12181_v54 }
 0x3e9   : > { %v3127_v35 = vsel %vm3099_vm1, %v14621_v51, %v14620_v32  ;;  %v14625_v60 = vld [vmem:[#allocation96_spill] sm:$0xff]  ;;  %v3176_v29 = vsel %vm3099_vm1, %v14627_v42, %v14626_v28  ;;  %v14628_v11 = vld [vmem:[#allocation103_spill] sm:$0xff]  ;;  %v14630_v32 = vld [vmem:[#allocation26_spill] sm:$0xff]  ;;  %v3177_v22 = vsel %vm3099_vm1, %v12245_v31, %v12251_v14  ;;  %v3146_v14 = vsel %vm3099_vm1, %v12309_v9, %v12315_v18  ;;  %3660 = vxpose.xlu0.b32.cont [8/16] %v3659_v49, 128 }
 0x3ea   : > { %v3667_v63 = vpack.i.bf16 %v3127_v35, %v3111_v26  ;;  %v3160_v50 = vsel %vm3099_vm1, %v14625_v60, %v14624_v17  ;;  %v3192_v46 = vsel %vm3099_vm1, %v14628_v11, %v12193_v19  ;;  %v14629_v26 = vld [vmem:[#allocation40_spill] sm:$0xff]  ;;  %v14631_v0 = vld [vmem:[#allocation27_spill] sm:$0xff]  ;;  %v14635_v28 = vld [vmem:[#allocation165_spill] sm:$0xff]  ;;  %v3114_v9 = vsel %vm3099_vm1, %v12363_v61, %v12373_v2 }
 0x3eb   : > { %v3781_v16 = vpack.i.bf16 %v3160_v50, %v3144_v44  ;;  %v3128_v51 = vsel %vm3099_vm1, %v14630_v32, %v14629_v26  ;;  %v3893_v35 = vpack.i.bf16 %v3192_v46, %v3176_v29  ;;  %v3161_v19 = vsel %vm3099_vm1, %v14631_v0, %v12235_v62  ;;  %v14632_v54 = vld [vmem:[#allocation123_spill] sm:$0xff]  ;;  %v14633_v60 = vld [vmem:[#allocation28_spill] sm:$0xff]  ;;  %v14638_v46 = vld [vmem:[#allocation169_spill] sm:$0xff]  ;;  %3774 = vxpose.xlu1.b32.cont [9/16] %v3773_v59, 128 }
 0x3ec   : > { %v3669_v47 = vpack.i.bf16 %v3128_v51, %v3112_v10  ;;  %v3783_v44 = vpack.i.bf16 %v3161_v19, %v3145_v41  ;;  %v3193_v17 = vsel %vm3099_vm1, %v14632_v54, %v12289_v12  ;;  %v3113_v52 = vsel %vm3099_vm1, %v14633_v60, %v12277_v56  ;;  %v14634_v50 = vld [vmem:[#allocation104_spill] sm:$0xff]  ;;  %v14636_v31 = vld [vmem:[#allocation167_spill] sm:$0xff]  ;;  %v14637_v56 = vld [vmem:[#allocation166_spill] sm:$0xff] }
 0x3ed   : > { %v3895_v48 = vpack.i.bf16 %v3193_v17, %v3177_v22  ;;  %v3129_v62 = vsel %vm3099_vm1, %v14635_v28, %v14634_v50  ;;  %v3162_v12 = vsel %vm3099_vm1, %v14636_v31, %v12335_v57  ;;  %v3178_v11 = vsel %vm3099_vm1, %v14637_v56, %v12347_v6  ;;  %v14639_v57 = vld [vmem:[#allocation164_spill] sm:$0xff] }
 0x3ee   : > { %v3671_v42 = vpack.i.bf16 %v3129_v62, %v3113_v52  ;;  %v3785_v29 = vpack.i.bf16 %v3162_v12, %v3146_v14  ;;  %v3194_v10 = vsel %vm3099_vm1, %v14638_v46, %v12385_v33  ;;  %v3130_v49 = vsel %vm3099_vm1, %v12379_v39, %v14639_v57 }
 0x3ef   : > { %v3897_v18 = vpack.i.bf16 %v3194_v10, %v3178_v11  ;;  %v3147_v6 = vsel %vm3099_vm1, %v12405_v37, %v12411_v5  ;;  %v3673_v26 = vpack.i.bf16 %v3130_v49, %v3114_v9  ;;  %v3163_v33 = vsel %vm3099_vm1, %v12417_v25, %v12431_v55 }
 0x3f0   : > { %v3179_v61 = vsel %vm3099_vm1, %v12437_v7, %v12443_v13  ;;  %v3195_v39 = vsel %vm3099_vm1, %v12449_v23, %v12481_v30  ;;  %v3787_v2 = vpack.i.bf16 %v3163_v33, %v3147_v6  ;;  %v3115_v37 = vsel %vm3099_vm1, %v12463_v24, %v12469_v15  ;;  %v14642_v23 = vld [vmem:[#allocation24_spill] sm:$0xff] }
 0x3f1   : > { %v3899_v59 = vpack.i.bf16 %v3195_v39, %v3179_v61  ;;  %v3131_v5 = vsel %vm3099_vm1, %v12475_v1, %v12399_v40  ;;  %v14640_v25 = vpack.i.bf16 %v12515_v20, %v12509_v21  ;;  %v3661_v7 = vpack.i.bf16 %v12550_v43, %v12526_v53  ;;  %v14643_v24 = vld [vmem:[#allocation168_spill] sm:$0xff] }
 0x3f2   : > { %v3675_v55 = vpack.i.bf16 %v3131_v5, %v3115_v37  ;;  %v14641_v13 = vpack.i.bf16 %v12538_v27, %v12532_v3  ;;  %v14644_v15 = vpack.i.bf16 %v14642_v23, %v14643_v24 }
 0x3f3   : > { %3886 = vxpose.xlu2.b32.cont [9/16] %v14640_v25, 128  ;;  %3662 = vxpose.xlu0.b32.cont [9/16] %v3661_v7, 128 }
 0x3f4   : > { %3776 = vxpose.xlu1.b32.cont [10/16] %v14641_v13, 128 }
 0x3fb   : > { %3888 = vxpose.xlu2.b32.cont [10/16] %v14644_v15, 128  ;;  %3664 = vxpose.xlu0.b32.cont [10/16] %v3663_v34, 128 }
 0x3fc   : > { %3778 = vxpose.xlu1.b32.cont [11/16] %v3777_v58, 128 }
 0x403   : > { %3890 = vxpose.xlu2.b32.cont [11/16] %v3889_v8, 128  ;;  %3666 = vxpose.xlu0.b32.cont [11/16] %v3665_v38, 128 }
 0x404   : > { %3780 = vxpose.xlu1.b32.cont [12/16] %v3779_v36, 128 }
 0x40b   : > { %3892 = vxpose.xlu2.b32.cont [12/16] %v3891_v4, 128  ;;  %3668 = vxpose.xlu0.b32.cont [12/16] %v3667_v63, 128 }
 0x40c   : > { %3782 = vxpose.xlu1.b32.cont [13/16] %v3781_v16, 128 }
 0x413   : > { %3894 = vxpose.xlu2.b32.cont [13/16] %v3893_v35, 128  ;;  %3670 = vxpose.xlu0.b32.cont [13/16] %v3669_v47, 128 }
 0x414   : > { %3784 = vxpose.xlu1.b32.cont [14/16] %v3783_v44, 128 }
 0x41b   : > { %3896 = vxpose.xlu2.b32.cont [14/16] %v3895_v48, 128  ;;  %3672 = vxpose.xlu0.b32.cont [14/16] %v3671_v42, 128 }
 0x41c   : > { %3786 = vxpose.xlu1.b32.cont [15/16] %v3785_v29, 128 }
 0x423   : > { %3898 = vxpose.xlu2.b32.cont [15/16] %v3897_v18, 128  ;;  %3674 = vxpose.xlu0.b32.cont [15/16] %v3673_v26, 128 }
 0x424   : > { %3788 = vxpose.xlu1.b32.end [16/16] %v3787_v2, 128 }
 0x42b   : > { %3900 = vxpose.xlu2.b32.end [16/16] %v3899_v59, 128  ;;  %3676 = vxpose.xlu0.b32.end [16/16] %v3675_v55, 128 }
 0x44c   : > { %v3901_v45 = vpop.trf.xlu2 }
 0x44d   : > { %v3905_v40 = vunpack.i.h.bf16 %v3901_v45  ;;  %v3902_v1 = vunpack.i.l.bf16 %v3901_v45 }
 0x44f   : > { %v3390_v30 = vpack.c.bf16 %v3905_v40, %v3902_v1 }
 0x450   : > { %v3789_v21 = vpop.trf.xlu1 }
 0x451   : > { %3438 = vst [vmem:[%s12741_s17 + $0x10] sm:$0xff] %v3390_v30  ;;  %v3793_v53 = vunpack.i.h.bf16 %v3789_v21  ;;  %v3790_v3 = vunpack.i.l.bf16 %v3789_v21 }
 0x453   : > { %v3389_v58 = vpack.c.bf16 %v3793_v53, %v3790_v3 }
 0x454   : > { %v3906_v20 = vpop.trf.xlu2 }
 0x455   : > { %v3910_v27 = vunpack.i.h.bf16 %v3906_v20  ;;  %v3907_v43 = vunpack.i.l.bf16 %v3906_v20  ;;  %3437 = vst [vmem:[%s12741_s17 + $0x8] sm:$0xff] %v3389_v58 }
 0x457   : > { %v3393_v34 = vpack.c.bf16 %v3910_v27, %v3907_v43  ;;  %v3677_v8 = vpop.trf.xlu0 }
 0x458   : > { %v3681_v38 = vunpack.i.h.bf16 %v3677_v8  ;;  %v3678_v36 = vunpack.i.l.bf16 %v3677_v8  ;;  %v3794_v4 = vpop.trf.xlu1 }
 0x459   : > { %3441 = vst [vmem:[%s12741_s17 + $0x28] sm:$0xff] %v3393_v34  ;;  %v3798_v16 = vunpack.i.h.bf16 %v3794_v4  ;;  %v3795_v32 = vunpack.i.l.bf16 %v3794_v4 }
 0x45a   : > { %v3388_v51 = vpack.c.bf16 %v3681_v38, %v3678_v36 }
 0x45b   : > { %v3392_v47 = vpack.c.bf16 %v3798_v16, %v3795_v32 }
 0x45c   : > { %v3911_v63 = vpop.trf.xlu2  ;;  %3436 = vst [vmem:[%s12741_s17] sm:$0xff] %v3388_v51 }
 0x45d   : > { %v3915_v35 = vunpack.i.h.bf16 %v3911_v63  ;;  %v3912_v41 = vunpack.i.l.bf16 %v3911_v63  ;;  %3440 = vst [vmem:[%s12741_s17 + $0x20] sm:$0xff] %v3392_v47 }
 0x45f   : > { %v3396_v0 = vpack.c.bf16 %v3915_v35, %v3912_v41  ;;  %v3682_v19 = vpop.trf.xlu0 }
 0x460   : > { %v3686_v44 = vunpack.i.h.bf16 %v3682_v19  ;;  %v3683_v22 = vunpack.i.l.bf16 %v3682_v19  ;;  %v3799_v54 = vpop.trf.xlu1 }
 0x461   : > { %3444 = vst [vmem:[%s12741_s17 + $0x40] sm:$0xff] %v3396_v0  ;;  %v3803_v60 = vunpack.i.h.bf16 %v3799_v54  ;;  %v3800_v52 = vunpack.i.l.bf16 %v3799_v54 }
 0x462   : > { %v3391_v48 = vpack.c.bf16 %v3686_v44, %v3683_v22 }
 0x463   : > { %v3395_v28 = vpack.c.bf16 %v3803_v60, %v3800_v52 }
 0x464   : > { %v3916_v17 = vpop.trf.xlu2  ;;  %3439 = vst [vmem:[%s12741_s17 + $0x18] sm:$0xff] %v3391_v48 }
 0x465   : > { %v3920_v50 = vunpack.i.h.bf16 %v3916_v17  ;;  %v3917_v62 = vunpack.i.l.bf16 %v3916_v17  ;;  %3443 = vst [vmem:[%s12741_s17 + $0x38] sm:$0xff] %v3395_v28 }
 0x467   : > { %v3399_v14 = vpack.c.bf16 %v3920_v50, %v3917_v62  ;;  %v3687_v31 = vpop.trf.xlu0 }
 0x468   : > { %v3691_v12 = vunpack.i.h.bf16 %v3687_v31  ;;  %v3688_v42 = vunpack.i.l.bf16 %v3687_v31  ;;  %v3804_v29 = vpop.trf.xlu1 }
 0x469   : > { %3447 = vst [vmem:[%s12741_s17 + $0x58] sm:$0xff] %v3399_v14  ;;  %v3808_v11 = vunpack.i.h.bf16 %v3804_v29  ;;  %v3805_v46 = vunpack.i.l.bf16 %v3804_v29 }
 0x46a   : > { %v3394_v10 = vpack.c.bf16 %v3691_v12, %v3688_v42 }
 0x46b   : > { %v3398_v9 = vpack.c.bf16 %v3808_v11, %v3805_v46 }
 0x46c   : > { %v3921_v56 = vpop.trf.xlu2  ;;  %3442 = vst [vmem:[%s12741_s17 + $0x30] sm:$0xff] %v3394_v10 }
 0x46d   : > { %v3925_v18 = vunpack.i.h.bf16 %v3921_v56  ;;  %v3922_v57 = vunpack.i.l.bf16 %v3921_v56  ;;  %3446 = vst [vmem:[%s12741_s17 + $0x50] sm:$0xff] %v3398_v9 }
 0x46f   : > { %v3402_v49 = vpack.c.bf16 %v3925_v18, %v3922_v57  ;;  %v3692_v6 = vpop.trf.xlu0 }
 0x470   : > { %v3696_v26 = vunpack.i.h.bf16 %v3692_v6  ;;  %v3693_v33 = vunpack.i.l.bf16 %v3692_v6  ;;  %v3809_v61 = vpop.trf.xlu1 }
 0x471   : > { %3450 = vst [vmem:[%s12741_s17 + $0x70] sm:$0xff] %v3402_v49  ;;  %v3813_v2 = vunpack.i.h.bf16 %v3809_v61  ;;  %v3810_v59 = vunpack.i.l.bf16 %v3809_v61 }
 0x472   : > { %v3397_v37 = vpack.c.bf16 %v3696_v26, %v3693_v33 }
 0x473   : > { %v3401_v25 = vpack.c.bf16 %v3813_v2, %v3810_v59 }
 0x474   : > { %v3926_v39 = vpop.trf.xlu2  ;;  %3445 = vst [vmem:[%s12741_s17 + $0x48] sm:$0xff] %v3397_v37 }
 0x475   : > { %v3930_v5 = vunpack.i.h.bf16 %v3926_v39  ;;  %v3927_v55 = vunpack.i.l.bf16 %v3926_v39  ;;  %3449 = vst [vmem:[%s12741_s17 + $0x68] sm:$0xff] %v3401_v25 }
 0x477   : > { %v3405_v7 = vpack.c.bf16 %v3930_v5, %v3927_v55  ;;  %v3697_v13 = vpop.trf.xlu0 }
 0x478   : > { %v3701_v23 = vunpack.i.h.bf16 %v3697_v13  ;;  %v3698_v24 = vunpack.i.l.bf16 %v3697_v13  ;;  %v3814_v15 = vpop.trf.xlu1 }
 0x479   : > { %3453 = vst [vmem:[%s12741_s17 + $0x88] sm:$0xff] %v3405_v7  ;;  %v3818_v40 = vunpack.i.h.bf16 %v3814_v15  ;;  %v3815_v1 = vunpack.i.l.bf16 %v3814_v15 }
 0x47a   : > { %v3400_v30 = vpack.c.bf16 %v3701_v23, %v3698_v24 }
 0x47b   : > { %v3404_v20 = vpack.c.bf16 %v3818_v40, %v3815_v1 }
 0x47c   : > { %v3931_v45 = vpop.trf.xlu2  ;;  %3448 = vst [vmem:[%s12741_s17 + $0x60] sm:$0xff] %v3400_v30 }
 0x47d   : > { %v3935_v21 = vunpack.i.h.bf16 %v3931_v45  ;;  %v3932_v53 = vunpack.i.l.bf16 %v3931_v45  ;;  %3452 = vst [vmem:[%s12741_s17 + $0x80] sm:$0xff] %v3404_v20 }
 0x47f   : > { %v3408_v3 = vpack.c.bf16 %v3935_v21, %v3932_v53  ;;  %v3702_v27 = vpop.trf.xlu0 }
 0x480   : > { %v3706_v43 = vunpack.i.h.bf16 %v3702_v27  ;;  %v3703_v58 = vunpack.i.l.bf16 %v3702_v27  ;;  %v3819_v34 = vpop.trf.xlu1 }
 0x481   : > { %3456 = vst [vmem:[%s12741_s17 + $0xa0] sm:$0xff] %v3408_v3  ;;  %v3823_v38 = vunpack.i.h.bf16 %v3819_v34  ;;  %v3820_v36 = vunpack.i.l.bf16 %v3819_v34 }
 0x482   : > { %v3403_v4 = vpack.c.bf16 %v3706_v43, %v3703_v58 }
 0x483   : > { %v3407_v16 = vpack.c.bf16 %v3823_v38, %v3820_v36 }
 0x484   : > { %v3936_v8 = vpop.trf.xlu2  ;;  %3451 = vst [vmem:[%s12741_s17 + $0x78] sm:$0xff] %v3403_v4 }
 0x485   : > { %v3940_v63 = vunpack.i.h.bf16 %v3936_v8  ;;  %v3937_v32 = vunpack.i.l.bf16 %v3936_v8  ;;  %3455 = vst [vmem:[%s12741_s17 + $0x98] sm:$0xff] %v3407_v16 }
 0x487   : > { %v3411_v51 = vpack.c.bf16 %v3940_v63, %v3937_v32  ;;  %v3707_v35 = vpop.trf.xlu0 }
 0x488   : > { %v3711_v47 = vunpack.i.h.bf16 %v3707_v35  ;;  %v3708_v41 = vunpack.i.l.bf16 %v3707_v35  ;;  %v3824_v0 = vpop.trf.xlu1 }
 0x489   : > { %3459 = vst [vmem:[%s12741_s17 + $0xb8] sm:$0xff] %v3411_v51  ;;  %v3828_v44 = vunpack.i.h.bf16 %v3824_v0  ;;  %v3825_v22 = vunpack.i.l.bf16 %v3824_v0 }
 0x48a   : > { %v3406_v54 = vpack.c.bf16 %v3711_v47, %v3708_v41 }
 0x48b   : > { %v3410_v60 = vpack.c.bf16 %v3828_v44, %v3825_v22 }
 0x48c   : > { %v3941_v19 = vpop.trf.xlu2  ;;  %3454 = vst [vmem:[%s12741_s17 + $0x90] sm:$0xff] %v3406_v54 }
 0x48d   : > { %v3945_v17 = vunpack.i.h.bf16 %v3941_v19  ;;  %v3942_v52 = vunpack.i.l.bf16 %v3941_v19  ;;  %3458 = vst [vmem:[%s12741_s17 + $0xb0] sm:$0xff] %v3410_v60 }
 0x48f   : > { %v3414_v48 = vpack.c.bf16 %v3945_v17, %v3942_v52  ;;  %v3712_v50 = vpop.trf.xlu0 }
 0x490   : > { %v3716_v28 = vunpack.i.h.bf16 %v3712_v50  ;;  %v3713_v62 = vunpack.i.l.bf16 %v3712_v50  ;;  %v3829_v14 = vpop.trf.xlu1 }
 0x491   : > { %3462 = vst [vmem:[%s12741_s17 + $0xd0] sm:$0xff] %v3414_v48  ;;  %v3833_v12 = vunpack.i.h.bf16 %v3829_v14  ;;  %v3830_v42 = vunpack.i.l.bf16 %v3829_v14 }
 0x492   : > { %v3409_v29 = vpack.c.bf16 %v3716_v28, %v3713_v62 }
 0x493   : > { %v3413_v11 = vpack.c.bf16 %v3833_v12, %v3830_v42 }
 0x494   : > { %v3946_v31 = vpop.trf.xlu2  ;;  %3457 = vst [vmem:[%s12741_s17 + $0xa8] sm:$0xff] %v3409_v29 }
 0x495   : > { %v3950_v56 = vunpack.i.h.bf16 %v3946_v31  ;;  %v3947_v46 = vunpack.i.l.bf16 %v3946_v31  ;;  %3461 = vst [vmem:[%s12741_s17 + $0xc8] sm:$0xff] %v3413_v11 }
 0x497   : > { %v3417_v10 = vpack.c.bf16 %v3950_v56, %v3947_v46  ;;  %v3717_v18 = vpop.trf.xlu0 }
 0x498   : > { %v3721_v9 = vunpack.i.h.bf16 %v3717_v18  ;;  %v3718_v57 = vunpack.i.l.bf16 %v3717_v18  ;;  %v3834_v49 = vpop.trf.xlu1 }
 0x499   : > { %3465 = vst [vmem:[%s12741_s17 + $0xe8] sm:$0xff] %v3417_v10  ;;  %v3838_v26 = vunpack.i.h.bf16 %v3834_v49  ;;  %v3835_v33 = vunpack.i.l.bf16 %v3834_v49 }
 0x49a   : > { %v3412_v61 = vpack.c.bf16 %v3721_v9, %v3718_v57 }
 0x49b   : > { %v3416_v2 = vpack.c.bf16 %v3838_v26, %v3835_v33 }
 0x49c   : > { %v3951_v6 = vpop.trf.xlu2  ;;  %3460 = vst [vmem:[%s12741_s17 + $0xc0] sm:$0xff] %v3412_v61 }
 0x49d   : > { %v3955_v39 = vunpack.i.h.bf16 %v3951_v6  ;;  %v3952_v59 = vunpack.i.l.bf16 %v3951_v6  ;;  %3464 = vst [vmem:[%s12741_s17 + $0xe0] sm:$0xff] %v3416_v2 }
 0x49f   : > { %v3420_v37 = vpack.c.bf16 %v3955_v39, %v3952_v59  ;;  %v3722_v5 = vpop.trf.xlu0 }
 0x4a0   : > { %v3726_v25 = vunpack.i.h.bf16 %v3722_v5  ;;  %v3723_v55 = vunpack.i.l.bf16 %v3722_v5  ;;  %v3839_v7 = vpop.trf.xlu1 }
 0x4a1   : > { %3468 = vst [vmem:[%s12741_s17 + $0x100] sm:$0xff] %v3420_v37  ;;  %v3843_v23 = vunpack.i.h.bf16 %v3839_v7  ;;  %v3840_v24 = vunpack.i.l.bf16 %v3839_v7 }
 0x4a2   : > { %v3415_v15 = vpack.c.bf16 %v3726_v25, %v3723_v55 }
 0x4a3   : > { %v3419_v40 = vpack.c.bf16 %v3843_v23, %v3840_v24 }
 0x4a4   : > { %v3956_v13 = vpop.trf.xlu2  ;;  %3463 = vst [vmem:[%s12741_s17 + $0xd8] sm:$0xff] %v3415_v15 }
 0x4a5   : > { %v3960_v45 = vunpack.i.h.bf16 %v3956_v13  ;;  %v3957_v1 = vunpack.i.l.bf16 %v3956_v13  ;;  %3467 = vst [vmem:[%s12741_s17 + $0xf8] sm:$0xff] %v3419_v40 }
 0x4a7   : > { %v3423_v30 = vpack.c.bf16 %v3960_v45, %v3957_v1  ;;  %v3727_v21 = vpop.trf.xlu0 }
 0x4a8   : > { %v3731_v20 = vunpack.i.h.bf16 %v3727_v21  ;;  %v3728_v53 = vunpack.i.l.bf16 %v3727_v21  ;;  %v3844_v3 = vpop.trf.xlu1 }
 0x4a9   : > { %3471 = vst [vmem:[%s12741_s17 + $0x118] sm:$0xff] %v3423_v30  ;;  %v3848_v43 = vunpack.i.h.bf16 %v3844_v3  ;;  %v3845_v58 = vunpack.i.l.bf16 %v3844_v3 }
 0x4aa   : > { %v3418_v34 = vpack.c.bf16 %v3731_v20, %v3728_v53 }
 0x4ab   : > { %v3422_v38 = vpack.c.bf16 %v3848_v43, %v3845_v58 }
 0x4ac   : > { %v3961_v27 = vpop.trf.xlu2  ;;  %3466 = vst [vmem:[%s12741_s17 + $0xf0] sm:$0xff] %v3418_v34 }
 0x4ad   : > { %v3965_v8 = vunpack.i.h.bf16 %v3961_v27  ;;  %v3962_v36 = vunpack.i.l.bf16 %v3961_v27  ;;  %3470 = vst [vmem:[%s12741_s17 + $0x110] sm:$0xff] %v3422_v38 }
 0x4af   : > { %v3426_v4 = vpack.c.bf16 %v3965_v8, %v3962_v36  ;;  %v3732_v63 = vpop.trf.xlu0 }
 0x4b0   : > { %v3736_v16 = vunpack.i.h.bf16 %v3732_v63  ;;  %v3733_v32 = vunpack.i.l.bf16 %v3732_v63  ;;  %v3849_v51 = vpop.trf.xlu1 }
 0x4b1   : > { %3474 = vst [vmem:[%s12741_s17 + $0x130] sm:$0xff] %v3426_v4  ;;  %v3853_v47 = vunpack.i.h.bf16 %v3849_v51  ;;  %v3850_v41 = vunpack.i.l.bf16 %v3849_v51 }
 0x4b2   : > { %v3421_v0 = vpack.c.bf16 %v3736_v16, %v3733_v32 }
 0x4b3   : > { %v3425_v44 = vpack.c.bf16 %v3853_v47, %v3850_v41 }
 0x4b4   : > { %v3966_v35 = vpop.trf.xlu2  ;;  %3469 = vst [vmem:[%s12741_s17 + $0x108] sm:$0xff] %v3421_v0 }
 0x4b5   : > { %v3970_v19 = vunpack.i.h.bf16 %v3966_v35  ;;  %v3967_v22 = vunpack.i.l.bf16 %v3966_v35  ;;  %3473 = vst [vmem:[%s12741_s17 + $0x128] sm:$0xff] %v3425_v44 }
 0x4b7   : > { %v3429_v54 = vpack.c.bf16 %v3970_v19, %v3967_v22  ;;  %v3737_v17 = vpop.trf.xlu0 }
 0x4b8   : > { %v3741_v60 = vunpack.i.h.bf16 %v3737_v17  ;;  %v3738_v52 = vunpack.i.l.bf16 %v3737_v17  ;;  %v3854_v48 = vpop.trf.xlu1 }
 0x4b9   : > { %3477 = vst [vmem:[%s12741_s17 + $0x148] sm:$0xff] %v3429_v54  ;;  %v3858_v28 = vunpack.i.h.bf16 %v3854_v48  ;;  %v3855_v62 = vunpack.i.l.bf16 %v3854_v48 }
 0x4ba   : > { %v3424_v14 = vpack.c.bf16 %v3741_v60, %v3738_v52 }
 0x4bb   : > { %v3428_v12 = vpack.c.bf16 %v3858_v28, %v3855_v62 }
 0x4bc   : > { %v3971_v50 = vpop.trf.xlu2  ;;  %3472 = vst [vmem:[%s12741_s17 + $0x120] sm:$0xff] %v3424_v14 }
 0x4bd   : > { %v3975_v31 = vunpack.i.h.bf16 %v3971_v50  ;;  %v3972_v42 = vunpack.i.l.bf16 %v3971_v50  ;;  %3476 = vst [vmem:[%s12741_s17 + $0x140] sm:$0xff] %v3428_v12 }
 0x4bf   : > { %v3432_v29 = vpack.c.bf16 %v3975_v31, %v3972_v42  ;;  %v3742_v56 = vpop.trf.xlu0 }
 0x4c0   : > { %v3746_v11 = vunpack.i.h.bf16 %v3742_v56  ;;  %v3743_v46 = vunpack.i.l.bf16 %v3742_v56  ;;  %v3859_v10 = vpop.trf.xlu1 }
 0x4c1   : > { %3480 = vst [vmem:[%s12741_s17 + $0x160] sm:$0xff] %v3432_v29  ;;  %v3863_v9 = vunpack.i.h.bf16 %v3859_v10  ;;  %v3860_v57 = vunpack.i.l.bf16 %v3859_v10 }
 0x4c2   : > { %v3427_v49 = vpack.c.bf16 %v3746_v11, %v3743_v46 }
 0x4c3   : > { %v3431_v26 = vpack.c.bf16 %v3863_v9, %v3860_v57 }
 0x4c4   : > { %v3976_v18 = vpop.trf.xlu2  ;;  %3475 = vst [vmem:[%s12741_s17 + $0x138] sm:$0xff] %v3427_v49 }
 0x4c5   : > { %v3980_v6 = vunpack.i.h.bf16 %v3976_v18  ;;  %v3977_v33 = vunpack.i.l.bf16 %v3976_v18  ;;  %3479 = vst [vmem:[%s12741_s17 + $0x158] sm:$0xff] %v3431_v26 }
 0x4c7   : > { %v3435_v61 = vpack.c.bf16 %v3980_v6, %v3977_v33  ;;  %v3747_v39 = vpop.trf.xlu0 }
 0x4c8   : > { %v3751_v2 = vunpack.i.h.bf16 %v3747_v39  ;;  %v3748_v59 = vunpack.i.l.bf16 %v3747_v39  ;;  %v3864_v37 = vpop.trf.xlu1 }
 0x4c9   : > { %3483 = vst [vmem:[%s12741_s17 + $0x178] sm:$0xff] %v3435_v61  ;;  %v3868_v5 = vunpack.i.h.bf16 %v3864_v37  ;;  %v3865_v25 = vunpack.i.l.bf16 %v3864_v37 }
 0x4ca   : > { %v3430_v55 = vpack.c.bf16 %v3751_v2, %v3748_v59 }
 0x4cb   : > { %v3434_v7 = vpack.c.bf16 %v3868_v5, %v3865_v25 }
 0x4cc   : > { %3478 = vst [vmem:[%s12741_s17 + $0x150] sm:$0xff] %v3430_v55 }
 0x4cd   : > { %3482 = vst [vmem:[%s12741_s17 + $0x170] sm:$0xff] %v3434_v7 }
 0x4cf   : > { %v3752_v13 = vpop.trf.xlu0 }
 0x4d0   : > { %v3756_v23 = vunpack.i.h.bf16 %v3752_v13  ;;  %v3753_v24 = vunpack.i.l.bf16 %v3752_v13 }
 0x4d2   : > { %v3433_v15 = vpack.c.bf16 %v3756_v23, %v3753_v24 }
 0x4d4   : > { %3481 = vst [vmem:[%s12741_s17 + $0x168] sm:$0xff] %v3433_v15 }
 0x4d5   : > { %4041 = shalt.err (!%p4038_p4)
}
 0x4d6   : > { %s4086_s25 = smov 384   ;;  %s4087_s5 = smov 24  }
 0x4d7   : > { %3591 = dma.vmem_to_hbm [thread:$0]  (%p4148_p10), %s3499_s23, 6144, %s3501_s24, %s3485_s13, %s4086_s25, %s4086_s25, %s4087_s5  }
 0x4d8 PF: > { %p3602_p5 = scmp.ge.s32.totalorder %s4080_s12, 2  ;;  %s3515_s6 = sand.u32 1, %s4068_s9  }
 0x4d9   : > { %s3516_s19 = scalar_lea.sflag [#allocation4], %s3515_s6 }
 0x4da   : > { %p3598_p7 = pnand %p3602_p5, %p4152_p11 }
 0x4dc   : > { %p3599_p8 = pneg %p3598_p7 }
 0x4de   : > { %4063 = dma.done.wait (%p3599_p8), %s3516_s19, 6144  }
 0x4df   : > { %4065 = vsyncadd (%p3599_p8), %s3516_s19, 4294961152  ;;  %p15_p9 = scmp.ge.s32.totalorder %s4128_s15, 5   ;;  %s14645_s9 = smov %s4072_s10 }
 0x4e0   : > { %s14646_s10 = smov %s4076_s11  ;;  %s14647_s11 = smov %s4140_s18 }
 0x4e1   : > { %s14648_s12 = smov %s4128_s15  ;;  %17 = sbr.rel (!%p15_p9) target bundleno = 5 (0x5), region = 73 }
 0x4e6   :  { %3522 = vsyncpa [#allocation3], 1 }
 0x4e7   :  { %3524 = vsyncpa [#allocation3 + $0x1], 1 }
 0x4e8   :  { %3525 = vsyncpa [#allocation4], 1 }
 0x4e9   :  { %3527 = vsyncpa [#allocation4 + $0x1], 1 }

</bundles_post_ra>
